<compile_context>
chip_gen: v6e
topology: v6e:2x2x1
jax: 0.10.0
libtpu: 0.0.40
codegen_flags: <defaults>
</compile_context>

<pallas_src>
import jax
import jax.numpy as jnp
from jax.experimental import pallas as pl
from jax.experimental.pallas import tpu as pltpu


def _tpu_config():
    """Per-generation (vmem_limit_bytes, num_tensorcores)."""
    kind = ""
    try:
        kind = jax.devices()[0].device_kind.lower()
    except Exception:
        pass
    is_v7 = ("v7" in kind) or (kind == "")      # unknown -> conservative
    # v7x: 64 MiB physical VMEM -> leave headroom; v5e/v6e: 128 MiB physical.
    vmem_limit = (48 if is_v7 else 96) * 1024 * 1024
    ncores = 2 if "v7" in kind else 1           # v7x has 2 TensorCores/chip
    return vmem_limit, ncores


def network2_kernel(att_ref, pooled_ref, w1a_ref, w1b_ref, w1c_ref, b1_ref,
                    w2_ref, b2_ref, out_ref):
    p = pooled_ref[...]                          # (3, H, TB)  batch on lanes
    prev = p[0]                                  # (H, TB) preceding CLS
    t = p[1]                                     # (H, TB) target CLS (raw Q)
    foll = p[2]                                  # (H, TB) following CLS

    # nn.MultiheadAttention(embed_dim=1, num_heads=1): every projection is a
    # scalar affine map; seq_len = H, head_dim = 1 (scale = 1.0).
    def scalar_head(q_raw, kv_raw, h):
        wq = att_ref[h, 0]; bq = att_ref[h, 1]
        wk = att_ref[h, 2]; bk = att_ref[h, 3]
        wv = att_ref[h, 4]; bv = att_ref[h, 5]
        wo = att_ref[h, 6]; bo = att_ref[h, 7]
        q = q_raw * wq + bq                      # (H, TB)
        k = kv_raw * wk + bk
        v = kv_raw * wv + bv
        # Exact row max of the outer-product scores without an (H,H,TB) reduce:
        #   max_j q_i*k_j = max(q_i * max_j k_j, q_i * min_j k_j).
        kmax = k.max(axis=0, keepdims=True)      # (1, TB)  sublane reduce
        kmin = k.min(axis=0, keepdims=True)
        m = jnp.maximum(q * kmax, q * kmin)      # (H, TB)
        # scores[i, j, b] = q[i, b] * k[j, b]  — lane-dense (TB on lanes).
        s = q[:, None, :] * k[None, :, :]        # (H, H, TB)
        e = jnp.exp(s - m[:, None, :])           # (H, H, TB)  packed EUP work
        den = e.sum(axis=1)                      # (H, TB)  key-axis (sublane) sum
        num = (e * v[None, :, :]).sum(axis=1)    # (H, TB)
        # Softmax normalization folded into one exact reciprocal-multiply.
        attn = num * pl.reciprocal(den, approx=False)
        return attn * wo + bo                    # out_proj

    x1 = scalar_head(t, prev, 0)                 # attention(T, P): (H, TB)
    x2 = scalar_head(t, foll, 1)                 # attention(T, F): (H, TB)

    # fc1 as three accumulated K=H MXU dots (no lane-axis concat of 32-wide slabs).
    h = jnp.dot(w1a_ref[...], x1, preferred_element_type=jnp.float32)
    h = h + jnp.dot(w1b_ref[...], t, preferred_element_type=jnp.float32)
    h = h + jnp.dot(w1c_ref[...], x2, preferred_element_type=jnp.float32)
    h = h + b1_ref[...]                          # (192, TB), lane broadcast
    h = jnp.where(h > 0, h, 0.01 * h)            # LeakyReLU(0.01)
    # dropout: identity (inference)
    o = jnp.dot(w2_ref[...], h, preferred_element_type=jnp.float32)  # (8, TB)
    out_ref[...] = o + b2_ref[...]               # lane-dense (8, TB) store


def network2_pallas(pooled, att_params, w1, b1, w2, b2, *, block_b=512):
    B, L, H = pooled.shape
    assert L == 3
    NOUT = w2.shape[1]                           # 3 logits
    NH = w1.shape[1]                             # 192 fc1 width
    OPAD = 8                                     # pad logit rows 3 -> 8 sublanes

    vmem_limit, ncores = _tpu_config()

    # ---- derive the per-step batch tile (lane axis) -------------------------
    block_b = max(128, (block_b // 128) * 128)
    # VMEM cap: ~6 live (H, H, TB) f32 temporaries + blocked in/out tiles.
    per_tb_bytes = (6 * H * H + 2 * 3 * H + 2 * OPAD + NH) * 4
    tb_cap = max(128, int(((int(vmem_limit * 0.6) // per_tb_bytes) // 128) * 128))
    block_b = min(block_b, tb_cap)
    if ncores >= 2:
        # v7x: make sure the grid has >= 2 steps so both TensorCores get work.
        half = max(128, ((pl.cdiv(B, 2) + 127) // 128) * 128)
        block_b = min(block_b, half)

    if B <= block_b:
        TB = max(8, ((B + 7) // 8) * 8)          # single step: whole padded batch
    else:
        TB = block_b                             # multiple of 128 -> lane-aligned
    B_pad = pl.cdiv(B, TB) * TB
    grid_b = B_pad // TB

    # ---- lay operands out with batch on lanes / weights pre-transposed ------
    pooled_t = jnp.transpose(pooled, (1, 2, 0))  # (3, H, B)
    if B_pad != B:
        pooled_t = jnp.pad(pooled_t, ((0, 0), (0, 0), (0, B_pad - B)))

    w1t = w1.T                                   # (192, 3H)
    w1a = w1t[:, 0 * H:1 * H]                    # (192, H) for x1
    w1b = w1t[:, 1 * H:2 * H]                    # (192, H) for t
    w1c = w1t[:, 2 * H:3 * H]                    # (192, H) for x2
    b1c = b1.reshape(NH, 1)
    w2t = jnp.zeros((OPAD, NH), w2.dtype).at[:NOUT, :].set(w2.T)
    b2c = jnp.zeros((OPAD, 1), b2.dtype).at[:NOUT, 0].set(b2.reshape(-1))

    vmem = pltpu.MemorySpace.VMEM
    out = pl.pallas_call(
        network2_kernel,
        out_shape=jax.ShapeDtypeStruct((OPAD, B_pad), jnp.float32),
        grid_spec=pltpu.PrefetchScalarGridSpec(
            num_scalar_prefetch=0,
            grid=(grid_b,),
            in_specs=[
                # scalar MHA params (2 heads x [wq,bq,wk,bk,wv,bv,wo,bo]) in SMEM
                pl.BlockSpec(memory_space=pltpu.MemorySpace.SMEM),
                # pooled CLS tile: (3, H, TB), batch on lanes
                pl.BlockSpec((L, H, TB), lambda b: (0, 0, b)),
                # grid-invariant weights: whole-array VMEM (single-buffered)
                pl.BlockSpec(memory_space=vmem),   # w1a
                pl.BlockSpec(memory_space=vmem),   # w1b
                pl.BlockSpec(memory_space=vmem),   # w1c
                pl.BlockSpec(memory_space=vmem),   # b1
                pl.BlockSpec(memory_space=vmem),   # w2 (padded, transposed)
                pl.BlockSpec(memory_space=vmem),   # b2 (padded)
            ],
            out_specs=pl.BlockSpec((OPAD, TB), lambda b: (0, b)),
        ),
        compiler_params=pltpu.CompilerParams(
            dimension_semantics=("parallel",),     # megacore-shardable batch axis
            vmem_limit_bytes=vmem_limit,           # 96 MiB v5e/v6e, 48 MiB v7x
        ),
    )(att_params, pooled_t, w1a, w1b, w1c, b1c, w2t, b2c)
    return out[:NOUT, :B].T                      # (B, 3)


def network2_ref(pooled, att_params, w1, b1, w2, b2):
    """Pure-JAX reference of the post-BERT forward pass."""
    def head(q_raw, kv_raw, prm):
        wq, bq, wk, bk, wv, bv, wo, bo = [prm[i] for i in range(8)]
        q = q_raw * wq + bq
        k = kv_raw * wk + bk
        v = kv_raw * wv + bv
        scores = q[:, :, None] * k[:, None, :]   # (B, H, H)
        w = jax.nn.softmax(scores, axis=-1)
        attn = jnp.einsum('bij,bj->bi', w, v)
        return attn * wo + bo

    t = pooled[:, 1, :]
    x1 = head(t, pooled[:, 0, :], att_params[0])
    x2 = head(t, pooled[:, 2, :], att_params[1])
    feat = jnp.concatenate([x1, t, x2], axis=-1)
    h = feat @ w1 + b1
    h = jnp.where(h > 0, h, 0.01 * h)
    return h @ w2 + b2


if __name__ == "__main__":
    L, H = 3, 32                # sentences (S_P, S_T, S_F), hidden size
    key = jax.random.PRNGKey(0)
    k1, k2, k3, k4, k5, k6 = jax.random.split(key, 6)

    # Deterministic parameter init.
    att_params = jax.random.normal(k2, (2, 8), jnp.float32) * 0.5
    w1 = jax.random.normal(k3, (3 * H, 192), jnp.float32) / jnp.sqrt(3.0 * H)
    b1 = jax.random.normal(k4, (1, 192), jnp.float32) * 0.01
    w2 = jax.random.normal(k5, (192, 3), jnp.float32) / jnp.sqrt(192.0)
    b2 = jax.random.normal(k6, (1, 3), jnp.float32) * 0.01

    # 1) Small-batch check (single grid step).
    B = 4
    pooled = jax.random.normal(k1, (B, L, H), jnp.float32)
    out = network2_pallas(pooled, att_params, w1, b1, w2, b2)
    out = jax.block_until_ready(out)
    ref = network2_ref(pooled, att_params, w1, b1, w2, b2)
    assert out.shape == (B, 3), out.shape
    assert jnp.allclose(out, ref, atol=1e-4, rtol=1e-4), (out, ref)

    # 2) Multi-step-grid check (exercises 128-lane tiles + batch padding).
    B2 = 272
    pooled2 = jax.random.normal(k1, (B2, L, H), jnp.float32)
    out2 = network2_pallas(pooled2, att_params, w1, b1, w2, b2, block_b=128)
    out2 = jax.block_until_ready(out2)
    ref2 = network2_ref(pooled2, att_params, w1, b1, w2, b2)
    assert out2.shape == (B2, 3), out2.shape
    assert jnp.allclose(out2, ref2, atol=1e-4, rtol=1e-4)

    print("KERNEL_OK")
</pallas_src>

<mosaic_0001>
module attributes {stable_mosaic.version = 11 : i64} {
  func.func @network2_kernel(%arg0: i32, %arg1: memref<2x8xf32, #tpu.memory_space<smem>>, %arg2: memref<3x32x8xf32, #tpu.memory_space<vmem>>, %arg3: memref<192x32xf32, #tpu.memory_space<vmem>>, %arg4: memref<192x32xf32, #tpu.memory_space<vmem>>, %arg5: memref<192x32xf32, #tpu.memory_space<vmem>>, %arg6: memref<192x1xf32, #tpu.memory_space<vmem>>, %arg7: memref<8x192xf32, #tpu.memory_space<vmem>>, %arg8: memref<8x1xf32, #tpu.memory_space<vmem>>, %arg9: memref<8x8xf32, #tpu.memory_space<vmem>>) attributes {dimension_semantics = [#tpu.dimension_semantics<parallel>], iteration_bounds = array<i64: 1>, scalar_prefetch = 0 : i64, scratch_operands = 0 : i64, tpu.core_type = #tpu.core_type<tc>, window_params = [{transform_indices = @transform_0, window_bounds = array<i64: 2, 8>}, {transform_indices = @transform_1, window_bounds = array<i64: 3, 32, 8>}, {pipeline_mode = #tpu.pipeline_mode<synchronous>, transform_indices = @transform_2, window_bounds = array<i64: 192, 32>}, {pipeline_mode = #tpu.pipeline_mode<synchronous>, transform_indices = @transform_3, window_bounds = array<i64: 192, 32>}, {pipeline_mode = #tpu.pipeline_mode<synchronous>, transform_indices = @transform_4, window_bounds = array<i64: 192, 32>}, {pipeline_mode = #tpu.pipeline_mode<synchronous>, transform_indices = @transform_5, window_bounds = array<i64: 192, 1>}, {pipeline_mode = #tpu.pipeline_mode<synchronous>, transform_indices = @transform_6, window_bounds = array<i64: 8, 192>}, {pipeline_mode = #tpu.pipeline_mode<synchronous>, transform_indices = @transform_7, window_bounds = array<i64: 8, 1>}, {transform_indices = @transform_8, window_bounds = array<i64: 8, 8>}]} {
    %c0 = arith.constant 0 : index
    %c0_0 = arith.constant 0 : index
    %c0_1 = arith.constant 0 : index
    %0 = vector.load %arg2[%c0, %c0_0, %c0_1] : memref<3x32x8xf32, #tpu.memory_space<vmem>>, vector<3x32x8xf32>
    %1 = vector.extract_strided_slice %0 {offsets = [0, 0, 0], sizes = [1, 32, 8], strides = [1, 1, 1]} : vector<3x32x8xf32> to vector<1x32x8xf32>
    %2 = vector.shape_cast %1 : vector<1x32x8xf32> to vector<32x8xf32>
    %3 = vector.extract_strided_slice %0 {offsets = [1, 0, 0], sizes = [1, 32, 8], strides = [1, 1, 1]} : vector<3x32x8xf32> to vector<1x32x8xf32>
    %4 = vector.shape_cast %3 : vector<1x32x8xf32> to vector<32x8xf32>
    %5 = vector.extract_strided_slice %0 {offsets = [2, 0, 0], sizes = [1, 32, 8], strides = [1, 1, 1]} : vector<3x32x8xf32> to vector<1x32x8xf32>
    %6 = vector.shape_cast %5 : vector<1x32x8xf32> to vector<32x8xf32>
    %c0_2 = arith.constant 0 : index
    %c0_3 = arith.constant 0 : index
    %7 = memref.load %arg1[%c0_2, %c0_3] : memref<2x8xf32, #tpu.memory_space<smem>>
    %c0_4 = arith.constant 0 : index
    %c1 = arith.constant 1 : index
    %8 = memref.load %arg1[%c0_4, %c1] : memref<2x8xf32, #tpu.memory_space<smem>>
    %c0_5 = arith.constant 0 : index
    %c2 = arith.constant 2 : index
    %9 = memref.load %arg1[%c0_5, %c2] : memref<2x8xf32, #tpu.memory_space<smem>>
    %c0_6 = arith.constant 0 : index
    %c3 = arith.constant 3 : index
    %10 = memref.load %arg1[%c0_6, %c3] : memref<2x8xf32, #tpu.memory_space<smem>>
    %c0_7 = arith.constant 0 : index
    %c4 = arith.constant 4 : index
    %11 = memref.load %arg1[%c0_7, %c4] : memref<2x8xf32, #tpu.memory_space<smem>>
    %c0_8 = arith.constant 0 : index
    %c5 = arith.constant 5 : index
    %12 = memref.load %arg1[%c0_8, %c5] : memref<2x8xf32, #tpu.memory_space<smem>>
    %c0_9 = arith.constant 0 : index
    %c6 = arith.constant 6 : index
    %13 = memref.load %arg1[%c0_9, %c6] : memref<2x8xf32, #tpu.memory_space<smem>>
    %c0_10 = arith.constant 0 : index
    %c7 = arith.constant 7 : index
    %14 = memref.load %arg1[%c0_10, %c7] : memref<2x8xf32, #tpu.memory_space<smem>>
    %15 = vector.broadcast %7 : f32 to vector<32x8xf32>
    %16 = arith.mulf %4, %15 : vector<32x8xf32>
    %17 = vector.broadcast %8 : f32 to vector<32x8xf32>
    %18 = arith.addf %16, %17 : vector<32x8xf32>
    %19 = vector.broadcast %9 : f32 to vector<32x8xf32>
    %20 = arith.mulf %2, %19 : vector<32x8xf32>
    %21 = vector.broadcast %10 : f32 to vector<32x8xf32>
    %22 = arith.addf %20, %21 : vector<32x8xf32>
    %23 = vector.broadcast %11 : f32 to vector<32x8xf32>
    %24 = arith.mulf %2, %23 : vector<32x8xf32>
    %25 = vector.broadcast %12 : f32 to vector<32x8xf32>
    %26 = arith.addf %24, %25 : vector<32x8xf32>
    %cst = arith.constant dense<0xFF800000> : vector<8xf32>
    %27 = vector.multi_reduction <maximumf>, %22, %cst [0] : vector<32x8xf32> to vector<8xf32>
    %28 = vector.shape_cast %27 : vector<8xf32> to vector<1x8xf32>
    %cst_11 = arith.constant dense<0x7F800000> : vector<8xf32>
    %29 = vector.multi_reduction <minimumf>, %22, %cst_11 [0] : vector<32x8xf32> to vector<8xf32>
    %30 = vector.shape_cast %29 : vector<8xf32> to vector<1x8xf32>
    %31 = vector.broadcast %28 : vector<1x8xf32> to vector<32x8xf32>
    %32 = arith.mulf %18, %31 : vector<32x8xf32>
    %33 = vector.broadcast %30 : vector<1x8xf32> to vector<32x8xf32>
    %34 = arith.mulf %18, %33 : vector<32x8xf32>
    %35 = arith.maximumf %32, %34 : vector<32x8xf32>
    %36 = vector.shape_cast %18 : vector<32x8xf32> to vector<32x1x8xf32>
    %37 = vector.shape_cast %22 : vector<32x8xf32> to vector<1x32x8xf32>
    %38 = vector.broadcast %36 : vector<32x1x8xf32> to vector<32x32x8xf32>
    %39 = vector.broadcast %37 : vector<1x32x8xf32> to vector<32x32x8xf32>
    %40 = arith.mulf %38, %39 : vector<32x32x8xf32>
    %41 = vector.shape_cast %35 : vector<32x8xf32> to vector<32x1x8xf32>
    %42 = vector.broadcast %41 : vector<32x1x8xf32> to vector<32x32x8xf32>
    %43 = arith.subf %40, %42 : vector<32x32x8xf32>
    %44 = math.exp %43 : vector<32x32x8xf32>
    %cst_12 = arith.constant dense<0.000000e+00> : vector<32x8xf32>
    %45 = vector.multi_reduction <add>, %44, %cst_12 [1] : vector<32x32x8xf32> to vector<32x8xf32>
    %46 = vector.shape_cast %26 : vector<32x8xf32> to vector<1x32x8xf32>
    %47 = vector.broadcast %46 : vector<1x32x8xf32> to vector<32x32x8xf32>
    %48 = arith.mulf %44, %47 : vector<32x32x8xf32>
    %cst_13 = arith.constant dense<0.000000e+00> : vector<32x8xf32>
    %49 = vector.multi_reduction <add>, %48, %cst_13 [1] : vector<32x32x8xf32> to vector<32x8xf32>
    %50 = tpu.reciprocal %45 : vector<32x8xf32> -> vector<32x8xf32>
    %51 = arith.mulf %49, %50 : vector<32x8xf32>
    %52 = vector.broadcast %13 : f32 to vector<32x8xf32>
    %53 = arith.mulf %51, %52 : vector<32x8xf32>
    %54 = vector.broadcast %14 : f32 to vector<32x8xf32>
    %55 = arith.addf %53, %54 : vector<32x8xf32>
    %c1_14 = arith.constant 1 : index
    %c0_15 = arith.constant 0 : index
    %56 = memref.load %arg1[%c1_14, %c0_15] : memref<2x8xf32, #tpu.memory_space<smem>>
    %c1_16 = arith.constant 1 : index
    %c1_17 = arith.constant 1 : index
    %57 = memref.load %arg1[%c1_16, %c1_17] : memref<2x8xf32, #tpu.memory_space<smem>>
    %c1_18 = arith.constant 1 : index
    %c2_19 = arith.constant 2 : index
    %58 = memref.load %arg1[%c1_18, %c2_19] : memref<2x8xf32, #tpu.memory_space<smem>>
    %c1_20 = arith.constant 1 : index
    %c3_21 = arith.constant 3 : index
    %59 = memref.load %arg1[%c1_20, %c3_21] : memref<2x8xf32, #tpu.memory_space<smem>>
    %c1_22 = arith.constant 1 : index
    %c4_23 = arith.constant 4 : index
    %60 = memref.load %arg1[%c1_22, %c4_23] : memref<2x8xf32, #tpu.memory_space<smem>>
    %c1_24 = arith.constant 1 : index
    %c5_25 = arith.constant 5 : index
    %61 = memref.load %arg1[%c1_24, %c5_25] : memref<2x8xf32, #tpu.memory_space<smem>>
    %c1_26 = arith.constant 1 : index
    %c6_27 = arith.constant 6 : index
    %62 = memref.load %arg1[%c1_26, %c6_27] : memref<2x8xf32, #tpu.memory_space<smem>>
    %c1_28 = arith.constant 1 : index
    %c7_29 = arith.constant 7 : index
    %63 = memref.load %arg1[%c1_28, %c7_29] : memref<2x8xf32, #tpu.memory_space<smem>>
    %64 = vector.broadcast %56 : f32 to vector<32x8xf32>
    %65 = arith.mulf %4, %64 : vector<32x8xf32>
    %66 = vector.broadcast %57 : f32 to vector<32x8xf32>
    %67 = arith.addf %65, %66 : vector<32x8xf32>
    %68 = vector.broadcast %58 : f32 to vector<32x8xf32>
    %69 = arith.mulf %6, %68 : vector<32x8xf32>
    %70 = vector.broadcast %59 : f32 to vector<32x8xf32>
    %71 = arith.addf %69, %70 : vector<32x8xf32>
    %72 = vector.broadcast %60 : f32 to vector<32x8xf32>
    %73 = arith.mulf %6, %72 : vector<32x8xf32>
    %74 = vector.broadcast %61 : f32 to vector<32x8xf32>
    %75 = arith.addf %73, %74 : vector<32x8xf32>
    %cst_30 = arith.constant dense<0xFF800000> : vector<8xf32>
    %76 = vector.multi_reduction <maximumf>, %71, %cst_30 [0] : vector<32x8xf32> to vector<8xf32>
    %77 = vector.shape_cast %76 : vector<8xf32> to vector<1x8xf32>
    %cst_31 = arith.constant dense<0x7F800000> : vector<8xf32>
    %78 = vector.multi_reduction <minimumf>, %71, %cst_31 [0] : vector<32x8xf32> to vector<8xf32>
    %79 = vector.shape_cast %78 : vector<8xf32> to vector<1x8xf32>
    %80 = vector.broadcast %77 : vector<1x8xf32> to vector<32x8xf32>
    %81 = arith.mulf %67, %80 : vector<32x8xf32>
    %82 = vector.broadcast %79 : vector<1x8xf32> to vector<32x8xf32>
    %83 = arith.mulf %67, %82 : vector<32x8xf32>
    %84 = arith.maximumf %81, %83 : vector<32x8xf32>
    %85 = vector.shape_cast %67 : vector<32x8xf32> to vector<32x1x8xf32>
    %86 = vector.shape_cast %71 : vector<32x8xf32> to vector<1x32x8xf32>
    %87 = vector.broadcast %85 : vector<32x1x8xf32> to vector<32x32x8xf32>
    %88 = vector.broadcast %86 : vector<1x32x8xf32> to vector<32x32x8xf32>
    %89 = arith.mulf %87, %88 : vector<32x32x8xf32>
    %90 = vector.shape_cast %84 : vector<32x8xf32> to vector<32x1x8xf32>
    %91 = vector.broadcast %90 : vector<32x1x8xf32> to vector<32x32x8xf32>
    %92 = arith.subf %89, %91 : vector<32x32x8xf32>
    %93 = math.exp %92 : vector<32x32x8xf32>
    %cst_32 = arith.constant dense<0.000000e+00> : vector<32x8xf32>
    %94 = vector.multi_reduction <add>, %93, %cst_32 [1] : vector<32x32x8xf32> to vector<32x8xf32>
    %95 = vector.shape_cast %75 : vector<32x8xf32> to vector<1x32x8xf32>
    %96 = vector.broadcast %95 : vector<1x32x8xf32> to vector<32x32x8xf32>
    %97 = arith.mulf %93, %96 : vector<32x32x8xf32>
    %cst_33 = arith.constant dense<0.000000e+00> : vector<32x8xf32>
    %98 = vector.multi_reduction <add>, %97, %cst_33 [1] : vector<32x32x8xf32> to vector<32x8xf32>
    %99 = tpu.reciprocal %94 : vector<32x8xf32> -> vector<32x8xf32>
    %100 = arith.mulf %98, %99 : vector<32x8xf32>
    %101 = vector.broadcast %62 : f32 to vector<32x8xf32>
    %102 = arith.mulf %100, %101 : vector<32x8xf32>
    %103 = vector.broadcast %63 : f32 to vector<32x8xf32>
    %104 = arith.addf %102, %103 : vector<32x8xf32>
    %c0_34 = arith.constant 0 : index
    %c0_35 = arith.constant 0 : index
    %105 = vector.load %arg3[%c0_34, %c0_35] : memref<192x32xf32, #tpu.memory_space<vmem>>, vector<192x32xf32>
    %cst_36 = arith.constant dense<0.000000e+00> : vector<192x8xf32>
    %106 = tpu.matmul %105, %55, %cst_36 {dimension_numbers = #tpu.dot_dimension_numbers<[1], [0], [0], [1], [0, 0, 1, 1], [], []>} : vector<192x32xf32>, vector<32x8xf32>, vector<192x8xf32> -> vector<192x8xf32>
    %c0_37 = arith.constant 0 : index
    %c0_38 = arith.constant 0 : index
    %107 = vector.load %arg4[%c0_37, %c0_38] : memref<192x32xf32, #tpu.memory_space<vmem>>, vector<192x32xf32>
    %cst_39 = arith.constant dense<0.000000e+00> : vector<192x8xf32>
    %108 = tpu.matmul %107, %4, %cst_39 {dimension_numbers = #tpu.dot_dimension_numbers<[1], [0], [0], [1], [0, 0, 1, 1], [], []>} : vector<192x32xf32>, vector<32x8xf32>, vector<192x8xf32> -> vector<192x8xf32>
    %109 = arith.addf %106, %108 : vector<192x8xf32>
    %c0_40 = arith.constant 0 : index
    %c0_41 = arith.constant 0 : index
    %110 = vector.load %arg5[%c0_40, %c0_41] : memref<192x32xf32, #tpu.memory_space<vmem>>, vector<192x32xf32>
    %cst_42 = arith.constant dense<0.000000e+00> : vector<192x8xf32>
    %111 = tpu.matmul %110, %104, %cst_42 {dimension_numbers = #tpu.dot_dimension_numbers<[1], [0], [0], [1], [0, 0, 1, 1], [], []>} : vector<192x32xf32>, vector<32x8xf32>, vector<192x8xf32> -> vector<192x8xf32>
    %112 = arith.addf %109, %111 : vector<192x8xf32>
    %c0_43 = arith.constant 0 : index
    %c0_44 = arith.constant 0 : index
    %113 = vector.load %arg6[%c0_43, %c0_44] : memref<192x1xf32, #tpu.memory_space<vmem>>, vector<192x1xf32>
    %114 = vector.broadcast %113 : vector<192x1xf32> to vector<192x8xf32>
    %115 = arith.addf %112, %114 : vector<192x8xf32>
    %cst_45 = arith.constant 0.000000e+00 : f32
    %116 = vector.broadcast %cst_45 : f32 to vector<192x8xf32>
    %117 = arith.cmpf ogt, %115, %116 : vector<192x8xf32>
    %cst_46 = arith.constant 0.00999999977 : f32
    %118 = vector.broadcast %cst_46 : f32 to vector<192x8xf32>
    %119 = arith.mulf %118, %115 : vector<192x8xf32>
    %120 = arith.select %117, %115, %119 : vector<192x8xi1>, vector<192x8xf32>
    %c0_47 = arith.constant 0 : index
    %c0_48 = arith.constant 0 : index
    %121 = vector.load %arg7[%c0_47, %c0_48] : memref<8x192xf32, #tpu.memory_space<vmem>>, vector<8x192xf32>
    %cst_49 = arith.constant dense<0.000000e+00> : vector<8x8xf32>
    %122 = tpu.matmul %121, %120, %cst_49 {dimension_numbers = #tpu.dot_dimension_numbers<[1], [0], [0], [1], [0, 0, 1, 1], [], []>} : vector<8x192xf32>, vector<192x8xf32>, vector<8x8xf32> -> vector<8x8xf32>
    %c0_50 = arith.constant 0 : index
    %c0_51 = arith.constant 0 : index
    %123 = vector.load %arg8[%c0_50, %c0_51] : memref<8x1xf32, #tpu.memory_space<vmem>>, vector<8x1xf32>
    %124 = vector.broadcast %123 : vector<8x1xf32> to vector<8x8xf32>
    %125 = arith.addf %122, %124 : vector<8x8xf32>
    %c0_52 = arith.constant 0 : index
    %c0_53 = arith.constant 0 : index
    %126 = vector.load %arg9[%c0_52, %c0_53] : memref<8x8xf32, #tpu.memory_space<vmem>>, vector<8x8xf32>
    tpu.vector_store %arg9[%c0_52, %c0_53], %125 {strides = array<i32>} : memref<8x8xf32, #tpu.memory_space<vmem>>, vector<8x8xf32>,
    return
  }
  func.func @transform_0(%arg0: i32) -> (i32, i32) {
    %c0_i32 = arith.constant 0 : i32
    %c0_i32_0 = arith.constant 0 : i32
    %c0_i32_1 = arith.constant 0 : i32
    return %c0_i32, %c0_i32_0 : i32, i32
  }
  func.func @transform_1(%arg0: i32) -> (i32, i32, i32) {
    %c0_i32 = arith.constant 0 : i32
    %c0_i32_0 = arith.constant 0 : i32
    %c0_i32_1 = arith.constant 0 : i32
    return %c0_i32, %c0_i32_0, %arg0 : i32, i32, i32
  }
  func.func @transform_2(%arg0: i32) -> (i32, i32) {
    %c0_i32 = arith.constant 0 : i32
    %c0_i32_0 = arith.constant 0 : i32
    %c0_i32_1 = arith.constant 0 : i32
    return %c0_i32, %c0_i32_0 : i32, i32
  }
  func.func @transform_3(%arg0: i32) -> (i32, i32) {
    %c0_i32 = arith.constant 0 : i32
    %c0_i32_0 = arith.constant 0 : i32
    %c0_i32_1 = arith.constant 0 : i32
    return %c0_i32, %c0_i32_0 : i32, i32
  }
  func.func @transform_4(%arg0: i32) -> (i32, i32) {
    %c0_i32 = arith.constant 0 : i32
    %c0_i32_0 = arith.constant 0 : i32
    %c0_i32_1 = arith.constant 0 : i32
    return %c0_i32, %c0_i32_0 : i32, i32
  }
  func.func @transform_5(%arg0: i32) -> (i32, i32) {
    %c0_i32 = arith.constant 0 : i32
    %c0_i32_0 = arith.constant 0 : i32
    %c0_i32_1 = arith.constant 0 : i32
    return %c0_i32, %c0_i32_0 : i32, i32
  }
  func.func @transform_6(%arg0: i32) -> (i32, i32) {
    %c0_i32 = arith.constant 0 : i32
    %c0_i32_0 = arith.constant 0 : i32
    %c0_i32_1 = arith.constant 0 : i32
    return %c0_i32, %c0_i32_0 : i32, i32
  }
  func.func @transform_7(%arg0: i32) -> (i32, i32) {
    %c0_i32 = arith.constant 0 : i32
    %c0_i32_0 = arith.constant 0 : i32
    %c0_i32_1 = arith.constant 0 : i32
    return %c0_i32, %c0_i32_0 : i32, i32
  }
  func.func @transform_8(%arg0: i32) -> (i32, i32) {
    %c0_i32 = arith.constant 0 : i32
    %c0_i32_0 = arith.constant 0 : i32
    return %c0_i32, %arg0 : i32, i32
  }
}

</mosaic_0001>

<bundles_post_ra>
// kernel: tpu_custom_call.1
= control target key start
LH: loop header
LB: loop body
LE: loop exit
PB: predicated region body
PF: predicated region fallthrough
CT: control target
= control target key end

     0   :  { %13 = vsyncpa [#allocation4], 0  ;;  %s12433_s0 = inlined_call_operand.vmem [shape: f32[2,8], index: 0, kind: input, shape index: {}]   ;;  %s12434_s1 = inlined_call_operand.vmem [shape: f32[3,32,8], index: 1, kind: input, shape index: {}]   ;;  %s12435_s2 = inlined_call_operand.vmem [shape: f32[192,32], index: 2, kind: input, shape index: {}]   ;;  %s12436_s3 = inlined_call_operand.vmem [shape: f32[192,32], index: 3, kind: input, shape index: {}]   ;;  %s12437_s4 = inlined_call_operand.vmem [shape: f32[192,32], index: 4, kind: input, shape index: {}]   ;;  %s12438_s5 = inlined_call_operand.vmem [shape: f32[192,1], index: 5, kind: input, shape index: {}]   ;;  %s12439_s6 = inlined_call_operand.vmem [shape: f32[8,192], index: 6, kind: input, shape index: {}]   ;;  %s12440_s7 = inlined_call_operand.vmem [shape: f32[8,1], index: 7, kind: input, shape index: {}]   ;;  %s12441_s8 = inlined_call_operand.hbm [shape: f32[8,8], index: 8, kind: output, shape index: {}]  }
   0x1   :  { %14 = vsyncpa [#allocation3], 0  ;;  %s21_s29 = sshll.u32 %s12433_s0, 4  ;;  %s22_s29 = int_to_ptr.vmem [resolvable:$true] %s21_s29 }
   0x2   :  { %s7160_s30 = scalar_lea.vmem %s22_s29, 32  ;;  %p7165_p1 = scmp.lt.s32.totalorder %s22_s29, %s22_s29 }
   0x3   :  { %p7161_p0 = scmp.ne.s32.totalorder %s22_s29, %s7160_s30  ;;  %p7166_p2 = scmp.lt.s32.totalorder %s7160_s30, %s7160_s30 }
   0x5   :  { %p7167_p3 = por %p7166_p2, %p7165_p1 }
   0x7   :  { %p7168_p4 = pnand %p7167_p3, %p7161_p0 }
   0x9   :  { %7171 = shalt.err (!%p7168_p4)
}
   0xa   :  { %s7196_s9 = smov [#allocation2]  }
   0xb   :  { %24 = dma.vmem_to_smem %s22_s29, 32, %s7196_s9, [#allocation4]  }
   0xc   :  { %7192 = dma.done.wait [#allocation4], 32  }
   0xd   :  { %7193 = vsyncadd [#allocation4], 4294967264 }
   0xe   :  { %42 = sfence }
   0xf   :  { %s55_s10 = sld [smem:[#allocation2]]  ;;  %v140_v0 = vlaneseq  ;;  %v7252_v1 = vld [vmem:[%s12434_s1 + $0x38] sm:$0xff]  ;;  %v7260_v2 = vld [vmem:[%s12434_s1 + $0x30] sm:$0xff]  ;;  %v7197_v3 = vmov 1966171168   ;;  %v43_v6 = vld [vmem:[%s12434_s1] sm:$0xff] }
  0x10   :  { %s6193_s0 = sld [smem:[#allocation2 + $0x1]]  ;;  %6365 = vmatprep.subr.mxu0 %v7252_v1  ;;  %6497 = vmatprep.subr.mxu1 %v7252_v1  ;;  %v138_v4 = vunpack.c.l.s4 %v7197_v3  ;;  %v44_v7 = vld [vmem:[%s12434_s1 + $0x8] sm:$0xff]  ;;  %v45_v8 = vld [vmem:[%s12434_s1 + $0x10] sm:$0xff]  ;;  %v46_v11 = vld [vmem:[%s12434_s1 + $0x18] sm:$0xff]  ;;  %vm93_vm0 = vcmask 64512   ;;  %vm4900_vm1 = vcmask 261120  }
  0x11   :  { %s6194_s13 = sld [smem:[#allocation2 + $0x2]]  ;;  %6366 = vmatpush3.msra.mxu0 %v7252_v1  ;;  %6501 = vmatpush3.msra.mxu1 %v7252_v1  ;;  %v141_v5 = vshrl.u32 %v140_v0, 7  ;;  %v7317_v33 = vld [vmem:[%s12434_s1 + $0x28] sm:$0xff]  ;;  %vm5190_vm2 = vcmask 1041409   ;;  %vm5192_vm3 = vcmask 1042434   ;;  %vm5194_vm4 = vcmask 1043459  }
  0x12   :  { %s6195_s14 = sld [smem:[#allocation2 + $0x3]]  ;;  %6367 = vmatprep.subr.mxu0 %v7260_v2  ;;  %6498 = vmatprep.subr.mxu1 %v7260_v2  ;;  %v139_v10 = vunpack.c.0.s8 %v138_v4  ;;  %vm5196_vm5 = vcmask 1044484   ;;  %vm5198_vm6 = vcmask 1045509   ;;  %vm5200_vm7 = vcmask 1046534  }
  0x13   :  { %s6200_s17 = sld [smem:[#allocation2 + $0x80]]  ;;  %6368 = vmatpush3.msra.mxu0 %v7260_v2  ;;  %6502 = vmatpush3.msra.mxu1 %v7260_v2  ;;  %v7335_v45 = vsub.s32 0, %v141_v5  ;;  %vm5202_vm8 = vcmask 1047559   ;;  %vm6103_vm9 = vcmask 523264  }
  0x14   :  { %v7285_v15 = vsub.s32 %v139_v10, %v141_v5  ;;  %s7298_s26 = sld [smem:[#allocation2 + $0x81]]  ;;  %6369 = vmatprep.subr.mxu0 %v7317_v33  ;;  %6499 = vmatprep.subr.mxu1 %v7317_v33 }
  0x15   :  { %v7276_v9 = vstv %s55_s10  ;;  %s7325_s29 = sld [smem:[#allocation2 + $0x82]]  ;;  %6370 = vmatpush3.msra.mxu0 %v7317_v33  ;;  %6503 = vmatpush3.msra.mxu1 %v7317_v33 }
  0x16   :  { %v67_v12 = vmul.f32 %v7276_v9, %v7252_v1  ;;  %v7283_v13 = vstv %s6193_s0  ;;  %v66_v49 = vmul.f32 %v7276_v9, %v7260_v2  ;;  %s7368_s30 = sld [smem:[#allocation2 + $0x83]] }
  0x17   :  { %v73_v14 = vstv %s6194_s13  ;;  %s8807_s9 = sld [smem:[#allocation2 + $0x4]]  ;;  %s7200_s13 = smov [#allocation5]  }
  0x18   :  { %v7288_v16 = vadd.f32 %v7283_v13, %v67_v12  ;;  %v74_v17 = vmul.f32 %v73_v14, %v43_v6  ;;  %v75_v18 = vmul.f32 %v73_v14, %v44_v7  ;;  %v76_v19 = vmul.f32 %v73_v14, %v45_v8  ;;  %s9020_s12 = sld [smem:[#allocation2 + $0x5]] }
  0x19   :  { %v77_v20 = vmul.f32 %v73_v14, %v46_v11  ;;  %v78_v21 = vstv %s6195_s14  ;;  %v7304_v28 = vstv %s6200_s17  ;;  %v7349_v63 = vadd.f32 %v7283_v13, %v66_v49  ;;  %s9553_s22 = sld [smem:[#allocation2 + $0x6]] }
  0x1a   :  { %v7290_v22 = vadd.f32 %v78_v21, %v74_v17  ;;  %v7292_v23 = vadd.f32 %v78_v21, %v75_v18  ;;  %v7294_v24 = vadd.f32 %v78_v21, %v76_v19  ;;  %v283_v25 = vcombine.high %v7288_v16, %v7288_v16  ;;  %s9555_s23 = sld [smem:[#allocation2 + $0x7]] }
  0x1b   :  { %v7300_v26 = vadd.f32 %v78_v21, %v77_v20  ;;  %v290_v27 = vrot.slane %v7288_v16, %v7285_v15  ;;  %v2466_v52 = vmul.f32 %v7304_v28, %v7252_v1  ;;  %v7345_v56 = vstv %s7298_s26  ;;  %s9561_s24 = sld [smem:[#allocation2 + $0x84]] }
  0x1c   :  { %12693 = vst [vmem:[#allocation8_spill] sm:$0xff] %v7290_v22  ;;  %12694 = vst [vmem:[#allocation9_spill] sm:$0xff] %v7292_v23  ;;  %v94_v29 = vsel %vm93_vm0, %v7290_v22, -inf  ;;  %v95_v30 = vsel %vm93_vm0, %v7292_v23, -inf  ;;  %v96_v31 = vsel %vm93_vm0, %v7294_v24, -inf  ;;  %v107_v32 = vsel %vm93_vm0, %v7290_v22, inf }
  0x1d   :  { %12695 = vst [vmem:[#allocation10_spill] sm:$0xff] %v7294_v24  ;;  %12696 = vst [vmem:[#allocation11_spill] sm:$0xff] %v7300_v26  ;;  %v97_v34 = vsel %vm93_vm0, %v7300_v26, -inf  ;;  %v98_v35 = vmax.f32 %v94_v29, %v95_v30  ;;  %v108_v36 = vsel %vm93_vm0, %v7292_v23, inf  ;;  %v109_v37 = vsel %vm93_vm0, %v7294_v24, inf  ;;  %s9568_s25 = sld [smem:[#allocation2 + $0x85]] }
  0x1e   :  { %v99_v38 = vmax.f32 %v96_v31, %v97_v34  ;;  %v110_v39 = vsel %vm93_vm0, %v7300_v26, inf  ;;  %v111_v40 = vmin.f32 %v107_v32, %v108_v36  ;;  %v297_v41 = vrot.slane %v283_v25, %v7285_v15  ;;  %v52_v36 = vld [vmem:[%s12434_s1 + $0x48] sm:$0xff]  ;;  %s9923_s14 = sld [smem:[#allocation2 + $0x86]] }
  0x1f   :  { %v112_v42 = vmin.f32 %v109_v37, %v110_v39  ;;  %v298_v43 = vcombine.high %v290_v27, %v290_v27  ;;  %v306_v44 = vrot.slane %v290_v27, %v7285_v15  ;;  %v7353_v1 = vadd.f32 %v7345_v56, %v2466_v52  ;;  %v53_v37 = vld [vmem:[%s12434_s1 + $0x50] sm:$0xff]  ;;  %s9927_s15 = sld [smem:[#allocation2 + $0x87]] }
  0x20   :  { %v100_v46 = vmax.f32 %v98_v35, %v99_v38  ;;  %v299_v47 = vcombine.high %v297_v41, %v297_v41  ;;  %v313_v48 = vrot.slane %v297_v41, %v7285_v15  ;;  %v2472_v4 = vstv %s7325_s29  ;;  %v51_v35 = vld [vmem:[%s12434_s1 + $0x40] sm:$0xff] }
  0x21   :  { %v113_v50 = vmin.f32 %v111_v40, %v112_v42  ;;  %v320_v51 = vrot.slane %v298_v43, %v7285_v15  ;;  %v328_v55 = vcombine.high %v306_v44, %v306_v44  ;;  %v431_v60 = vrot.slane %v306_v44, %v7335_v45  ;;  %v54_v42 = vld [vmem:[%s12434_s1 + $0x58] sm:$0xff] }
  0x22   :  { %v101_v53 = vrot.slane %v100_v46, 4  ;;  %v327_v54 = vrot.slane %v299_v47, %v7285_v15  ;;  %v329_v58 = vcombine.high %v313_v48, %v313_v48  ;;  %v447_v7 = vrot.slane %v313_v48, %v7335_v45 }
  0x23   :  { %v114_v57 = vrot.slane %v113_v50, 4  ;;  %v330_v59 = vcombine.high %v320_v51, %v320_v51  ;;  %v435_v3 = vrot.slane %v320_v51, %v7335_v45  ;;  %v439_v6 = vrot.slane %v328_v55, %v7335_v45 }
  0x24   :  { %v102_v61 = vmax.f32 %v100_v46, %v101_v53  ;;  %v331_v62 = vcombine.high %v327_v54, %v327_v54  ;;  %v7359_v8 = vrot.slane %v327_v54, %v7335_v45  ;;  %v7363_v12 = vrot.slane %v329_v58, %v7335_v45 }
  0x25   :  { %v115_v0 = vmin.f32 %v113_v50, %v114_v57  ;;  %v443_v11 = vrot.slane %v330_v59, %v7335_v45  ;;  %v7366_v14 = vmul.f32 %v431_v60, %v7290_v22  ;;  %v7374_v19 = vmul.f32 %v431_v60, %v7292_v23 }
  0x26   :  { %v103_v5 = vrot.slane %v102_v61, 2  ;;  %12697 = vst [vmem:[#allocation12_spill] sm:$0xff] %v7363_v12  ;;  %v7371_v18 = vrot.slane %v331_v62, %v7335_v45  ;;  %v7377_v20 = vmul.f32 %v431_v60, %v7294_v24  ;;  %v7380_v25 = vmul.f32 %v431_v60, %v7300_v26 }
  0x27   :  { %v116_v10 = vrot.slane %v115_v0, 2  ;;  %v7383_v27 = vmul.f32 %v435_v3, %v7290_v22  ;;  %v7386_v29 = vmul.f32 %v435_v3, %v7292_v23  ;;  %v7389_v31 = vmul.f32 %v435_v3, %v7294_v24 }
  0x28   :  { %v104_v17 = vmax.f32 %v102_v61, %v103_v5  ;;  %12698 = vst [vmem:[#allocation13_spill] sm:$0xff] %v7371_v18  ;;  %v7392_v32 = vmul.f32 %v435_v3, %v7300_v26  ;;  %v7395_v34 = vmul.f32 %v439_v6, %v7290_v22  ;;  %v7407_v39 = vmul.f32 %v439_v6, %v7292_v23 }
  0x29   :  { %v117_v21 = vmin.f32 %v115_v0, %v116_v10  ;;  %v7410_v40 = vmul.f32 %v439_v6, %v7294_v24  ;;  %v7413_v41 = vmul.f32 %v439_v6, %v7300_v26  ;;  %v7421_v44 = vmul.f32 %v443_v11, %v7290_v22 }
  0x2a   :  { %v105_v30 = vrot.slane %v104_v17, 1  ;;  %v7424_v46 = vmul.f32 %v443_v11, %v7292_v23  ;;  %v7427_v47 = vmul.f32 %v443_v11, %v7294_v24  ;;  %v7432_v49 = vmul.f32 %v443_v11, %v7300_v26 }
  0x2b   :  { %v118_v38 = vrot.slane %v117_v21, 1  ;;  %v7435_v50 = vmul.f32 %v447_v7, %v7290_v22  ;;  %v7438_v51 = vmul.f32 %v447_v7, %v7292_v23  ;;  %v2473_v53 = vmul.f32 %v2472_v4, %v51_v35 }
  0x2c   :  { %v7418_v43 = vmax.f32 %v104_v17, %v105_v30  ;;  %12699 = vst [vmem:[#allocation14_spill] sm:$0xff] %v7432_v49  ;;  %v2474_v54 = vmul.f32 %v2472_v4, %v52_v36  ;;  %v2475_v55 = vmul.f32 %v2472_v4, %v53_v37  ;;  %v7445_v58 = vmul.f32 %v447_v7, %v7294_v24 }
  0x2d   :  { %v7429_v48 = vmin.f32 %v117_v21, %v118_v38  ;;  %v2476_v59 = vmul.f32 %v2472_v4, %v54_v42  ;;  %v2477_v60 = vstv %s7368_s30  ;;  %v7449_v61 = vmul.f32 %v447_v7, %v7300_v26 }
  0x2e   :  { %v123_v52 = vmul.f32 %v7418_v43, %v7288_v16  ;;  %v7451_v62 = vadd.f32 %v2477_v60, %v2473_v53  ;;  %v7453_v0 = vadd.f32 %v2477_v60, %v2474_v54  ;;  %v7455_v3 = vadd.f32 %v2477_v60, %v2475_v55 }
  0x2f   :  { %v127_v57 = vmul.f32 %v7429_v48, %v7288_v16  ;;  %12700 = vst [vmem:[#allocation15_spill] sm:$0xff] %v7449_v61  ;;  %v7459_v6 = vmul.f32 %v7359_v8, %v7290_v22  ;;  %v7461_v16 = vadd.f32 %v2477_v60, %v2476_v59  ;;  %v2681_v4 = vcombine.high %v7353_v1, %v7353_v1 }
  0x30   :  { %12701 = vst [vmem:[#allocation16_spill] sm:$0xff] %v7451_v62  ;;  %12702 = vst [vmem:[#allocation17_spill] sm:$0xff] %v7453_v0  ;;  %v2492_v7 = vsel %vm93_vm0, %v7451_v62, -inf  ;;  %v2493_v10 = vsel %vm93_vm0, %v7453_v0, -inf  ;;  %v2494_v11 = vsel %vm93_vm0, %v7455_v3, -inf  ;;  %v2505_v17 = vsel %vm93_vm0, %v7451_v62, inf }
  0x31   :  { %12703 = vst [vmem:[#allocation18_spill] sm:$0xff] %v7455_v3  ;;  %v131_v5 = vmax.f32 %v123_v52, %v127_v57  ;;  %12704 = vst [vmem:[#allocation19_spill] sm:$0xff] %v7459_v6  ;;  %v2495_v35 = vsel %vm93_vm0, %v7461_v16, -inf  ;;  %v2496_v36 = vmax.f32 %v2492_v7, %v2493_v10  ;;  %v2506_v38 = vsel %vm93_vm0, %v7453_v0, inf }
  0x32   :  { %12705 = vst [vmem:[#allocation20_spill] sm:$0xff] %v7461_v16  ;;  %v2497_v37 = vmax.f32 %v2494_v11, %v2495_v35  ;;  %v2507_v42 = vsel %vm93_vm0, %v7455_v3, inf  ;;  %v2508_v52 = vsel %vm93_vm0, %v7461_v16, inf  ;;  %v7486_v57 = vrot.slane %v7353_v1, %v7285_v15 }
  0x33   :  { %v771_v21 = vcombine.high %v131_v5, %v131_v5  ;;  %v778_v30 = vrot.slane %v131_v5, %v7285_v15  ;;  %v2509_v60 = vmin.f32 %v2505_v17, %v2506_v38  ;;  %v2510_v5 = vmin.f32 %v2507_v42, %v2508_v52 }
  0x34   :  { %v2498_v59 = vmax.f32 %v2496_v36, %v2497_v37  ;;  %v7489_v7 = vrot.slane %v2681_v4, %v7285_v15  ;;  %v7503_v17 = vmul.f32 %v7363_v12, %v7290_v22  ;;  %v7508_v36 = vmul.f32 %v7363_v12, %v7292_v23 }
  0x35   :  { %v785_v53 = vrot.slane %v771_v21, %v7285_v15  ;;  %v786_v54 = vcombine.high %v778_v30, %v778_v30  ;;  %v794_v55 = vrot.slane %v778_v30, %v7285_v15  ;;  %v7495_v21 = vmul.f32 %v7359_v8, %v7292_v23 }
  0x36   :  { %v7499_v30 = vmul.f32 %v7359_v8, %v7294_v24  ;;  %12708 = vst [vmem:[#allocation23_spill] sm:$0xff] %v7503_v17  ;;  %12709 = vst [vmem:[#allocation24_spill] sm:$0xff] %v7508_v36  ;;  %v7518_v17 = vmul.f32 %v7418_v43, %v7349_v63  ;;  %v2499_v36 = vrot.slane %v2498_v59, 4  ;;  %v7528_v49 = vrot.slane %v7486_v57, %v7285_v15 }
  0x37   :  { %v787_v10 = vcombine.high %v785_v53, %v785_v53  ;;  %v801_v11 = vrot.slane %v785_v53, %v7285_v15  ;;  %v808_v35 = vrot.slane %v786_v54, %v7285_v15  ;;  %v816_v6 = vcombine.high %v794_v55, %v794_v55  ;;  %12706 = vst [vmem:[#allocation21_spill] sm:$0xff] %v7495_v21 }
  0x38   :  { %12707 = vst [vmem:[#allocation22_spill] sm:$0xff] %v7499_v30  ;;  %v919_v4 = vrot.slane %v794_v55, %v7335_v45  ;;  %v2696_v53 = vcombine.high %v7486_v57, %v7486_v57  ;;  %v2697_v54 = vcombine.high %v7489_v7, %v7489_v7  ;;  %v2511_v21 = vmin.f32 %v2509_v60, %v2510_v5 }
  0x39   :  { %v815_v37 = vrot.slane %v787_v10, %v7285_v15  ;;  %v817_v38 = vcombine.high %v801_v11, %v801_v11  ;;  %v818_v42 = vcombine.high %v808_v35, %v808_v35  ;;  %v923_v52 = vrot.slane %v808_v35, %v7335_v45 }
  0x3a   :  { %v927_v30 = vrot.slane %v816_v6, %v7335_v45  ;;  %v7522_v10 = vrot.slane %v801_v11, %v7335_v45  ;;  %v1076_v35 = vsub.f32 %v7366_v14, %v919_v4  ;;  %v1077_v61 = vsub.f32 %v7374_v19, %v919_v4 }
  0x3b   :  { %v819_v55 = vcombine.high %v815_v37, %v815_v37  ;;  %v7531_v18 = vrot.slane %v818_v42, %v7335_v45  ;;  %v7534_v12 = vrot.slane %v815_v37, %v7335_v45  ;;  %v7537_v6 = vrot.slane %v817_v38, %v7335_v45 }
  0x3c   :  { %12710 = vst [vmem:[#allocation25_spill] sm:$0xff] %v7522_v10  ;;  %v1078_v60 = vsub.f32 %v7377_v20, %v919_v4  ;;  %v1079_v14 = vsub.f32 %v7380_v25, %v919_v4  ;;  %v1080_v19 = vsub.f32 %v7383_v27, %v923_v52  ;;  %v1081_v57 = vsub.f32 %v7386_v29, %v923_v52 }
  0x3d   :  { %12711 = vst [vmem:[#allocation26_spill] sm:$0xff] %v7534_v12  ;;  %12712 = vst [vmem:[#allocation27_spill] sm:$0xff] %v7537_v6  ;;  %v7541_v5 = vrot.slane %v819_v55, %v7335_v45  ;;  %v1082_v11 = vsub.f32 %v7389_v31, %v923_v52  ;;  %v1083_v42 = vsub.f32 %v7392_v32, %v923_v52  ;;  %v1300_v55 = vmul.f32 1.442695, %v1076_v35 }
  0x3e   :  { %v1084_v37 = vsub.f32 %v7395_v34, %v927_v30  ;;  %v1085_v38 = vsub.f32 %v7407_v39, %v927_v30  ;;  %v1086_v6 = vsub.f32 %v7410_v40, %v927_v30  ;;  %v1087_v20 = vsub.f32 %v7413_v41, %v927_v30 }
  0x3f   :  { %12713 = vst [vmem:[#allocation28_spill] sm:$0xff] %v7541_v5  ;;  %v1302_v5 = vmul.f32 1.442695, %v1077_v61  ;;  %v1088_v25 = vsub.f32 %v7421_v44, %v7531_v18  ;;  %v1089_v27 = vsub.f32 %v7424_v46, %v7531_v18  ;;  %v1090_v29 = vsub.f32 %v7427_v47, %v7531_v18 }
  0x40   :  { %v1304_v31 = vmul.f32 1.442695, %v1078_v60  ;;  %v1092_v32 = vsub.f32 %v7435_v50, %v7522_v10  ;;  %v1093_v34 = vsub.f32 %v7438_v51, %v7522_v10  ;;  %v1094_v39 = vsub.f32 %v7445_v58, %v7522_v10 }
  0x41   :  { %v2500_v40 = vmax.f32 %v2498_v59, %v2499_v36  ;;  %6512 = vpow2.f32 %v1300_v55  ;;  %v1306_v41 = vmul.f32 1.442695, %v1079_v14  ;;  %v1308_v44 = vmul.f32 1.442695, %v1080_v19 }
  0x42   :  { %v1310_v61 = vmul.f32 1.442695, %v1081_v57  ;;  %6514 = vpow2.f32 %v1302_v5  ;;  %v1312_v46 = vmul.f32 1.442695, %v1082_v11  ;;  %v1314_v30 = vmul.f32 1.442695, %v1083_v42 }
  0x43   :  { %v1316_v4 = vmul.f32 1.442695, %v1084_v37  ;;  %6516 = vpow2.f32 %v1304_v31  ;;  %v1318_v47 = vmul.f32 1.442695, %v1085_v38  ;;  %v1320_v52 = vmul.f32 1.442695, %v1086_v6 }
  0x44   :  { %v1322_v35 = vmul.f32 1.442695, %v1087_v20  ;;  %v1324_v50 = vmul.f32 1.442695, %v1088_v25  ;;  %v1326_v60 = vmul.f32 1.442695, %v1089_v27  ;;  %6518 = vpow2.f32 %v1306_v41 }
  0x45   :  { %v2501_v12 = vrot.slane %v2500_v40, 2  ;;  %v2512_v51 = vrot.slane %v2511_v21, 4  ;;  %v2711_v58 = vrot.slane %v7489_v7, %v7285_v15  ;;  %v2718_v59 = vrot.slane %v2696_v53, %v7285_v15 }
  0x46   :  { %v2725_v36 = vrot.slane %v2697_v54, %v7285_v15  ;;  %6520 = vpow2.f32 %v1308_v44  ;;  %v7568_v5 = vmul.f32 1.442695, %v1090_v29  ;;  %v1332_v6 = vmul.f32 1.442695, %v1092_v32 }
  0x47   :  { %v2502_v14 = vmax.f32 %v2500_v40, %v2501_v12  ;;  %v2513_v19 = vmin.f32 %v2511_v21, %v2512_v51  ;;  %6522 = vpow2.f32 %v1310_v61  ;;  %v2726_v57 = vcombine.high %v7528_v49, %v7528_v49 }
  0x48   :  { %12714 = vst [vmem:[#allocation29_spill] sm:$0xff] %v7568_v5  ;;  %v2728_v11 = vcombine.high %v2718_v59, %v2718_v59  ;;  %6524 = vpow2.f32 %v1312_v46  ;;  %v1334_v42 = vmul.f32 1.442695, %v1093_v34  ;;  %v2727_v7 = vcombine.high %v2711_v58, %v2711_v58 }
  0x49   :  { %v2503_v37 = vrot.slane %v2502_v14, 1  ;;  %v2514_v38 = vrot.slane %v2513_v19, 2  ;;  %6526 = vpow2.f32 %v1314_v30  ;;  %v2729_v53 = vcombine.high %v2725_v36, %v2725_v36 }
  0x4a   :  { %v2829_v54 = vrot.slane %v7528_v49, %v7335_v45  ;;  %6528 = vpow2.f32 %v1316_v4  ;;  %v7574_v20 = vmul.f32 1.442695, %v1094_v39  ;;  %v2833_v55 = vrot.slane %v2718_v59, %v7335_v45 }
  0x4b   :  { %v7576_v12 = vmax.f32 %v2502_v14, %v2503_v37  ;;  %v2515_v21 = vmin.f32 %v2513_v19, %v2514_v38  ;;  %6530 = vpow2.f32 %v1318_v47  ;;  %v2837_v25 = vrot.slane %v2726_v57, %v7335_v45 }
  0x4c   :  { %12715 = vst [vmem:[#allocation30_spill] sm:$0xff] %v7574_v20  ;;  %v2841_v27 = vrot.slane %v2728_v11, %v7335_v45  ;;  %6532 = vpow2.f32 %v1320_v52  ;;  %v2845_v31 = vrot.slane %v2711_v58, %v7335_v45  ;;  %v7583_v32 = vrot.slane %v2725_v36, %v7335_v45 }
  0x4d   :  { %v2516_v29 = vrot.slane %v2515_v21, 1  ;;  %6534 = vpow2.f32 %v1322_v35  ;;  %v7586_v49 = vrot.slane %v2727_v7, %v7335_v45  ;;  %v7589_v34 = vrot.slane %v2729_v53, %v7335_v45 }
  0x4e   :  { %12716 = vst [vmem:[#allocation31_spill] sm:$0xff] %v7583_v32  ;;  %v7592_v39 = vmul.f32 %v2829_v54, %v7451_v62  ;;  %v7594_v40 = vpop.eup %6512  ;;  %6536 = vpow2.f32 %v1324_v50  ;;  %v2521_v44 = vmul.f32 %v7576_v12, %v7353_v1  ;;  %v7601_v61 = vmul.f32 %v2829_v54, %v7453_v0 }
  0x4f   :  { %12717 = vst [vmem:[#allocation32_spill] sm:$0xff] %v7586_v49  ;;  %12718 = vst [vmem:[#allocation33_spill] sm:$0xff] %v7589_v34  ;;  %v7596_v41 = vmin.f32 %v2515_v21, %v2516_v29  ;;  %v7603_v46 = vpop.eup %6514  ;;  %6538 = vpow2.f32 %v1326_v60  ;;  %v7606_v30 = vmul.f32 %v2829_v54, %v7455_v3  ;;  %v7609_v4 = vmul.f32 %v2829_v54, %v7461_v16 }
  0x50   :  { %12719 = vst [vmem:[#allocation34_spill] sm:$0xff] %v7594_v40  ;;  %12720 = vst [vmem:[#allocation35_spill] sm:$0xff] %v7603_v46  ;;  %v7612_v47 = vmul.f32 %v2833_v55, %v7451_v62  ;;  %v7614_v52 = vpop.eup %6516  ;;  %6540 = vpow2.f32 %v1332_v6  ;;  %v7619_v50 = vmul.f32 %v2833_v55, %v7453_v0  ;;  %v7622_v60 = vmul.f32 %v2833_v55, %v7455_v3 }
  0x51   :  { %12721 = vst [vmem:[#allocation36_spill] sm:$0xff] %v7614_v52  ;;  %v2525_v35 = vmul.f32 %v7596_v41, %v7353_v1  ;;  %6542 = vpow2.f32 %v1334_v42  ;;  %v7625_v51 = vmul.f32 %v2833_v55, %v7461_v16  ;;  %v7628_v58 = vmul.f32 %v2837_v25, %v7451_v62  ;;  %v7633_v36 = vpop.eup %6518 }
  0x52   :  { %v7631_v59 = vmul.f32 %v2837_v25, %v7453_v0  ;;  %12722 = vst [vmem:[#allocation37_spill] sm:$0xff] %v7633_v36  ;;  %v7636_v1 = vmul.f32 %v2837_v25, %v7455_v3  ;;  %v7639_v19 = vmul.f32 %v2837_v25, %v7461_v16  ;;  %v7642_v6 = vmul.f32 %v2841_v27, %v7451_v62 }
  0x53   :  { %v2529_v14 = vmax.f32 %v2521_v44, %v2525_v35  ;;  %v7644_v57 = vpop.eup %6520  ;;  %v7647_v11 = vmul.f32 %v2841_v27, %v7453_v0  ;;  %v7650_v42 = vmul.f32 %v2841_v27, %v7455_v3  ;;  %v7653_v37 = vmul.f32 %v2841_v27, %v7461_v16 }
  0x54   :  { %12723 = vst [vmem:[#allocation38_spill] sm:$0xff] %v7644_v57  ;;  %v7656_v38 = vmul.f32 %v2845_v31, %v7451_v62  ;;  %v7658_v7 = vpop.eup %6522  ;;  %v7661_v53 = vmul.f32 %v2845_v31, %v7453_v0  ;;  %v7664_v54 = vmul.f32 %v2845_v31, %v7455_v3  ;;  %v7670_v29 = vmul.f32 %v2845_v31, %v7461_v16 }
  0x55   :  { %12724 = vst [vmem:[#allocation39_spill] sm:$0xff] %v7653_v37  ;;  %12725 = vst [vmem:[#allocation40_spill] sm:$0xff] %v7658_v7  ;;  %v3169_v21 = vcombine.high %v2529_v14, %v2529_v14  ;;  %v3176_v55 = vrot.slane %v2529_v14, %v7285_v15  ;;  %v7667_v25 = vpop.eup %6524  ;;  %v7674_v27 = vmul.f32 %v7583_v32, %v7451_v62 }
  0x56   :  { %12726 = vst [vmem:[#allocation41_spill] sm:$0xff] %v7667_v25  ;;  %12727 = vst [vmem:[#allocation42_spill] sm:$0xff] %v7670_v29  ;;  %v234_v44 = vcombine.high %v7349_v63, %v7349_v63  ;;  %v241_v35 = vrot.slane %v7349_v63, %v7285_v15  ;;  %v7680_v37 = vpop.eup %6526  ;;  %v7684_v14 = vmul.f32 %v7583_v32, %v7453_v0 }
  0x57   :  { %12728 = vst [vmem:[#allocation43_spill] sm:$0xff] %v7674_v27  ;;  %12729 = vst [vmem:[#allocation44_spill] sm:$0xff] %v7680_v37  ;;  %v3183_v34 = vrot.slane %v3169_v21, %v7285_v15  ;;  %v3184_v31 = vcombine.high %v3176_v55, %v3176_v55  ;;  %v3192_v29 = vrot.slane %v3176_v55, %v7285_v15  ;;  %v7688_v20 = vpop.eup %6528 }
  0x58   :  { %12730 = vst [vmem:[#allocation45_spill] sm:$0xff] %v7684_v14  ;;  %12731 = vst [vmem:[#allocation46_spill] sm:$0xff] %v7688_v20  ;;  %v7692_v27 = vmul.f32 %v7583_v32, %v7455_v3  ;;  %v126_v25 = vmul.f32 %v7429_v48, %v7349_v63  ;;  %v7697_v37 = vrot.slane %v234_v44, %v7285_v15  ;;  %v7701_v5 = vpop.eup %6530 }
  0x59   :  { %v2465_v14 = vmul.f32 %v7304_v28, %v7260_v2  ;;  %12733 = vst [vmem:[#allocation48_spill] sm:$0xff] %v7701_v5  ;;  %v3185_v21 = vcombine.high %v3183_v34, %v3183_v34  ;;  %v3199_v55 = vrot.slane %v3183_v34, %v7285_v15  ;;  %v3206_v20 = vrot.slane %v3184_v31, %v7285_v15  ;;  %v7710_v63 = vpop.eup %6532 }
  0x5a   :  { %12732 = vst [vmem:[#allocation47_spill] sm:$0xff] %v7692_v27  ;;  %v3214_v7 = vcombine.high %v3192_v29, %v3192_v29  ;;  %v7708_v27 = vld [vmem:[%s12434_s1 + $0x20] sm:$0xff]  ;;  %12734 = vst [vmem:[#allocation49_spill] sm:$0xff] %v7710_v63  ;;  %v7714_v44 = vmul.f32 %v7586_v49, %v7451_v62  ;;  %v7718_v2 = vmul.f32 %v7586_v49, %v7453_v0  ;;  %v7722_v31 = vpop.eup %6534 }
  0x5b   :  { %v3317_v34 = vrot.slane %v3192_v29, %v7335_v45  ;;  %v249_v32 = vcombine.high %v241_v35, %v241_v35  ;;  %6371 = vmatprep.subr.mxu0 %v7708_v27  ;;  %12737 = vst [vmem:[#allocation52_spill] sm:$0xff] %v7722_v31  ;;  %v3213_v5 = vrot.slane %v3185_v21, %v7285_v15 }
  0x5c   :  { %12735 = vst [vmem:[#allocation50_spill] sm:$0xff] %v7714_v44  ;;  %12736 = vst [vmem:[#allocation51_spill] sm:$0xff] %v7718_v2  ;;  %v3215_v57 = vcombine.high %v3199_v55, %v3199_v55  ;;  %v3216_v36 = vcombine.high %v3206_v20, %v3206_v20  ;;  %v7727_v63 = vmul.f32 %v7276_v9, %v7317_v33  ;;  %6372 = vmatpush3.msra.mxu0 %v7708_v27  ;;  %v7730_v44 = vpop.eup %6536 }
  0x5d   :  { %12738 = vst [vmem:[#allocation53_spill] sm:$0xff] %v7730_v44  ;;  %v3321_v2 = vrot.slane %v3206_v20, %v7335_v45  ;;  %v7734_v29 = vmax.f32 %v7518_v17, %v126_v25  ;;  %v7737_v49 = vrot.slane %v241_v35, %v7285_v15  ;;  %v7740_v21 = vadd.f32 %v7345_v56, %v2465_v14  ;;  %v7743_v31 = vpop.eup %6538 }
  0x5e   :  { %6500 = vmatprep.subr.mxu1 %v7708_v27  ;;  %12739 = vst [vmem:[#allocation54_spill] sm:$0xff] %v7743_v31  ;;  %v3217_v52 = vcombine.high %v3213_v5, %v3213_v5  ;;  %v3325_v46 = vrot.slane %v3214_v7, %v7335_v45  ;;  %v250_v44 = vcombine.high %v7697_v37, %v7697_v37  ;;  %v7753_v20 = vpop.eup %6540 }
  0x5f   :  { %v7750_v17 = vrot.slane %v7697_v37, %v7285_v15  ;;  %6504 = vmatpush3.msra.mxu1 %v7708_v27  ;;  %12740 = vst [vmem:[#allocation55_spill] sm:$0xff] %v7753_v20  ;;  %v7756_v25 = vrot.slane %v3199_v55, %v7335_v45  ;;  %v3474_v35 = vsub.f32 %v7592_v39, %v3317_v34  ;;  %v7761_v31 = vpop.eup %6542 }
  0x60   :  { %v3475_v14 = vsub.f32 %v7601_v61, %v3317_v34  ;;  %v271_v7 = vrot.slane %v249_v32, %v7285_v15  ;;  %12742 = vst [vmem:[#allocation57_spill] sm:$0xff] %v7761_v31  ;;  %v7764_v40 = vrot.slane %v3216_v36, %v7335_v45  ;;  %v7767_v37 = vrot.slane %v3213_v5, %v7335_v45 }
  0x61   :  { %12741 = vst [vmem:[#allocation56_spill] sm:$0xff] %v7756_v25  ;;  %v7770_v10 = vrot.slane %v3215_v57, %v7335_v45  ;;  %v3476_v55 = vsub.f32 %v7606_v30, %v3317_v34  ;;  %v7774_v20 = vrot.slane %v3217_v52, %v7335_v45  ;;  %v3477_v39 = vsub.f32 %v7609_v4, %v3317_v34 }
  0x62   :  { %12743 = vst [vmem:[#allocation58_spill] sm:$0xff] %v7767_v37  ;;  %v3478_v32 = vsub.f32 %v7612_v47, %v3321_v2  ;;  %v3479_v61 = vsub.f32 %v7619_v50, %v3321_v2  ;;  %v3480_v36 = vsub.f32 %v7622_v60, %v3321_v2  ;;  %v3481_v31 = vsub.f32 %v7625_v51, %v3321_v2 }
  0x63   :  { %12744 = vst [vmem:[#allocation59_spill] sm:$0xff] %v7770_v10  ;;  %12745 = vst [vmem:[#allocation60_spill] sm:$0xff] %v7774_v20  ;;  %v3482_v5 = vsub.f32 %v7628_v58, %v3325_v46  ;;  %v3483_v57 = vsub.f32 %v7631_v59, %v3325_v46  ;;  %v3484_v10 = vsub.f32 %v7636_v1, %v3325_v46  ;;  %v3698_v52 = vmul.f32 1.442695, %v3474_v35 }
  0x64   :  { %v3485_v30 = vsub.f32 %v7639_v19, %v3325_v46  ;;  %v3700_v20 = vmul.f32 1.442695, %v3475_v14  ;;  %v3486_v4 = vsub.f32 %v7642_v6, %v7764_v40  ;;  %v3487_v47 = vsub.f32 %v7647_v11, %v7764_v40 }
  0x65   :  { %v3488_v50 = vsub.f32 %v7650_v42, %v7764_v40  ;;  %v3702_v60 = vmul.f32 1.442695, %v3476_v55  ;;  %v3490_v51 = vsub.f32 %v7656_v38, %v7756_v25  ;;  %v3491_v58 = vsub.f32 %v7661_v53, %v7756_v25 }
  0x66   :  { %v3492_v46 = vsub.f32 %v7664_v54, %v7756_v25  ;;  %v3704_v59 = vmul.f32 1.442695, %v3477_v39  ;;  %6544 = vpow2.f32 %v3698_v52  ;;  %v3706_v1 = vmul.f32 1.442695, %v3478_v32 }
  0x67   :  { %v3708_v19 = vmul.f32 1.442695, %v3479_v61  ;;  %v278_v6 = vrot.slane %v250_v44, %v7285_v15  ;;  %6546 = vpow2.f32 %v3700_v20  ;;  %v3710_v11 = vmul.f32 1.442695, %v3480_v36 }
  0x68   :  { %v3712_v2 = vmul.f32 1.442695, %v3481_v31  ;;  %v3714_v42 = vmul.f32 1.442695, %v3482_v5  ;;  %6548 = vpow2.f32 %v3702_v60  ;;  %v3716_v34 = vmul.f32 1.442695, %v3483_v57 }
  0x69   :  { %v3718_v35 = vmul.f32 1.442695, %v3484_v10  ;;  %v3720_v38 = vmul.f32 1.442695, %v3485_v30  ;;  %6550 = vpow2.f32 %v3704_v59  ;;  %v3722_v14 = vmul.f32 1.442695, %v3486_v4 }
  0x6a   :  { %v279_v53 = vcombine.high %v7737_v49, %v7737_v49  ;;  %v281_v54 = vcombine.high %v271_v7, %v271_v7  ;;  %6552 = vpow2.f32 %v3706_v1  ;;  %v3724_v55 = vmul.f32 1.442695, %v3487_v47 }
  0x6b   :  { %v280_v39 = vcombine.high %v7750_v17, %v7750_v17  ;;  %v282_v44 = vcombine.high %v278_v6, %v278_v6  ;;  %6554 = vpow2.f32 %v3708_v19  ;;  %v7802_v20 = vmul.f32 1.442695, %v3488_v50 }
  0x6c   :  { %v3730_v31 = vmul.f32 1.442695, %v3490_v51  ;;  %v399_v10 = vrot.slane %v7737_v49, %v7335_v45  ;;  %6556 = vpow2.f32 %v3710_v11  ;;  %v3732_v32 = vmul.f32 1.442695, %v3491_v58 }
  0x6d   :  { %12746 = vst [vmem:[#allocation61_spill] sm:$0xff] %v7802_v20  ;;  %v7806_v61 = vmul.f32 1.442695, %v3492_v46  ;;  %v403_v36 = vrot.slane %v271_v7, %v7335_v45  ;;  %6558 = vpow2.f32 %v3712_v2  ;;  %v407_v5 = vrot.slane %v279_v53, %v7335_v45 }
  0x6e   :  { %v411_v57 = vrot.slane %v281_v54, %v7335_v45  ;;  %v415_v30 = vrot.slane %v7750_v17, %v7335_v45  ;;  %6560 = vpow2.f32 %v3714_v42  ;;  %v7814_v52 = vrot.slane %v278_v6, %v7335_v45 }
  0x6f   :  { %12747 = vst [vmem:[#allocation62_spill] sm:$0xff] %v7806_v61  ;;  %v7817_v49 = vrot.slane %v280_v39, %v7335_v45  ;;  %v7820_v4 = vrot.slane %v282_v44, %v7335_v45  ;;  %6562 = vpow2.f32 %v3716_v34  ;;  %v7823_v7 = vmul.f32 %v399_v10, %v7290_v22 }
  0x70   :  { %12748 = vst [vmem:[#allocation63_spill] sm:$0xff] %v7814_v52  ;;  %v7826_v47 = vmul.f32 %v399_v10, %v7292_v23  ;;  %v7829_v50 = vmul.f32 %v399_v10, %v7294_v24  ;;  %6564 = vpow2.f32 %v3718_v35  ;;  %v7832_v17 = vmul.f32 %v399_v10, %v7300_v26 }
  0x71   :  { %12749 = vst [vmem:[#allocation64_spill] sm:$0xff] %v7817_v49  ;;  %12750 = vst [vmem:[#allocation65_spill] sm:$0xff] %v7820_v4  ;;  %v7835_v60 = vmul.f32 %v403_v36, %v7290_v22  ;;  %v7838_v51 = vmul.f32 %v403_v36, %v7292_v23  ;;  %6566 = vpow2.f32 %v3720_v38  ;;  %v7841_v58 = vmul.f32 %v403_v36, %v7294_v24 }
  0x72   :  { %v7844_v46 = vmul.f32 %v403_v36, %v7300_v26  ;;  %v7847_v59 = vmul.f32 %v407_v5, %v7290_v22  ;;  %6568 = vpow2.f32 %v3722_v14  ;;  %v7850_v1 = vmul.f32 %v407_v5, %v7292_v23 }
  0x73   :  { %v7853_v19 = vmul.f32 %v407_v5, %v7294_v24  ;;  %v7856_v6 = vmul.f32 %v407_v5, %v7300_v26  ;;  %v7858_v11 = vpop.eup %6544  ;;  %6570 = vpow2.f32 %v3724_v55  ;;  %v7861_v2 = vmul.f32 %v411_v57, %v7290_v22 }
  0x74   :  { %12751 = vst [vmem:[#allocation66_spill] sm:$0xff] %v7858_v11  ;;  %v7864_v42 = vmul.f32 %v411_v57, %v7292_v23  ;;  %v7867_v34 = vmul.f32 %v411_v57, %v7294_v24  ;;  %v7869_v35 = vpop.eup %6546  ;;  %6572 = vpow2.f32 %v3730_v31  ;;  %v7872_v38 = vmul.f32 %v411_v57, %v7300_v26 }
  0x75   :  { %12752 = vst [vmem:[#allocation67_spill] sm:$0xff] %v7869_v35  ;;  %v7875_v14 = vmul.f32 %v415_v30, %v7290_v22  ;;  %v7878_v53 = vmul.f32 %v415_v30, %v7292_v23  ;;  %v7880_v54 = vpop.eup %6548  ;;  %v7883_v55 = vmul.f32 %v415_v30, %v7294_v24  ;;  %v7886_v39 = vmul.f32 %v415_v30, %v7300_v26 }
  0x76   :  { %12753 = vst [vmem:[#allocation68_spill] sm:$0xff] %v7872_v38  ;;  %12754 = vst [vmem:[#allocation69_spill] sm:$0xff] %v7880_v54  ;;  %v722_v44 = vcombine.high %v7734_v29, %v7734_v29  ;;  %v729_v31 = vrot.slane %v7734_v29, %v7285_v15  ;;  %v7892_v10 = vpop.eup %6550  ;;  %6574 = vpow2.f32 %v3732_v32  ;;  %v7896_v36 = vmul.f32 %v7814_v52, %v7290_v22 }
  0x77   :  { %12755 = vst [vmem:[#allocation70_spill] sm:$0xff] %v7886_v39  ;;  %12756 = vst [vmem:[#allocation71_spill] sm:$0xff] %v7892_v10  ;;  %v2632_v5 = vcombine.high %v7740_v21, %v7740_v21  ;;  %v2639_v57 = vrot.slane %v7740_v21, %v7285_v15  ;;  %v7902_v30 = vpop.eup %6552  ;;  %v7906_v39 = vmul.f32 %v7814_v52, %v7292_v23 }
  0x78   :  { %12757 = vst [vmem:[#allocation72_spill] sm:$0xff] %v7896_v36  ;;  %12758 = vst [vmem:[#allocation73_spill] sm:$0xff] %v7902_v30  ;;  %v736_v29 = vrot.slane %v722_v44, %v7285_v15  ;;  %v737_v38 = vcombine.high %v729_v31, %v729_v31  ;;  %v745_v32 = vrot.slane %v729_v31, %v7285_v15  ;;  %v7910_v4 = vpop.eup %6554 }
  0x79   :  { %12759 = vst [vmem:[#allocation74_spill] sm:$0xff] %v7906_v39  ;;  %12760 = vst [vmem:[#allocation75_spill] sm:$0xff] %v7910_v4  ;;  %v7914_v36 = vmul.f32 %v7814_v52, %v7294_v24  ;;  %v2520_v10 = vmul.f32 %v7576_v12, %v7740_v21  ;;  %v2524_v30 = vmul.f32 %v7596_v41, %v7740_v21  ;;  %v7923_v39 = vpop.eup %6556 }
  0x7a   :  { %v7921_v54 = vrot.slane %v2632_v5, %v7285_v15  ;;  %12762 = vst [vmem:[#allocation77_spill] sm:$0xff] %v7923_v39  ;;  %v738_v44 = vcombine.high %v736_v29, %v736_v29  ;;  %v752_v31 = vrot.slane %v736_v29, %v7285_v15  ;;  %v759_v4 = vrot.slane %v737_v38, %v7285_v15  ;;  %v7927_v11 = vpop.eup %6558 }
  0x7b   :  { %12761 = vst [vmem:[#allocation76_spill] sm:$0xff] %v7914_v36  ;;  %v767_v35 = vcombine.high %v745_v32, %v745_v32  ;;  %12763 = vst [vmem:[#allocation78_spill] sm:$0xff] %v7927_v11  ;;  %v7931_v36 = vmul.f32 %v7817_v49, %v7290_v22  ;;  %v7935_v21 = vmul.f32 %v7817_v49, %v7292_v23  ;;  %v7938_v39 = vpop.eup %6560 }
  0x7c   :  { %v887_v5 = vrot.slane %v745_v32, %v7335_v45  ;;  %v2647_v52 = vcombine.high %v2639_v57, %v2639_v57  ;;  %12766 = vst [vmem:[#allocation81_spill] sm:$0xff] %v7938_v39  ;;  %v766_v29 = vrot.slane %v738_v44, %v7285_v15  ;;  %v768_v61 = vcombine.high %v752_v31, %v752_v31  ;;  %v7945_v20 = vpop.eup %6562 }
  0x7d   :  { %12764 = vst [vmem:[#allocation79_spill] sm:$0xff] %v7931_v36  ;;  %12765 = vst [vmem:[#allocation80_spill] sm:$0xff] %v7935_v21  ;;  %v769_v38 = vcombine.high %v759_v4, %v759_v4  ;;  %v7943_v11 = vadd.f32 %v7283_v13, %v7727_v63  ;;  %v891_v36 = vrot.slane %v759_v4, %v7335_v45  ;;  %v7957_v44 = vpop.eup %6564 }
  0x7e   :  { %12767 = vst [vmem:[#allocation82_spill] sm:$0xff] %v7945_v20  ;;  %v7948_v37 = vmax.f32 %v2520_v10, %v2524_v30  ;;  %v7951_v21 = vrot.slane %v2639_v57, %v7285_v15  ;;  %v7955_v32 = vmul.f32 %v7304_v28, %v7317_v33  ;;  %12768 = vst [vmem:[#allocation83_spill] sm:$0xff] %v7957_v44  ;;  %v7966_v10 = vpop.eup %6566 }
  0x7f   :  { %v770_v49 = vcombine.high %v766_v29, %v766_v29  ;;  %v895_v39 = vrot.slane %v767_v35, %v7335_v45  ;;  %v2648_v63 = vcombine.high %v7921_v54, %v7921_v54  ;;  %v7964_v4 = vrot.slane %v7921_v54, %v7285_v15  ;;  %12769 = vst [vmem:[#allocation84_spill] sm:$0xff] %v7966_v10  ;;  %v7974_v20 = vpop.eup %6568 }
  0x80   :  { %v7969_v57 = vrot.slane %v752_v31, %v7335_v45  ;;  %v1044_v33 = vsub.f32 %v7823_v7, %v887_v5  ;;  %v1045_v30 = vsub.f32 %v7826_v47, %v887_v5  ;;  %v2669_v44 = vrot.slane %v2647_v52, %v7285_v15  ;;  %12771 = vst [vmem:[#allocation86_spill] sm:$0xff] %v7974_v20  ;;  %v7986_v10 = vpop.eup %6570 }
  0x81   :  { %v7977_v35 = vrot.slane %v769_v38, %v7335_v45  ;;  %v7980_v25 = vrot.slane %v766_v29, %v7335_v45  ;;  %v7983_v54 = vrot.slane %v768_v61, %v7335_v45  ;;  %v1046_v31 = vsub.f32 %v7829_v50, %v887_v5  ;;  %12775 = vst [vmem:[#allocation90_spill] sm:$0xff] %v7986_v10  ;;  %v7994_v20 = vpop.eup %6572 }
  0x82   :  { %12770 = vst [vmem:[#allocation85_spill] sm:$0xff] %v7969_v57  ;;  %v7989_v7 = vrot.slane %v770_v49, %v7335_v45  ;;  %v1047_v52 = vsub.f32 %v7832_v17, %v887_v5  ;;  %v1048_v47 = vsub.f32 %v7835_v60, %v891_v36  ;;  %v1049_v38 = vsub.f32 %v7838_v51, %v891_v36 }
  0x83   :  { %12772 = vst [vmem:[#allocation87_spill] sm:$0xff] %v7977_v35  ;;  %12773 = vst [vmem:[#allocation88_spill] sm:$0xff] %v7980_v25  ;;  %v1050_v29 = vsub.f32 %v7841_v58, %v891_v36  ;;  %v1051_v61 = vsub.f32 %v7844_v46, %v891_v36  ;;  %v1053_v50 = vsub.f32 %v7850_v1, %v895_v39  ;;  %v1238_v17 = vmul.f32 1.442695, %v1045_v30  ;;  %v8002_v5 = vpop.eup %6574 }
  0x84   :  { %12774 = vst [vmem:[#allocation89_spill] sm:$0xff] %v7983_v54  ;;  %12776 = vst [vmem:[#allocation91_spill] sm:$0xff] %v7989_v7  ;;  %v1052_v54 = vsub.f32 %v7847_v59, %v895_v39  ;;  %v1054_v25 = vsub.f32 %v7853_v19, %v895_v39  ;;  %v1055_v49 = vsub.f32 %v7856_v6, %v895_v39  ;;  %v1236_v7 = vmul.f32 1.442695, %v1044_v33 }
  0x85   :  { %12777 = vst [vmem:[#allocation92_spill] sm:$0xff] %v7994_v20  ;;  %12778 = vst [vmem:[#allocation93_spill] sm:$0xff] %v8002_v5  ;;  %v1056_v60 = vsub.f32 %v7861_v2, %v7977_v35  ;;  %v1057_v51 = vsub.f32 %v7864_v42, %v7977_v35  ;;  %v1058_v58 = vsub.f32 %v7867_v34, %v7977_v35  ;;  %v1240_v46 = vmul.f32 1.442695, %v1046_v31 }
  0x86   :  { %v1060_v59 = vsub.f32 %v7875_v14, %v7969_v57  ;;  %v1061_v1 = vsub.f32 %v7878_v53, %v7969_v57  ;;  %v1062_v19 = vsub.f32 %v7883_v55, %v7969_v57  ;;  %v1242_v6 = vmul.f32 1.442695, %v1047_v52 }
  0x87   :  { %6576 = vpow2.f32 %v1236_v7  ;;  %v1244_v39 = vmul.f32 1.442695, %v1048_v47  ;;  %v1246_v2 = vmul.f32 1.442695, %v1049_v38  ;;  %v2676_v36 = vrot.slane %v2648_v63, %v7285_v15 }
  0x88   :  { %6578 = vpow2.f32 %v1238_v17  ;;  %v1248_v42 = vmul.f32 1.442695, %v1050_v29  ;;  %v1250_v33 = vmul.f32 1.442695, %v1051_v61  ;;  %v1252_v34 = vmul.f32 1.442695, %v1052_v54 }
  0x89   :  { %6580 = vpow2.f32 %v1240_v46  ;;  %v1254_v30 = vmul.f32 1.442695, %v1053_v50  ;;  %v1256_v31 = vmul.f32 1.442695, %v1054_v25  ;;  %v1258_v14 = vmul.f32 1.442695, %v1055_v49 }
  0x8a   :  { %6582 = vpow2.f32 %v1242_v6  ;;  %v1260_v35 = vmul.f32 1.442695, %v1056_v60  ;;  %v2677_v53 = vcombine.high %v7951_v21, %v7951_v21  ;;  %v2679_v55 = vcombine.high %v2669_v44, %v2669_v44 }
  0x8b   :  { %6584 = vpow2.f32 %v1244_v39  ;;  %v1262_v7 = vmul.f32 1.442695, %v1057_v51  ;;  %v2678_v52 = vcombine.high %v7964_v4, %v7964_v4  ;;  %v2680_v63 = vcombine.high %v2676_v36, %v2676_v36 }
  0x8c   :  { %6586 = vpow2.f32 %v1246_v2  ;;  %v8021_v47 = vmul.f32 1.442695, %v1058_v58  ;;  %v1268_v54 = vmul.f32 1.442695, %v1060_v59  ;;  %v2797_v25 = vrot.slane %v7951_v21, %v7335_v45 }
  0x8d   :  { %6588 = vpow2.f32 %v1248_v42  ;;  %v1270_v38 = vmul.f32 1.442695, %v1061_v1  ;;  %v8025_v29 = vmul.f32 1.442695, %v1062_v19  ;;  %v2801_v61 = vrot.slane %v2669_v44, %v7335_v45 }
  0x8e   :  { %12779 = vst [vmem:[#allocation94_spill] sm:$0xff] %v8021_v47  ;;  %6590 = vpow2.f32 %v1250_v33  ;;  %v2805_v50 = vrot.slane %v2677_v53, %v7335_v45  ;;  %v2809_v49 = vrot.slane %v2679_v55, %v7335_v45  ;;  %v2813_v17 = vrot.slane %v7964_v4, %v7335_v45 }
  0x8f   :  { %12780 = vst [vmem:[#allocation95_spill] sm:$0xff] %v8025_v29  ;;  %6592 = vpow2.f32 %v1252_v34  ;;  %v8033_v60 = vrot.slane %v2676_v36, %v7335_v45  ;;  %v8036_v21 = vrot.slane %v2678_v52, %v7335_v45  ;;  %v8039_v51 = vrot.slane %v2680_v63, %v7335_v45 }
  0x90   :  { %6594 = vpow2.f32 %v1254_v30  ;;  %v8042_v44 = vmul.f32 %v2797_v25, %v7451_v62  ;;  %v8045_v58 = vmul.f32 %v2797_v25, %v7453_v0  ;;  %v8048_v46 = vmul.f32 %v2797_v25, %v7455_v3 }
  0x91   :  { %12781 = vst [vmem:[#allocation96_spill] sm:$0xff] %v8033_v60  ;;  %12782 = vst [vmem:[#allocation97_spill] sm:$0xff] %v8036_v21  ;;  %6596 = vpow2.f32 %v1256_v31  ;;  %v8051_v4 = vmul.f32 %v2797_v25, %v7461_v16  ;;  %v8054_v59 = vmul.f32 %v2801_v61, %v7451_v62  ;;  %v8057_v1 = vmul.f32 %v2801_v61, %v7453_v0 }
  0x92   :  { %12783 = vst [vmem:[#allocation98_spill] sm:$0xff] %v8039_v51  ;;  %6598 = vpow2.f32 %v1258_v14  ;;  %v8060_v19 = vmul.f32 %v2801_v61, %v7455_v3  ;;  %v8063_v6 = vmul.f32 %v2801_v61, %v7461_v16  ;;  %v8066_v39 = vmul.f32 %v2805_v50, %v7451_v62 }
  0x93   :  { %6600 = vpow2.f32 %v1260_v35  ;;  %v8069_v2 = vmul.f32 %v2805_v50, %v7453_v0  ;;  %v8072_v36 = vmul.f32 %v2805_v50, %v7455_v3  ;;  %v8075_v42 = vmul.f32 %v2805_v50, %v7461_v16 }
  0x94   :  { %v8077_v33 = vpop.eup %6576  ;;  %6602 = vpow2.f32 %v1262_v7  ;;  %v8080_v34 = vmul.f32 %v2809_v49, %v7451_v62  ;;  %v8083_v30 = vmul.f32 %v2809_v49, %v7453_v0  ;;  %v8086_v35 = vmul.f32 %v2809_v49, %v7455_v3 }
  0x95   :  { %12784 = vst [vmem:[#allocation99_spill] sm:$0xff] %v8077_v33  ;;  %v8088_v31 = vpop.eup %6578  ;;  %6604 = vpow2.f32 %v1268_v54  ;;  %v8091_v14 = vmul.f32 %v2809_v49, %v7461_v16  ;;  %v8094_v53 = vmul.f32 %v2813_v17, %v7451_v62  ;;  %v8097_v55 = vmul.f32 %v2813_v17, %v7453_v0 }
  0x96   :  { %12785 = vst [vmem:[#allocation100_spill] sm:$0xff] %v8088_v31  ;;  %v8099_v7 = vpop.eup %6580  ;;  %v8102_v52 = vmul.f32 %v2813_v17, %v7455_v3  ;;  %v8105_v63 = vmul.f32 %v2813_v17, %v7461_v16  ;;  %v3120_v54 = vcombine.high %v7948_v37, %v7948_v37  ;;  %v3127_v25 = vrot.slane %v7948_v37, %v7285_v15 }
  0x97   :  { %12786 = vst [vmem:[#allocation101_spill] sm:$0xff] %v8091_v14  ;;  %12787 = vst [vmem:[#allocation102_spill] sm:$0xff] %v8099_v7  ;;  %v8111_v61 = vpop.eup %6582  ;;  %6606 = vpow2.f32 %v1270_v38  ;;  %v8115_v50 = vmul.f32 %v8033_v60, %v7451_v62  ;;  %v185_v49 = vcombine.high %v7943_v11, %v7943_v11  ;;  %v192_v17 = vrot.slane %v7943_v11, %v7285_v15 }
  0x98   :  { %12788 = vst [vmem:[#allocation103_spill] sm:$0xff] %v8105_v63  ;;  %12789 = vst [vmem:[#allocation104_spill] sm:$0xff] %v8111_v61  ;;  %v8121_v63 = vpop.eup %6584  ;;  %v8125_v14 = vmul.f32 %v8033_v60, %v7453_v0  ;;  %v3134_v37 = vrot.slane %v3120_v54, %v7285_v15  ;;  %v3135_v51 = vcombine.high %v3127_v25, %v3127_v25 }
  0x99   :  { %12790 = vst [vmem:[#allocation105_spill] sm:$0xff] %v8115_v50  ;;  %12791 = vst [vmem:[#allocation106_spill] sm:$0xff] %v8121_v63  ;;  %v3143_v38 = vrot.slane %v3127_v25, %v7285_v15  ;;  %v8129_v61 = vpop.eup %6586  ;;  %v8133_v50 = vmul.f32 %v8033_v60, %v7455_v3  ;;  %v121_v7 = vmul.f32 %v7418_v43, %v7943_v11 }
  0x9a   :  { %12792 = vst [vmem:[#allocation107_spill] sm:$0xff] %v8125_v14  ;;  %12793 = vst [vmem:[#allocation108_spill] sm:$0xff] %v8129_v61  ;;  %v125_v63 = vmul.f32 %v7429_v48, %v7943_v11  ;;  %v8140_v31 = vrot.slane %v185_v49, %v7285_v15  ;;  %v8142_v14 = vpop.eup %6588  ;;  %v3136_v54 = vcombine.high %v3134_v37, %v3134_v37 }
  0x9b   :  { %12794 = vst [vmem:[#allocation109_spill] sm:$0xff] %v8133_v50  ;;  %12795 = vst [vmem:[#allocation110_spill] sm:$0xff] %v8142_v14  ;;  %v3150_v25 = vrot.slane %v3134_v37, %v7285_v15  ;;  %v3157_v61 = vrot.slane %v3135_v51, %v7285_v15  ;;  %v3165_v33 = vcombine.high %v3143_v38, %v3143_v38  ;;  %v8146_v29 = vpop.eup %6590 }
  0x9c   :  { %12796 = vst [vmem:[#allocation111_spill] sm:$0xff] %v8146_v29  ;;  %v8150_v50 = vmul.f32 %v8036_v21, %v7451_v62  ;;  %v8154_v11 = vmul.f32 %v8036_v21, %v7453_v0  ;;  %v3285_v49 = vrot.slane %v3143_v38, %v7335_v45  ;;  %v200_v60 = vcombine.high %v192_v17, %v192_v17  ;;  %v8157_v14 = vpop.eup %6592 }
  0x9d   :  { %12799 = vst [vmem:[#allocation114_spill] sm:$0xff] %v8157_v14  ;;  %v3164_v37 = vrot.slane %v3136_v54, %v7285_v15  ;;  %v3166_v47 = vcombine.high %v3150_v25, %v3150_v25  ;;  %v3167_v51 = vcombine.high %v3157_v61, %v3157_v61  ;;  %v8162_v29 = vadd.f32 %v7345_v56, %v7955_v32  ;;  %v8164_v57 = vpop.eup %6594 }
  0x9e   :  { %12797 = vst [vmem:[#allocation112_spill] sm:$0xff] %v8150_v50  ;;  %12798 = vst [vmem:[#allocation113_spill] sm:$0xff] %v8154_v11  ;;  %v3289_v50 = vrot.slane %v3157_v61, %v7335_v45  ;;  %v8167_v5 = vmax.f32 %v121_v7, %v125_v63  ;;  %v8170_v11 = vrot.slane %v192_v17, %v7285_v15  ;;  %v8176_v54 = vpop.eup %6596 }
  0x9f   :  { %12800 = vst [vmem:[#allocation115_spill] sm:$0xff] %v8164_v57  ;;  %v8174_v38 = vmul.f32 %v7276_v9, %v7708_v27  ;;  %12801 = vst [vmem:[#allocation116_spill] sm:$0xff] %v8176_v54  ;;  %v3168_v21 = vcombine.high %v3164_v37, %v3164_v37  ;;  %v3293_v14 = vrot.slane %v3165_v33, %v7335_v45  ;;  %v8185_v7 = vpop.eup %6598 }
  0xa0   :  { %v201_v32 = vcombine.high %v8140_v31, %v8140_v31  ;;  %v8183_v61 = vrot.slane %v8140_v31, %v7285_v15  ;;  %12802 = vst [vmem:[#allocation117_spill] sm:$0xff] %v8185_v7  ;;  %v8188_v63 = vrot.slane %v3150_v25, %v7335_v45  ;;  %v3442_v9 = vsub.f32 %v8042_v44, %v3285_v49  ;;  %v8193_v57 = vpop.eup %6600 }
  0xa1   :  { %v3443_v17 = vsub.f32 %v8045_v58, %v3285_v49  ;;  %v222_v54 = vrot.slane %v200_v60, %v7285_v15  ;;  %12804 = vst [vmem:[#allocation119_spill] sm:$0xff] %v8193_v57  ;;  %v8196_v33 = vrot.slane %v3167_v51, %v7335_v45  ;;  %v8199_v20 = vrot.slane %v3164_v37, %v7335_v45  ;;  %v8205_v7 = vpop.eup %6602 }
  0xa2   :  { %12803 = vst [vmem:[#allocation118_spill] sm:$0xff] %v8188_v63  ;;  %v8202_v31 = vrot.slane %v3166_v47, %v7335_v45  ;;  %v3444_v25 = vsub.f32 %v8048_v46, %v3285_v49  ;;  %12808 = vst [vmem:[#allocation123_spill] sm:$0xff] %v8205_v7  ;;  %v8208_v44 = vrot.slane %v3168_v21, %v7335_v45  ;;  %v8213_v57 = vpop.eup %6604 }
  0xa3   :  { %12805 = vst [vmem:[#allocation120_spill] sm:$0xff] %v8196_v33  ;;  %12806 = vst [vmem:[#allocation121_spill] sm:$0xff] %v8199_v20  ;;  %v3445_v60 = vsub.f32 %v8051_v4, %v3285_v49  ;;  %v3446_v58 = vsub.f32 %v8054_v59, %v3289_v50  ;;  %v3447_v51 = vsub.f32 %v8057_v1, %v3289_v50  ;;  %v3636_v4 = vmul.f32 1.442695, %v3443_v17 }
  0xa4   :  { %12807 = vst [vmem:[#allocation122_spill] sm:$0xff] %v8202_v31  ;;  %12809 = vst [vmem:[#allocation124_spill] sm:$0xff] %v8208_v44  ;;  %v3448_v37 = vsub.f32 %v8060_v19, %v3289_v50  ;;  %v3449_v47 = vsub.f32 %v8063_v6, %v3289_v50  ;;  %v3450_v31 = vsub.f32 %v8066_v39, %v3293_v14  ;;  %v3634_v44 = vmul.f32 1.442695, %v3442_v9  ;;  %v8221_v49 = vpop.eup %6606 }
  0xa5   :  { %12810 = vst [vmem:[#allocation125_spill] sm:$0xff] %v8213_v57  ;;  %v3451_v46 = vsub.f32 %v8069_v2, %v3293_v14  ;;  %v3452_v20 = vsub.f32 %v8072_v36, %v3293_v14  ;;  %v3453_v21 = vsub.f32 %v8075_v42, %v3293_v14  ;;  %12811 = vst [vmem:[#allocation126_spill] sm:$0xff] %v8221_v49  ;;  %v3638_v6 = vmul.f32 1.442695, %v3444_v25 }
  0xa6   :  { %v3454_v59 = vsub.f32 %v8080_v34, %v8196_v33  ;;  %v3455_v1 = vsub.f32 %v8083_v30, %v8196_v33  ;;  %v3456_v19 = vsub.f32 %v8086_v35, %v8196_v33  ;;  %v3458_v39 = vsub.f32 %v8094_v53, %v8188_v63 }
  0xa7   :  { %v3459_v2 = vsub.f32 %v8097_v55, %v8188_v63  ;;  %v3460_v36 = vsub.f32 %v8102_v52, %v8188_v63  ;;  %v3640_v42 = vmul.f32 1.442695, %v3445_v60  ;;  %6608 = vpow2.f32 %v3634_v44 }
  0xa8   :  { %v3642_v14 = vmul.f32 1.442695, %v3446_v58  ;;  %v3644_v34 = vmul.f32 1.442695, %v3447_v51  ;;  %v229_v50 = vrot.slane %v201_v32, %v7285_v15  ;;  %6610 = vpow2.f32 %v3636_v4 }
  0xa9   :  { %v3646_v30 = vmul.f32 1.442695, %v3448_v37  ;;  %v3648_v9 = vmul.f32 1.442695, %v3449_v47  ;;  %v3650_v35 = vmul.f32 1.442695, %v3450_v31  ;;  %6612 = vpow2.f32 %v3638_v6 }
  0xaa   :  { %v3652_v17 = vmul.f32 1.442695, %v3451_v46  ;;  %v3654_v25 = vmul.f32 1.442695, %v3452_v20  ;;  %v3656_v53 = vmul.f32 1.442695, %v3453_v21  ;;  %6614 = vpow2.f32 %v3640_v42 }
  0xab   :  { %v3658_v33 = vmul.f32 1.442695, %v3454_v59  ;;  %v230_v55 = vcombine.high %v8170_v11, %v8170_v11  ;;  %v232_v52 = vcombine.high %v222_v54, %v222_v54  ;;  %6616 = vpow2.f32 %v3642_v14 }
  0xac   :  { %v3660_v44 = vmul.f32 1.442695, %v3455_v1  ;;  %v231_v60 = vcombine.high %v8183_v61, %v8183_v61  ;;  %v233_v32 = vcombine.high %v229_v50, %v229_v50  ;;  %6618 = vpow2.f32 %v3644_v34 }
  0xad   :  { %v8240_v58 = vmul.f32 1.442695, %v3456_v19  ;;  %v3666_v31 = vmul.f32 1.442695, %v3458_v39  ;;  %v367_v20 = vrot.slane %v8170_v11, %v7335_v45  ;;  %6620 = vpow2.f32 %v3646_v30 }
  0xae   :  { %v3668_v51 = vmul.f32 1.442695, %v3459_v2  ;;  %v8244_v37 = vmul.f32 1.442695, %v3460_v36  ;;  %v371_v47 = vrot.slane %v222_v54, %v7335_v45  ;;  %6622 = vpow2.f32 %v3648_v9 }
  0xaf   :  { %12812 = vst [vmem:[#allocation127_spill] sm:$0xff] %v8240_v58  ;;  %v375_v46 = vrot.slane %v230_v55, %v7335_v45  ;;  %v379_v21 = vrot.slane %v232_v52, %v7335_v45  ;;  %v383_v4 = vrot.slane %v8183_v61, %v7335_v45  ;;  %6624 = vpow2.f32 %v3650_v35 }
  0xb0   :  { %12813 = vst [vmem:[#allocation128_spill] sm:$0xff] %v8244_v37  ;;  %v8252_v59 = vrot.slane %v229_v50, %v7335_v45  ;;  %v8255_v11 = vrot.slane %v231_v60, %v7335_v45  ;;  %v8258_v1 = vrot.slane %v233_v32, %v7335_v45  ;;  %6626 = vpow2.f32 %v3652_v17 }
  0xb1   :  { %v8261_v54 = vmul.f32 %v367_v20, %v7290_v22  ;;  %v8264_v19 = vmul.f32 %v367_v20, %v7292_v23  ;;  %v8267_v6 = vmul.f32 %v367_v20, %v7294_v24  ;;  %6628 = vpow2.f32 %v3654_v25 }
  0xb2   :  { %12814 = vst [vmem:[#allocation129_spill] sm:$0xff] %v8252_v59  ;;  %12815 = vst [vmem:[#allocation130_spill] sm:$0xff] %v8255_v11  ;;  %v8270_v61 = vmul.f32 %v367_v20, %v7300_v26  ;;  %v8273_v39 = vmul.f32 %v371_v47, %v7290_v22  ;;  %v8276_v2 = vmul.f32 %v371_v47, %v7292_v23  ;;  %6630 = vpow2.f32 %v3656_v53 }
  0xb3   :  { %12816 = vst [vmem:[#allocation131_spill] sm:$0xff] %v8258_v1  ;;  %v8279_v36 = vmul.f32 %v371_v47, %v7294_v24  ;;  %v8282_v42 = vmul.f32 %v371_v47, %v7300_v26  ;;  %v8285_v14 = vmul.f32 %v375_v46, %v7290_v22  ;;  %6632 = vpow2.f32 %v3658_v33 }
  0xb4   :  { %v8288_v34 = vmul.f32 %v375_v46, %v7292_v23  ;;  %v8291_v50 = vmul.f32 %v375_v46, %v7294_v24  ;;  %v8294_v30 = vmul.f32 %v375_v46, %v7300_v26  ;;  %v8296_v9 = vpop.eup %6608  ;;  %6634 = vpow2.f32 %v3660_v44 }
  0xb5   :  { %12817 = vst [vmem:[#allocation132_spill] sm:$0xff] %v8296_v9  ;;  %v8299_v35 = vmul.f32 %v379_v21, %v7290_v22  ;;  %v8302_v17 = vmul.f32 %v379_v21, %v7292_v23  ;;  %v8305_v33 = vmul.f32 %v379_v21, %v7294_v24  ;;  %v8307_v25 = vpop.eup %6610  ;;  %6636 = vpow2.f32 %v3666_v31 }
  0xb6   :  { %12818 = vst [vmem:[#allocation133_spill] sm:$0xff] %v8307_v25  ;;  %v8310_v53 = vmul.f32 %v379_v21, %v7300_v26  ;;  %v8313_v55 = vmul.f32 %v383_v4, %v7290_v22  ;;  %v8316_v52 = vmul.f32 %v383_v4, %v7292_v23  ;;  %v8318_v44 = vpop.eup %6612  ;;  %v8321_v60 = vmul.f32 %v383_v4, %v7294_v24 }
  0xb7   :  { %12820 = vst [vmem:[#allocation135_spill] sm:$0xff] %v8318_v44  ;;  %v8324_v32 = vmul.f32 %v383_v4, %v7300_v26  ;;  %v673_v31 = vcombine.high %v8167_v5, %v8167_v5  ;;  %v680_v20 = vrot.slane %v8167_v5, %v7285_v15  ;;  %v8330_v47 = vpop.eup %6614  ;;  %6638 = vpow2.f32 %v3668_v51 }
  0xb8   :  { %12819 = vst [vmem:[#allocation134_spill] sm:$0xff] %v8310_v53  ;;  %12822 = vst [vmem:[#allocation137_spill] sm:$0xff] %v8330_v47  ;;  %v8334_v46 = vmul.f32 %v8252_v59, %v7290_v22  ;;  %v2583_v21 = vcombine.high %v8162_v29, %v8162_v29  ;;  %v2590_v4 = vrot.slane %v8162_v29, %v7285_v15  ;;  %v8340_v44 = vpop.eup %6616 }
  0xb9   :  { %12821 = vst [vmem:[#allocation136_spill] sm:$0xff] %v8324_v32  ;;  %12824 = vst [vmem:[#allocation139_spill] sm:$0xff] %v8340_v44  ;;  %v8344_v25 = vmul.f32 %v8252_v59, %v7292_v23  ;;  %v687_v5 = vrot.slane %v673_v31, %v7285_v15  ;;  %v688_v47 = vcombine.high %v680_v20, %v680_v20  ;;  %v8348_v9 = vpop.eup %6618 }
  0xba   :  { %12823 = vst [vmem:[#allocation138_spill] sm:$0xff] %v8334_v46  ;;  %v696_v51 = vrot.slane %v680_v20, %v7285_v15  ;;  %12826 = vst [vmem:[#allocation141_spill] sm:$0xff] %v8348_v9  ;;  %v8352_v37 = vmul.f32 %v8252_v59, %v7294_v24  ;;  %v2519_v58 = vmul.f32 %v7576_v12, %v8162_v29 }
  0xbb   :  { %12825 = vst [vmem:[#allocation140_spill] sm:$0xff] %v8344_v25  ;;  %v2523_v44 = vmul.f32 %v7596_v41, %v8162_v29  ;;  %v8359_v63 = vrot.slane %v2583_v21, %v7285_v15  ;;  %v8361_v25 = vpop.eup %6620  ;;  %v689_v31 = vcombine.high %v687_v5, %v687_v5  ;;  %v703_v20 = vrot.slane %v687_v5, %v7285_v15 }
  0xbc   :  { %12827 = vst [vmem:[#allocation142_spill] sm:$0xff] %v8352_v37  ;;  %12828 = vst [vmem:[#allocation143_spill] sm:$0xff] %v8361_v25  ;;  %v710_v9 = vrot.slane %v688_v47, %v7285_v15  ;;  %v718_v46 = vcombine.high %v696_v51, %v696_v51  ;;  %v8365_v32 = vpop.eup %6622  ;;  %v8369_v37 = vmul.f32 %v8255_v11, %v7290_v22 }
  0xbd   :  { %12829 = vst [vmem:[#allocation144_spill] sm:$0xff] %v8365_v32  ;;  %v8373_v29 = vmul.f32 %v8255_v11, %v7292_v23  ;;  %v855_v21 = vrot.slane %v696_v51, %v7335_v45  ;;  %v2598_v53 = vcombine.high %v2590_v4, %v2590_v4  ;;  %v8376_v25 = vpop.eup %6624  ;;  %v717_v5 = vrot.slane %v689_v31, %v7285_v15 }
  0xbe   :  { %12830 = vst [vmem:[#allocation145_spill] sm:$0xff] %v8369_v37  ;;  %12832 = vst [vmem:[#allocation147_spill] sm:$0xff] %v8376_v25  ;;  %v719_v1 = vcombine.high %v703_v20, %v703_v20  ;;  %v720_v47 = vcombine.high %v710_v9, %v710_v9  ;;  %v8381_v32 = vadd.f32 %v7283_v13, %v8174_v38  ;;  %v8383_v59 = vpop.eup %6626 }
  0xbf   :  { %12831 = vst [vmem:[#allocation146_spill] sm:$0xff] %v8373_v29  ;;  %12833 = vst [vmem:[#allocation148_spill] sm:$0xff] %v8383_v59  ;;  %v859_v37 = vrot.slane %v710_v9, %v7335_v45  ;;  %v8386_v49 = vmax.f32 %v2519_v58, %v2523_v44  ;;  %v8389_v29 = vrot.slane %v2590_v4, %v7285_v15  ;;  %v8395_v31 = vpop.eup %6628 }
  0xc0   :  { %v8393_v51 = vmul.f32 %v7304_v28, %v7708_v27  ;;  %12834 = vst [vmem:[#allocation149_spill] sm:$0xff] %v8395_v31  ;;  %v721_v25 = vcombine.high %v717_v5, %v717_v5  ;;  %v863_v11 = vrot.slane %v718_v46, %v7335_v45  ;;  %v2599_v13 = vcombine.high %v8359_v63, %v8359_v63  ;;  %v8404_v58 = vpop.eup %6630 }
  0xc1   :  { %v8402_v38 = vrot.slane %v8359_v63, %v7285_v15  ;;  %12835 = vst [vmem:[#allocation150_spill] sm:$0xff] %v8404_v58  ;;  %v8407_v9 = vrot.slane %v703_v20, %v7335_v45  ;;  %v1012_v28 = vsub.f32 %v8261_v54, %v855_v21  ;;  %v1013_v27 = vsub.f32 %v8264_v19, %v855_v21  ;;  %v8412_v4 = vpop.eup %6632 }
  0xc2   :  { %v2620_v44 = vrot.slane %v2598_v53, %v7285_v15  ;;  %12837 = vst [vmem:[#allocation152_spill] sm:$0xff] %v8412_v4  ;;  %v8415_v46 = vrot.slane %v720_v47, %v7335_v45  ;;  %v8418_v31 = vrot.slane %v717_v5, %v7335_v45  ;;  %v8421_v63 = vrot.slane %v719_v1, %v7335_v45  ;;  %v8424_v58 = vpop.eup %6634 }
  0xc3   :  { %12836 = vst [vmem:[#allocation151_spill] sm:$0xff] %v8407_v9  ;;  %v1014_v20 = vsub.f32 %v8267_v6, %v855_v21  ;;  %12841 = vst [vmem:[#allocation156_spill] sm:$0xff] %v8424_v58  ;;  %v8427_v54 = vrot.slane %v721_v25, %v7335_v45  ;;  %v1015_v19 = vsub.f32 %v8270_v61, %v855_v21  ;;  %v8432_v4 = vpop.eup %6636  ;;  %v1174_v61 = vmul.f32 1.442695, %v1013_v27 }
  0xc4   :  { %12838 = vst [vmem:[#allocation153_spill] sm:$0xff] %v8415_v46  ;;  %12839 = vst [vmem:[#allocation154_spill] sm:$0xff] %v8418_v31  ;;  %v1016_v53 = vsub.f32 %v8273_v39, %v859_v37  ;;  %v1017_v47 = vsub.f32 %v8276_v2, %v859_v37  ;;  %v1018_v5 = vsub.f32 %v8279_v36, %v859_v37  ;;  %v8440_v21 = vpop.eup %6638 }
  0xc5   :  { %12840 = vst [vmem:[#allocation155_spill] sm:$0xff] %v8421_v63  ;;  %12842 = vst [vmem:[#allocation157_spill] sm:$0xff] %v8427_v54  ;;  %v1019_v1 = vsub.f32 %v8282_v42, %v859_v37  ;;  %v1020_v59 = vsub.f32 %v8285_v14, %v863_v11  ;;  %v1021_v6 = vsub.f32 %v8288_v34, %v863_v11  ;;  %v1172_v54 = vmul.f32 1.442695, %v1012_v28 }
  0xc6   :  { %12843 = vst [vmem:[#allocation158_spill] sm:$0xff] %v8432_v4  ;;  %v1022_v58 = vsub.f32 %v8291_v50, %v863_v11  ;;  %v1023_v25 = vsub.f32 %v8294_v30, %v863_v11  ;;  %12844 = vst [vmem:[#allocation159_spill] sm:$0xff] %v8440_v21  ;;  %v1024_v39 = vsub.f32 %v8299_v35, %v8415_v46  ;;  %v1176_v36 = vmul.f32 1.442695, %v1014_v20 }
  0xc7   :  { %v1025_v2 = vsub.f32 %v8302_v17, %v8415_v46  ;;  %v1026_v37 = vsub.f32 %v8305_v33, %v8415_v46  ;;  %v1028_v42 = vsub.f32 %v8313_v55, %v8407_v9  ;;  %v1029_v11 = vsub.f32 %v8316_v52, %v8407_v9 }
  0xc8   :  { %v1030_v14 = vsub.f32 %v8321_v60, %v8407_v9  ;;  %v1178_v34 = vmul.f32 1.442695, %v1015_v19  ;;  %6640 = vpow2.f32 %v1172_v54  ;;  %v1180_v50 = vmul.f32 1.442695, %v1016_v53 }
  0xc9   :  { %v1182_v30 = vmul.f32 1.442695, %v1017_v47  ;;  %v2627_v35 = vrot.slane %v2599_v13, %v7285_v15  ;;  %6642 = vpow2.f32 %v1174_v61  ;;  %v1184_v17 = vmul.f32 1.442695, %v1018_v5 }
  0xca   :  { %v1186_v28 = vmul.f32 1.442695, %v1019_v1  ;;  %v1188_v33 = vmul.f32 1.442695, %v1020_v59  ;;  %6644 = vpow2.f32 %v1176_v36  ;;  %v1190_v27 = vmul.f32 1.442695, %v1021_v6 }
  0xcb   :  { %v1192_v20 = vmul.f32 1.442695, %v1022_v58  ;;  %v1194_v55 = vmul.f32 1.442695, %v1023_v25  ;;  %6646 = vpow2.f32 %v1178_v34  ;;  %v1196_v21 = vmul.f32 1.442695, %v1024_v39 }
  0xcc   :  { %v2628_v52 = vcombine.high %v8389_v29, %v8389_v29  ;;  %v2630_v60 = vcombine.high %v2620_v44, %v2620_v44  ;;  %6648 = vpow2.f32 %v1180_v50  ;;  %v1198_v54 = vmul.f32 1.442695, %v1025_v2 }
  0xcd   :  { %v2629_v19 = vcombine.high %v8402_v38, %v8402_v38  ;;  %v2631_v13 = vcombine.high %v2627_v35, %v2627_v35  ;;  %6650 = vpow2.f32 %v1182_v30  ;;  %v8459_v53 = vmul.f32 1.442695, %v1026_v37 }
  0xce   :  { %v1204_v59 = vmul.f32 1.442695, %v1028_v42  ;;  %v2765_v58 = vrot.slane %v8389_v29, %v7335_v45  ;;  %6652 = vpow2.f32 %v1184_v17  ;;  %v1206_v47 = vmul.f32 1.442695, %v1029_v11 }
  0xcf   :  { %12845 = vst [vmem:[#allocation160_spill] sm:$0xff] %v8459_v53  ;;  %v8463_v5 = vmul.f32 1.442695, %v1030_v14  ;;  %v2769_v1 = vrot.slane %v2620_v44, %v7335_v45  ;;  %6654 = vpow2.f32 %v1186_v28  ;;  %v2773_v6 = vrot.slane %v2628_v52, %v7335_v45 }
  0xd0   :  { %v2777_v25 = vrot.slane %v2630_v60, %v7335_v45  ;;  %v2781_v61 = vrot.slane %v8402_v38, %v7335_v45  ;;  %6656 = vpow2.f32 %v1188_v33  ;;  %v8471_v39 = vrot.slane %v2627_v35, %v7335_v45 }
  0xd1   :  { %12846 = vst [vmem:[#allocation161_spill] sm:$0xff] %v8463_v5  ;;  %v8474_v29 = vrot.slane %v2629_v19, %v7335_v45  ;;  %v8477_v2 = vrot.slane %v2631_v13, %v7335_v45  ;;  %6658 = vpow2.f32 %v1190_v27  ;;  %v8480_v44 = vmul.f32 %v2765_v58, %v7451_v62 }
  0xd2   :  { %12847 = vst [vmem:[#allocation162_spill] sm:$0xff] %v8471_v39  ;;  %v8483_v37 = vmul.f32 %v2765_v58, %v7453_v0  ;;  %v8486_v36 = vmul.f32 %v2765_v58, %v7455_v3  ;;  %6660 = vpow2.f32 %v1192_v20  ;;  %v8489_v38 = vmul.f32 %v2765_v58, %v7461_v16 }
  0xd3   :  { %12848 = vst [vmem:[#allocation163_spill] sm:$0xff] %v8474_v29  ;;  %12849 = vst [vmem:[#allocation164_spill] sm:$0xff] %v8477_v2  ;;  %v8492_v42 = vmul.f32 %v2769_v1, %v7451_v62  ;;  %v8495_v11 = vmul.f32 %v2769_v1, %v7453_v0  ;;  %6662 = vpow2.f32 %v1194_v55  ;;  %v8498_v14 = vmul.f32 %v2769_v1, %v7455_v3 }
  0xd4   :  { %v8501_v34 = vmul.f32 %v2769_v1, %v7461_v16  ;;  %v8504_v50 = vmul.f32 %v2773_v6, %v7451_v62  ;;  %6664 = vpow2.f32 %v1196_v21  ;;  %v8507_v30 = vmul.f32 %v2773_v6, %v7453_v0  ;;  %v4876_v1 = vld [vmem:[%s12436_s3] sm:$0xff] }
  0xd5   :  { %v8510_v35 = vmul.f32 %v2773_v6, %v7455_v3  ;;  %v8513_v17 = vmul.f32 %v2773_v6, %v7461_v16  ;;  %v8515_v28 = vpop.eup %6640  ;;  %6666 = vpow2.f32 %v1198_v54  ;;  %v8518_v33 = vmul.f32 %v2777_v25, %v7451_v62  ;;  %6373 = vmatprep.mubr.msk.f32.mxu0 %vm4900_vm1, %v4876_v1 }
  0xd6   :  { %12850 = vst [vmem:[#allocation165_spill] sm:$0xff] %v8515_v28  ;;  %v8521_v27 = vmul.f32 %v2777_v25, %v7453_v0  ;;  %v8524_v21 = vmul.f32 %v2777_v25, %v7455_v3  ;;  %v8526_v20 = vpop.eup %6642  ;;  %6668 = vpow2.f32 %v1204_v59  ;;  %v8529_v55 = vmul.f32 %v2777_v25, %v7461_v16 }
  0xd7   :  { %12851 = vst [vmem:[#allocation166_spill] sm:$0xff] %v8526_v20  ;;  %v8532_v52 = vmul.f32 %v2781_v61, %v7451_v62  ;;  %v8535_v60 = vmul.f32 %v2781_v61, %v7453_v0  ;;  %v8537_v54 = vpop.eup %6644  ;;  %v8540_v19 = vmul.f32 %v2781_v61, %v7455_v3  ;;  %v8543_v13 = vmul.f32 %v2781_v61, %v7461_v16 }
  0xd8   :  { %12852 = vst [vmem:[#allocation167_spill] sm:$0xff] %v8529_v55  ;;  %12853 = vst [vmem:[#allocation168_spill] sm:$0xff] %v8537_v54  ;;  %v3071_v59 = vcombine.high %v8386_v49, %v8386_v49  ;;  %v3078_v58 = vrot.slane %v8386_v49, %v7285_v15  ;;  %v8552_v6 = vpop.eup %6646  ;;  %6670 = vpow2.f32 %v1206_v47  ;;  %v8556_v25 = vmul.f32 %v8471_v39, %v7451_v62  ;;  %v4877_v49 = vld [vmem:[%s12436_s3 + $0x8] sm:$0xff] }
  0xd9   :  { %12854 = vst [vmem:[#allocation169_spill] sm:$0xff] %v8543_v13  ;;  %12855 = vst [vmem:[#allocation170_spill] sm:$0xff] %v8552_v6  ;;  %v136_v61 = vcombine.high %v8381_v32, %v8381_v32  ;;  %v143_v13 = vrot.slane %v8381_v32, %v7285_v15  ;;  %v8565_v55 = vpop.eup %6648  ;;  %v8576_v54 = vmul.f32 %v8471_v39, %v7453_v0  ;;  %6374 = vmatmul.mubr.msk.f32.vlgmr.msra.gmra.mxu0 %vm4900_vm1, %v4877_v49  ;;  %v4879_v49 = vld [vmem:[%s12436_s3 + $0x18] sm:$0xff] }
  0xda   :  { %12856 = vst [vmem:[#allocation171_spill] sm:$0xff] %v8556_v25  ;;  %12857 = vst [vmem:[#allocation172_spill] sm:$0xff] %v8565_v55  ;;  %v3085_v2 = vrot.slane %v3071_v59, %v7285_v15  ;;  %v3086_v4 = vcombine.high %v3078_v58, %v3078_v58  ;;  %v3094_v47 = vrot.slane %v3078_v58, %v7285_v15  ;;  %v4878_v25 = vld [vmem:[%s12436_s3 + $0x10] sm:$0xff]  ;;  %v8572_v6 = vpop.eup %6650 }
  0xdb   :  { %12858 = vst [vmem:[#allocation173_spill] sm:$0xff] %v8572_v6  ;;  %12859 = vst [vmem:[#allocation174_spill] sm:$0xff] %v8576_v54  ;;  %v120_v20 = vmul.f32 %v7418_v43, %v8381_v32  ;;  %v124_v59 = vmul.f32 %v7429_v48, %v8381_v32  ;;  %v8583_v55 = vrot.slane %v136_v61, %v7285_v15  ;;  %v4890_v58 = vld [vmem:[%s12436_s3 + $0x70] sm:$0xff]  ;;  %v8589_v6 = vpop.eup %6652  ;;  %v4891_v48 = vld [vmem:[%s12436_s3 + $0x78] sm:$0xff]  ;;  %6376 = vmatprep.mubr.msk.f32.mxu0 %vm4900_vm1, %v4878_v25 }
  0xdc   :  { %12860 = vst [vmem:[#allocation175_spill] sm:$0xff] %v8589_v6  ;;  %v3087_v28 = vcombine.high %v3085_v2, %v3085_v2  ;;  %v3101_v54 = vrot.slane %v3085_v2, %v7285_v15  ;;  %v3108_v5 = vrot.slane %v3086_v4, %v7285_v15  ;;  %v3116_v43 = vcombine.high %v3094_v47, %v3094_v47  ;;  %v8597_v32 = vpop.eup %6654  ;;  %v4880_v25 = vld [vmem:[%s12436_s3 + $0x20] sm:$0xff] }
  0xdd   :  { %12861 = vst [vmem:[#allocation176_spill] sm:$0xff] %v8597_v32  ;;  %v8601_v1 = vmul.f32 %v8471_v39, %v7455_v3  ;;  %v8605_v61 = vmul.f32 %v8474_v29, %v7451_v62  ;;  %v8608_v2 = vrot.slane %v3094_v47, %v7335_v45  ;;  %v151_v4 = vcombine.high %v143_v13, %v143_v13  ;;  %v8614_v6 = vpop.eup %6656 }
  0xde   :  { %12864 = vst [vmem:[#allocation179_spill] sm:$0xff] %v8614_v6  ;;  %v8618_v39 = vmul.f32 %v8474_v29, %v7453_v0  ;;  %v3117_v32 = vcombine.high %v3101_v54, %v3101_v54  ;;  %6394 = vmatprep.mubr.msk.f32.mxu1 %vm4900_vm1, %v4890_v58  ;;  %v8625_v47 = vpop.eup %6658  ;;  %v8628_v53 = vrot.slane %v3108_v5, %v7335_v45  ;;  %v4892_v58 = vld [vmem:[%s12436_s3 + $0x80] sm:$0xff] }
  0xdf   :  { %12862 = vst [vmem:[#allocation177_spill] sm:$0xff] %v8601_v1  ;;  %12863 = vst [vmem:[#allocation178_spill] sm:$0xff] %v8605_v61  ;;  %v3115_v1 = vrot.slane %v3087_v28, %v7285_v15  ;;  %v3118_v61 = vcombine.high %v3108_v5, %v3108_v5  ;;  %v8630_v6 = vmax.f32 %v120_v20, %v124_v59  ;;  %6395 = vmatmul.mubr.msk.f32.vlgmr.msra.gmra.mxu1 %vm4900_vm1, %v4891_v48 }
  0xe0   :  { %12865 = vst [vmem:[#allocation180_spill] sm:$0xff] %v8618_v39  ;;  %12866 = vst [vmem:[#allocation181_spill] sm:$0xff] %v8625_v47  ;;  %v8633_v29 = vrot.slane %v143_v13, %v7285_v15  ;;  %v8637_v28 = vadd.f32 %v7345_v56, %v8393_v51  ;;  %v8643_v39 = vpop.eup %6660  ;;  %v8646_v5 = vrot.slane %v3116_v43, %v7335_v45  ;;  %6377 = vmatmul.mubr.msk.f32.gmra.mxu0 %vm4900_vm1, %v4879_v49  ;;  %v4893_v56 = vld [vmem:[%s12436_s3 + $0x88] sm:$0xff] }
  0xe1   :  { %12867 = vst [vmem:[#allocation182_spill] sm:$0xff] %v8643_v39  ;;  %v3119_v47 = vcombine.high %v3115_v1, %v3115_v1  ;;  %v152_v20 = vcombine.high %v8583_v55, %v8583_v55  ;;  %v8652_v13 = vrot.slane %v8583_v55, %v7285_v15  ;;  %v8658_v51 = vpop.eup %6662  ;;  %v8661_v59 = vrot.slane %v3101_v54, %v7335_v45  ;;  %v4881_v49 = vld [vmem:[%s12436_s3 + $0x28] sm:$0xff] }
  0xe2   :  { %12868 = vst [vmem:[#allocation183_spill] sm:$0xff] %v8658_v51  ;;  %v3410_v43 = vsub.f32 %v8480_v44, %v8608_v2  ;;  %v3411_v48 = vsub.f32 %v8483_v37, %v8608_v2  ;;  %v8668_v55 = vrot.slane %v151_v4, %v7285_v15  ;;  %6379 = vmatprep.mubr.msk.f32.mxu0 %vm4900_vm1, %v4880_v25  ;;  %v8674_v39 = vpop.eup %6664  ;;  %v4882_v4 = vld [vmem:[%s12436_s3 + $0x30] sm:$0xff] }
  0xe3   :  { %12869 = vst [vmem:[#allocation184_spill] sm:$0xff] %v8661_v59  ;;  %12870 = vst [vmem:[#allocation185_spill] sm:$0xff] %v8674_v39  ;;  %v8677_v54 = vrot.slane %v3118_v61, %v7335_v45  ;;  %v8680_v51 = vrot.slane %v3115_v1, %v7335_v45  ;;  %v8683_v44 = vrot.slane %v3117_v32, %v7335_v45  ;;  %6397 = vmatprep.mubr.msk.f32.mxu1 %vm4900_vm1, %v4892_v58  ;;  %v4894_v61 = vld [vmem:[%s12436_s3 + $0x90] sm:$0xff]  ;;  %v8694_v25 = vpop.eup %6666 }
  0xe4   :  { %v3412_v37 = vsub.f32 %v8486_v36, %v8608_v2  ;;  %12874 = vst [vmem:[#allocation189_spill] sm:$0xff] %v8694_v25  ;;  %v8697_v1 = vrot.slane %v3119_v47, %v7335_v45  ;;  %v3413_v32 = vsub.f32 %v8489_v38, %v8608_v2  ;;  %v3414_v36 = vsub.f32 %v8492_v42, %v8628_v53  ;;  %v4895_v42 = vld [vmem:[%s12436_s3 + $0x98] sm:$0xff] }
  0xe5   :  { %12871 = vst [vmem:[#allocation186_spill] sm:$0xff] %v8677_v54  ;;  %12872 = vst [vmem:[#allocation187_spill] sm:$0xff] %v8680_v51  ;;  %v3415_v58 = vsub.f32 %v8495_v11, %v8628_v53  ;;  %6398 = vmatmul.mubr.msk.f32.gmra.mxu1 %vm4900_vm1, %v4893_v56  ;;  %v3416_v51 = vsub.f32 %v8498_v14, %v8628_v53  ;;  %v3417_v47 = vsub.f32 %v8501_v34, %v8628_v53  ;;  %v4883_v34 = vld [vmem:[%s12436_s3 + $0x38] sm:$0xff] }
  0xe6   :  { %12873 = vst [vmem:[#allocation188_spill] sm:$0xff] %v8683_v44  ;;  %12875 = vst [vmem:[#allocation190_spill] sm:$0xff] %v8697_v1  ;;  %v8706_v44 = vpop.eup %6668  ;;  %v3418_v1 = vsub.f32 %v8504_v50, %v8646_v5  ;;  %v3419_v38 = vsub.f32 %v8507_v30, %v8646_v5  ;;  %6380 = vmatmul.mubr.msk.f32.gmra.mxu0 %vm4900_vm1, %v4881_v49  ;;  %v3420_v11 = vsub.f32 %v8510_v35, %v8646_v5  ;;  %v4896_v50 = vld [vmem:[%s12436_s3 + $0xa0] sm:$0xff] }
  0xe7   :  { %12876 = vst [vmem:[#allocation191_spill] sm:$0xff] %v8706_v44  ;;  %v3421_v14 = vsub.f32 %v8513_v17, %v8646_v5  ;;  %v3570_v2 = vmul.f32 1.442695, %v3410_v43  ;;  %v3572_v53 = vmul.f32 1.442695, %v3411_v48  ;;  %6382 = vmatprep.mubr.msk.f32.mxu0 %vm4900_vm1, %v4882_v4  ;;  %6400 = vmatprep.mubr.msk.f32.mxu1 %vm4900_vm1, %v4894_v61  ;;  %v8732_v30 = vpop.eup %6670  ;;  %v3422_v35 = vsub.f32 %v8518_v33, %v8677_v54  ;;  %v4884_v43 = vld [vmem:[%s12436_s3 + $0x40] sm:$0xff] }
  0xe8   :  { %12877 = vst [vmem:[#allocation192_spill] sm:$0xff] %v8732_v30  ;;  %v3423_v17 = vsub.f32 %v8521_v27, %v8677_v54  ;;  %v3424_v5 = vsub.f32 %v8524_v21, %v8677_v54  ;;  %v3574_v56 = vmul.f32 1.442695, %v3412_v37  ;;  %v3426_v48 = vsub.f32 %v8532_v52, %v8661_v59  ;;  %v4885_v52 = vld [vmem:[%s12436_s3 + $0x48] sm:$0xff] }
  0xe9   :  { %v3427_v49 = vsub.f32 %v8535_v60, %v8661_v59  ;;  %v3428_v33 = vsub.f32 %v8540_v19, %v8661_v59  ;;  %v3576_v4 = vmul.f32 1.442695, %v3413_v32  ;;  %6401 = vmatmul.mubr.msk.f32.gmra.mxu1 %vm4900_vm1, %v4895_v42  ;;  %6672 = vpow2.f32 %v3570_v2  ;;  %v4897_v60 = vld [vmem:[%s12436_s3 + $0xa8] sm:$0xff] }
  0xea   :  { %v3578_v27 = vmul.f32 1.442695, %v3414_v36  ;;  %v3580_v21 = vmul.f32 1.442695, %v3415_v58  ;;  %v180_v37 = vrot.slane %v152_v20, %v7285_v15  ;;  %6383 = vmatmul.mubr.msk.f32.gmra.mxu0 %vm4900_vm1, %v4883_v34  ;;  %6403 = vmatprep.mubr.msk.f32.mxu1 %vm4900_vm1, %v4896_v50  ;;  %6674 = vpow2.f32 %v3572_v53 }
  0xeb   :  { %v3582_v19 = vmul.f32 1.442695, %v3416_v51  ;;  %v3584_v61 = vmul.f32 1.442695, %v3417_v47  ;;  %v3586_v32 = vmul.f32 1.442695, %v3418_v1  ;;  %6385 = vmatprep.mubr.msk.f32.mxu0 %vm4900_vm1, %v4884_v43  ;;  %6676 = vpow2.f32 %v3574_v56 }
  0xec   :  { %v3588_v20 = vmul.f32 1.442695, %v3419_v38  ;;  %v3590_v36 = vmul.f32 1.442695, %v3420_v11  ;;  %v3592_v58 = vmul.f32 1.442695, %v3421_v14  ;;  %6678 = vpow2.f32 %v3576_v4 }
  0xed   :  { %v3594_v42 = vmul.f32 1.442695, %v3422_v35  ;;  %v181_v2 = vcombine.high %v8633_v29, %v8633_v29  ;;  %v183_v34 = vcombine.high %v8668_v55, %v8668_v55  ;;  %6404 = vmatmul.mubr.msk.f32.gmra.mxu1 %vm4900_vm1, %v4897_v60  ;;  %6680 = vpow2.f32 %v3578_v27 }
  0xee   :  { %v3596_v51 = vmul.f32 1.442695, %v3423_v17  ;;  %v182_v1 = vcombine.high %v8652_v13, %v8652_v13  ;;  %v184_v47 = vcombine.high %v180_v37, %v180_v37  ;;  %6386 = vmatmul.mubr.msk.f32.gmra.mxu0 %vm4900_vm1, %v4885_v52  ;;  %6682 = vpow2.f32 %v3580_v21 }
  0xef   :  { %v8768_v38 = vmul.f32 1.442695, %v3424_v5  ;;  %v3602_v11 = vmul.f32 1.442695, %v3426_v48  ;;  %v335_v14 = vrot.slane %v8633_v29, %v7335_v45  ;;  %6684 = vpow2.f32 %v3582_v19 }
  0xf0   :  { %v3604_v53 = vmul.f32 1.442695, %v3427_v49  ;;  %v8772_v50 = vmul.f32 1.442695, %v3428_v33  ;;  %v339_v35 = vrot.slane %v8668_v55, %v7335_v45  ;;  %6686 = vpow2.f32 %v3584_v61 }
  0xf1   :  { %12878 = vst [vmem:[#allocation193_spill] sm:$0xff] %v8768_v38  ;;  %v343_v17 = vrot.slane %v181_v2, %v7335_v45  ;;  %v347_v56 = vrot.slane %v183_v34, %v7335_v45  ;;  %v351_v5 = vrot.slane %v8652_v13, %v7335_v45  ;;  %6688 = vpow2.f32 %v3586_v32 }
  0xf2   :  { %12879 = vst [vmem:[#allocation194_spill] sm:$0xff] %v8772_v50  ;;  %v8781_v43 = vrot.slane %v180_v37, %v7335_v45  ;;  %v8784_v29 = vrot.slane %v182_v1, %v7335_v45  ;;  %v8787_v48 = vrot.slane %v184_v47, %v7335_v45  ;;  %6690 = vpow2.f32 %v3588_v20 }
  0xf3   :  { %v8790_v55 = vmul.f32 %v335_v14, %v7290_v22  ;;  %v8793_v49 = vmul.f32 %v335_v14, %v7292_v23  ;;  %v8796_v33 = vmul.f32 %v335_v14, %v7294_v24  ;;  %6692 = vpow2.f32 %v3590_v36 }
  0xf4   :  { %12880 = vst [vmem:[#allocation195_spill] sm:$0xff] %v8781_v43  ;;  %12881 = vst [vmem:[#allocation196_spill] sm:$0xff] %v8784_v29  ;;  %v8799_v13 = vmul.f32 %v335_v14, %v7300_v26  ;;  %v8802_v4 = vmul.f32 %v339_v35, %v7290_v22  ;;  %v8805_v27 = vmul.f32 %v339_v35, %v7292_v23  ;;  %6694 = vpow2.f32 %v3592_v58 }
  0xf5   :  { %12882 = vst [vmem:[#allocation197_spill] sm:$0xff] %v8787_v48  ;;  %v8810_v21 = vmul.f32 %v339_v35, %v7294_v24  ;;  %v8813_v37 = vmul.f32 %v339_v35, %v7300_v26  ;;  %v8816_v52 = vmul.f32 %v343_v17, %v7290_v22  ;;  %6696 = vpow2.f32 %v3594_v42 }
  0xf6   :  { %v8819_v60 = vmul.f32 %v343_v17, %v7292_v23  ;;  %v8822_v19 = vmul.f32 %v343_v17, %v7294_v24  ;;  %v8825_v61 = vmul.f32 %v343_v17, %v7300_v26  ;;  %v8827_v32 = vpop.eup %6672  ;;  %6698 = vpow2.f32 %v3596_v51 }
  0xf7   :  { %12883 = vst [vmem:[#allocation198_spill] sm:$0xff] %v8827_v32  ;;  %v8830_v20 = vmul.f32 %v347_v56, %v7290_v22  ;;  %v8833_v36 = vmul.f32 %v347_v56, %v7292_v23  ;;  %v8836_v58 = vmul.f32 %v347_v56, %v7294_v24  ;;  %v8838_v42 = vpop.eup %6674  ;;  %6700 = vpow2.f32 %v3602_v11 }
  0xf8   :  { %12884 = vst [vmem:[#allocation199_spill] sm:$0xff] %v8838_v42  ;;  %v8841_v2 = vmul.f32 %v347_v56, %v7300_v26  ;;  %v8844_v34 = vmul.f32 %v351_v5, %v7290_v22  ;;  %v8847_v51 = vmul.f32 %v351_v5, %v7292_v23  ;;  %v8849_v1 = vpop.eup %6676  ;;  %v8852_v47 = vmul.f32 %v351_v5, %v7294_v24 }
  0xf9   :  { %12886 = vst [vmem:[#allocation201_spill] sm:$0xff] %v8849_v1  ;;  %v8855_v14 = vmul.f32 %v351_v5, %v7300_v26  ;;  %v624_v11 = vcombine.high %v8630_v6, %v8630_v6  ;;  %v631_v35 = vrot.slane %v8630_v6, %v7285_v15  ;;  %v8861_v17 = vpop.eup %6678  ;;  %6702 = vpow2.f32 %v3604_v53 }
  0xfa   :  { %12885 = vst [vmem:[#allocation200_spill] sm:$0xff] %v8841_v2  ;;  %12888 = vst [vmem:[#allocation203_spill] sm:$0xff] %v8861_v17  ;;  %v8865_v56 = vmul.f32 %v8781_v43, %v7290_v22  ;;  %v2534_v1 = vcombine.high %v8637_v28, %v8637_v28  ;;  %v2541_v5 = vrot.slane %v8637_v28, %v7285_v15  ;;  %v8871_v42 = vpop.eup %6680 }
  0xfb   :  { %12887 = vst [vmem:[#allocation202_spill] sm:$0xff] %v8855_v14  ;;  %12890 = vst [vmem:[#allocation205_spill] sm:$0xff] %v8871_v42  ;;  %v8875_v32 = vmul.f32 %v8781_v43, %v7292_v23  ;;  %v638_v6 = vrot.slane %v624_v11, %v7285_v15  ;;  %v639_v17 = vcombine.high %v631_v35, %v631_v35  ;;  %v8879_v50 = vpop.eup %6682  ;;  %v8889_v42 = vstv %s8807_s9 }
  0xfc   :  { %12889 = vst [vmem:[#allocation204_spill] sm:$0xff] %v8865_v56  ;;  %v647_v53 = vrot.slane %v631_v35, %v7285_v15  ;;  %12892 = vst [vmem:[#allocation207_spill] sm:$0xff] %v8879_v50  ;;  %v2518_v38 = vmul.f32 %v7576_v12, %v8637_v28  ;;  %v2522_v59 = vmul.f32 %v7596_v41, %v8637_v28  ;;  %v8891_v56 = vpop.eup %6684 }
  0xfd   :  { %12891 = vst [vmem:[#allocation206_spill] sm:$0xff] %v8875_v32  ;;  %v8886_v54 = vrot.slane %v2534_v1, %v7285_v15  ;;  %12893 = vst [vmem:[#allocation208_spill] sm:$0xff] %v8891_v56  ;;  %v640_v32 = vcombine.high %v638_v6, %v638_v6  ;;  %v654_v11 = vrot.slane %v638_v6, %v7285_v15  ;;  %v8895_v50 = vpop.eup %6686 }
  0xfe   :  { %v661_v35 = vrot.slane %v639_v17, %v7285_v15  ;;  %v669_v14 = vcombine.high %v647_v53, %v647_v53  ;;  %12894 = vst [vmem:[#allocation209_spill] sm:$0xff] %v8895_v50  ;;  %v8899_v12 = vmul.f32 %v8781_v43, %v7294_v24  ;;  %v8903_v41 = vmul.f32 %v8784_v29, %v7290_v22  ;;  %v8906_v56 = vpop.eup %6688 }
  0xff   :  { %v823_v28 = vrot.slane %v647_v53, %v7335_v45  ;;  %v2549_v1 = vcombine.high %v2541_v5, %v2541_v5  ;;  %12897 = vst [vmem:[#allocation212_spill] sm:$0xff] %v8906_v56  ;;  %v8910_v6 = vmul.f32 %v8784_v29, %v7292_v23  ;;  %v668_v17 = vrot.slane %v640_v32, %v7285_v15  ;;  %v8913_v48 = vpop.eup %6690  ;;  %v7152_v53 = vld [vmem:[%s12434_s1] sm:$0xff] }
 0x100   :  { %12895 = vst [vmem:[#allocation210_spill] sm:$0xff] %v8899_v12  ;;  %12896 = vst [vmem:[#allocation211_spill] sm:$0xff] %v8903_v41  ;;  %v670_v50 = vcombine.high %v654_v11, %v654_v11  ;;  %v671_v2 = vcombine.high %v661_v35, %v661_v35  ;;  %v827_v12 = vrot.slane %v661_v35, %v7335_v45 }
 0x101   :  { %12898 = vst [vmem:[#allocation213_spill] sm:$0xff] %v8910_v6  ;;  %12899 = vst [vmem:[#allocation214_spill] sm:$0xff] %v8913_v48  ;;  %v8916_v43 = vmax.f32 %v2518_v38, %v2522_v59  ;;  %v8919_v41 = vrot.slane %v2541_v5, %v7285_v15  ;;  %v8925_v56 = vmul.f32 %v7152_v53, %v8889_v42  ;;  %v8927_v6 = vpop.eup %6692 }
 0x102   :  { %12900 = vst [vmem:[#allocation215_spill] sm:$0xff] %v8927_v6  ;;  %v672_v32 = vcombine.high %v668_v17, %v668_v17  ;;  %v831_v29 = vrot.slane %v669_v14, %v7335_v45  ;;  %v2550_v35 = vcombine.high %v8886_v54, %v8886_v54  ;;  %v8934_v59 = vrot.slane %v8886_v54, %v7285_v15  ;;  %v8936_v38 = vpop.eup %6694 }
 0x103   :  { %12901 = vst [vmem:[#allocation216_spill] sm:$0xff] %v8936_v38  ;;  %v8939_v5 = vrot.slane %v654_v11, %v7335_v45  ;;  %v980_v53 = vsub.f32 %v8790_v55, %v823_v28  ;;  %v981_v48 = vsub.f32 %v8793_v49, %v823_v28  ;;  %v2571_v6 = vrot.slane %v2549_v1, %v7285_v15  ;;  %v8944_v30 = vpop.eup %6696 }
 0x104   :  { %12903 = vst [vmem:[#allocation218_spill] sm:$0xff] %v8944_v30  ;;  %v8947_v14 = vrot.slane %v671_v2, %v7335_v45  ;;  %v8950_v44 = vrot.slane %v668_v17, %v7335_v45  ;;  %v8953_v54 = vrot.slane %v670_v50, %v7335_v45  ;;  %v982_v11 = vsub.f32 %v8796_v33, %v823_v28  ;;  %v8956_v38 = vpop.eup %6698 }
 0x105   :  { %12902 = vst [vmem:[#allocation217_spill] sm:$0xff] %v8939_v5  ;;  %12907 = vst [vmem:[#allocation222_spill] sm:$0xff] %v8956_v38  ;;  %v8959_v55 = vrot.slane %v672_v32, %v7335_v45  ;;  %v983_v49 = vsub.f32 %v8799_v13, %v823_v28  ;;  %v984_v1 = vsub.f32 %v8802_v4, %v827_v12  ;;  %v8964_v30 = vpop.eup %6700  ;;  %v1110_v13 = vmul.f32 1.442695, %v981_v48 }
 0x106   :  { %12904 = vst [vmem:[#allocation219_spill] sm:$0xff] %v8947_v14  ;;  %12905 = vst [vmem:[#allocation220_spill] sm:$0xff] %v8950_v44  ;;  %v985_v2 = vsub.f32 %v8805_v27, %v827_v12  ;;  %v986_v17 = vsub.f32 %v8810_v21, %v827_v12  ;;  %v987_v50 = vsub.f32 %v8813_v37, %v827_v12  ;;  %v8972_v28 = vpop.eup %6702  ;;  %v1112_v37 = vmul.f32 1.442695, %v982_v11 }
 0x107   :  { %12906 = vst [vmem:[#allocation221_spill] sm:$0xff] %v8953_v54  ;;  %12908 = vst [vmem:[#allocation223_spill] sm:$0xff] %v8959_v55  ;;  %v988_v54 = vsub.f32 %v8816_v52, %v831_v29  ;;  %v989_v33 = vsub.f32 %v8819_v60, %v831_v29  ;;  %v990_v38 = vsub.f32 %v8822_v19, %v831_v29  ;;  %v1108_v55 = vmul.f32 1.442695, %v980_v53 }
 0x108   :  { %12909 = vst [vmem:[#allocation224_spill] sm:$0xff] %v8964_v30  ;;  %v991_v32 = vsub.f32 %v8825_v61, %v831_v29  ;;  %12910 = vst [vmem:[#allocation225_spill] sm:$0xff] %v8972_v28  ;;  %v992_v4 = vsub.f32 %v8830_v20, %v8947_v14  ;;  %v993_v27 = vsub.f32 %v8833_v36, %v8947_v14  ;;  %v1114_v60 = vmul.f32 1.442695, %v983_v49 }
 0x109   :  { %v994_v21 = vsub.f32 %v8836_v58, %v8947_v14  ;;  %v996_v52 = vsub.f32 %v8844_v34, %v8939_v5  ;;  %v997_v29 = vsub.f32 %v8847_v51, %v8939_v5  ;;  %v998_v48 = vsub.f32 %v8852_v47, %v8939_v5 }
 0x10a   :  { %6704 = vpow2.f32 %v1108_v55  ;;  %v1116_v19 = vmul.f32 1.442695, %v984_v1  ;;  %v1118_v61 = vmul.f32 1.442695, %v985_v2  ;;  %v2578_v20 = vrot.slane %v2550_v35, %v7285_v15 }
 0x10b   :  { %6706 = vpow2.f32 %v1110_v13  ;;  %v1120_v36 = vmul.f32 1.442695, %v986_v17  ;;  %v1122_v12 = vmul.f32 1.442695, %v987_v50  ;;  %v1124_v58 = vmul.f32 1.442695, %v988_v54 }
 0x10c   :  { %6708 = vpow2.f32 %v1112_v37  ;;  %v1126_v53 = vmul.f32 1.442695, %v989_v33  ;;  %v1128_v11 = vmul.f32 1.442695, %v990_v38  ;;  %v1130_v34 = vmul.f32 1.442695, %v991_v32 }
 0x10d   :  { %6710 = vpow2.f32 %v1114_v60  ;;  %v1132_v28 = vmul.f32 1.442695, %v992_v4  ;;  %v2579_v51 = vcombine.high %v8919_v41, %v8919_v41  ;;  %v2581_v47 = vcombine.high %v2571_v6, %v2571_v6 }
 0x10e   :  { %6712 = vpow2.f32 %v1116_v19  ;;  %v1134_v55 = vmul.f32 1.442695, %v993_v27  ;;  %v2580_v49 = vcombine.high %v8934_v59, %v8934_v59  ;;  %v2582_v35 = vcombine.high %v2578_v20, %v2578_v20 }
 0x10f   :  { %6714 = vpow2.f32 %v1118_v61  ;;  %v8991_v1 = vmul.f32 1.442695, %v994_v21  ;;  %v1140_v54 = vmul.f32 1.442695, %v996_v52  ;;  %v2733_v38 = vrot.slane %v8919_v41, %v7335_v45 }
 0x110   :  { %6716 = vpow2.f32 %v1120_v36  ;;  %v1142_v2 = vmul.f32 1.442695, %v997_v29  ;;  %v8995_v17 = vmul.f32 1.442695, %v998_v48  ;;  %v2737_v50 = vrot.slane %v2571_v6, %v7335_v45 }
 0x111   :  { %12911 = vst [vmem:[#allocation226_spill] sm:$0xff] %v8991_v1  ;;  %6718 = vpow2.f32 %v1122_v12  ;;  %v2741_v33 = vrot.slane %v2579_v51, %v7335_v45  ;;  %v2745_v32 = vrot.slane %v2581_v47, %v7335_v45  ;;  %v2749_v13 = vrot.slane %v8934_v59, %v7335_v45  ;;  %v12935_v1 = vld [vmem:[#allocation12_spill] sm:$0xff] }
 0x112   :  { %12912 = vst [vmem:[#allocation227_spill] sm:$0xff] %v8995_v17  ;;  %6720 = vpow2.f32 %v1124_v58  ;;  %v9003_v4 = vrot.slane %v2578_v20, %v7335_v45  ;;  %v9006_v41 = vrot.slane %v2580_v49, %v7335_v45  ;;  %v9009_v27 = vrot.slane %v2582_v35, %v7335_v45 }
 0x113   :  { %6722 = vpow2.f32 %v1126_v53  ;;  %v9012_v6 = vmul.f32 %v2733_v38, %v7451_v62  ;;  %v9015_v21 = vmul.f32 %v2733_v38, %v7453_v0  ;;  %v9018_v37 = vmul.f32 %v2733_v38, %v7455_v3 }
 0x114   :  { %12913 = vst [vmem:[#allocation228_spill] sm:$0xff] %v9003_v4  ;;  %12914 = vst [vmem:[#allocation229_spill] sm:$0xff] %v9006_v41  ;;  %6724 = vpow2.f32 %v1128_v11  ;;  %v9023_v59 = vmul.f32 %v2733_v38, %v7461_v16  ;;  %v9026_v52 = vmul.f32 %v2737_v50, %v7451_v62  ;;  %v9029_v29 = vmul.f32 %v2737_v50, %v7453_v0 }
 0x115   :  { %12915 = vst [vmem:[#allocation230_spill] sm:$0xff] %v9009_v27  ;;  %6726 = vpow2.f32 %v1130_v34  ;;  %v9032_v48 = vmul.f32 %v2737_v50, %v7455_v3  ;;  %v9035_v60 = vmul.f32 %v2737_v50, %v7461_v16  ;;  %v9038_v19 = vmul.f32 %v2741_v33, %v7451_v62 }
 0x116   :  { %6728 = vpow2.f32 %v1132_v28  ;;  %v9041_v61 = vmul.f32 %v2741_v33, %v7453_v0  ;;  %v9044_v20 = vmul.f32 %v2741_v33, %v7455_v3  ;;  %v9047_v36 = vmul.f32 %v2741_v33, %v7461_v16 }
 0x117   :  { %v9049_v12 = vpop.eup %6704  ;;  %6730 = vpow2.f32 %v1134_v55  ;;  %v9052_v58 = vmul.f32 %v2745_v32, %v7451_v62  ;;  %v9055_v53 = vmul.f32 %v2745_v32, %v7453_v0  ;;  %v9058_v28 = vmul.f32 %v2745_v32, %v7455_v3 }
 0x118   :  { %12916 = vst [vmem:[#allocation231_spill] sm:$0xff] %v9049_v12  ;;  %v9060_v11 = vpop.eup %6706  ;;  %6732 = vpow2.f32 %v1140_v54  ;;  %v9063_v34 = vmul.f32 %v2745_v32, %v7461_v16  ;;  %v9066_v51 = vmul.f32 %v2749_v13, %v7451_v62  ;;  %v9069_v47 = vmul.f32 %v2749_v13, %v7453_v0  ;;  %v7153_v32 = vld [vmem:[%s12434_s1 + $0x8] sm:$0xff] }
 0x119   :  { %12917 = vst [vmem:[#allocation232_spill] sm:$0xff] %v9060_v11  ;;  %v9071_v55 = vpop.eup %6708  ;;  %v9074_v49 = vmul.f32 %v2749_v13, %v7455_v3  ;;  %v9077_v35 = vmul.f32 %v2749_v13, %v7461_v16  ;;  %v3022_v54 = vcombine.high %v8916_v43, %v8916_v43  ;;  %v3029_v38 = vrot.slane %v8916_v43, %v7285_v15 }
 0x11a   :  { %12918 = vst [vmem:[#allocation233_spill] sm:$0xff] %v9063_v34  ;;  %12919 = vst [vmem:[#allocation234_spill] sm:$0xff] %v9071_v55  ;;  %v9083_v50 = vpop.eup %6710  ;;  %6734 = vpow2.f32 %v1142_v2  ;;  %v9087_v33 = vmul.f32 %v9003_v4, %v7451_v62  ;;  %v85_v13 = vmul.f32 %v7153_v32, %v8889_v42  ;;  %v9106_v55 = vmul.f32 %v9003_v4, %v7453_v0 }
 0x11b   :  { %12920 = vst [vmem:[#allocation235_spill] sm:$0xff] %v9077_v35  ;;  %12921 = vst [vmem:[#allocation236_spill] sm:$0xff] %v9083_v50  ;;  %v7154_v35 = vld [vmem:[%s12434_s1 + $0x10] sm:$0xff]  ;;  %v9097_v43 = vpop.eup %6712  ;;  %v3036_v2 = vrot.slane %v3022_v54, %v7285_v15  ;;  %v3037_v27 = vcombine.high %v3029_v38, %v3029_v38  ;;  %v3045_v30 = vrot.slane %v3029_v38, %v7285_v15  ;;  %v7155_v54 = vld [vmem:[%s12434_s1 + $0x18] sm:$0xff] }
 0x11c   :  { %12922 = vst [vmem:[#allocation237_spill] sm:$0xff] %v9087_v33  ;;  %v86_v34 = vmul.f32 %v7154_v35, %v8889_v42  ;;  %12923 = vst [vmem:[#allocation238_spill] sm:$0xff] %v9097_v43  ;;  %v88_v33 = vstv %s9020_s12  ;;  %v9102_v50 = vpop.eup %6714  ;;  %v9110_v32 = vmul.f32 %v9003_v4, %v7455_v3  ;;  %v9114_v35 = vmul.f32 %v9006_v41, %v7451_v62 }
 0x11d   :  { %12924 = vst [vmem:[#allocation239_spill] sm:$0xff] %v9102_v50  ;;  %12925 = vst [vmem:[#allocation240_spill] sm:$0xff] %v9106_v55  ;;  %v87_v38 = vmul.f32 %v7155_v54, %v8889_v42  ;;  %v9120_v43 = vpop.eup %6716  ;;  %v3038_v50 = vcombine.high %v3036_v2, %v3036_v2  ;;  %v3052_v11 = vrot.slane %v3036_v2, %v7285_v15 }
 0x11e   :  { %12926 = vst [vmem:[#allocation241_spill] sm:$0xff] %v9110_v32  ;;  %12927 = vst [vmem:[#allocation242_spill] sm:$0xff] %v9114_v35  ;;  %v3059_v55 = vrot.slane %v3037_v27, %v7285_v15  ;;  %v3067_v12 = vcombine.high %v3045_v30, %v3045_v30  ;;  %v9124_v4 = vpop.eup %6718  ;;  %v9128_v32 = vmul.f32 %v9006_v41, %v7453_v0 }
 0x11f   :  { %12928 = vst [vmem:[#allocation243_spill] sm:$0xff] %v9120_v43  ;;  %12929 = vst [vmem:[#allocation244_spill] sm:$0xff] %v9124_v4  ;;  %v3221_v35 = vrot.slane %v3045_v30, %v7335_v45  ;;  %v9132_v17 = vadd.f32 %v88_v33, %v8925_v56  ;;  %v9136_v42 = vmul.f32 %v7359_v8, %v7300_v26  ;;  %v9138_v54 = vpop.eup %6720 }
 0x120   :  { %12930 = vst [vmem:[#allocation245_spill] sm:$0xff] %v9128_v32  ;;  %12931 = vst [vmem:[#allocation246_spill] sm:$0xff] %v9138_v54  ;;  %v3066_v27 = vrot.slane %v3038_v50, %v7285_v15  ;;  %v3069_v2 = vcombine.high %v3059_v55, %v3059_v55  ;;  %v9141_v43 = vadd.f32 %v88_v33, %v85_v13  ;;  %v9145_v41 = vpop.eup %6722  ;;  %v12937_v50 = vld [vmem:[#allocation13_spill] sm:$0xff] }
 0x121   :  { %v9143_v4 = vadd.f32 %v88_v33, %v86_v34  ;;  %12933 = vst [vmem:[#allocation248_spill] sm:$0xff] %v9145_v41  ;;  %v3068_v32 = vcombine.high %v3052_v11, %v3052_v11  ;;  %v3225_v30 = vrot.slane %v3059_v55, %v7335_v45  ;;  %v9148_v56 = vadd.f32 %v88_v33, %v87_v38  ;;  %v9154_v44 = vpop.eup %6724 }
 0x122   :  { %v9152_v8 = vmul.f32 %v12935_v1, %v7294_v24  ;;  %12936 = vst [vmem:[#allocation12_spill] sm:$0xff] %v9154_v44  ;;  %v3070_v54 = vcombine.high %v3066_v27, %v3066_v27  ;;  %v3229_v15 = vrot.slane %v3067_v12, %v7335_v45  ;;  %v9159_v34 = vmul.f32 %v12935_v1, %v7300_v26  ;;  %v9165_v55 = vpop.eup %6726 }
 0x123   :  { %12932 = vst [vmem:[#allocation247_spill] sm:$0xff] %v9143_v4  ;;  %12934 = vst [vmem:[#allocation249_spill] sm:$0xff] %v9148_v56  ;;  %v9163_v13 = vmul.f32 %v12937_v50, %v7290_v22  ;;  %v3378_v33 = vsub.f32 %v9012_v6, %v3221_v35  ;;  %v3379_v38 = vsub.f32 %v9015_v21, %v3221_v35  ;;  %v9174_v12 = vpop.eup %6728 }
 0x124   :  { %12938 = vst [vmem:[#allocation13_spill] sm:$0xff] %v9165_v55  ;;  %v3380_v41 = vsub.f32 %v9018_v37, %v3221_v35  ;;  %v9172_v44 = vmul.f32 %v12937_v50, %v7292_v23  ;;  %12939 = vst [vmem:[#allocation250_spill] sm:$0xff] %v9174_v12  ;;  %v9177_v1 = vrot.slane %v3069_v2, %v7335_v45  ;;  %v9186_v21 = vpop.eup %6730 }
 0x125   :  { %v9180_v5 = vrot.slane %v3052_v11, %v7335_v45  ;;  %v9183_v55 = vrot.slane %v3066_v27, %v7335_v45  ;;  %v3381_v6 = vsub.f32 %v9023_v59, %v3221_v35  ;;  %12943 = vst [vmem:[#allocation254_spill] sm:$0xff] %v9186_v21  ;;  %v9189_v37 = vrot.slane %v3068_v32, %v7335_v45  ;;  %v9196_v25 = vpop.eup %6732 }
 0x126   :  { %12940 = vst [vmem:[#allocation251_spill] sm:$0xff] %v9177_v1  ;;  %v9192_v14 = vrot.slane %v3070_v54, %v7335_v45  ;;  %v3382_v12 = vsub.f32 %v9026_v52, %v3225_v30  ;;  %v3383_v2 = vsub.f32 %v9029_v29, %v3225_v30  ;;  %12946 = vst [vmem:[#allocation257_spill] sm:$0xff] %v9196_v25  ;;  %v3510_v45 = vmul.f32 1.442695, %v3380_v41 }
 0x127   :  { %12941 = vst [vmem:[#allocation252_spill] sm:$0xff] %v9180_v5  ;;  %12942 = vst [vmem:[#allocation253_spill] sm:$0xff] %v9183_v55  ;;  %v3384_v11 = vsub.f32 %v9032_v48, %v3225_v30  ;;  %v3385_v27 = vsub.f32 %v9035_v60, %v3225_v30  ;;  %v3386_v59 = vsub.f32 %v9038_v19, %v3229_v15  ;;  %v3508_v55 = vmul.f32 1.442695, %v3379_v38  ;;  %v9203_v54 = vpop.eup %6734 }
 0x128   :  { %12944 = vst [vmem:[#allocation255_spill] sm:$0xff] %v9189_v37  ;;  %12945 = vst [vmem:[#allocation256_spill] sm:$0xff] %v9192_v14  ;;  %v3387_v35 = vsub.f32 %v9041_v61, %v3229_v15  ;;  %v3388_v32 = vsub.f32 %v9044_v20, %v3229_v15  ;;  %v3506_v37 = vmul.f32 1.442695, %v3378_v33  ;;  %v3389_v52 = vsub.f32 %v9047_v36, %v3229_v15  ;;  %v12976_v14 = vld [vmem:[#allocation48_spill] sm:$0xff] }
 0x129   :  { %12947 = vst [vmem:[#allocation258_spill] sm:$0xff] %v9203_v54  ;;  %v3390_v29 = vsub.f32 %v9052_v58, %v9177_v1  ;;  %v3391_v48 = vsub.f32 %v9055_v53, %v9177_v1  ;;  %v3512_v60 = vmul.f32 1.442695, %v3381_v6  ;;  %v3392_v19 = vsub.f32 %v9058_v28, %v9177_v1  ;;  %v12979_v1 = vld [vmem:[#allocation49_spill] sm:$0xff] }
 0x12a   :  { %v3394_v61 = vsub.f32 %v9066_v51, %v9180_v5  ;;  %6736 = vpow2.f32 %v3506_v37  ;;  %v3514_v20 = vmul.f32 1.442695, %v3382_v12  ;;  %v3395_v41 = vsub.f32 %v9069_v47, %v9180_v5 }
 0x12b   :  { %v3396_v36 = vsub.f32 %v9074_v49, %v9180_v5  ;;  %6738 = vpow2.f32 %v3508_v55  ;;  %v3516_v58 = vmul.f32 1.442695, %v3383_v2  ;;  %v3518_v30 = vmul.f32 1.442695, %v3384_v11  ;;  %v12950_v11 = vld [vmem:[#allocation14_spill] sm:$0xff] }
 0x12c   :  { %6740 = vpow2.f32 %v3510_v45  ;;  %v3520_v53 = vmul.f32 1.442695, %v3385_v27  ;;  %v9220_v15 = vmul.f32 %v12937_v50, %v7294_v24  ;;  %v3522_v28 = vmul.f32 1.442695, %v3386_v59  ;;  %v12951_v59 = vld [vmem:[#allocation25_spill] sm:$0xff]  ;;  %v12953_v45 = vld [vmem:[#allocation26_spill] sm:$0xff] }
 0x12d   :  { %6742 = vpow2.f32 %v3512_v60  ;;  %v3524_v51 = vmul.f32 1.442695, %v3387_v35  ;;  %v3526_v33 = vmul.f32 1.442695, %v3388_v32  ;;  %v3528_v38 = vmul.f32 1.442695, %v3389_v52 }
 0x12e   :  { %6744 = vpow2.f32 %v3514_v20  ;;  %v3530_v12 = vmul.f32 1.442695, %v3390_v29  ;;  %v3532_v47 = vmul.f32 1.442695, %v3391_v48  ;;  %v9222_v6 = vmul.f32 1.442695, %v3392_v19 }
 0x12f   :  { %6746 = vpow2.f32 %v3516_v58  ;;  %v3538_v49 = vmul.f32 1.442695, %v3394_v61  ;;  %v3540_v55 = vmul.f32 1.442695, %v3395_v41  ;;  %v9224_v37 = vmul.f32 1.442695, %v3396_v36 }
 0x130   :  { %12948 = vst [vmem:[#allocation259_spill] sm:$0xff] %v9222_v6  ;;  %6748 = vpow2.f32 %v3518_v30  ;;  %v9228_v2 = vmul.f32 %v12937_v50, %v7300_v26  ;;  %v1091_v27 = vsub.f32 %v12950_v11, %v7531_v18  ;;  %v12952_v35 = vld [vmem:[#allocation15_spill] sm:$0xff]  ;;  %v12955_v48 = vld [vmem:[#allocation21_spill] sm:$0xff]  ;;  %v12956_v19 = vld [vmem:[#allocation22_spill] sm:$0xff]  ;;  %v1099_v50 = vsub.f32 %v9136_v42, %v12953_v45 }
 0x131   :  { %12949 = vst [vmem:[#allocation260_spill] sm:$0xff] %v9224_v37  ;;  %6750 = vpow2.f32 %v3520_v53  ;;  %v1095_v32 = vsub.f32 %v12952_v35, %v12951_v59  ;;  %v12954_v52 = vld [vmem:[#allocation19_spill] sm:$0xff]  ;;  %v1097_v60 = vsub.f32 %v12955_v48, %v12953_v45  ;;  %v1098_v61 = vsub.f32 %v12956_v19, %v12953_v45  ;;  %v12959_v36 = vld [vmem:[#allocation24_spill] sm:$0xff]  ;;  %v12962_v19 = vld [vmem:[#allocation34_spill] sm:$0xff] }
 0x132   :  { %v1096_v29 = vsub.f32 %v12954_v52, %v12953_v45  ;;  %6752 = vpow2.f32 %v3522_v28  ;;  %v12957_v20 = vld [vmem:[#allocation27_spill] sm:$0xff]  ;;  %v12960_v28 = vld [vmem:[#allocation28_spill] sm:$0xff]  ;;  %v1330_v35 = vmul.f32 1.442695, %v1091_v27  ;;  %v12971_v59 = vld [vmem:[#allocation29_spill] sm:$0xff]  ;;  %v1703_v5 = vsel %vm93_vm0, %v12976_v14, 0.0 }
 0x133   :  { %v12958_v41 = vld [vmem:[#allocation23_spill] sm:$0xff]  ;;  %6754 = vpow2.f32 %v3524_v51  ;;  %v1101_v58 = vsub.f32 %v12959_v36, %v12957_v20  ;;  %v1102_v30 = vsub.f32 %v9152_v8, %v12957_v20  ;;  %v1103_v53 = vsub.f32 %v9159_v34, %v12957_v20  ;;  %v12965_v27 = vld [vmem:[#allocation36_spill] sm:$0xff] }
 0x134   :  { %v1100_v18 = vsub.f32 %v12958_v41, %v12957_v20  ;;  %6756 = vpow2.f32 %v3526_v33  ;;  %v1104_v11 = vsub.f32 %v9163_v13, %v12960_v28  ;;  %v1338_v45 = vmul.f32 1.442695, %v1095_v32  ;;  %v12966_v32 = vld [vmem:[#allocation37_spill] sm:$0xff]  ;;  %v12973_v37 = vld [vmem:[#allocation44_spill] sm:$0xff] }
 0x135   :  { %6758 = vpow2.f32 %v3528_v38  ;;  %v1340_v8 = vmul.f32 1.442695, %v1096_v29  ;;  %v1342_v52 = vmul.f32 1.442695, %v1097_v60  ;;  %v1344_v34 = vmul.f32 1.442695, %v1098_v61 }
 0x136   :  { %6760 = vpow2.f32 %v3530_v12  ;;  %v1346_v13 = vmul.f32 1.442695, %v1099_v50  ;;  %v1348_v48 = vmul.f32 1.442695, %v1100_v18  ;;  %v1676_v20 = vsel %vm93_vm0, %v12962_v19, 0.0  ;;  %v12964_v38 = vld [vmem:[#allocation35_spill] sm:$0xff] }
 0x137   :  { %v9258_v33 = vpop.eup %6736  ;;  %6762 = vpow2.f32 %v3532_v47  ;;  %v1677_v36 = vsel %vm93_vm0, %v12964_v38, 0.0  ;;  %v1679_v12 = vsel %vm93_vm0, %v12965_v27, 0.0  ;;  %v1681_v29 = vsel %vm93_vm0, %v12966_v32, 0.0  ;;  %v12968_v61 = vld [vmem:[#allocation38_spill] sm:$0xff]  ;;  %v12969_v18 = vld [vmem:[#allocation40_spill] sm:$0xff] }
 0x138   :  { %12961 = vst [vmem:[#allocation14_spill] sm:$0xff] %v9258_v33  ;;  %v9262_v41 = vpop.eup %6738  ;;  %6764 = vpow2.f32 %v3538_v49  ;;  %v1678_v47 = vadd.f32 %v1677_v36, %v1676_v20  ;;  %v1689_v50 = vsel %vm93_vm0, %v12968_v61, 0.0  ;;  %v1690_v51 = vsel %vm93_vm0, %v12969_v18, 0.0  ;;  %v12975_v20 = vld [vmem:[#allocation46_spill] sm:$0xff] }
 0x139   :  { %12963 = vst [vmem:[#allocation25_spill] sm:$0xff] %v9262_v41  ;;  %v9270_v60 = vpop.eup %6740  ;;  %6766 = vpow2.f32 %v3540_v55  ;;  %v1691_v42 = vadd.f32 %v1690_v51, %v1689_v50  ;;  %v12972_v41 = vld [vmem:[#allocation41_spill] sm:$0xff]  ;;  %v1694_v6 = vsel %vm93_vm0, %v12973_v37, 0.0  ;;  %v1702_v36 = vsel %vm93_vm0, %v12975_v20, 0.0 }
 0x13a   :  { %12967 = vst [vmem:[#allocation15_spill] sm:$0xff] %v9270_v60  ;;  %v9276_v49 = vpop.eup %6742  ;;  %6768 = vpow2.f32 %v12971_v59  ;;  %v1692_v33 = vsel %vm93_vm0, %v12972_v41, 0.0  ;;  %v1680_v55 = vadd.f32 %v1679_v12, %v1678_v47  ;;  %v12978_v59 = vld [vmem:[#allocation30_spill] sm:$0xff]  ;;  %v1704_v50 = vadd.f32 %v1703_v5, %v1702_v36  ;;  %v12981_v47 = vld [vmem:[#allocation52_spill] sm:$0xff] }
 0x13b   :  { %12970 = vst [vmem:[#allocation26_spill] sm:$0xff] %v9276_v49  ;;  %v9283_v60 = vpop.eup %6744  ;;  %6770 = vpow2.f32 %v1330_v35  ;;  %v1693_v51 = vadd.f32 %v1692_v33, %v1691_v42  ;;  %v1705_v54 = vsel %vm93_vm0, %v12979_v1, 0.0  ;;  %v1350_v35 = vmul.f32 1.442695, %v1101_v58 }
 0x13c   :  { %12974 = vst [vmem:[#allocation19_spill] sm:$0xff] %v9283_v60  ;;  %v9289_v49 = vpop.eup %6746  ;;  %6772 = vpow2.f32 %v12978_v59  ;;  %v1682_v12 = vadd.f32 %v1681_v29, %v1680_v55  ;;  %v1707_v60 = vsel %vm93_vm0, %v12981_v47, 0.0  ;;  %v1352_v39 = vmul.f32 1.442695, %v1102_v30  ;;  %v12985_v29 = vld [vmem:[#allocation53_spill] sm:$0xff] }
 0x13d   :  { %12977 = vst [vmem:[#allocation21_spill] sm:$0xff] %v9289_v49  ;;  %v9294_v25 = vpop.eup %6748  ;;  %6774 = vpow2.f32 %v1338_v45  ;;  %v1695_v49 = vadd.f32 %v1694_v6, %v1693_v51  ;;  %v1706_v63 = vadd.f32 %v1705_v54, %v1704_v50  ;;  %v1354_v5 = vmul.f32 1.442695, %v1103_v53  ;;  %v12987_v6 = vld [vmem:[#allocation54_spill] sm:$0xff]  ;;  %v12990_v51 = vld [vmem:[#allocation57_spill] sm:$0xff] }
 0x13e   :  { %12980 = vst [vmem:[#allocation22_spill] sm:$0xff] %v9294_v25  ;;  %v9298_v21 = vpop.eup %6750  ;;  %6776 = vpow2.f32 %v1340_v8  ;;  %v1356_v42 = vmul.f32 1.442695, %v1104_v11  ;;  %v1683_v33 = vrot.slane %v1682_v12, 4  ;;  %v1715_v55 = vsel %vm93_vm0, %v12985_v29, 0.0  ;;  %v12988_v8 = vld [vmem:[#allocation55_spill] sm:$0xff] }
 0x13f   :  { %12982 = vst [vmem:[#allocation27_spill] sm:$0xff] %v9298_v21  ;;  %v9300_v59 = vpop.eup %6752  ;;  %6778 = vpow2.f32 %v1342_v52  ;;  %v1696_v58 = vrot.slane %v1695_v49, 4  ;;  %v1708_v45 = vadd.f32 %v1707_v60, %v1706_v63  ;;  %v1716_v54 = vsel %vm93_vm0, %v12987_v6, 0.0 }
 0x140   :  { %12983 = vst [vmem:[#allocation23_spill] sm:$0xff] %v9300_v59  ;;  %v9302_v36 = vpop.eup %6754  ;;  %6780 = vpow2.f32 %v1344_v34  ;;  %v1684_v30 = vadd.f32 %v1683_v33, %v1682_v12  ;;  %v1728_v53 = vsel %vm93_vm0, %v12988_v8, 0.0  ;;  %v1729_v63 = vsel %vm93_vm0, %v12990_v51, 0.0 }
 0x141   :  { %12984 = vst [vmem:[#allocation24_spill] sm:$0xff] %v9302_v36  ;;  %v9306_v25 = vpop.eup %6756  ;;  %6782 = vpow2.f32 %v1346_v13  ;;  %v1697_v52 = vadd.f32 %v1696_v58, %v1695_v49  ;;  %v1709_v34 = vrot.slane %v1708_v45, 4  ;;  %v12992_v13 = vsub.f32 %v9172_v44, %v12960_v28 }
 0x142   :  { %12986 = vst [vmem:[#allocation28_spill] sm:$0xff] %v9306_v25  ;;  %v9312_v11 = vpop.eup %6758  ;;  %6784 = vpow2.f32 %v1348_v48  ;;  %v12993_v12 = vsub.f32 %v9220_v15, %v12960_v28  ;;  %v1685_v25 = vrot.slane %v1684_v30, 2  ;;  %v12995_v48 = vsub.f32 %v9228_v2, %v12960_v28 }
 0x143   :  { %12989 = vst [vmem:[#allocation34_spill] sm:$0xff] %v9312_v11  ;;  %v9316_v60 = vpop.eup %6760  ;;  %6786 = vpow2.f32 %v1350_v35  ;;  %v1358_v50 = vmul.f32 1.442695, %v12992_v13  ;;  %v1698_v58 = vrot.slane %v1697_v52, 2  ;;  %v1710_v11 = vadd.f32 %v1709_v34, %v1708_v45 }
 0x144   :  { %12991 = vst [vmem:[#allocation35_spill] sm:$0xff] %v9316_v60  ;;  %v1360_v33 = vmul.f32 1.442695, %v12993_v12  ;;  %v9324_v36 = vpop.eup %6762  ;;  %6788 = vpow2.f32 %v1352_v39  ;;  %v1362_v49 = vmul.f32 1.442695, %v12995_v48  ;;  %v1686_v35 = vadd.f32 %v1685_v25, %v1684_v30 }
 0x145   :  { %12994 = vst [vmem:[#allocation36_spill] sm:$0xff] %v9324_v36  ;;  %v9329_v60 = vpop.eup %6764  ;;  %6790 = vpow2.f32 %v1354_v5  ;;  %v1717_v44 = vadd.f32 %v1716_v54, %v1715_v55  ;;  %v1730_v13 = vadd.f32 %v1729_v63, %v1728_v53  ;;  %v1699_v15 = vadd.f32 %v1698_v58, %v1697_v52 }
 0x146   :  { %12996 = vst [vmem:[#allocation37_spill] sm:$0xff] %v9329_v60  ;;  %v9331_v59 = vpop.eup %6766  ;;  %6792 = vpow2.f32 %v1356_v42  ;;  %v1711_v12 = vrot.slane %v1710_v11, 2  ;;  %v9335_v39 = vmul.f32 %v12962_v19, %v9132_v17  ;;  %v9339_v2 = vmul.f32 %v12964_v38, %v9141_v43 }
 0x147   :  { %12997 = vst [vmem:[#allocation38_spill] sm:$0xff] %v9331_v59  ;;  %v6769_v36 = vpop.eup %6768  ;;  %6794 = vpow2.f32 %v1358_v50  ;;  %v9343_v25 = vmul.f32 %v12965_v27, %v9143_v4  ;;  %v9347_v28 = vmul.f32 %v12966_v32, %v9148_v56  ;;  %v9352_v45 = vmul.f32 %v12968_v61, %v9132_v17 }
 0x148   :  { %v6771_v5 = vpop.eup %6770  ;;  %6796 = vpow2.f32 %v1360_v33  ;;  %v1712_v42 = vadd.f32 %v1711_v12, %v1710_v11  ;;  %v1718_v19 = vsel %vm93_vm0, %v6769_v36, 0.0  ;;  %v1687_v38 = vrot.slane %v1686_v35, 1 }
 0x149   :  { %v9354_v55 = vpop.eup %6772  ;;  %6798 = vpow2.f32 %v1362_v49  ;;  %v1719_v30 = vadd.f32 %v1718_v19, %v1717_v44  ;;  %v1720_v27 = vsel %vm93_vm0, %v6771_v5, 0.0  ;;  %v1700_v32 = vrot.slane %v1699_v15, 1 }
 0x14a   :  { %v9357_v54 = vpop.eup %6774  ;;  %v1731_v53 = vsel %vm93_vm0, %v9354_v55, 0.0  ;;  %v9363_v11 = vmul.f32 %v12969_v18, %v9141_v43  ;;  %v9367_v61 = vmul.f32 %v12972_v41, %v9143_v4  ;;  %v9375_v33 = vmul.f32 %v12973_v37, %v9148_v56 }
 0x14b   :  { %v9369_v52 = vpop.eup %6776  ;;  %v1721_v34 = vadd.f32 %v1720_v27, %v1719_v30  ;;  %v1732_v63 = vadd.f32 %v1731_v53, %v1730_v13  ;;  %v1733_v50 = vsel %vm93_vm0, %v9357_v54, 0.0  ;;  %v1713_v49 = vrot.slane %v1712_v42, 1 }
 0x14c   :  { %v6779_v48 = vpop.eup %6778  ;;  %v1741_v18 = vsel %vm93_vm0, %v9369_v52, 0.0  ;;  %v9381_v41 = vmul.f32 %v12975_v20, %v9132_v17  ;;  %v9385_v58 = vmul.f32 %v12976_v14, %v9141_v43  ;;  %v9387_v13 = vadd.f32 %v1687_v38, %v1686_v35 }
 0x14d   :  { %v6781_v44 = vpop.eup %6780  ;;  %v1722_v12 = vrot.slane %v1721_v34, 4  ;;  %v1734_v19 = vadd.f32 %v1733_v50, %v1732_v63  ;;  %v1742_v37 = vsel %vm93_vm0, %v6779_v48, 0.0  ;;  %v9390_v27 = vadd.f32 %v1700_v32, %v1699_v15 }
 0x14e   :  { %v6783_v30 = vpop.eup %6782  ;;  %v1743_v53 = vadd.f32 %v1742_v37, %v1741_v18  ;;  %v1744_v59 = vsel %vm93_vm0, %v6781_v44, 0.0  ;;  %v9395_v20 = vmul.f32 %v12979_v1, %v9143_v4  ;;  %v9400_v38 = vmul.f32 %v12981_v47, %v9148_v56 }
 0x14f   :  { %v6785_v60 = vpop.eup %6784  ;;  %v1723_v14 = vadd.f32 %v1722_v12, %v1721_v34  ;;  %v1735_v21 = vrot.slane %v1734_v19, 4  ;;  %v1746_v35 = vsel %vm93_vm0, %v6783_v30, 0.0  ;;  %v9402_v50 = vadd.f32 %v1713_v49, %v1712_v42 }
 0x150   :  { %v6787_v63 = vpop.eup %6786  ;;  %v1745_v15 = vadd.f32 %v1744_v59, %v1743_v53  ;;  %v1754_v32 = vsel %vm93_vm0, %v6785_v60, 0.0  ;;  %v9407_v18 = vmul.f32 %v12985_v29, %v9132_v17  ;;  %v9412_v31 = vmul.f32 %v12987_v6, %v9141_v43 }
 0x151   :  { %v6789_v1 = vpop.eup %6788  ;;  %v1724_v37 = vrot.slane %v1723_v14, 2  ;;  %v1736_v34 = vadd.f32 %v1735_v21, %v1734_v19  ;;  %v1755_v12 = vsel %vm93_vm0, %v6787_v63, 0.0  ;;  %v9416_v49 = vmul.f32 %v6769_v36, %v9143_v4 }
 0x152   :  { %v6791_v47 = vpop.eup %6790  ;;  %v1747_v9 = vadd.f32 %v1746_v35, %v1745_v15  ;;  %v1756_v42 = vadd.f32 %v1755_v12, %v1754_v32  ;;  %v1757_v59 = vsel %vm93_vm0, %v6789_v1, 0.0  ;;  %v9420_v21 = vmul.f32 %v6771_v5, %v9148_v56 }
 0x153   :  { %v6793_v53 = vpop.eup %6792  ;;  %v1725_v29 = vadd.f32 %v1724_v37, %v1723_v14  ;;  %v1737_v46 = vrot.slane %v1736_v34, 2  ;;  %v1759_v57 = vsel %vm93_vm0, %v6791_v47, 0.0  ;;  %v9425_v35 = vmul.f32 %v12988_v8, %v9132_v17 }
 0x154   :  { %v6795_v19 = vpop.eup %6794  ;;  %v1748_v7 = vrot.slane %v1747_v9, 4  ;;  %v1758_v6 = vadd.f32 %v1757_v59, %v1756_v42  ;;  %v1767_v23 = vsel %vm93_vm0, %v6793_v53, 0.0  ;;  %v9430_v37 = vmul.f32 %v12990_v51, %v9141_v43 }
 0x155   :  { %v6797_v15 = vpop.eup %6796  ;;  %v1726_v36 = vrot.slane %v1725_v29, 1  ;;  %v1738_v32 = vadd.f32 %v1737_v46, %v1736_v34  ;;  %v1768_v14 = vsel %vm93_vm0, %v6795_v19, 0.0  ;;  %v1894_v8 = vmul.f32 %v9354_v55, %v9143_v4 }
 0x156   :  { %v6799_v5 = vpop.eup %6798  ;;  %v1749_v12 = vadd.f32 %v1748_v7, %v1747_v9  ;;  %v1760_v22 = vadd.f32 %v1759_v57, %v1758_v6  ;;  %v1769_v24 = vadd.f32 %v1768_v14, %v1767_v23  ;;  %v1770_v42 = vsel %vm93_vm0, %v6797_v15, 0.0 }
 0x157   :  { %v1739_v59 = vrot.slane %v1738_v32, 1  ;;  %v1772_v26 = vsel %vm93_vm0, %v6799_v5, 0.0  ;;  %v9438_v46 = vmul.f32 %v9357_v54, %v9148_v56  ;;  %v9442_v51 = vmul.f32 %v9369_v52, %v9132_v17 }
 0x158   :  { %v1761_v34 = vrot.slane %v1760_v22, 4  ;;  %v1771_v10 = vadd.f32 %v1770_v42, %v1769_v24  ;;  %v9445_v23 = vmul.f32 %v6779_v48, %v9141_v43  ;;  %v9447_v57 = vadd.f32 %v1726_v36, %v1725_v29 }
 0x159   :  { %v9450_v7 = vmul.f32 %v6781_v44, %v9143_v4  ;;  %v9453_v9 = vmul.f32 %v6783_v30, %v9148_v56  ;;  %v9456_v55 = vmul.f32 %v6785_v60, %v9132_v17  ;;  %v1750_v54 = vrot.slane %v1749_v12, 2 }
 0x15a   :  { %v1773_v24 = vadd.f32 %v1772_v26, %v1771_v10  ;;  %v9459_v6 = vmul.f32 %v6787_v63, %v9141_v43  ;;  %v9462_v52 = vmul.f32 %v6789_v1, %v9143_v4  ;;  %v9464_v48 = vadd.f32 %v1739_v59, %v1738_v32 }
 0x15b   :  { %v2220_v44 = vsel %vm93_vm0, %v9335_v39, 0.0  ;;  %v2221_v30 = vsel %vm93_vm0, %v9339_v2, 0.0  ;;  %v2223_v60 = vsel %vm93_vm0, %v9343_v25, 0.0  ;;  %v1762_v29 = vadd.f32 %v1761_v34, %v1760_v22 }
 0x15c   :  { %v1774_v36 = vrot.slane %v1773_v24, 4  ;;  %v9473_v26 = vmul.f32 %v6791_v47, %v9148_v56  ;;  %v2222_v10 = vadd.f32 %v2221_v30, %v2220_v44  ;;  %v9476_v63 = vmul.f32 %v6793_v53, %v9132_v17 }
 0x15d   :  { %v2225_v1 = vsel %vm93_vm0, %v9347_v28, 0.0  ;;  %v2233_v39 = vsel %vm93_vm0, %v9352_v45, 0.0  ;;  %v2234_v2 = vsel %vm93_vm0, %v9363_v11, 0.0  ;;  %v9485_v22 = vmul.f32 %v6795_v19, %v9141_v43 }
 0x15e   :  { %v1775_v32 = vadd.f32 %v1774_v36, %v1773_v24  ;;  %v2224_v25 = vadd.f32 %v2223_v60, %v2222_v10  ;;  %v2236_v47 = vsel %vm93_vm0, %v9367_v61, 0.0  ;;  %v9489_v14 = vadd.f32 %v1750_v54, %v1749_v12 }
 0x15f   :  { %v2235_v53 = vadd.f32 %v2234_v2, %v2233_v39  ;;  %v2246_v28 = vsel %vm93_vm0, %v9381_v41, 0.0  ;;  %v2247_v45 = vsel %vm93_vm0, %v9385_v58, 0.0  ;;  %v1763_v42 = vrot.slane %v1762_v29, 2 }
 0x160   :  { %v2226_v59 = vadd.f32 %v2225_v1, %v2224_v25  ;;  %v2238_v11 = vsel %vm93_vm0, %v9375_v33, 0.0  ;;  %v2248_v19 = vadd.f32 %v2247_v45, %v2246_v28  ;;  %v2249_v24 = vsel %vm93_vm0, %v9395_v20, 0.0 }
 0x161   :  { %v2237_v34 = vadd.f32 %v2236_v47, %v2235_v53  ;;  %v2251_v61 = vsel %vm93_vm0, %v9400_v38, 0.0  ;;  %v2259_v12 = vsel %vm93_vm0, %v9407_v18, 0.0  ;;  %v1776_v41 = vrot.slane %v1775_v32, 2 }
 0x162   :  { %v9504_v54 = vmul.f32 %v6797_v15, %v9143_v4  ;;  %v2227_v58 = vrot.slane %v2226_v59, 4  ;;  %v2250_v44 = vadd.f32 %v2249_v24, %v2248_v19  ;;  %v9507_v30 = vmul.f32 %v6799_v5, %v9148_v56 }
 0x163   :  { %v2239_v33 = vadd.f32 %v2238_v11, %v2237_v34  ;;  %v2260_v60 = vsel %vm93_vm0, %v9412_v31, 0.0  ;;  %v2262_v20 = vsel %vm93_vm0, %v9416_v49, 0.0  ;;  %v9513_v38 = vadd.f32 %v1763_v42, %v1762_v29  ;;  %v4886_v31 = vld [vmem:[%s12436_s3 + $0x50] sm:$0xff] }
 0x164   :  { %v2228_v36 = vadd.f32 %v2227_v58, %v2226_v59  ;;  %v2252_v18 = vadd.f32 %v2251_v61, %v2250_v44  ;;  %v2261_v10 = vadd.f32 %v2260_v60, %v2259_v12  ;;  %v2264_v15 = vsel %vm93_vm0, %v9420_v21, 0.0  ;;  %6388 = vmatprep.mubr.msk.f32.mxu0 %vm4900_vm1, %v4886_v31  ;;  %v4887_v21 = vld [vmem:[%s12436_s3 + $0x58] sm:$0xff] }
 0x165   :  { %v2240_v1 = vrot.slane %v2239_v33, 4  ;;  %v2272_v5 = vsel %vm93_vm0, %v9425_v35, 0.0  ;;  %v2273_v39 = vsel %vm93_vm0, %v9430_v37, 0.0  ;;  %v9524_v49 = vadd.f32 %v1776_v41, %v1775_v32  ;;  %6389 = vmatmul.mubr.msk.f32.gmra.mxu0 %vm4900_vm1, %v4887_v21 }
 0x166   :  { %v2253_v29 = vrot.slane %v2252_v18, 4  ;;  %v2263_v2 = vadd.f32 %v2262_v20, %v2261_v10  ;;  %v2275_v25 = vsel %vm93_vm0, %v1894_v8, 0.0  ;;  %v2229_v35 = vrot.slane %v2228_v36, 2 }
 0x167   :  { %v2241_v47 = vadd.f32 %v2240_v1, %v2239_v33  ;;  %v2274_v53 = vadd.f32 %v2273_v39, %v2272_v5  ;;  %v2285_v37 = vsel %vm93_vm0, %v9442_v51, 0.0  ;;  %v2277_v45 = vsel %vm93_vm0, %v9438_v46, 0.0 }
 0x168   :  { %v2254_v32 = vadd.f32 %v2253_v29, %v2252_v18  ;;  %v2265_v28 = vadd.f32 %v2264_v15, %v2263_v2  ;;  %v2286_v8 = vsel %vm93_vm0, %v9445_v23, 0.0  ;;  %v2288_v19 = vsel %vm93_vm0, %v9450_v7, 0.0 }
 0x169   :  { %v2242_v42 = vrot.slane %v2241_v47, 2  ;;  %v2276_v59 = vadd.f32 %v2275_v25, %v2274_v53  ;;  %v2287_v11 = vadd.f32 %v2286_v8, %v2285_v37  ;;  %v1752_v34 = vrot.slane %v9489_v14, 1 }
 0x16a   :  { %v2255_v24 = vrot.slane %v2254_v32, 2  ;;  %v2266_v51 = vrot.slane %v2265_v28, 4  ;;  %v2290_v61 = vsel %vm93_vm0, %v9453_v9, 0.0  ;;  %v2230_v12 = vadd.f32 %v2229_v35, %v2228_v36 }
 0x16b   :  { %v2278_v41 = vadd.f32 %v2277_v45, %v2276_v59  ;;  %v2289_v58 = vadd.f32 %v2288_v19, %v2287_v11  ;;  %v2298_v46 = vsel %vm93_vm0, %v9456_v55, 0.0  ;;  %v1765_v23 = vrot.slane %v9513_v38, 1 }
 0x16c   :  { %v2243_v44 = vadd.f32 %v2242_v42, %v2241_v47  ;;  %v2267_v33 = vadd.f32 %v2266_v51, %v2265_v28  ;;  %v2299_v7 = vsel %vm93_vm0, %v9459_v6, 0.0  ;;  %v1778_v60 = vrot.slane %v9524_v49, 1 }
 0x16d   :  { %v2279_v20 = vrot.slane %v2278_v41, 4  ;;  %v2291_v18 = vadd.f32 %v2290_v61, %v2289_v58  ;;  %v2300_v10 = vadd.f32 %v2299_v7, %v2298_v46  ;;  %v2256_v1 = vadd.f32 %v2255_v24, %v2254_v32 }
 0x16e   :  { %v2268_v9 = vrot.slane %v2267_v33, 2  ;;  %v2301_v36 = vsel %vm93_vm0, %v9462_v52, 0.0  ;;  %v2303_v55 = vsel %vm93_vm0, %v9473_v26, 0.0  ;;  %v2231_v15 = vrot.slane %v2230_v12, 1 }
 0x16f   :  { %v2280_v5 = vadd.f32 %v2279_v20, %v2278_v41  ;;  %v2292_v39 = vrot.slane %v2291_v18, 4  ;;  %v2302_v31 = vadd.f32 %v2301_v36, %v2300_v10  ;;  %v2244_v6 = vrot.slane %v2243_v44, 1  ;;  %v7159_v10 = vld [vmem:[%s12434_s1 + $0x58] sm:$0xff] }
 0x170   :  { %v2269_v29 = vadd.f32 %v2268_v9, %v2267_v33  ;;  %v2311_v2 = vsel %vm93_vm0, %v9476_v63, 0.0  ;;  %v2312_v25 = vsel %vm93_vm0, %v9485_v22, 0.0  ;;  %v2257_v47 = vrot.slane %v2256_v1, 1 }
 0x171   :  { %v2281_v52 = vrot.slane %v2280_v5, 2  ;;  %v2293_v21 = vadd.f32 %v2292_v39, %v2291_v18  ;;  %v2304_v35 = vadd.f32 %v2303_v55, %v2302_v31  ;;  %v2313_v26 = vadd.f32 %v2312_v25, %v2311_v2 }
 0x172   :  { %v2314_v53 = vsel %vm93_vm0, %v9504_v54, 0.0  ;;  %v2316_v37 = vsel %vm93_vm0, %v9507_v30, 0.0  ;;  %6800 = vrcp.f32 %v9387_v13  ;;  %v1753_v45 = vadd.f32 %v1752_v34, %v9489_v14 }
 0x173   :  { %v2282_v63 = vadd.f32 %v2281_v52, %v2280_v5  ;;  %v2294_v32 = vrot.slane %v2293_v21, 2  ;;  %v2305_v22 = vrot.slane %v2304_v35, 4  ;;  %v2315_v28 = vadd.f32 %v2314_v53, %v2313_v26 }
 0x174   :  { %v1766_v8 = vadd.f32 %v1765_v23, %v9513_v38  ;;  %v2270_v42 = vrot.slane %v2269_v29, 1  ;;  %6802 = vrcp.f32 %v9390_v27  ;;  %v1779_v13 = vadd.f32 %v1778_v60, %v9524_v49  ;;  %v7157_v60 = vld [vmem:[%s12434_s1 + $0x48] sm:$0xff] }
 0x175   :  { %v2283_v54 = vrot.slane %v2282_v63, 1  ;;  %v2295_v59 = vadd.f32 %v2294_v32, %v2293_v21  ;;  %v2306_v30 = vadd.f32 %v2305_v22, %v2304_v35  ;;  %v2317_v11 = vadd.f32 %v2316_v37, %v2315_v28  ;;  %v13006_v35 = vld [vmem:[#allocation33_spill] sm:$0xff]  ;;  %v13007_v32 = vld [vmem:[#allocation39_spill] sm:$0xff] }
 0x176   :  { %v2232_v19 = vadd.f32 %v2231_v15, %v2230_v12  ;;  %v2245_v24 = vadd.f32 %v2244_v6, %v2243_v44  ;;  %6804 = vrcp.f32 %v9402_v50  ;;  %v9575_v14 = vadd.f32 %v2257_v47, %v2256_v1  ;;  %v13001_v15 = vld [vmem:[#allocation31_spill] sm:$0xff] }
 0x177   :  { %v2296_v38 = vrot.slane %v2295_v59, 1  ;;  %v2307_v34 = vrot.slane %v2306_v30, 2  ;;  %v2318_v51 = vrot.slane %v2317_v11, 4  ;;  %v9577_v61 = vadd.f32 %v2270_v42, %v2269_v29  ;;  %v13005_v29 = vld [vmem:[#allocation32_spill] sm:$0xff]  ;;  %v13009_v42 = vld [vmem:[#allocation42_spill] sm:$0xff] }
 0x178   :  { %6806 = vrcp.f32 %v9447_v57  ;;  %v9581_v27 = vstv %s9553_s22  ;;  %v9584_v41 = vstv %s9555_s23  ;;  %v9586_v49 = vadd.f32 %v2283_v54, %v2282_v63  ;;  %v7156_v57 = vld [vmem:[%s12434_s1 + $0x40] sm:$0xff] }
 0x179   :  { %12998 = vst [vmem:[#allocation40_spill] sm:$0xff] %v9581_v27  ;;  %12999 = vst [vmem:[#allocation29_spill] sm:$0xff] %v9584_v41  ;;  %v2308_v12 = vadd.f32 %v2307_v34, %v2306_v30  ;;  %v2319_v58 = vadd.f32 %v2318_v51, %v2317_v11  ;;  %6808 = vrcp.f32 %v9464_v48  ;;  %v9589_v50 = vadd.f32 %v2296_v38, %v2295_v59  ;;  %v7158_v48 = vld [vmem:[%s12434_s1 + $0x50] sm:$0xff]  ;;  %v13010_v59 = vld [vmem:[#allocation58_spill] sm:$0xff] }
 0x17a   :  { %6810 = vrcp.f32 %v1753_v45  ;;  %v2482_v46 = vstv %s9561_s24  ;;  %v2487_v23 = vstv %s9568_s25  ;;  %v9611_v5 = vmul.f32 %v13001_v15, %v7461_v16  ;;  %v13011_v30 = vld [vmem:[#allocation43_spill] sm:$0xff] }
 0x17b   :  { %v2309_v44 = vrot.slane %v2308_v12, 1  ;;  %v2320_v33 = vrot.slane %v2319_v58, 2  ;;  %6812 = vrcp.f32 %v1766_v8  ;;  %v2483_v7 = vmul.f32 %v7156_v57, %v2482_v46  ;;  %v13008_v8 = vld [vmem:[#allocation56_spill] sm:$0xff]  ;;  %v13013_v51 = vld [vmem:[#allocation47_spill] sm:$0xff] }
 0x17c   :  { %6814 = vrcp.f32 %v1779_v13  ;;  %v2484_v20 = vmul.f32 %v7157_v60, %v2482_v46  ;;  %v2485_v18 = vmul.f32 %v7158_v48, %v2482_v46  ;;  %v2486_v1 = vmul.f32 %v7159_v10, %v2482_v46  ;;  %v13012_v13 = vld [vmem:[#allocation45_spill] sm:$0xff]  ;;  %v13014_v46 = vld [vmem:[#allocation59_spill] sm:$0xff] }
 0x17d   :  { %v9605_v9 = vadd.f32 %v2309_v44, %v2308_v12  ;;  %v2321_v36 = vadd.f32 %v2320_v33, %v2319_v58  ;;  %v9607_v55 = vadd.f32 %v2487_v23, %v2483_v7  ;;  %v9621_v2 = vmul.f32 %v13005_v29, %v7455_v3  ;;  %v13016_v33 = vld [vmem:[#allocation51_spill] sm:$0xff] }
 0x17e   :  { %v9613_v39 = vadd.f32 %v2487_v23, %v2484_v20  ;;  %v9615_v31 = vadd.f32 %v2487_v23, %v2485_v18  ;;  %v9617_v6 = vadd.f32 %v2487_v23, %v2486_v1  ;;  %v9625_v21 = vmul.f32 %v13005_v29, %v7461_v16  ;;  %v13015_v23 = vld [vmem:[#allocation50_spill] sm:$0xff]  ;;  %v13017_v18 = vld [vmem:[#allocation60_spill] sm:$0xff] }
 0x17f   :  { %13000 = vst [vmem:[#allocation41_spill] sm:$0xff] %v9607_v55  ;;  %v6801_v25 = vpop.eup %6800  ;;  %v2322_v52 = vrot.slane %v2321_v36, 1  ;;  %v9629_v26 = vmul.f32 %v13006_v35, %v7451_v62  ;;  %v9633_v47 = vmul.f32 %v13006_v35, %v7453_v0  ;;  %v9637_v37 = vmul.f32 %v13006_v35, %v7455_v3 }
 0x180   :  { %13002 = vst [vmem:[#allocation44_spill] sm:$0xff] %v9613_v39  ;;  %13003 = vst [vmem:[#allocation46_spill] sm:$0xff] %v9615_v31  ;;  %v2380_v53 = vmul.f32 %v6801_v25, %v2232_v19  ;;  %v9641_v63 = vmul.f32 %v13006_v35, %v7461_v16  ;;  %v3489_v22 = vsub.f32 %v13007_v32, %v7764_v40 }
 0x181   :  { %13004 = vst [vmem:[#allocation48_spill] sm:$0xff] %v9617_v6  ;;  %v6803_v28 = vpop.eup %6802  ;;  %v2323_v45 = vadd.f32 %v2322_v52, %v2321_v36  ;;  %v3493_v54 = vsub.f32 %v13009_v42, %v13008_v8  ;;  %v3494_v11 = vsub.f32 %v13011_v30, %v13010_v59  ;;  %v3495_v19 = vsub.f32 %v13012_v13, %v13010_v59 }
 0x182   :  { %v2381_v38 = vmul.f32 %v6803_v28, %v2245_v24  ;;  %v2413_v34 = vmul.f32 %v9581_v27, %v2380_v53  ;;  %v3496_v12 = vsub.f32 %v13013_v51, %v13010_v59  ;;  %v3497_v40 = vsub.f32 %v9611_v5, %v13010_v59 }
 0x183   :  { %v6805_v58 = vpop.eup %6804  ;;  %v3498_v44 = vsub.f32 %v13015_v23, %v13014_v46  ;;  %v3499_v57 = vsub.f32 %v13016_v33, %v13014_v46  ;;  %v3500_v24 = vsub.f32 %v9621_v2, %v13014_v46  ;;  %v3501_v7 = vsub.f32 %v9625_v21, %v13014_v46 }
 0x184   :  { %v2382_v60 = vmul.f32 %v6805_v58, %v9575_v14  ;;  %v2414_v20 = vmul.f32 %v9581_v27, %v2381_v38  ;;  %v2446_v48 = vadd.f32 %v9584_v41, %v2413_v34  ;;  %v3502_v10 = vsub.f32 %v9629_v26, %v13017_v18  ;;  %v13018_v14 = vld [vmem:[#allocation61_spill] sm:$0xff] }
 0x185   :  { %v6807_v1 = vpop.eup %6806  ;;  %v3503_v36 = vsub.f32 %v9633_v47, %v13017_v18  ;;  %v3504_v15 = vsub.f32 %v9637_v37, %v13017_v18  ;;  %v3505_v5 = vsub.f32 %v9641_v63, %v13017_v18  ;;  %6816 = vpow2.f32 %v13018_v14  ;;  %v13019_v47 = vld [vmem:[#allocation62_spill] sm:$0xff] }
 0x186   :  { %v6809_v29 = vpop.eup %6808  ;;  %v2383_v2 = vmul.f32 %v6807_v1, %v9577_v61  ;;  %v2415_v25 = vmul.f32 %v9581_v27, %v2382_v60  ;;  %v2447_v52 = vadd.f32 %v9584_v41, %v2414_v20  ;;  %v3728_v21 = vmul.f32 1.442695, %v3489_v22 }
 0x187   :  { %v6811_v35 = vpop.eup %6810  ;;  %v2384_v26 = vmul.f32 %v6809_v29, %v9586_v49  ;;  %6818 = vpow2.f32 %v13019_v47  ;;  %v3736_v53 = vmul.f32 1.442695, %v3493_v54  ;;  %v3738_v37 = vmul.f32 1.442695, %v3494_v11  ;;  %v13025_v47 = vld [vmem:[#allocation75_spill] sm:$0xff] }
 0x188   :  { %v6813_v32 = vpop.eup %6812  ;;  %v2385_v63 = vmul.f32 %v6811_v35, %v9589_v50  ;;  %v2416_v28 = vmul.f32 %v9581_v27, %v2383_v2  ;;  %v2448_v8 = vadd.f32 %v9584_v41, %v2415_v25  ;;  %v5218_v61 = vsel %vm5190_vm2, %v2447_v52, %v2446_v48  ;;  %v13020_v52 = vld [vmem:[#allocation66_spill] sm:$0xff] }
 0x189   :  { %v6815_v42 = vpop.eup %6814  ;;  %v2386_v59 = vmul.f32 %v6813_v32, %v9605_v9  ;;  %v2417_v22 = vmul.f32 %v9581_v27, %v2384_v26  ;;  %6820 = vpow2.f32 %v3728_v21  ;;  %v3740_v49 = vmul.f32 1.442695, %v3495_v19  ;;  %v13021_v21 = vld [vmem:[#allocation67_spill] sm:$0xff] }
 0x18a   :  { %v2387_v30 = vmul.f32 %v6815_v42, %v2323_v45  ;;  %v2418_v54 = vmul.f32 %v9581_v27, %v2385_v63  ;;  %v2449_v11 = vadd.f32 %v9584_v41, %v2416_v28  ;;  %v5219_v50 = vsel %vm5192_vm3, %v2448_v8, %v5218_v61  ;;  %v13027_v63 = vld [vmem:[#allocation78_spill] sm:$0xff]  ;;  %v13028_v42 = vld [vmem:[#allocation81_spill] sm:$0xff] }
 0x18b   :  { %v2419_v13 = vmul.f32 %v9581_v27, %v2386_v59  ;;  %v2450_v38 = vadd.f32 %v9584_v41, %v2417_v22  ;;  %6822 = vpow2.f32 %v3736_v53  ;;  %v3742_v34 = vmul.f32 1.442695, %v3496_v12 }
 0x18c   :  { %v2420_v51 = vmul.f32 %v9581_v27, %v2387_v30  ;;  %v2451_v9 = vadd.f32 %v9584_v41, %v2418_v54  ;;  %v5220_v58 = vsel %vm5194_vm4, %v2449_v11, %v5219_v50  ;;  %6824 = vpow2.f32 %v3738_v37  ;;  %v13026_v37 = vld [vmem:[#allocation77_spill] sm:$0xff]  ;;  %v13030_v54 = vld [vmem:[#allocation83_spill] sm:$0xff]  ;;  %v13031_v50 = vld [vmem:[#allocation84_spill] sm:$0xff] }
 0x18d   :  { %v2452_v45 = vadd.f32 %v9584_v41, %v2419_v13  ;;  %v5221_v19 = vsel %vm5196_vm5, %v2450_v38, %v5220_v58  ;;  %6826 = vpow2.f32 %v3740_v49  ;;  %v3744_v46 = vmul.f32 1.442695, %v3497_v40  ;;  %v13029_v49 = vld [vmem:[#allocation82_spill] sm:$0xff] }
 0x18e   :  { %v2453_v23 = vadd.f32 %v9584_v41, %v2420_v51  ;;  %v5222_v33 = vsel %vm5198_vm6, %v2451_v9, %v5221_v19  ;;  %6828 = vpow2.f32 %v3742_v34  ;;  %v3746_v60 = vmul.f32 1.442695, %v3498_v44  ;;  %v13032_v58 = vld [vmem:[#allocation86_spill] sm:$0xff] }
 0x18f   :  { %v5223_v12 = vsel %vm5200_vm7, %v2452_v45, %v5222_v33  ;;  %6830 = vpow2.f32 %v3744_v46  ;;  %v3748_v20 = vmul.f32 1.442695, %v3499_v57  ;;  %v3750_v48 = vmul.f32 1.442695, %v3500_v24  ;;  %v13022_v24 = vld [vmem:[#allocation69_spill] sm:$0xff]  ;;  %v13033_v19 = vld [vmem:[#allocation90_spill] sm:$0xff] }
 0x190   :  { %v5224_v18 = vsel %vm5202_vm8, %v2453_v23, %v5223_v12  ;;  %6832 = vpow2.f32 %v3746_v60  ;;  %v3752_v1 = vmul.f32 1.442695, %v3501_v7  ;;  %v3754_v14 = vmul.f32 1.442695, %v3502_v10  ;;  %v13023_v10 = vld [vmem:[#allocation71_spill] sm:$0xff] }
 0x191   :  { %6409 = vmatprep.subr.mxu1 %v5224_v18  ;;  %6834 = vpow2.f32 %v3748_v20  ;;  %v3756_v29 = vmul.f32 1.442695, %v3503_v36  ;;  %v3758_v40 = vmul.f32 1.442695, %v3504_v15  ;;  %v3760_v2 = vmul.f32 1.442695, %v3505_v5 }
 0x192   :  { %v9701_v25 = vpop.eup %6816  ;;  %6836 = vpow2.f32 %v3750_v48  ;;  %v4074_v44 = vsel %vm93_vm0, %v13020_v52, 0.0  ;;  %v4075_v57 = vsel %vm93_vm0, %v13021_v21, 0.0  ;;  %v4077_v35 = vsel %vm93_vm0, %v13022_v24, 0.0  ;;  %6410 = vmatpush3.msra.mxu1 %v5224_v18  ;;  %v13024_v15 = vld [vmem:[#allocation73_spill] sm:$0xff] }
 0x193   :  { %6838 = vpow2.f32 %v3752_v1  ;;  %v4076_v7 = vadd.f32 %v4075_v57, %v4074_v44  ;;  %v4079_v36 = vsel %vm93_vm0, %v13023_v10, 0.0  ;;  %v4087_v5 = vsel %vm93_vm0, %v13024_v15, 0.0 }
 0x194   :  { %v9713_v26 = vpop.eup %6818  ;;  %6840 = vpow2.f32 %v3754_v14  ;;  %v4088_v53 = vsel %vm93_vm0, %v13025_v47, 0.0  ;;  %v4090_v32 = vsel %vm93_vm0, %v13026_v37, 0.0  ;;  %v4092_v28 = vsel %vm93_vm0, %v13027_v63, 0.0  ;;  %v13034_v14 = vld [vmem:[#allocation92_spill] sm:$0xff] }
 0x195   :  { %6842 = vpow2.f32 %v3756_v29  ;;  %v4078_v8 = vadd.f32 %v4077_v35, %v4076_v7  ;;  %v4089_v61 = vadd.f32 %v4088_v53, %v4087_v5  ;;  %v4100_v59 = vsel %vm93_vm0, %v13028_v42, 0.0 }
 0x196   :  { %v9723_v22 = vpop.eup %6820  ;;  %6844 = vpow2.f32 %v3758_v40  ;;  %v4101_v30 = vsel %vm93_vm0, %v13029_v49, 0.0  ;;  %v4103_v11 = vsel %vm93_vm0, %v13030_v54, 0.0  ;;  %v4105_v13 = vsel %vm93_vm0, %v13031_v50, 0.0  ;;  %v13035_v40 = vld [vmem:[#allocation93_spill] sm:$0xff] }
 0x197   :  { %6846 = vpow2.f32 %v3760_v2  ;;  %v4080_v38 = vadd.f32 %v4079_v36, %v4078_v8  ;;  %v4091_v34 = vadd.f32 %v4090_v32, %v4089_v61  ;;  %v4102_v51 = vadd.f32 %v4101_v30, %v4100_v59 }
 0x198   :  { %v9731_v9 = vpop.eup %6822  ;;  %v4113_v45 = vsel %vm93_vm0, %v13032_v58, 0.0  ;;  %v4114_v46 = vsel %vm93_vm0, %v13033_v19, 0.0  ;;  %v4116_v23 = vsel %vm93_vm0, %v9701_v25, 0.0  ;;  %v4118_v33 = vsel %vm93_vm0, %v9723_v22, 0.0 }
 0x199   :  { %v9741_v60 = vpop.eup %6824  ;;  %v4081_v12 = vrot.slane %v4080_v38, 4  ;;  %v4093_v20 = vadd.f32 %v4092_v28, %v4091_v34  ;;  %v4104_v48 = vadd.f32 %v4103_v11, %v4102_v51  ;;  %v4115_v18 = vadd.f32 %v4114_v46, %v4113_v45 }
 0x19a   :  { %v9743_v1 = vpop.eup %6826  ;;  %v4126_v29 = vsel %vm93_vm0, %v13034_v14, 0.0  ;;  %v4127_v2 = vsel %vm93_vm0, %v13035_v40, 0.0  ;;  %v4129_v44 = vsel %vm93_vm0, %v9713_v26, 0.0  ;;  %v4131_v57 = vsel %vm93_vm0, %v9731_v9, 0.0 }
 0x19b   :  { %v9753_v35 = vpop.eup %6828  ;;  %v4082_v7 = vadd.f32 %v4081_v12, %v4080_v38  ;;  %v4094_v36 = vrot.slane %v4093_v20, 4  ;;  %v4106_v5 = vadd.f32 %v4105_v13, %v4104_v48  ;;  %v4117_v53 = vadd.f32 %v4116_v23, %v4115_v18 }
 0x19c   :  { %v9755_v32 = vpop.eup %6830  ;;  %v4128_v28 = vadd.f32 %v4127_v2, %v4126_v29  ;;  %v4139_v8 = vsel %vm93_vm0, %v9741_v60, 0.0  ;;  %v4140_v61 = vsel %vm93_vm0, %v9743_v1, 0.0  ;;  %v4142_v59 = vsel %vm93_vm0, %v9753_v35, 0.0 }
 0x19d   :  { %v9763_v30 = vpop.eup %6832  ;;  %v4083_v11 = vrot.slane %v4082_v7, 2  ;;  %v4095_v34 = vadd.f32 %v4094_v36, %v4093_v20  ;;  %v4107_v38 = vrot.slane %v4106_v5, 4  ;;  %v4119_v51 = vadd.f32 %v4118_v33, %v4117_v53 }
 0x19e   :  { %v9765_v13 = vpop.eup %6834  ;;  %v4130_v45 = vadd.f32 %v4129_v44, %v4128_v28  ;;  %v4141_v46 = vadd.f32 %v4140_v61, %v4139_v8  ;;  %v4144_v23 = vsel %vm93_vm0, %v9755_v32, 0.0  ;;  %v4152_v12 = vsel %vm93_vm0, %v9763_v30, 0.0 }
 0x19f   :  { %v9771_v48 = vpop.eup %6836  ;;  %v4084_v18 = vadd.f32 %v4083_v11, %v4082_v7  ;;  %v4096_v29 = vrot.slane %v4095_v34, 2  ;;  %v4108_v2 = vadd.f32 %v4107_v38, %v4106_v5  ;;  %v4120_v0 = vrot.slane %v4119_v51, 4 }
 0x1a0   :  { %v9773_v62 = vpop.eup %6838  ;;  %v4132_v20 = vadd.f32 %v4131_v57, %v4130_v45  ;;  %v4143_v33 = vadd.f32 %v4142_v59, %v4141_v46  ;;  %v4153_v44 = vsel %vm93_vm0, %v9765_v13, 0.0  ;;  %v4155_v36 = vsel %vm93_vm0, %v9771_v48, 0.0 }
 0x1a1   :  { %v9779_v53 = vpop.eup %6840  ;;  %v4085_v28 = vrot.slane %v4084_v18, 1  ;;  %v4097_v8 = vadd.f32 %v4096_v29, %v4095_v34  ;;  %v4109_v61 = vrot.slane %v4108_v2, 2  ;;  %v4121_v3 = vadd.f32 %v4120_v0, %v4119_v51 }
 0x1a2   :  { %v9781_v7 = vpop.eup %6842  ;;  %v4133_v5 = vrot.slane %v4132_v20, 4  ;;  %v4145_v11 = vadd.f32 %v4144_v23, %v4143_v33  ;;  %v4154_v38 = vadd.f32 %v4153_v44, %v4152_v12  ;;  %v4157_v57 = vsel %vm93_vm0, %v9773_v62, 0.0 }
 0x1a3   :  { %v9785_v59 = vpop.eup %6844  ;;  %v9787_v45 = vadd.f32 %v4085_v28, %v4084_v18  ;;  %v4098_v46 = vrot.slane %v4097_v8, 1  ;;  %v4110_v16 = vadd.f32 %v4109_v61, %v4108_v2  ;;  %v4122_v41 = vrot.slane %v4121_v3, 2 }
 0x1a4   :  { %v9789_v27 = vpop.eup %6846  ;;  %v4134_v34 = vadd.f32 %v4133_v5, %v4132_v20  ;;  %v4146_v29 = vrot.slane %v4145_v11, 4  ;;  %v4156_v0 = vadd.f32 %v4155_v36, %v4154_v38  ;;  %v4165_v51 = vsel %vm93_vm0, %v9779_v53, 0.0 }
 0x1a5   :  { %v9793_v23 = vadd.f32 %v4098_v46, %v4097_v8  ;;  %v4111_v12 = vrot.slane %v4110_v16, 1  ;;  %v4123_v33 = vadd.f32 %v4122_v41, %v4121_v3  ;;  %v4166_v44 = vsel %vm93_vm0, %v9781_v7, 0.0 }
 0x1a6   :  { %v4135_v18 = vrot.slane %v4134_v34, 2  ;;  %v4147_v28 = vadd.f32 %v4146_v29, %v4145_v11  ;;  %v4158_v56 = vadd.f32 %v4157_v57, %v4156_v0  ;;  %v4167_v2 = vadd.f32 %v4166_v44, %v4165_v51 }
 0x1a7   :  { %v9797_v61 = vadd.f32 %v4111_v12, %v4110_v16  ;;  %v4124_v4 = vrot.slane %v4123_v33, 1  ;;  %v4168_v20 = vsel %vm93_vm0, %v9785_v59, 0.0  ;;  %v4170_v36 = vsel %vm93_vm0, %v9789_v27, 0.0 }
 0x1a8   :  { %v4136_v8 = vadd.f32 %v4135_v18, %v4134_v34  ;;  %v4148_v5 = vrot.slane %v4147_v28, 2  ;;  %v4159_v38 = vrot.slane %v4158_v56, 4  ;;  %v4169_v3 = vadd.f32 %v4168_v20, %v4167_v2 }
 0x1a9   :  { %v9803_v41 = vadd.f32 %v4124_v4, %v4123_v33  ;;  %v4274_v11 = vmul.f32 %v13020_v52, %v9607_v55  ;;  %v4275_v16 = vmul.f32 %v13021_v21, %v9613_v39  ;;  %v4276_v57 = vmul.f32 %v13022_v24, %v9615_v31 }
 0x1aa   :  { %v4137_v46 = vrot.slane %v4136_v8, 1  ;;  %v4149_v29 = vadd.f32 %v4148_v5, %v4147_v28  ;;  %v4160_v0 = vadd.f32 %v4159_v38, %v4158_v56  ;;  %v4171_v51 = vadd.f32 %v4170_v36, %v4169_v3 }
 0x1ab   :  { %v4277_v34 = vmul.f32 %v13023_v10, %v9617_v6  ;;  %v4278_v4 = vmul.f32 %v13024_v15, %v9607_v55  ;;  %v4279_v12 = vmul.f32 %v13025_v47, %v9613_v39  ;;  %v4280_v52 = vmul.f32 %v13026_v37, %v9615_v31 }
 0x1ac   :  { %v9819_v21 = vadd.f32 %v4137_v46, %v4136_v8  ;;  %v4150_v33 = vrot.slane %v4149_v29, 1  ;;  %v4161_v24 = vrot.slane %v4160_v0, 2  ;;  %v4172_v44 = vrot.slane %v4171_v51, 4 }
 0x1ad   :  { %v4281_v56 = vmul.f32 %v13027_v63, %v9617_v6  ;;  %v4282_v10 = vmul.f32 %v13028_v42, %v9607_v55  ;;  %v4283_v15 = vmul.f32 %v13029_v49, %v9613_v39  ;;  %v4284_v47 = vmul.f32 %v13030_v54, %v9615_v31 }
 0x1ae   :  { %v9829_v18 = vadd.f32 %v4150_v33, %v4149_v29  ;;  %v4162_v37 = vadd.f32 %v4161_v24, %v4160_v0  ;;  %v4173_v28 = vadd.f32 %v4172_v44, %v4171_v51  ;;  %v4285_v2 = vmul.f32 %v13031_v50, %v9617_v6 }
 0x1af   :  { %v4286_v20 = vmul.f32 %v13032_v58, %v9607_v55  ;;  %v4287_v63 = vmul.f32 %v13033_v19, %v9613_v39  ;;  %v4288_v42 = vmul.f32 %v9701_v25, %v9615_v31  ;;  %v4289_v49 = vmul.f32 %v9723_v22, %v9617_v6 }
 0x1b0   :  { %v4163_v54 = vrot.slane %v4162_v37, 1  ;;  %v4174_v36 = vrot.slane %v4173_v28, 2  ;;  %v4290_v8 = vmul.f32 %v13034_v14, %v9607_v55  ;;  %v4291_v50 = vmul.f32 %v13035_v40, %v9613_v39 }
 0x1b1   :  { %v4292_v58 = vmul.f32 %v9713_v26, %v9615_v31  ;;  %v4293_v19 = vmul.f32 %v9731_v9, %v9617_v6  ;;  %v4294_v25 = vmul.f32 %v9741_v60, %v9607_v55  ;;  %v4295_v22 = vmul.f32 %v9743_v1, %v9613_v39 }
 0x1b2   :  { %v9853_v5 = vadd.f32 %v4163_v54, %v4162_v37  ;;  %v4175_v38 = vadd.f32 %v4174_v36, %v4173_v28  ;;  %v4296_v14 = vmul.f32 %v9753_v35, %v9615_v31  ;;  %v4297_v40 = vmul.f32 %v9755_v32, %v9617_v6 }
 0x1b3   :  { %v4298_v26 = vmul.f32 %v9763_v30, %v9607_v55  ;;  %v4299_v9 = vmul.f32 %v9765_v13, %v9613_v39  ;;  %v9865_v60 = vmul.f32 %v9771_v48, %v9615_v31  ;;  %v9869_v1 = vmul.f32 %v9773_v62, %v9617_v6 }
 0x1b4   :  { %v4176_v3 = vrot.slane %v4175_v38, 1  ;;  %v9873_v35 = vmul.f32 %v9779_v53, %v9607_v55  ;;  %v9877_v32 = vmul.f32 %v9781_v7, %v9613_v39  ;;  %v9881_v30 = vmul.f32 %v9785_v59, %v9615_v31 }
 0x1b5   :  { %v9885_v13 = vmul.f32 %v9789_v27, %v9617_v6  ;;  %v4618_v62 = vsel %vm93_vm0, %v4274_v11, 0.0  ;;  %v4619_v48 = vsel %vm93_vm0, %v4275_v16, 0.0  ;;  %v4621_v46 = vsel %vm93_vm0, %v4276_v57, 0.0  ;;  %v4898_v11 = vld [vmem:[%s12436_s3 + $0xb0] sm:$0xff] }
 0x1b6   :  { %v9890_v53 = vadd.f32 %v4176_v3, %v4175_v38  ;;  %v4620_v29 = vadd.f32 %v4619_v48, %v4618_v62  ;;  %v4623_v7 = vsel %vm93_vm0, %v4277_v34, 0.0  ;;  %v4631_v0 = vsel %vm93_vm0, %v4278_v4, 0.0  ;;  %6406 = vmatprep.mubr.msk.f32.mxu1 %vm4900_vm1, %v4898_v11  ;;  %v4899_v4 = vld [vmem:[%s12436_s3 + $0xb8] sm:$0xff] }
 0x1b7   :  { %v4632_v59 = vsel %vm93_vm0, %v4279_v12, 0.0  ;;  %v4634_v51 = vsel %vm93_vm0, %v4280_v52, 0.0  ;;  %v4636_v27 = vsel %vm93_vm0, %v4281_v56, 0.0  ;;  %v4644_v33 = vsel %vm93_vm0, %v4282_v10, 0.0  ;;  %6407 = vmatmul.mubr.msk.f32.gmra.mxu1 %vm4900_vm1, %v4899_v4 }
 0x1b8   :  { %v4622_v16 = vadd.f32 %v4621_v46, %v4620_v29  ;;  %v4633_v57 = vadd.f32 %v4632_v59, %v4631_v0  ;;  %v4645_v24 = vsel %vm93_vm0, %v4283_v15, 0.0  ;;  %v4647_v34 = vsel %vm93_vm0, %v4284_v47, 0.0 }
 0x1b9   :  { %v4646_v12 = vadd.f32 %v4645_v24, %v4644_v33  ;;  %v4649_v52 = vsel %vm93_vm0, %v4285_v2, 0.0  ;;  %v4657_v44 = vsel %vm93_vm0, %v4286_v20, 0.0  ;;  %v4658_v56 = vsel %vm93_vm0, %v4287_v63, 0.0 }
 0x1ba   :  { %v4624_v10 = vadd.f32 %v4623_v7, %v4622_v16  ;;  %v4635_v37 = vadd.f32 %v4634_v51, %v4633_v57  ;;  %v4659_v15 = vadd.f32 %v4658_v56, %v4657_v44  ;;  %v4660_v47 = vsel %vm93_vm0, %v4288_v42, 0.0 }
 0x1bb   :  { %v4648_v28 = vadd.f32 %v4647_v34, %v4646_v12  ;;  %v4662_v54 = vsel %vm93_vm0, %v4289_v49, 0.0  ;;  %v4670_v36 = vsel %vm93_vm0, %v4290_v8, 0.0  ;;  %v4671_v38 = vsel %vm93_vm0, %v4291_v50, 0.0 }
 0x1bc   :  { %v4625_v3 = vrot.slane %v4624_v10, 4  ;;  %v4637_v2 = vadd.f32 %v4636_v27, %v4635_v37  ;;  %v4661_v62 = vadd.f32 %v4660_v47, %v4659_v15  ;;  %v4672_v20 = vadd.f32 %v4671_v38, %v4670_v36 }
 0x1bd   :  { %v4650_v48 = vadd.f32 %v4649_v52, %v4648_v28  ;;  %v4673_v63 = vsel %vm93_vm0, %v4292_v58, 0.0  ;;  %v4675_v46 = vsel %vm93_vm0, %v4293_v19, 0.0  ;;  %v4683_v29 = vsel %vm93_vm0, %v4294_v25, 0.0 }
 0x1be   :  { %v4626_v7 = vadd.f32 %v4625_v3, %v4624_v10  ;;  %v4638_v42 = vrot.slane %v4637_v2, 4  ;;  %v4663_v0 = vadd.f32 %v4662_v54, %v4661_v62  ;;  %v4674_v59 = vadd.f32 %v4673_v63, %v4672_v20 }
 0x1bf   :  { %v4651_v49 = vrot.slane %v4650_v48, 4  ;;  %v4684_v8 = vsel %vm93_vm0, %v4295_v22, 0.0  ;;  %v4686_v50 = vsel %vm93_vm0, %v4296_v14, 0.0  ;;  %v4688_v51 = vsel %vm93_vm0, %v4297_v40, 0.0 }
 0x1c0   :  { %v4627_v27 = vrot.slane %v4626_v7, 2  ;;  %v4639_v33 = vadd.f32 %v4638_v42, %v4637_v2  ;;  %v4664_v11 = vrot.slane %v4663_v0, 4  ;;  %v4676_v16 = vadd.f32 %v4675_v46, %v4674_v59 }
 0x1c1   :  { %v4652_v58 = vadd.f32 %v4651_v49, %v4650_v48  ;;  %v4685_v57 = vadd.f32 %v4684_v8, %v4683_v29  ;;  %v4696_v19 = vsel %vm93_vm0, %v4298_v26, 0.0  ;;  %v4697_v25 = vsel %vm93_vm0, %v4299_v9, 0.0 }
 0x1c2   :  { %v4628_v24 = vadd.f32 %v4627_v27, %v4626_v7  ;;  %v4640_v34 = vrot.slane %v4639_v33, 2  ;;  %v4665_v4 = vadd.f32 %v4664_v11, %v4663_v0  ;;  %v4677_v12 = vrot.slane %v4676_v16, 4 }
 0x1c3   :  { %v4653_v22 = vrot.slane %v4652_v58, 2  ;;  %v4687_v14 = vadd.f32 %v4686_v50, %v4685_v57  ;;  %v4698_v52 = vadd.f32 %v4697_v25, %v4696_v19  ;;  %v4699_v40 = vsel %vm93_vm0, %v9865_v60, 0.0  ;;  %v13040_v19 = vld [vmem:[#allocation10_spill] sm:$0xff] }
 0x1c4   :  { %v4629_v44 = vrot.slane %v4628_v24, 1  ;;  %v4641_v56 = vadd.f32 %v4640_v34, %v4639_v33  ;;  %v4666_v10 = vrot.slane %v4665_v4, 2  ;;  %v4678_v26 = vadd.f32 %v4677_v12, %v4676_v16  ;;  %v13042_v12 = vld [vmem:[#allocation8_spill] sm:$0xff] }
 0x1c5   :  { %v4654_v37 = vadd.f32 %v4653_v22, %v4652_v58  ;;  %v4689_v9 = vadd.f32 %v4688_v51, %v4687_v14  ;;  %v4700_v15 = vadd.f32 %v4699_v40, %v4698_v52  ;;  %v4701_v47 = vsel %vm93_vm0, %v9869_v1, 0.0 }
 0x1c6   :  { %v9931_v28 = vadd.f32 %v4629_v44, %v4628_v24  ;;  %v4642_v54 = vrot.slane %v4641_v56, 1  ;;  %v4667_v36 = vadd.f32 %v4666_v10, %v4665_v4  ;;  %v4679_v38 = vrot.slane %v4678_v26, 2  ;;  %v13046_v10 = vld [vmem:[#allocation68_spill] sm:$0xff] }
 0x1c7   :  { %v4655_v3 = vrot.slane %v4654_v37, 1  ;;  %v4690_v2 = vrot.slane %v4689_v9, 4  ;;  %v4702_v60 = vadd.f32 %v4701_v47, %v4700_v15  ;;  %v4709_v62 = vsel %vm93_vm0, %v9873_v35, 0.0 }
 0x1c8   :  { %v9935_v20 = vadd.f32 %v4642_v54, %v4641_v56  ;;  %v4668_v48 = vrot.slane %v4667_v36, 1  ;;  %v4680_v63 = vadd.f32 %v4679_v38, %v4678_v26  ;;  %v4710_v46 = vsel %vm93_vm0, %v9877_v32, 0.0  ;;  %v13050_v38 = vld [vmem:[#allocation72_spill] sm:$0xff] }
 0x1c9   :  { %v9939_v1 = vadd.f32 %v4655_v3, %v4654_v37  ;;  %v4691_v29 = vadd.f32 %v4690_v2, %v4689_v9  ;;  %v4703_v7 = vrot.slane %v4702_v60, 4  ;;  %v4711_v42 = vadd.f32 %v4710_v46, %v4709_v62  ;;  %v13047_v37 = vld [vmem:[#allocation85_spill] sm:$0xff]  ;;  %v13048_v9 = vld [vmem:[#allocation70_spill] sm:$0xff] }
 0x1ca   :  { %v9941_v0 = vadd.f32 %v4668_v48, %v4667_v36  ;;  %v4681_v59 = vrot.slane %v4680_v63, 1  ;;  %v4712_v35 = vsel %vm93_vm0, %v9881_v30, 0.0  ;;  %v4714_v49 = vsel %vm93_vm0, %v9885_v13, 0.0  ;;  %v13038_v30 = vld [vmem:[#allocation11_spill] sm:$0xff]  ;;  %v13049_v36 = vld [vmem:[#allocation88_spill] sm:$0xff]  ;;  %v13051_v2 = vld [vmem:[#allocation74_spill] sm:$0xff] }
 0x1cb   :  { %v4692_v8 = vrot.slane %v4691_v29, 2  ;;  %v4704_v50 = vadd.f32 %v4703_v7, %v4702_v60  ;;  %v4713_v51 = vadd.f32 %v4712_v35, %v4711_v42  ;;  %6848 = vrcp.f32 %v9787_v45  ;;  %v13039_v13 = vld [vmem:[#allocation63_spill] sm:$0xff]  ;;  %v13041_v45 = vld [vmem:[#allocation64_spill] sm:$0xff]  ;;  %v13053_v48 = vld [vmem:[#allocation89_spill] sm:$0xff] }
 0x1cc   :  { %v9948_v32 = vadd.f32 %v4681_v59, %v4680_v63  ;;  %6850 = vrcp.f32 %v9793_v23  ;;  %v9952_v27 = vstv %s9923_s14  ;;  %v9955_v33 = vstv %s9927_s15  ;;  %v13054_v63 = vld [vmem:[#allocation79_spill] sm:$0xff]  ;;  %s6184_s14 = sshll.u32 %s7200_s13, 4  ;;  %s6185_s14 = int_to_ptr.vmem [resolvable:$true] %s6184_s14 }
 0x1cd   :  { %13036 = vst [vmem:[#allocation30_spill] sm:$0xff] %v9952_v27  ;;  %13037 = vst [vmem:[#allocation49_spill] sm:$0xff] %v9955_v33  ;;  %v4693_v11 = vadd.f32 %v4692_v8, %v4691_v29  ;;  %v4705_v16 = vrot.slane %v4704_v50, 2  ;;  %v4715_v58 = vadd.f32 %v4714_v49, %v4713_v51  ;;  %6852 = vrcp.f32 %v9797_v61  ;;  %v13043_v61 = vld [vmem:[#allocation65_spill] sm:$0xff]  ;;  %v13055_v29 = vld [vmem:[#allocation80_spill] sm:$0xff]  ;;  %s7172_s15 = scalar_lea.vmem %s6185_s14, 128  ;;  %p7177_p6 = scmp.lt.s32.totalorder %s6185_s14, %s6185_s14 }
 0x1ce   :  { %6854 = vrcp.f32 %v9803_v41  ;;  %v579_v57 = vmul.f32 %v13039_v13, %v13038_v30  ;;  %v582_v25 = vmul.f32 %v13041_v45, %v13040_v19  ;;  %v583_v23 = vmul.f32 %v13041_v45, %v13038_v30  ;;  %v13044_v41 = vld [vmem:[#allocation9_spill] sm:$0xff]  ;;  %v13056_v49 = vld [vmem:[#allocation91_spill] sm:$0xff]  ;;  %p7173_p5 = scmp.ne.s32.totalorder %s6185_s14, %s7172_s15  ;;  %p7178_p7 = scmp.lt.s32.totalorder %s7172_s15, %s7172_s15 }
 0x1cf   :  { %v4694_v24 = vrot.slane %v4693_v11, 1  ;;  %v4706_v34 = vadd.f32 %v4705_v16, %v4704_v50  ;;  %v4716_v4 = vrot.slane %v4715_v58, 4  ;;  %6856 = vrcp.f32 %v9819_v21  ;;  %v13057_v16 = vld [vmem:[#allocation94_spill] sm:$0xff] }
 0x1d0   :  { %6858 = vrcp.f32 %v9829_v18  ;;  %v9969_v22 = vmul.f32 %v13043_v61, %v13042_v12  ;;  %v9973_v14 = vmul.f32 %v13043_v61, %v13044_v41  ;;  %v9977_v52 = vmul.f32 %v13043_v61, %v13040_v19  ;;  %v13045_v18 = vld [vmem:[#allocation87_spill] sm:$0xff]  ;;  %p7179_p8 = por %p7178_p7, %p7177_p6 }
 0x1d1   :  { %v4695_v40 = vadd.f32 %v4694_v24, %v4693_v11  ;;  %v4707_v44 = vrot.slane %v4706_v34, 1  ;;  %v4717_v56 = vadd.f32 %v4716_v4, %v4715_v58  ;;  %6860 = vrcp.f32 %v9853_v5  ;;  %v13059_v4 = vld [vmem:[#allocation99_spill] sm:$0xff] }
 0x1d2   :  { %6862 = vrcp.f32 %v9890_v53  ;;  %v9983_v21 = vmul.f32 %v13043_v61, %v13038_v30  ;;  %v1059_v26 = vsub.f32 %v13046_v10, %v13045_v18  ;;  %v1063_v15 = vsub.f32 %v13048_v9, %v13047_v37  ;;  %v13052_v53 = vld [vmem:[#allocation76_spill] sm:$0xff]  ;;  %p7180_p9 = pnand %p7179_p8, %p7173_p5 }
 0x1d3   :  { %v4708_v47 = vadd.f32 %v4707_v44, %v4706_v34  ;;  %v4718_v54 = vrot.slane %v4717_v56, 2  ;;  %v1064_v3 = vsub.f32 %v13050_v38, %v13049_v36  ;;  %v1065_v5 = vsub.f32 %v13051_v2, %v13049_v36 }
 0x1d4   :  { %v1066_v60 = vsub.f32 %v13052_v53, %v13049_v36  ;;  %v1067_v62 = vsub.f32 %v579_v57, %v13049_v36  ;;  %v1068_v46 = vsub.f32 %v13054_v63, %v13053_v48  ;;  %v1069_v7 = vsub.f32 %v13055_v29, %v13053_v48  ;;  %v13058_v57 = vld [vmem:[#allocation95_spill] sm:$0xff] }
 0x1d5   :  { %v4719_v42 = vadd.f32 %v4718_v54, %v4717_v56  ;;  %v1070_v59 = vsub.f32 %v582_v25, %v13053_v48  ;;  %v1071_v35 = vsub.f32 %v583_v23, %v13053_v48  ;;  %v1072_v8 = vsub.f32 %v9969_v22, %v13056_v49 }
 0x1d6   :  { %v1073_v50 = vsub.f32 %v9973_v14, %v13056_v49  ;;  %v1074_v51 = vsub.f32 %v9977_v52, %v13056_v49  ;;  %v1075_v11 = vsub.f32 %v9983_v21, %v13056_v49  ;;  %6864 = vpow2.f32 %v13057_v16  ;;  %v13060_v14 = vld [vmem:[#allocation100_spill] sm:$0xff]  ;;  %v13061_v52 = vld [vmem:[#allocation102_spill] sm:$0xff] }
 0x1d7   :  { %v4720_v58 = vrot.slane %v4719_v42, 1  ;;  %v1266_v13 = vmul.f32 1.442695, %v1059_v26  ;;  %6866 = vpow2.f32 %v13058_v57  ;;  %v1274_v45 = vmul.f32 1.442695, %v1063_v15  ;;  %v13062_v49 = vld [vmem:[#allocation104_spill] sm:$0xff] }
 0x1d8   :  { %v6849_v25 = vpop.eup %6848  ;;  %v1276_v23 = vmul.f32 1.442695, %v1064_v3  ;;  %v1278_v24 = vmul.f32 1.442695, %v1065_v5  ;;  %v1280_v34 = vmul.f32 1.442695, %v1066_v60  ;;  %v10014_v61 = vmul.f32 %v13059_v4, %v9132_v17 }
 0x1d9   :  { %v6851_v44 = vpop.eup %6850  ;;  %v4721_v56 = vadd.f32 %v4720_v58, %v4719_v42  ;;  %v4778_v18 = vmul.f32 %v6849_v25, %v9931_v28  ;;  %6868 = vpow2.f32 %v1266_v13  ;;  %v1282_v10 = vmul.f32 1.442695, %v1067_v62 }
 0x1da   :  { %v6853_v37 = vpop.eup %6852  ;;  %v4779_v26 = vmul.f32 %v6851_v44, %v9935_v20  ;;  %6870 = vpow2.f32 %v1274_v45  ;;  %v1284_v9 = vmul.f32 1.442695, %v1068_v46  ;;  %v1286_v15 = vmul.f32 1.442695, %v1069_v7 }
 0x1db   :  { %v6855_v54 = vpop.eup %6854  ;;  %v4780_v36 = vmul.f32 %v6853_v37, %v9939_v1  ;;  %v4811_v38 = vmul.f32 %v9952_v27, %v4778_v18  ;;  %6872 = vpow2.f32 %v1276_v23  ;;  %v1288_v3 = vmul.f32 1.442695, %v1070_v59 }
 0x1dc   :  { %v6857_v2 = vpop.eup %6856  ;;  %v4781_v5 = vmul.f32 %v6855_v54, %v9941_v0  ;;  %v4812_v28 = vmul.f32 %v9952_v27, %v4779_v26  ;;  %6874 = vpow2.f32 %v1278_v24  ;;  %v1290_v53 = vmul.f32 1.442695, %v1071_v35 }
 0x1dd   :  { %v6859_v60 = vpop.eup %6858  ;;  %v4782_v20 = vmul.f32 %v6857_v2, %v9948_v32  ;;  %v4813_v62 = vmul.f32 %v9952_v27, %v4780_v36  ;;  %v4844_v48 = vadd.f32 %v9955_v33, %v4811_v38  ;;  %6876 = vpow2.f32 %v1280_v34  ;;  %v13064_v2 = vld [vmem:[#allocation108_spill] sm:$0xff] }
 0x1de   :  { %v6861_v1 = vpop.eup %6860  ;;  %v4783_v63 = vmul.f32 %v6859_v60, %v4695_v40  ;;  %v4814_v46 = vmul.f32 %v9952_v27, %v4781_v5  ;;  %v4845_v29 = vadd.f32 %v9955_v33, %v4812_v28  ;;  %6878 = vpow2.f32 %v1282_v10  ;;  %v13065_v28 = vld [vmem:[#allocation110_spill] sm:$0xff]  ;;  %v13066_v60 = vld [vmem:[#allocation111_spill] sm:$0xff] }
 0x1df   :  { %v6863_v0 = vpop.eup %6862  ;;  %v4784_v7 = vmul.f32 %v6861_v1, %v4708_v47  ;;  %v4815_v42 = vmul.f32 %v9952_v27, %v4782_v20  ;;  %v4846_v59 = vadd.f32 %v9955_v33, %v4813_v62  ;;  %6880 = vpow2.f32 %v1284_v9 }
 0x1e0   :  { %v4785_v32 = vmul.f32 %v6863_v0, %v4721_v56  ;;  %v4816_v35 = vmul.f32 %v9952_v27, %v4783_v63  ;;  %v4847_v16 = vadd.f32 %v9955_v33, %v4814_v46  ;;  %v5563_v58 = vsel %vm5190_vm2, %v4845_v29, %v4844_v48  ;;  %v13067_v63 = vld [vmem:[#allocation114_spill] sm:$0xff]  ;;  %v13068_v29 = vld [vmem:[#allocation115_spill] sm:$0xff] }
 0x1e1   :  { %v4817_v40 = vmul.f32 %v9952_v27, %v4784_v7  ;;  %v4848_v13 = vadd.f32 %v9955_v33, %v4815_v42  ;;  %v5564_v57 = vsel %vm5192_vm3, %v4846_v59, %v5563_v58  ;;  %6882 = vpow2.f32 %v1286_v15  ;;  %v13069_v59 = vld [vmem:[#allocation116_spill] sm:$0xff]  ;;  %v13071_v58 = vld [vmem:[#allocation119_spill] sm:$0xff] }
 0x1e2   :  { %v4818_v47 = vmul.f32 %v9952_v27, %v4785_v32  ;;  %v4849_v45 = vadd.f32 %v9955_v33, %v4816_v35  ;;  %v5565_v25 = vsel %vm5194_vm4, %v4847_v16, %v5564_v57  ;;  %6884 = vpow2.f32 %v1288_v3  ;;  %v13070_v35 = vld [vmem:[#allocation117_spill] sm:$0xff] }
 0x1e3   :  { %v10038_v23 = vpop.eup %6864  ;;  %v4850_v24 = vadd.f32 %v9955_v33, %v4817_v40  ;;  %v5566_v34 = vsel %vm5196_vm5, %v4848_v13, %v5565_v25  ;;  %6886 = vpow2.f32 %v1290_v53  ;;  %v1292_v44 = vmul.f32 1.442695, %v1072_v8 }
 0x1e4   :  { %v10045_v56 = vpop.eup %6866  ;;  %v4851_v18 = vadd.f32 %v9955_v33, %v4818_v47  ;;  %v5567_v10 = vsel %vm5198_vm6, %v4849_v45, %v5566_v34  ;;  %v1294_v37 = vmul.f32 1.442695, %v1073_v50  ;;  %v1296_v26 = vmul.f32 1.442695, %v1074_v51  ;;  %v13072_v45 = vld [vmem:[#allocation123_spill] sm:$0xff] }
 0x1e5   :  { %v5568_v9 = vsel %vm5200_vm7, %v4850_v24, %v5567_v10  ;;  %6888 = vpow2.f32 %v1292_v44  ;;  %v1298_v22 = vmul.f32 1.442695, %v1075_v11  ;;  %v1572_v8 = vsel %vm93_vm0, %v13059_v4, 0.0  ;;  %v13063_v4 = vld [vmem:[#allocation106_spill] sm:$0xff] }
 0x1e6   :  { %v10061_v15 = vpop.eup %6868  ;;  %v5569_v54 = vsel %vm5202_vm8, %v4851_v18, %v5568_v9  ;;  %6890 = vpow2.f32 %v1294_v37  ;;  %v1573_v50 = vsel %vm93_vm0, %v13060_v14, 0.0  ;;  %v1575_v51 = vsel %vm93_vm0, %v13061_v52, 0.0  ;;  %v13073_v37 = vld [vmem:[#allocation125_spill] sm:$0xff] }
 0x1e7   :  { %v10068_v36 = vpop.eup %6870  ;;  %6453 = vmatprep.subr.mxu0 %v5569_v54  ;;  %6892 = vpow2.f32 %v1296_v26  ;;  %v1574_v21 = vadd.f32 %v1573_v50, %v1572_v8  ;;  %v1577_v11 = vsel %vm93_vm0, %v13062_v49, 0.0  ;;  %v1585_v38 = vsel %vm93_vm0, %v13063_v4, 0.0  ;;  %v13074_v8 = vld [vmem:[#allocation126_spill] sm:$0xff] }
 0x1e8   :  { %v10074_v3 = vpop.eup %6872  ;;  %6454 = vmatpush3.msra.mxu0 %v5569_v54  ;;  %6894 = vpow2.f32 %v1298_v22  ;;  %v1586_v5 = vsel %vm93_vm0, %v13064_v2, 0.0  ;;  %v1588_v53 = vsel %vm93_vm0, %v13065_v28, 0.0  ;;  %v1590_v20 = vsel %vm93_vm0, %v13066_v60, 0.0 }
 0x1e9   :  { %v10082_v62 = vpop.eup %6874  ;;  %v1576_v48 = vadd.f32 %v1575_v51, %v1574_v21  ;;  %v1587_v1 = vadd.f32 %v1586_v5, %v1585_v38  ;;  %v1598_v46 = vsel %vm93_vm0, %v13067_v63, 0.0  ;;  %v1599_v0 = vsel %vm93_vm0, %v13068_v29, 0.0 }
 0x1ea   :  { %v10088_v7 = vpop.eup %6876  ;;  %v1600_v42 = vadd.f32 %v1599_v0, %v1598_v46  ;;  %v1601_v32 = vsel %vm93_vm0, %v13069_v59, 0.0  ;;  %v1603_v16 = vsel %vm93_vm0, %v13070_v35, 0.0  ;;  %v1611_v40 = vsel %vm93_vm0, %v13071_v58, 0.0 }
 0x1eb   :  { %v10096_v13 = vpop.eup %6878  ;;  %v1578_v57 = vadd.f32 %v1577_v11, %v1576_v48  ;;  %v1589_v47 = vadd.f32 %v1588_v53, %v1587_v1  ;;  %v1612_v25 = vsel %vm93_vm0, %v13072_v45, 0.0  ;;  %v1614_v24 = vsel %vm93_vm0, %v10038_v23, 0.0 }
 0x1ec   :  { %v10102_v34 = vpop.eup %6880  ;;  %v1602_v44 = vadd.f32 %v1601_v32, %v1600_v42  ;;  %v1613_v18 = vadd.f32 %v1612_v25, %v1611_v40  ;;  %v1616_v10 = vsel %vm93_vm0, %v10061_v15, 0.0  ;;  %v1624_v26 = vsel %vm93_vm0, %v13073_v37, 0.0 }
 0x1ed   :  { %v1579_v9 = vrot.slane %v1578_v57, 4  ;;  %v1591_v22 = vadd.f32 %v1590_v20, %v1589_v47  ;;  %v1625_v54 = vsel %vm93_vm0, %v13074_v8, 0.0  ;;  %v1627_v50 = vsel %vm93_vm0, %v10045_v56, 0.0 }
 0x1ee   :  { %v10112_v51 = vpop.eup %6882  ;;  %v1604_v21 = vadd.f32 %v1603_v16, %v1602_v44  ;;  %v1615_v11 = vadd.f32 %v1614_v24, %v1613_v18  ;;  %v1626_v38 = vadd.f32 %v1625_v54, %v1624_v26  ;;  %v1629_v5 = vsel %vm93_vm0, %v10068_v36, 0.0 }
 0x1ef   :  { %v10116_v53 = vpop.eup %6884  ;;  %v1580_v48 = vadd.f32 %v1579_v9, %v1578_v57  ;;  %v1592_v1 = vrot.slane %v1591_v22, 4  ;;  %v1637_v20 = vsel %vm93_vm0, %v10074_v3, 0.0  ;;  %v1638_v46 = vsel %vm93_vm0, %v10082_v62, 0.0 }
 0x1f0   :  { %v10122_v0 = vpop.eup %6886  ;;  %v1605_v42 = vrot.slane %v1604_v21, 4  ;;  %v1617_v32 = vadd.f32 %v1616_v10, %v1615_v11  ;;  %v1628_v16 = vadd.f32 %v1627_v50, %v1626_v38  ;;  %v1639_v40 = vadd.f32 %v1638_v46, %v1637_v20 }
 0x1f1   :  { %v1581_v47 = vrot.slane %v1580_v48, 2  ;;  %v1593_v25 = vadd.f32 %v1592_v1, %v1591_v22  ;;  %v1640_v24 = vsel %vm93_vm0, %v10088_v7, 0.0  ;;  %v1642_v57 = vsel %vm93_vm0, %v10096_v13, 0.0 }
 0x1f2   :  { %v10128_v44 = vpop.eup %6888  ;;  %v1606_v18 = vadd.f32 %v1605_v42, %v1604_v21  ;;  %v1618_v26 = vrot.slane %v1617_v32, 4  ;;  %v1630_v9 = vadd.f32 %v1629_v5, %v1628_v16  ;;  %v1641_v54 = vadd.f32 %v1640_v24, %v1639_v40 }
 0x1f3   :  { %v10130_v33 = vpop.eup %6890  ;;  %v1582_v27 = vadd.f32 %v1581_v47, %v1580_v48  ;;  %v1594_v10 = vrot.slane %v1593_v25, 2  ;;  %v1650_v50 = vsel %vm93_vm0, %v10102_v34, 0.0  ;;  %v1651_v22 = vsel %vm93_vm0, %v10112_v51, 0.0 }
 0x1f4   :  { %v10136_v11 = vpop.eup %6892  ;;  %v1607_v38 = vrot.slane %v1606_v18, 2  ;;  %v1619_v1 = vadd.f32 %v1618_v26, %v1617_v32  ;;  %v1631_v20 = vrot.slane %v1630_v9, 4  ;;  %v1643_v46 = vadd.f32 %v1642_v57, %v1641_v54 }
 0x1f5   :  { %v10138_v21 = vpop.eup %6894  ;;  %v1583_v5 = vrot.slane %v1582_v27, 1  ;;  %v1595_v42 = vadd.f32 %v1594_v10, %v1593_v25  ;;  %v1652_v16 = vadd.f32 %v1651_v22, %v1650_v50  ;;  %v1653_v48 = vsel %vm93_vm0, %v10116_v53, 0.0 }
 0x1f6   :  { %v1608_v40 = vadd.f32 %v1607_v38, %v1606_v18  ;;  %v1620_v47 = vrot.slane %v1619_v1, 2  ;;  %v1632_v24 = vadd.f32 %v1631_v20, %v1630_v9  ;;  %v1644_v6 = vrot.slane %v1643_v46, 4 }
 0x1f7   :  { %v10142_v31 = vadd.f32 %v1583_v5, %v1582_v27  ;;  %v1596_v39 = vrot.slane %v1595_v42, 1  ;;  %v1654_v55 = vadd.f32 %v1653_v48, %v1652_v16  ;;  %v1655_v32 = vsel %vm93_vm0, %v10122_v0, 0.0 }
 0x1f8   :  { %v1609_v57 = vrot.slane %v1608_v40, 1  ;;  %v1621_v26 = vadd.f32 %v1620_v47, %v1619_v1  ;;  %v1633_v54 = vrot.slane %v1632_v24, 2  ;;  %v1645_v41 = vadd.f32 %v1644_v6, %v1643_v46 }
 0x1f9   :  { %v10146_v25 = vadd.f32 %v1596_v39, %v1595_v42  ;;  %v1656_v10 = vadd.f32 %v1655_v32, %v1654_v55  ;;  %v1663_v18 = vsel %vm93_vm0, %v10128_v44, 0.0  ;;  %v1664_v9 = vsel %vm93_vm0, %v10130_v33, 0.0 }
 0x1fa   :  { %v10152_v27 = vadd.f32 %v1609_v57, %v1608_v40  ;;  %v1622_v50 = vrot.slane %v1621_v26, 1  ;;  %v1634_v22 = vadd.f32 %v1633_v54, %v1632_v24  ;;  %v1646_v38 = vrot.slane %v1645_v41, 2  ;;  %v13075_v40 = vld [vmem:[#allocation247_spill] sm:$0xff]  ;;  %v13076_v24 = vld [vmem:[#allocation249_spill] sm:$0xff] }
 0x1fb   :  { %v1657_v20 = vrot.slane %v1656_v10, 4  ;;  %v1665_v5 = vadd.f32 %v1664_v9, %v1663_v18  ;;  %v1666_v1 = vsel %vm93_vm0, %v10136_v11, 0.0  ;;  %v1668_v39 = vsel %vm93_vm0, %v10138_v21, 0.0 }
 0x1fc   :  { %v10158_v55 = vadd.f32 %v1622_v50, %v1621_v26  ;;  %v1635_v6 = vrot.slane %v1634_v22, 1  ;;  %v1647_v46 = vadd.f32 %v1646_v38, %v1645_v41  ;;  %v1845_v42 = vmul.f32 %v13060_v14, %v9141_v43 }
 0x1fd   :  { %v1658_v16 = vadd.f32 %v1657_v20, %v1656_v10  ;;  %v1667_v48 = vadd.f32 %v1666_v1, %v1665_v5  ;;  %v1846_v47 = vmul.f32 %v13061_v52, %v13075_v40  ;;  %v1847_v32 = vmul.f32 %v13062_v49, %v13076_v24 }
 0x1fe   :  { %v10166_v57 = vadd.f32 %v1635_v6, %v1634_v22  ;;  %v1648_v54 = vrot.slane %v1647_v46, 1  ;;  %v1848_v26 = vmul.f32 %v13063_v4, %v9132_v17  ;;  %v1849_v41 = vmul.f32 %v13064_v2, %v9141_v43 }
 0x1ff   :  { %v1659_v18 = vrot.slane %v1658_v16, 2  ;;  %v1669_v9 = vadd.f32 %v1668_v39, %v1667_v48  ;;  %v1850_v14 = vmul.f32 %v13065_v28, %v13075_v40  ;;  %v1851_v52 = vmul.f32 %v13066_v60, %v13076_v24 }
 0x200   :  { %v10176_v10 = vadd.f32 %v1648_v54, %v1647_v46  ;;  %v1852_v49 = vmul.f32 %v13067_v63, %v9132_v17  ;;  %v1853_v50 = vmul.f32 %v13068_v29, %v9141_v43  ;;  %v1854_v4 = vmul.f32 %v13069_v59, %v13075_v40 }
 0x201   :  { %v1660_v2 = vadd.f32 %v1659_v18, %v1658_v16  ;;  %v1670_v22 = vrot.slane %v1669_v9, 4  ;;  %v1855_v38 = vmul.f32 %v13070_v35, %v13076_v24  ;;  %v1856_v28 = vmul.f32 %v13071_v58, %v9132_v17 }
 0x202   :  { %v1857_v60 = vmul.f32 %v13072_v45, %v9141_v43  ;;  %v1858_v63 = vmul.f32 %v10038_v23, %v13075_v40  ;;  %v1859_v29 = vmul.f32 %v10061_v15, %v13076_v24  ;;  %v1860_v59 = vmul.f32 %v13073_v37, %v9132_v17 }
 0x203   :  { %v1661_v20 = vrot.slane %v1660_v2, 1  ;;  %v1671_v5 = vadd.f32 %v1670_v22, %v1669_v9  ;;  %v1861_v35 = vmul.f32 %v13074_v8, %v9141_v43  ;;  %v1862_v58 = vmul.f32 %v10045_v56, %v13075_v40 }
 0x204   :  { %v1863_v45 = vmul.f32 %v10068_v36, %v13076_v24  ;;  %v1864_v23 = vmul.f32 %v10074_v3, %v9132_v17  ;;  %v1865_v15 = vmul.f32 %v10082_v62, %v9141_v43  ;;  %v1866_v37 = vmul.f32 %v10088_v7, %v13075_v40 }
 0x205   :  { %v10208_v1 = vadd.f32 %v1661_v20, %v1660_v2  ;;  %v1672_v39 = vrot.slane %v1671_v5, 2  ;;  %v1867_v8 = vmul.f32 %v10096_v13, %v13076_v24  ;;  %v1868_v56 = vmul.f32 %v10102_v34, %v9132_v17 }
 0x206   :  { %v1869_v36 = vmul.f32 %v10112_v51, %v9141_v43  ;;  %v1870_v3 = vmul.f32 %v10116_v53, %v13075_v40  ;;  %v10220_v62 = vmul.f32 %v10122_v0, %v13076_v24  ;;  %v10224_v7 = vmul.f32 %v10128_v44, %v9132_v17 }
 0x207   :  { %v1673_v6 = vadd.f32 %v1672_v39, %v1671_v5  ;;  %v10228_v13 = vmul.f32 %v10130_v33, %v9141_v43  ;;  %v10232_v34 = vmul.f32 %v10136_v11, %v13075_v40  ;;  %v10236_v51 = vmul.f32 %v10138_v21, %v13076_v24 }
 0x208   :  { %v2116_v53 = vsel %vm93_vm0, %v10014_v61, 0.0  ;;  %v2117_v0 = vsel %vm93_vm0, %v1845_v42, 0.0  ;;  %v2119_v44 = vsel %vm93_vm0, %v1846_v47, 0.0  ;;  %v2121_v46 = vsel %vm93_vm0, %v1847_v32, 0.0 }
 0x209   :  { %v1674_v16 = vrot.slane %v1673_v6, 1  ;;  %v2118_v33 = vadd.f32 %v2117_v0, %v2116_v53  ;;  %v2129_v48 = vsel %vm93_vm0, %v1848_v26, 0.0  ;;  %v2130_v11 = vsel %vm93_vm0, %v1849_v41, 0.0 }
 0x20a   :  { %v2131_v54 = vadd.f32 %v2130_v11, %v2129_v48  ;;  %v2132_v18 = vsel %vm93_vm0, %v1850_v14, 0.0  ;;  %v2134_v21 = vsel %vm93_vm0, %v1851_v52, 0.0  ;;  %v2142_v9 = vsel %vm93_vm0, %v1852_v49, 0.0 }
 0x20b   :  { %v10248_v61 = vadd.f32 %v1674_v16, %v1673_v6  ;;  %v2120_v42 = vadd.f32 %v2119_v44, %v2118_v33  ;;  %v2143_v47 = vsel %vm93_vm0, %v1853_v50, 0.0  ;;  %v2145_v32 = vsel %vm93_vm0, %v1854_v4, 0.0 }
 0x20c   :  { %v2133_v2 = vadd.f32 %v2132_v18, %v2131_v54  ;;  %v2144_v22 = vadd.f32 %v2143_v47, %v2142_v9  ;;  %v2147_v26 = vsel %vm93_vm0, %v1855_v38, 0.0  ;;  %v2155_v41 = vsel %vm93_vm0, %v1856_v28, 0.0 }
 0x20d   :  { %v2122_v20 = vadd.f32 %v2121_v46, %v2120_v42  ;;  %v2156_v14 = vsel %vm93_vm0, %v1857_v60, 0.0  ;;  %v2158_v52 = vsel %vm93_vm0, %v1858_v63, 0.0  ;;  %v2160_v49 = vsel %vm93_vm0, %v1859_v29, 0.0 }
 0x20e   :  { %v2135_v5 = vadd.f32 %v2134_v21, %v2133_v2  ;;  %v2146_v39 = vadd.f32 %v2145_v32, %v2144_v22  ;;  %v2157_v6 = vadd.f32 %v2156_v14, %v2155_v41  ;;  %v2168_v50 = vsel %vm93_vm0, %v1860_v59, 0.0 }
 0x20f   :  { %v2123_v53 = vrot.slane %v2122_v20, 4  ;;  %v2169_v4 = vsel %vm93_vm0, %v1861_v35, 0.0  ;;  %v2171_v0 = vsel %vm93_vm0, %v1862_v58, 0.0  ;;  %v2173_v38 = vsel %vm93_vm0, %v1863_v45, 0.0 }
 0x210   :  { %v2136_v28 = vrot.slane %v2135_v5, 4  ;;  %v2148_v44 = vadd.f32 %v2147_v26, %v2146_v39  ;;  %v2159_v46 = vadd.f32 %v2158_v52, %v2157_v6  ;;  %v2170_v60 = vadd.f32 %v2169_v4, %v2168_v50 }
 0x211   :  { %v2124_v16 = vadd.f32 %v2123_v53, %v2122_v20  ;;  %v2181_v63 = vsel %vm93_vm0, %v1864_v23, 0.0  ;;  %v2182_v29 = vsel %vm93_vm0, %v1865_v15, 0.0  ;;  %v2184_v33 = vsel %vm93_vm0, %v1866_v37, 0.0 }
 0x212   :  { %v2137_v48 = vadd.f32 %v2136_v28, %v2135_v5  ;;  %v2149_v59 = vrot.slane %v2148_v44, 4  ;;  %v2161_v11 = vadd.f32 %v2160_v49, %v2159_v46  ;;  %v2172_v54 = vadd.f32 %v2171_v0, %v2170_v60 }
 0x213   :  { %v2125_v35 = vrot.slane %v2124_v16, 2  ;;  %v2183_v18 = vadd.f32 %v2182_v29, %v2181_v63  ;;  %v2186_v58 = vsel %vm93_vm0, %v1867_v8, 0.0  ;;  %v2194_v45 = vsel %vm93_vm0, %v1868_v56, 0.0 }
 0x214   :  { %v2138_v21 = vrot.slane %v2137_v48, 2  ;;  %v2150_v9 = vadd.f32 %v2149_v59, %v2148_v44  ;;  %v2162_v42 = vrot.slane %v2161_v11, 4  ;;  %v2174_v47 = vadd.f32 %v2173_v38, %v2172_v54 }
 0x215   :  { %v2126_v32 = vadd.f32 %v2125_v35, %v2124_v16  ;;  %v2185_v23 = vadd.f32 %v2184_v33, %v2183_v18  ;;  %v2195_v15 = vsel %vm93_vm0, %v1869_v36, 0.0  ;;  %v2197_v37 = vsel %vm93_vm0, %v1870_v3, 0.0  ;;  %v13077_v35 = vld [vmem:[#allocation129_spill] sm:$0xff] }
 0x216   :  { %v2139_v2 = vadd.f32 %v2138_v21, %v2137_v48  ;;  %v2151_v22 = vrot.slane %v2150_v9, 2  ;;  %v2163_v26 = vadd.f32 %v2162_v42, %v2161_v11  ;;  %v2175_v41 = vrot.slane %v2174_v47, 4  ;;  %v13079_v42 = vld [vmem:[#allocation131_spill] sm:$0xff] }
 0x217   :  { %v2127_v20 = vrot.slane %v2126_v32, 1  ;;  %v2187_v14 = vadd.f32 %v2186_v58, %v2185_v23  ;;  %v2196_v52 = vadd.f32 %v2195_v15, %v2194_v45  ;;  %v2199_v8 = vsel %vm93_vm0, %v10220_v62, 0.0 }
 0x218   :  { %v2140_v56 = vrot.slane %v2139_v2, 1  ;;  %v2152_v49 = vadd.f32 %v2151_v22, %v2150_v9  ;;  %v2164_v5 = vrot.slane %v2163_v26, 2  ;;  %v2176_v39 = vadd.f32 %v2175_v41, %v2174_v47  ;;  %v13082_v22 = vld [vmem:[#allocation134_spill] sm:$0xff] }
 0x219   :  { %v10270_v6 = vadd.f32 %v2127_v20, %v2126_v32  ;;  %v2188_v50 = vrot.slane %v2187_v14, 4  ;;  %v2198_v36 = vadd.f32 %v2197_v37, %v2196_v52  ;;  %v2207_v3 = vsel %vm93_vm0, %v10224_v7, 0.0  ;;  %v13080_v32 = vld [vmem:[#allocation9_spill] sm:$0xff]  ;;  %v13083_v20 = vld [vmem:[#allocation151_spill] sm:$0xff] }
 0x21a   :  { %v10274_v53 = vadd.f32 %v2140_v56, %v2139_v2  ;;  %v2153_v4 = vrot.slane %v2152_v49, 1  ;;  %v2165_v0 = vadd.f32 %v2164_v5, %v2163_v26  ;;  %v2177_v38 = vrot.slane %v2176_v39, 2  ;;  %v13081_v2 = vld [vmem:[#allocation153_spill] sm:$0xff] }
 0x21b   :  { %v2189_v28 = vadd.f32 %v2188_v50, %v2187_v14  ;;  %v2200_v44 = vadd.f32 %v2199_v8, %v2198_v36  ;;  %v2208_v62 = vsel %vm93_vm0, %v10228_v13, 0.0  ;;  %v2210_v46 = vsel %vm93_vm0, %v10232_v34, 0.0  ;;  %v13084_v14 = vld [vmem:[#allocation136_spill] sm:$0xff]  ;;  %v13085_v8 = vld [vmem:[#allocation154_spill] sm:$0xff] }
 0x21c   :  { %v10280_v60 = vadd.f32 %v2153_v4, %v2152_v49  ;;  %v2166_v16 = vrot.slane %v2165_v0, 1  ;;  %v2178_v63 = vadd.f32 %v2177_v38, %v2176_v39  ;;  %v2209_v29 = vadd.f32 %v2208_v62, %v2207_v3  ;;  %v13087_v49 = vld [vmem:[#allocation140_spill] sm:$0xff]  ;;  %v13089_v3 = vld [vmem:[#allocation155_spill] sm:$0xff]  ;;  %v13090_v4 = vld [vmem:[#allocation145_spill] sm:$0xff] }
 0x21d   :  { %v2190_v33 = vrot.slane %v2189_v28, 2  ;;  %v2201_v7 = vrot.slane %v2200_v44, 4  ;;  %v2212_v48 = vsel %vm93_vm0, %v10236_v51, 0.0  ;;  %6896 = vrcp.f32 %v10142_v31  ;;  %v13078_v31 = vld [vmem:[#allocation130_spill] sm:$0xff] }
 0x21e   :  { %v10285_v59 = vadd.f32 %v2166_v16, %v2165_v0  ;;  %v2179_v11 = vrot.slane %v2178_v63, 1  ;;  %v2211_v54 = vadd.f32 %v2210_v46, %v2209_v29  ;;  %6898 = vrcp.f32 %v10146_v25 }
 0x21f   :  { %v2191_v13 = vadd.f32 %v2190_v33, %v2189_v28  ;;  %v2202_v34 = vadd.f32 %v2201_v7, %v2200_v44  ;;  %6900 = vrcp.f32 %v10152_v27  ;;  %v547_v18 = vmul.f32 %v13077_v35, %v13038_v30  ;;  %v13091_v28 = vld [vmem:[#allocation146_spill] sm:$0xff] }
 0x220   :  { %v10291_v58 = vadd.f32 %v2179_v11, %v2178_v63  ;;  %v2213_v45 = vadd.f32 %v2212_v48, %v2211_v54  ;;  %6902 = vrcp.f32 %v10158_v55  ;;  %v550_v51 = vmul.f32 %v13078_v31, %v13040_v19  ;;  %v13092_v63 = vld [vmem:[#allocation157_spill] sm:$0xff]  ;;  %v13093_v11 = vld [vmem:[#allocation160_spill] sm:$0xff] }
 0x221   :  { %v2192_v21 = vrot.slane %v2191_v13, 1  ;;  %v2203_v9 = vrot.slane %v2202_v34, 2  ;;  %6904 = vrcp.f32 %v10166_v57  ;;  %v10299_v25 = vmul.f32 %v13078_v31, %v13038_v30 }
 0x222   :  { %v2214_v27 = vrot.slane %v2213_v45, 4  ;;  %6906 = vrcp.f32 %v10176_v10  ;;  %v10304_v47 = vmul.f32 %v13079_v42, %v13042_v12  ;;  %v10308_v55 = vmul.f32 %v13079_v42, %v13080_v32 }
 0x223   :  { %v2193_v23 = vadd.f32 %v2192_v21, %v2191_v13  ;;  %v2204_v15 = vadd.f32 %v2203_v9, %v2202_v34  ;;  %6908 = vrcp.f32 %v10208_v1  ;;  %v10313_v57 = vmul.f32 %v13079_v42, %v13040_v19  ;;  %v13086_v1 = vld [vmem:[#allocation138_spill] sm:$0xff] }
 0x224   :  { %v2215_v37 = vadd.f32 %v2214_v27, %v2213_v45  ;;  %6910 = vrcp.f32 %v10248_v61  ;;  %v10318_v10 = vmul.f32 %v13079_v42, %v13038_v30  ;;  %v1027_v26 = vsub.f32 %v13082_v22, %v13081_v2  ;;  %v13088_v61 = vld [vmem:[#allocation142_spill] sm:$0xff] }
 0x225   :  { %v2205_v41 = vrot.slane %v2204_v15, 1  ;;  %v1031_v52 = vsub.f32 %v13084_v14, %v13083_v20  ;;  %v1032_v56 = vsub.f32 %v13086_v1, %v13085_v8  ;;  %v1033_v5 = vsub.f32 %v13087_v49, %v13085_v8  ;;  %v13096_v49 = vld [vmem:[#allocation29_spill] sm:$0xff] }
 0x226   :  { %v2216_v39 = vrot.slane %v2215_v37, 2  ;;  %v1034_v50 = vsub.f32 %v13088_v61, %v13085_v8  ;;  %v1035_v36 = vsub.f32 %v547_v18, %v13085_v8  ;;  %v1036_v0 = vsub.f32 %v13090_v4, %v13089_v3  ;;  %v13094_v18 = vld [vmem:[#allocation161_spill] sm:$0xff] }
 0x227   :  { %v2206_v38 = vadd.f32 %v2205_v41, %v2204_v15  ;;  %v1037_v44 = vsub.f32 %v13091_v28, %v13089_v3  ;;  %v1038_v62 = vsub.f32 %v550_v51, %v13089_v3  ;;  %v1039_v46 = vsub.f32 %v10299_v25, %v13089_v3 }
 0x228   :  { %v2217_v16 = vadd.f32 %v2216_v39, %v2215_v37  ;;  %v1040_v29 = vsub.f32 %v10304_v47, %v13092_v63  ;;  %v1041_v33 = vsub.f32 %v10308_v55, %v13092_v63  ;;  %v1042_v7 = vsub.f32 %v10313_v57, %v13092_v63 }
 0x229   :  { %v1043_v48 = vsub.f32 %v10318_v10, %v13092_v63  ;;  %6912 = vpow2.f32 %v13093_v11  ;;  %v1202_v54 = vmul.f32 1.442695, %v1027_v26  ;;  %v1210_v13 = vmul.f32 1.442695, %v1031_v52  ;;  %v13095_v26 = vld [vmem:[#allocation40_spill] sm:$0xff]  ;;  %v13100_v63 = vld [vmem:[#allocation170_spill] sm:$0xff] }
 0x22a   :  { %v6897_v34 = vpop.eup %6896  ;;  %v2218_v35 = vrot.slane %v2217_v16, 1  ;;  %6914 = vpow2.f32 %v13094_v18  ;;  %v1212_v45 = vmul.f32 1.442695, %v1032_v56  ;;  %v1214_v31 = vmul.f32 1.442695, %v1033_v5 }
 0x22b   :  { %v6899_v51 = vpop.eup %6898  ;;  %v2372_v21 = vmul.f32 %v6897_v34, %v10270_v6  ;;  %6916 = vpow2.f32 %v1202_v54  ;;  %v1216_v9 = vmul.f32 1.442695, %v1034_v50  ;;  %v1218_v27 = vmul.f32 1.442695, %v1035_v36 }
 0x22c   :  { %v6901_v42 = vpop.eup %6900  ;;  %v2219_v47 = vadd.f32 %v2218_v35, %v2217_v16  ;;  %v2373_v15 = vmul.f32 %v6899_v51, %v10274_v53  ;;  %6918 = vpow2.f32 %v1210_v13  ;;  %v1220_v37 = vmul.f32 1.442695, %v1036_v0 }
 0x22d   :  { %v6903_v2 = vpop.eup %6902  ;;  %v2374_v22 = vmul.f32 %v6901_v42, %v10280_v60  ;;  %v2405_v41 = vmul.f32 %v13095_v26, %v2372_v21  ;;  %6920 = vpow2.f32 %v1212_v45  ;;  %v1222_v20 = vmul.f32 1.442695, %v1037_v44 }
 0x22e   :  { %v6905_v14 = vpop.eup %6904  ;;  %v2375_v52 = vmul.f32 %v6903_v2, %v10285_v59  ;;  %v2406_v6 = vmul.f32 %v13095_v26, %v2373_v15  ;;  %6922 = vpow2.f32 %v1214_v31  ;;  %v1224_v8 = vmul.f32 1.442695, %v1038_v62  ;;  %v13101_v2 = vld [vmem:[#allocation172_spill] sm:$0xff] }
 0x22f   :  { %v6907_v1 = vpop.eup %6906  ;;  %v2376_v56 = vmul.f32 %v6905_v14, %v10291_v58  ;;  %v2407_v53 = vmul.f32 %v13095_v26, %v2374_v22  ;;  %v2438_v5 = vadd.f32 %v13096_v49, %v2405_v41  ;;  %6924 = vpow2.f32 %v1216_v9 }
 0x230   :  { %v6909_v60 = vpop.eup %6908  ;;  %v2377_v39 = vmul.f32 %v6907_v1, %v2193_v23  ;;  %v2408_v61 = vmul.f32 %v13095_v26, %v2375_v52  ;;  %v2439_v50 = vadd.f32 %v13096_v49, %v2406_v6  ;;  %6926 = vpow2.f32 %v1218_v27  ;;  %v13103_v52 = vld [vmem:[#allocation175_spill] sm:$0xff] }
 0x231   :  { %v6911_v59 = vpop.eup %6910  ;;  %v2378_v36 = vmul.f32 %v6909_v60, %v2206_v38  ;;  %v2409_v4 = vmul.f32 %v13095_v26, %v2376_v56  ;;  %v2440_v0 = vadd.f32 %v13096_v49, %v2407_v53  ;;  %6928 = vpow2.f32 %v1220_v37  ;;  %v13105_v60 = vld [vmem:[#allocation179_spill] sm:$0xff] }
 0x232   :  { %v2379_v58 = vmul.f32 %v6911_v59, %v2219_v47  ;;  %v2410_v28 = vmul.f32 %v13095_v26, %v2377_v39  ;;  %v2441_v44 = vadd.f32 %v13096_v49, %v2408_v61  ;;  %v5211_v62 = vsel %vm5190_vm2, %v2439_v50, %v2438_v5  ;;  %v13106_v50 = vld [vmem:[#allocation181_spill] sm:$0xff] }
 0x233   :  { %v2411_v23 = vmul.f32 %v13095_v26, %v2378_v36  ;;  %v2442_v16 = vadd.f32 %v13096_v49, %v2409_v4  ;;  %v5212_v11 = vsel %vm5192_vm3, %v2440_v0, %v5211_v62  ;;  %6930 = vpow2.f32 %v1222_v20  ;;  %v13102_v20 = vld [vmem:[#allocation173_spill] sm:$0xff]  ;;  %v13107_v36 = vld [vmem:[#allocation182_spill] sm:$0xff]  ;;  %v13108_v0 = vld [vmem:[#allocation183_spill] sm:$0xff] }
 0x234   :  { %v2412_v38 = vmul.f32 %v13095_v26, %v2379_v58  ;;  %v2443_v54 = vadd.f32 %v13096_v49, %v2410_v28  ;;  %v5213_v13 = vsel %vm5194_vm4, %v2441_v44, %v5212_v11  ;;  %6932 = vpow2.f32 %v1224_v8  ;;  %v13104_v8 = vld [vmem:[#allocation176_spill] sm:$0xff]  ;;  %v13109_v28 = vld [vmem:[#allocation185_spill] sm:$0xff] }
 0x235   :  { %v2444_v34 = vadd.f32 %v13096_v49, %v2411_v23  ;;  %v5214_v35 = vsel %vm5196_vm5, %v2442_v16, %v5213_v13  ;;  %v1226_v18 = vmul.f32 1.442695, %v1039_v46  ;;  %v1228_v45 = vmul.f32 1.442695, %v1040_v29  ;;  %v13097_v46 = vld [vmem:[#allocation165_spill] sm:$0xff] }
 0x236   :  { %v10375_v31 = vpop.eup %6912  ;;  %v2445_v51 = vadd.f32 %v13096_v49, %v2412_v38  ;;  %v5215_v21 = vsel %vm5198_vm6, %v2443_v54, %v5214_v35  ;;  %v1230_v9 = vmul.f32 1.442695, %v1041_v33  ;;  %v1232_v27 = vmul.f32 1.442695, %v1042_v7  ;;  %v13098_v33 = vld [vmem:[#allocation166_spill] sm:$0xff]  ;;  %v13099_v7 = vld [vmem:[#allocation168_spill] sm:$0xff] }
 0x237   :  { %v10385_v42 = vpop.eup %6914  ;;  %v5216_v25 = vsel %vm5200_vm7, %v2444_v34, %v5215_v21  ;;  %6934 = vpow2.f32 %v1226_v18  ;;  %v1234_v3 = vmul.f32 1.442695, %v1043_v48  ;;  %v1468_v29 = vsel %vm93_vm0, %v13097_v46, 0.0  ;;  %v13110_v38 = vld [vmem:[#allocation189_spill] sm:$0xff] }
 0x238   :  { %v10393_v47 = vpop.eup %6916  ;;  %v5217_v55 = vsel %vm5202_vm8, %v2445_v51, %v5216_v25  ;;  %6936 = vpow2.f32 %v1228_v45  ;;  %v1469_v57 = vsel %vm93_vm0, %v13098_v33, 0.0  ;;  %v1471_v15 = vsel %vm93_vm0, %v13099_v7, 0.0  ;;  %v13111_v45 = vld [vmem:[#allocation191_spill] sm:$0xff]  ;;  %v13112_v25 = vld [vmem:[#allocation192_spill] sm:$0xff] }
 0x239   :  { %v10400_v37 = vpop.eup %6918  ;;  %6411 = vmatprep.subr.mxu1 %v5217_v55  ;;  %6938 = vpow2.f32 %v1230_v9  ;;  %v1470_v10 = vadd.f32 %v1469_v57, %v1468_v29  ;;  %v1473_v48 = vsel %vm93_vm0, %v13100_v63, 0.0  ;;  %v1481_v22 = vsel %vm93_vm0, %v13101_v2, 0.0 }
 0x23a   :  { %v10406_v41 = vpop.eup %6920  ;;  %6412 = vmatpush3.msra.mxu1 %v5217_v55  ;;  %6940 = vpow2.f32 %v1232_v27  ;;  %v1482_v14 = vsel %vm93_vm0, %v13102_v20, 0.0  ;;  %v1484_v6 = vsel %vm93_vm0, %v13103_v52, 0.0  ;;  %v1486_v1 = vsel %vm93_vm0, %v13104_v8, 0.0 }
 0x23b   :  { %v10414_v56 = vpop.eup %6922  ;;  %6942 = vpow2.f32 %v1234_v3  ;;  %v1472_v53 = vadd.f32 %v1471_v15, %v1470_v10  ;;  %v1483_v5 = vadd.f32 %v1482_v14, %v1481_v22  ;;  %v1494_v39 = vsel %vm93_vm0, %v13105_v60, 0.0 }
 0x23c   :  { %v10418_v61 = vpop.eup %6924  ;;  %v1495_v59 = vsel %vm93_vm0, %v13106_v50, 0.0  ;;  %v1497_v4 = vsel %vm93_vm0, %v13107_v36, 0.0  ;;  %v1499_v58 = vsel %vm93_vm0, %v13108_v0, 0.0  ;;  %v1507_v44 = vsel %vm93_vm0, %v13109_v28, 0.0 }
 0x23d   :  { %v10428_v62 = vpop.eup %6926  ;;  %v1474_v23 = vadd.f32 %v1473_v48, %v1472_v53  ;;  %v1485_v16 = vadd.f32 %v1484_v6, %v1483_v5  ;;  %v1496_v11 = vadd.f32 %v1495_v59, %v1494_v39  ;;  %v1508_v54 = vsel %vm93_vm0, %v13110_v38, 0.0 }
 0x23e   :  { %v10432_v13 = vpop.eup %6928  ;;  %v1509_v34 = vadd.f32 %v1508_v54, %v1507_v44  ;;  %v1510_v35 = vsel %vm93_vm0, %v10375_v31, 0.0  ;;  %v1512_v18 = vsel %vm93_vm0, %v10393_v47, 0.0  ;;  %v1520_v51 = vsel %vm93_vm0, %v13111_v45, 0.0 }
 0x23f   :  { %v1475_v21 = vrot.slane %v1474_v23, 4  ;;  %v1487_v9 = vadd.f32 %v1486_v1, %v1485_v16  ;;  %v1498_v27 = vadd.f32 %v1497_v4, %v1496_v11  ;;  %v1521_v3 = vsel %vm93_vm0, %v13112_v25, 0.0 }
 0x240   :  { %v10442_v29 = vpop.eup %6930  ;;  %v1511_v55 = vadd.f32 %v1510_v35, %v1509_v34  ;;  %v1522_v57 = vadd.f32 %v1521_v3, %v1520_v51  ;;  %v1523_v15 = vsel %vm93_vm0, %v10385_v42, 0.0  ;;  %v1525_v10 = vsel %vm93_vm0, %v10400_v37, 0.0 }
 0x241   :  { %v10448_v48 = vpop.eup %6932  ;;  %v1476_v22 = vadd.f32 %v1475_v21, %v1474_v23  ;;  %v1488_v14 = vrot.slane %v1487_v9, 4  ;;  %v1500_v6 = vadd.f32 %v1499_v58, %v1498_v27  ;;  %v1533_v1 = vsel %vm93_vm0, %v10406_v41, 0.0 }
 0x242   :  { %v1513_v53 = vadd.f32 %v1512_v18, %v1511_v55  ;;  %v1524_v5 = vadd.f32 %v1523_v15, %v1522_v57  ;;  %v1534_v39 = vsel %vm93_vm0, %v10414_v56, 0.0  ;;  %v1536_v59 = vsel %vm93_vm0, %v10418_v61, 0.0 }
 0x243   :  { %v1477_v4 = vrot.slane %v1476_v22, 2  ;;  %v1489_v44 = vadd.f32 %v1488_v14, %v1487_v9  ;;  %v1501_v16 = vrot.slane %v1500_v6, 4  ;;  %v1535_v11 = vadd.f32 %v1534_v39, %v1533_v1 }
 0x244   :  { %v10456_v54 = vpop.eup %6934  ;;  %v1514_v23 = vrot.slane %v1513_v53, 4  ;;  %v1526_v34 = vadd.f32 %v1525_v10, %v1524_v5  ;;  %v1538_v58 = vsel %vm93_vm0, %v10428_v62, 0.0  ;;  %v1546_v35 = vsel %vm93_vm0, %v10432_v13, 0.0 }
 0x245   :  { %v10462_v18 = vpop.eup %6936  ;;  %v1478_v51 = vadd.f32 %v1477_v4, %v1476_v22  ;;  %v1490_v21 = vrot.slane %v1489_v44, 2  ;;  %v1502_v27 = vadd.f32 %v1501_v16, %v1500_v6  ;;  %v1537_v3 = vadd.f32 %v1536_v59, %v1535_v11 }
 0x246   :  { %v10464_v55 = vpop.eup %6938  ;;  %v1515_v9 = vadd.f32 %v1514_v23, %v1513_v53  ;;  %v1527_v57 = vrot.slane %v1526_v34, 4  ;;  %v1547_v15 = vsel %vm93_vm0, %v10442_v29, 0.0  ;;  %v1549_v10 = vsel %vm93_vm0, %v10448_v48, 0.0 }
 0x247   :  { %v10470_v14 = vpop.eup %6940  ;;  %v1479_v1 = vrot.slane %v1478_v51, 1  ;;  %v1491_v5 = vadd.f32 %v1490_v21, %v1489_v44  ;;  %v1503_v39 = vrot.slane %v1502_v27, 2  ;;  %v1539_v32 = vadd.f32 %v1538_v58, %v1537_v3 }
 0x248   :  { %v10472_v22 = vpop.eup %6942  ;;  %v1516_v6 = vrot.slane %v1515_v9, 2  ;;  %v1528_v59 = vadd.f32 %v1527_v57, %v1526_v34  ;;  %v1548_v4 = vadd.f32 %v1547_v15, %v1546_v35  ;;  %v1551_v53 = vsel %vm93_vm0, %v10456_v54, 0.0 }
 0x249   :  { %v10476_v16 = vadd.f32 %v1479_v1, %v1478_v51  ;;  %v1492_v11 = vrot.slane %v1491_v5, 1  ;;  %v1504_v23 = vadd.f32 %v1503_v39, %v1502_v27  ;;  %v1540_v12 = vrot.slane %v1539_v32, 4 }
 0x24a   :  { %v1517_v19 = vadd.f32 %v1516_v6, %v1515_v9  ;;  %v1529_v30 = vrot.slane %v1528_v59, 2  ;;  %v1550_v49 = vadd.f32 %v1549_v10, %v1548_v4  ;;  %v1559_v44 = vsel %vm93_vm0, %v10462_v18, 0.0 }
 0x24b   :  { %v10480_v58 = vadd.f32 %v1492_v11, %v1491_v5  ;;  %v1505_v21 = vrot.slane %v1504_v23, 1  ;;  %v1541_v3 = vadd.f32 %v1540_v12, %v1539_v32  ;;  %v1560_v34 = vsel %vm93_vm0, %v10464_v55, 0.0 }
 0x24c   :  { %v1518_v35 = vrot.slane %v1517_v19, 1  ;;  %v1530_v57 = vadd.f32 %v1529_v30, %v1528_v59  ;;  %v1552_v51 = vadd.f32 %v1551_v53, %v1550_v49  ;;  %v1561_v15 = vadd.f32 %v1560_v34, %v1559_v44 }
 0x24d   :  { %v10484_v1 = vadd.f32 %v1505_v21, %v1504_v23  ;;  %v1542_v27 = vrot.slane %v1541_v3, 2  ;;  %v1562_v9 = vsel %vm93_vm0, %v10470_v14, 0.0  ;;  %v1564_v10 = vsel %vm93_vm0, %v10472_v22, 0.0 }
 0x24e   :  { %v10490_v5 = vadd.f32 %v1518_v35, %v1517_v19  ;;  %v1531_v39 = vrot.slane %v1530_v57, 1  ;;  %v1553_v12 = vrot.slane %v1552_v51, 4  ;;  %v1563_v32 = vadd.f32 %v1562_v9, %v1561_v15 }
 0x24f   :  { %v1543_v6 = vadd.f32 %v1542_v27, %v1541_v3  ;;  %v1812_v30 = vmul.f32 %v13097_v46, %v9132_v17  ;;  %v1813_v49 = vmul.f32 %v13098_v33, %v9141_v43  ;;  %v1814_v59 = vmul.f32 %v13099_v7, %v13075_v40 }
 0x250   :  { %v10498_v4 = vadd.f32 %v1531_v39, %v1530_v57  ;;  %v1554_v53 = vadd.f32 %v1553_v12, %v1552_v51  ;;  %v1565_v11 = vadd.f32 %v1564_v10, %v1563_v32  ;;  %v1815_v19 = vmul.f32 %v13100_v63, %v13076_v24 }
 0x251   :  { %v1544_v23 = vrot.slane %v1543_v6, 1  ;;  %v1816_v44 = vmul.f32 %v13101_v2, %v9132_v17  ;;  %v1817_v46 = vmul.f32 %v13102_v20, %v9141_v43  ;;  %v1818_v33 = vmul.f32 %v13103_v52, %v13075_v40 }
 0x252   :  { %v1555_v21 = vrot.slane %v1554_v53, 2  ;;  %v1566_v3 = vrot.slane %v1565_v11, 4  ;;  %v1819_v7 = vmul.f32 %v13104_v8, %v13076_v24  ;;  %v1820_v34 = vmul.f32 %v13105_v60, %v9132_v17 }
 0x253   :  { %v10512_v35 = vadd.f32 %v1544_v23, %v1543_v6  ;;  %v1821_v63 = vmul.f32 %v13106_v50, %v9141_v43  ;;  %v1822_v2 = vmul.f32 %v13107_v36, %v13075_v40  ;;  %v1823_v20 = vmul.f32 %v13108_v0, %v13076_v24 }
 0x254   :  { %v1556_v52 = vadd.f32 %v1555_v21, %v1554_v53  ;;  %v1567_v57 = vadd.f32 %v1566_v3, %v1565_v11  ;;  %v1824_v51 = vmul.f32 %v13109_v28, %v9132_v17  ;;  %v1825_v8 = vmul.f32 %v13110_v38, %v9141_v43 }
 0x255   :  { %v1826_v60 = vmul.f32 %v10375_v31, %v13075_v40  ;;  %v1827_v50 = vmul.f32 %v10393_v47, %v13076_v24  ;;  %v1828_v36 = vmul.f32 %v13111_v45, %v9132_v17  ;;  %v1829_v0 = vmul.f32 %v13112_v25, %v9141_v43 }
 0x256   :  { %v1557_v15 = vrot.slane %v1556_v52, 1  ;;  %v1568_v27 = vrot.slane %v1567_v57, 2  ;;  %v1830_v28 = vmul.f32 %v10385_v42, %v13075_v40  ;;  %v1831_v38 = vmul.f32 %v10400_v37, %v13076_v24 }
 0x257   :  { %v1832_v31 = vmul.f32 %v10406_v41, %v9132_v17  ;;  %v1833_v47 = vmul.f32 %v10414_v56, %v9141_v43  ;;  %v1834_v45 = vmul.f32 %v10418_v61, %v13075_v40  ;;  %v1835_v25 = vmul.f32 %v10428_v62, %v13076_v24 }
 0x258   :  { %v10544_v9 = vadd.f32 %v1557_v15, %v1556_v52  ;;  %v1569_v10 = vadd.f32 %v1568_v27, %v1567_v57  ;;  %v10548_v42 = vmul.f32 %v10432_v13, %v9132_v17  ;;  %v10552_v37 = vmul.f32 %v10442_v29, %v9141_v43 }
 0x259   :  { %v10556_v41 = vmul.f32 %v10448_v48, %v13075_v40  ;;  %v10560_v56 = vmul.f32 %v10456_v54, %v13076_v24  ;;  %v10564_v61 = vmul.f32 %v10462_v18, %v9132_v17  ;;  %v10568_v62 = vmul.f32 %v10464_v55, %v9141_v43 }
 0x25a   :  { %v1570_v13 = vrot.slane %v1569_v10, 1  ;;  %v10572_v29 = vmul.f32 %v10470_v14, %v13075_v40  ;;  %v10576_v48 = vmul.f32 %v10472_v22, %v13076_v24  ;;  %v2012_v54 = vsel %vm93_vm0, %v1812_v30, 0.0 }
 0x25b   :  { %v2013_v39 = vsel %vm93_vm0, %v1813_v49, 0.0  ;;  %v2015_v18 = vsel %vm93_vm0, %v1814_v59, 0.0  ;;  %v2017_v12 = vsel %vm93_vm0, %v1815_v19, 0.0  ;;  %v2025_v55 = vsel %vm93_vm0, %v1816_v44, 0.0 }
 0x25c   :  { %v10583_v32 = vadd.f32 %v1570_v13, %v1569_v10  ;;  %v2014_v6 = vadd.f32 %v2013_v39, %v2012_v54  ;;  %v2026_v14 = vsel %vm93_vm0, %v1817_v46, 0.0  ;;  %v2028_v53 = vsel %vm93_vm0, %v1818_v33, 0.0 }
 0x25d   :  { %v2027_v11 = vadd.f32 %v2026_v14, %v2025_v55  ;;  %v2030_v22 = vsel %vm93_vm0, %v1819_v7, 0.0  ;;  %v2038_v30 = vsel %vm93_vm0, %v1820_v34, 0.0  ;;  %v2039_v49 = vsel %vm93_vm0, %v1821_v63, 0.0  ;;  %v4888_v7 = vld [vmem:[%s12436_s3 + $0x60] sm:$0xff] }
 0x25e   :  { %v2016_v23 = vadd.f32 %v2015_v18, %v2014_v6  ;;  %v2040_v59 = vadd.f32 %v2039_v49, %v2038_v30  ;;  %v2041_v19 = vsel %vm93_vm0, %v1822_v2, 0.0  ;;  %v2043_v44 = vsel %vm93_vm0, %v1823_v20, 0.0  ;;  %6391 = vmatprep.mubr.msk.f32.mxu0 %vm4900_vm1, %v4888_v7  ;;  %v4889_v2 = vld [vmem:[%s12436_s3 + $0x68] sm:$0xff] }
 0x25f   :  { %v2029_v21 = vadd.f32 %v2028_v53, %v2027_v11  ;;  %v2051_v3 = vsel %vm93_vm0, %v1824_v51, 0.0  ;;  %v2052_v46 = vsel %vm93_vm0, %v1825_v8, 0.0  ;;  %v2054_v33 = vsel %vm93_vm0, %v1826_v60, 0.0  ;;  %6392 = vmatmul.mubr.msk.f32.gmra.mxu0 %vm4900_vm1, %v4889_v2 }
 0x260   :  { %v2018_v34 = vadd.f32 %v2017_v12, %v2016_v23  ;;  %v2042_v52 = vadd.f32 %v2041_v19, %v2040_v59  ;;  %v2053_v63 = vadd.f32 %v2052_v46, %v2051_v3  ;;  %v2056_v57 = vsel %vm93_vm0, %v1827_v50, 0.0 }
 0x261   :  { %v2031_v20 = vadd.f32 %v2030_v22, %v2029_v21  ;;  %v2064_v51 = vsel %vm93_vm0, %v1828_v36, 0.0  ;;  %v2065_v8 = vsel %vm93_vm0, %v1829_v0, 0.0  ;;  %v2067_v60 = vsel %vm93_vm0, %v1830_v28, 0.0 }
 0x262   :  { %v2019_v15 = vrot.slane %v2018_v34, 4  ;;  %v2044_v27 = vadd.f32 %v2043_v44, %v2042_v52  ;;  %v2055_v10 = vadd.f32 %v2054_v33, %v2053_v63  ;;  %v2066_v13 = vadd.f32 %v2065_v8, %v2064_v51 }
 0x263   :  { %v2032_v50 = vrot.slane %v2031_v20, 4  ;;  %v2069_v54 = vsel %vm93_vm0, %v1831_v38, 0.0  ;;  %v2077_v39 = vsel %vm93_vm0, %v1832_v31, 0.0  ;;  %v2078_v18 = vsel %vm93_vm0, %v1833_v47, 0.0 }
 0x264   :  { %v2020_v12 = vadd.f32 %v2019_v15, %v2018_v34  ;;  %v2045_v55 = vrot.slane %v2044_v27, 4  ;;  %v2057_v36 = vadd.f32 %v2056_v57, %v2055_v10  ;;  %v2068_v6 = vadd.f32 %v2067_v60, %v2066_v13 }
 0x265   :  { %v2033_v0 = vadd.f32 %v2032_v50, %v2031_v20  ;;  %v2079_v14 = vadd.f32 %v2078_v18, %v2077_v39  ;;  %v2080_v28 = vsel %vm93_vm0, %v1834_v45, 0.0  ;;  %v2082_v53 = vsel %vm93_vm0, %v1835_v25, 0.0 }
 0x266   :  { %v2021_v11 = vrot.slane %v2020_v12, 2  ;;  %v2046_v22 = vadd.f32 %v2045_v55, %v2044_v27  ;;  %v2058_v30 = vrot.slane %v2057_v36, 4  ;;  %v2070_v49 = vadd.f32 %v2069_v54, %v2068_v6 }
 0x267   :  { %v2034_v23 = vrot.slane %v2033_v0, 2  ;;  %v2081_v38 = vadd.f32 %v2080_v28, %v2079_v14  ;;  %v2090_v31 = vsel %vm93_vm0, %v10548_v42, 0.0  ;;  %v2091_v47 = vsel %vm93_vm0, %v10552_v37, 0.0  ;;  %v13113_v28 = vld [vmem:[#allocation20_spill] sm:$0xff] }
 0x268   :  { %v2022_v59 = vadd.f32 %v2021_v11, %v2020_v12  ;;  %v2047_v19 = vrot.slane %v2046_v22, 2  ;;  %v2059_v44 = vadd.f32 %v2058_v30, %v2057_v36  ;;  %v2071_v21 = vrot.slane %v2070_v49, 4  ;;  %v13115_v11 = vld [vmem:[#allocation18_spill] sm:$0xff] }
 0x269   :  { %v2035_v3 = vadd.f32 %v2034_v23, %v2033_v0  ;;  %v2083_v45 = vadd.f32 %v2082_v53, %v2081_v38  ;;  %v2092_v46 = vadd.f32 %v2091_v47, %v2090_v31  ;;  %v2093_v25 = vsel %vm93_vm0, %v10556_v41, 0.0  ;;  %v13114_v53 = vld [vmem:[#allocation96_spill] sm:$0xff]  ;;  %v13118_v38 = vld [vmem:[#allocation98_spill] sm:$0xff] }
 0x26a   :  { %v2023_v33 = vrot.slane %v2022_v59, 1  ;;  %v2048_v7 = vadd.f32 %v2047_v19, %v2046_v22  ;;  %v2060_v34 = vrot.slane %v2059_v44, 2  ;;  %v2072_v52 = vadd.f32 %v2071_v21, %v2070_v49  ;;  %v13116_v22 = vld [vmem:[#allocation97_spill] sm:$0xff]  ;;  %v13120_v21 = vld [vmem:[#allocation120_spill] sm:$0xff] }
 0x26b   :  { %v2036_v63 = vrot.slane %v2035_v3, 1  ;;  %v2084_v57 = vrot.slane %v2083_v45, 4  ;;  %v2094_v42 = vadd.f32 %v2093_v25, %v2092_v46  ;;  %v2095_v37 = vsel %vm93_vm0, %v10560_v56, 0.0 }
 0x26c   :  { %v10620_v2 = vadd.f32 %v2023_v33, %v2022_v59  ;;  %v2049_v20 = vrot.slane %v2048_v7, 1  ;;  %v2061_v51 = vadd.f32 %v2060_v34, %v2059_v44  ;;  %v2073_v8 = vrot.slane %v2072_v52, 2  ;;  %v13122_v33 = vld [vmem:[#allocation118_spill] sm:$0xff]  ;;  %v13124_v34 = vld [vmem:[#allocation121_spill] sm:$0xff] }
 0x26d   :  { %v10622_v60 = vadd.f32 %v2036_v63, %v2035_v3  ;;  %v2085_v15 = vadd.f32 %v2084_v57, %v2083_v45  ;;  %v2096_v27 = vadd.f32 %v2095_v37, %v2094_v42  ;;  %v2103_v41 = vsel %vm93_vm0, %v10564_v61, 0.0  ;;  %v13121_v3 = vld [vmem:[#allocation101_spill] sm:$0xff]  ;;  %v13126_v63 = vld [vmem:[#allocation107_spill] sm:$0xff] }
 0x26e   :  { %v10626_v10 = vadd.f32 %v2049_v20, %v2048_v7  ;;  %v2062_v13 = vrot.slane %v2061_v51, 1  ;;  %v2074_v50 = vadd.f32 %v2073_v8, %v2072_v52  ;;  %v2104_v54 = vsel %vm93_vm0, %v10568_v62, 0.0  ;;  %v13123_v7 = vld [vmem:[#allocation103_spill] sm:$0xff]  ;;  %v13127_v42 = vld [vmem:[#allocation109_spill] sm:$0xff] }
 0x26f   :  { %v2086_v56 = vrot.slane %v2085_v15, 2  ;;  %v2097_v39 = vrot.slane %v2096_v27, 4  ;;  %v2105_v18 = vadd.f32 %v2104_v54, %v2103_v41  ;;  %v2106_v12 = vsel %vm93_vm0, %v10572_v29, 0.0 }
 0x270   :  { %v10632_v55 = vadd.f32 %v2062_v13, %v2061_v51  ;;  %v2075_v36 = vrot.slane %v2074_v50, 1  ;;  %v2108_v6 = vsel %vm93_vm0, %v10576_v48, 0.0  ;;  %6944 = vrcp.f32 %v10476_v16 }
 0x271   :  { %v2087_v61 = vadd.f32 %v2086_v56, %v2085_v15  ;;  %v2098_v0 = vadd.f32 %v2097_v39, %v2096_v27  ;;  %v2107_v14 = vadd.f32 %v2106_v12, %v2105_v18  ;;  %6946 = vrcp.f32 %v10480_v58  ;;  %v13117_v58 = vld [vmem:[#allocation16_spill] sm:$0xff]  ;;  %v13128_v15 = vld [vmem:[#allocation122_spill] sm:$0xff] }
 0x272   :  { %v10638_v62 = vadd.f32 %v2075_v36, %v2074_v50  ;;  %6948 = vrcp.f32 %v10484_v1  ;;  %v2977_v29 = vmul.f32 %v13114_v53, %v13113_v28  ;;  %v2980_v30 = vmul.f32 %v13116_v22, %v13115_v11  ;;  %v13119_v1 = vld [vmem:[#allocation17_spill] sm:$0xff]  ;;  %v13129_v27 = vld [vmem:[#allocation112_spill] sm:$0xff] }
 0x273   :  { %v2088_v49 = vrot.slane %v2087_v61, 1  ;;  %v2099_v23 = vrot.slane %v2098_v0, 2  ;;  %v2109_v48 = vadd.f32 %v2108_v6, %v2107_v14  ;;  %6950 = vrcp.f32 %v10490_v5  ;;  %v13131_v56 = vld [vmem:[#allocation124_spill] sm:$0xff] }
 0x274   :  { %6952 = vrcp.f32 %v10498_v4  ;;  %v2981_v16 = vmul.f32 %v13116_v22, %v13113_v28  ;;  %v10651_v31 = vmul.f32 %v13118_v38, %v13117_v58  ;;  %v10655_v47 = vmul.f32 %v13118_v38, %v13119_v1  ;;  %v13133_v14 = vld [vmem:[#allocation128_spill] sm:$0xff] }
 0x275   :  { %v10657_v59 = vadd.f32 %v2088_v49, %v2087_v61  ;;  %v2100_v19 = vadd.f32 %v2099_v23, %v2098_v0  ;;  %v2110_v44 = vrot.slane %v2109_v48, 4  ;;  %6954 = vrcp.f32 %v10512_v35  ;;  %v13132_v61 = vld [vmem:[#allocation127_spill] sm:$0xff] }
 0x276   :  { %6956 = vrcp.f32 %v10544_v9  ;;  %v10663_v5 = vmul.f32 %v13118_v38, %v13115_v11  ;;  %v10667_v4 = vmul.f32 %v13118_v38, %v13113_v28  ;;  %v3457_v45 = vsub.f32 %v13121_v3, %v13120_v21  ;;  %v13125_v9 = vld [vmem:[#allocation105_spill] sm:$0xff]  ;;  %v13154_v28 = vld [vmem:[#allocation48_spill] sm:$0xff] }
 0x277   :  { %v2101_v46 = vrot.slane %v2100_v19, 1  ;;  %v2111_v25 = vadd.f32 %v2110_v44, %v2109_v48  ;;  %6958 = vrcp.f32 %v10583_v32  ;;  %v3461_v35 = vsub.f32 %v13123_v7, %v13122_v33  ;;  %v13130_v32 = vld [vmem:[#allocation113_spill] sm:$0xff]  ;;  %v13134_v48 = vld [vmem:[#allocation132_spill] sm:$0xff] }
 0x278   :  { %v3462_v52 = vsub.f32 %v13125_v9, %v13124_v34  ;;  %v3463_v57 = vsub.f32 %v13126_v63, %v13124_v34  ;;  %v3464_v37 = vsub.f32 %v13127_v42, %v13124_v34  ;;  %v3465_v20 = vsub.f32 %v2977_v29, %v13124_v34 }
 0x279   :  { %v2102_v51 = vadd.f32 %v2101_v46, %v2100_v19  ;;  %v2112_v8 = vrot.slane %v2111_v25, 2  ;;  %v3466_v41 = vsub.f32 %v13129_v27, %v13128_v15  ;;  %v3467_v13 = vsub.f32 %v13130_v32, %v13128_v15 }
 0x27a   :  { %v3468_v50 = vsub.f32 %v2980_v30, %v13128_v15  ;;  %v3469_v54 = vsub.f32 %v2981_v16, %v13128_v15  ;;  %v3470_v39 = vsub.f32 %v10651_v31, %v13131_v56  ;;  %v3471_v18 = vsub.f32 %v10655_v47, %v13131_v56 }
 0x27b   :  { %v2113_v12 = vadd.f32 %v2112_v8, %v2111_v25  ;;  %v3472_v36 = vsub.f32 %v10663_v5, %v13131_v56  ;;  %v3473_v6 = vsub.f32 %v10667_v4, %v13131_v56  ;;  %6960 = vpow2.f32 %v13132_v61  ;;  %v13139_v56 = vld [vmem:[#allocation139_spill] sm:$0xff] }
 0x27c   :  { %v3664_v0 = vmul.f32 1.442695, %v3457_v45  ;;  %6962 = vpow2.f32 %v13133_v14  ;;  %v3672_v53 = vmul.f32 1.442695, %v3461_v35  ;;  %v3674_v29 = vmul.f32 1.442695, %v3462_v52 }
 0x27d   :  { %v6945_v22 = vpop.eup %6944  ;;  %v2114_v30 = vrot.slane %v2113_v12, 1  ;;  %v3676_v49 = vmul.f32 1.442695, %v3463_v57  ;;  %v3678_v23 = vmul.f32 1.442695, %v3464_v37  ;;  %v10699_v16 = vsel %vm93_vm0, %v13134_v48, 0.0 }
 0x27e   :  { %v6947_v38 = vpop.eup %6946  ;;  %v2364_v19 = vmul.f32 %v6945_v22, %v10620_v2  ;;  %6964 = vpow2.f32 %v3664_v0  ;;  %v3680_v44 = vmul.f32 1.442695, %v3465_v20  ;;  %v3682_v21 = vmul.f32 1.442695, %v3466_v41  ;;  %v13135_v37 = vld [vmem:[#allocation29_spill] sm:$0xff] }
 0x27f   :  { %v6949_v3 = vpop.eup %6948  ;;  %v2115_v45 = vadd.f32 %v2114_v30, %v2113_v12  ;;  %v2365_v46 = vmul.f32 %v6947_v38, %v10622_v60  ;;  %6966 = vpow2.f32 %v3672_v53  ;;  %v3684_v25 = vmul.f32 1.442695, %v3467_v13 }
 0x280   :  { %v6951_v33 = vpop.eup %6950  ;;  %v2366_v7 = vmul.f32 %v6949_v3, %v10626_v10  ;;  %v2397_v35 = vmul.f32 %v13095_v26, %v2364_v19  ;;  %6968 = vpow2.f32 %v3674_v29  ;;  %v3686_v34 = vmul.f32 1.442695, %v3468_v50 }
 0x281   :  { %v6953_v9 = vpop.eup %6952  ;;  %v2367_v52 = vmul.f32 %v6951_v33, %v10632_v55  ;;  %v2398_v2 = vmul.f32 %v13095_v26, %v2365_v46  ;;  %6970 = vpow2.f32 %v3676_v49  ;;  %v3688_v63 = vmul.f32 1.442695, %v3469_v54  ;;  %v13138_v33 = vld [vmem:[#allocation137_spill] sm:$0xff] }
 0x282   :  { %v6955_v57 = vpop.eup %6954  ;;  %v2368_v42 = vmul.f32 %v6953_v9, %v10638_v62  ;;  %v2399_v60 = vmul.f32 %v13095_v26, %v2366_v7  ;;  %v2430_v20 = vadd.f32 %v13135_v37, %v2397_v35  ;;  %6972 = vpow2.f32 %v3678_v23  ;;  %v13140_v7 = vld [vmem:[#allocation141_spill] sm:$0xff] }
 0x283   :  { %v6957_v10 = vpop.eup %6956  ;;  %v2369_v8 = vmul.f32 %v6955_v57, %v10657_v59  ;;  %v2400_v15 = vmul.f32 %v13095_v26, %v2367_v52  ;;  %v2431_v27 = vadd.f32 %v13135_v37, %v2398_v2  ;;  %6974 = vpow2.f32 %v3680_v44  ;;  %v13141_v52 = vld [vmem:[#allocation143_spill] sm:$0xff]  ;;  %v13142_v57 = vld [vmem:[#allocation144_spill] sm:$0xff] }
 0x284   :  { %v6959_v55 = vpop.eup %6958  ;;  %v2370_v41 = vmul.f32 %v6957_v10, %v2102_v51  ;;  %v2401_v32 = vmul.f32 %v13095_v26, %v2368_v42  ;;  %v2432_v13 = vadd.f32 %v13135_v37, %v2399_v60  ;;  %6976 = vpow2.f32 %v3682_v21  ;;  %v13143_v60 = vld [vmem:[#allocation147_spill] sm:$0xff]  ;;  %v13144_v10 = vld [vmem:[#allocation148_spill] sm:$0xff] }
 0x285   :  { %v2371_v62 = vmul.f32 %v6959_v55, %v2115_v45  ;;  %v2402_v50 = vmul.f32 %v13095_v26, %v2369_v8  ;;  %v2433_v54 = vadd.f32 %v13135_v37, %v2400_v15  ;;  %v5204_v12 = vsel %vm5190_vm2, %v2431_v27, %v2430_v20  ;;  %v13145_v15 = vld [vmem:[#allocation149_spill] sm:$0xff] }
 0x286   :  { %v2403_v59 = vmul.f32 %v13095_v26, %v2370_v41  ;;  %v2434_v61 = vadd.f32 %v13135_v37, %v2401_v32  ;;  %v5205_v0 = vsel %vm5192_vm3, %v2432_v13, %v5204_v12  ;;  %6978 = vpow2.f32 %v3684_v25  ;;  %v13147_v12 = vld [vmem:[#allocation152_spill] sm:$0xff] }
 0x287   :  { %v2404_v51 = vmul.f32 %v13095_v26, %v2371_v62  ;;  %v2435_v14 = vadd.f32 %v13135_v37, %v2402_v50  ;;  %v5206_v53 = vsel %vm5194_vm4, %v2433_v54, %v5205_v0  ;;  %6980 = vpow2.f32 %v3686_v34  ;;  %v13146_v62 = vld [vmem:[#allocation150_spill] sm:$0xff] }
 0x288   :  { %v10724_v29 = vpop.eup %6960  ;;  %v2436_v22 = vadd.f32 %v13135_v37, %v2403_v59  ;;  %v5207_v30 = vsel %vm5196_vm5, %v2434_v61, %v5206_v53  ;;  %6982 = vpow2.f32 %v3688_v63  ;;  %v3690_v49 = vmul.f32 1.442695, %v3470_v39  ;;  %v13136_v39 = vld [vmem:[#allocation133_spill] sm:$0xff]  ;;  %v13148_v61 = vld [vmem:[#allocation156_spill] sm:$0xff] }
 0x289   :  { %v10731_v23 = vpop.eup %6962  ;;  %v2437_v38 = vadd.f32 %v13135_v37, %v2404_v51  ;;  %v5208_v19 = vsel %vm5198_vm6, %v2435_v14, %v5207_v30  ;;  %v3692_v44 = vmul.f32 1.442695, %v3471_v18  ;;  %v3694_v21 = vmul.f32 1.442695, %v3472_v36  ;;  %v13137_v18 = vld [vmem:[#allocation135_spill] sm:$0xff] }
 0x28a   :  { %v5209_v3 = vsel %vm5200_vm7, %v2436_v22, %v5208_v19  ;;  %6984 = vpow2.f32 %v3690_v49  ;;  %v3696_v31 = vmul.f32 1.442695, %v3473_v6  ;;  %v3971_v45 = vsel %vm93_vm0, %v13136_v39, 0.0  ;;  %v13149_v19 = vld [vmem:[#allocation158_spill] sm:$0xff] }
 0x28b   :  { %v10747_v46 = vpop.eup %6964  ;;  %v5210_v25 = vsel %vm5202_vm8, %v2437_v38, %v5209_v3  ;;  %6986 = vpow2.f32 %v3692_v44  ;;  %v3972_v47 = vadd.f32 %v3971_v45, %v10699_v16  ;;  %v3973_v5 = vsel %vm93_vm0, %v13137_v18, 0.0 }
 0x28c   :  { %v10753_v36 = vpop.eup %6966  ;;  %6413 = vmatprep.subr.mxu1 %v5210_v25  ;;  %6988 = vpow2.f32 %v3694_v21  ;;  %v3975_v4 = vsel %vm93_vm0, %v13138_v33, 0.0  ;;  %v3983_v6 = vsel %vm93_vm0, %v13139_v56, 0.0  ;;  %v3984_v35 = vsel %vm93_vm0, %v13140_v7, 0.0  ;;  %v13150_v21 = vld [vmem:[#allocation159_spill] sm:$0xff] }
 0x28d   :  { %v10761_v34 = vpop.eup %6968  ;;  %6990 = vpow2.f32 %v3696_v31  ;;  %v3974_v16 = vadd.f32 %v3973_v5, %v3972_v47  ;;  %v3985_v9 = vadd.f32 %v3984_v35, %v3983_v6  ;;  %v3986_v2 = vsel %vm93_vm0, %v13141_v52, 0.0  ;;  %6414 = vmatpush3.msra.mxu1 %v5210_v25 }
 0x28e   :  { %v10765_v63 = vpop.eup %6970  ;;  %v3988_v42 = vsel %vm93_vm0, %v13142_v57, 0.0  ;;  %v3996_v20 = vsel %vm93_vm0, %v13143_v60, 0.0  ;;  %v3997_v8 = vsel %vm93_vm0, %v13144_v10, 0.0  ;;  %v3999_v27 = vsel %vm93_vm0, %v13145_v15, 0.0 }
 0x28f   :  { %v10775_v55 = vpop.eup %6972  ;;  %v3976_v41 = vadd.f32 %v3975_v4, %v3974_v16  ;;  %v3987_v32 = vadd.f32 %v3986_v2, %v3985_v9  ;;  %v3998_v13 = vadd.f32 %v3997_v8, %v3996_v20  ;;  %v4001_v50 = vsel %vm93_vm0, %v13146_v62, 0.0 }
 0x290   :  { %v10779_v54 = vpop.eup %6974  ;;  %v4009_v59 = vsel %vm93_vm0, %v13147_v12, 0.0  ;;  %v4010_v0 = vsel %vm93_vm0, %v13148_v61, 0.0  ;;  %v4012_v51 = vsel %vm93_vm0, %v10724_v29, 0.0  ;;  %v4014_v14 = vsel %vm93_vm0, %v10747_v46, 0.0 }
 0x291   :  { %v10789_v53 = vpop.eup %6976  ;;  %v3977_v22 = vrot.slane %v3976_v41, 4  ;;  %v3989_v30 = vadd.f32 %v3988_v42, %v3987_v32  ;;  %v4000_v49 = vadd.f32 %v3999_v27, %v3998_v13  ;;  %v4011_v38 = vadd.f32 %v4010_v0, %v4009_v59 }
 0x292   :  { %v4022_v44 = vsel %vm93_vm0, %v13149_v19, 0.0  ;;  %v4023_v3 = vsel %vm93_vm0, %v13150_v21, 0.0  ;;  %v4025_v31 = vsel %vm93_vm0, %v10731_v23, 0.0  ;;  %v4027_v45 = vsel %vm93_vm0, %v10753_v36, 0.0 }
 0x293   :  { %v10799_v25 = vpop.eup %6978  ;;  %v3978_v47 = vadd.f32 %v3977_v22, %v3976_v41  ;;  %v3990_v5 = vrot.slane %v3989_v30, 4  ;;  %v4002_v4 = vadd.f32 %v4001_v50, %v4000_v49  ;;  %v4013_v6 = vadd.f32 %v4012_v51, %v4011_v38 }
 0x294   :  { %v10801_v35 = vpop.eup %6980  ;;  %v4024_v16 = vadd.f32 %v4023_v3, %v4022_v44  ;;  %v4035_v9 = vsel %vm93_vm0, %v10761_v34, 0.0  ;;  %v4036_v2 = vsel %vm93_vm0, %v10765_v63, 0.0  ;;  %v4038_v42 = vsel %vm93_vm0, %v10775_v55, 0.0 }
 0x295   :  { %v10809_v20 = vpop.eup %6982  ;;  %v3979_v8 = vrot.slane %v3978_v47, 2  ;;  %v3991_v27 = vadd.f32 %v3990_v5, %v3989_v30  ;;  %v4003_v41 = vrot.slane %v4002_v4, 4  ;;  %v4015_v32 = vadd.f32 %v4014_v14, %v4013_v6 }
 0x296   :  { %v4026_v13 = vadd.f32 %v4025_v31, %v4024_v16  ;;  %v4037_v50 = vadd.f32 %v4036_v2, %v4035_v9  ;;  %v4040_v59 = vsel %vm93_vm0, %v10779_v54, 0.0  ;;  %v4048_v0 = vsel %vm93_vm0, %v10789_v53, 0.0 }
 0x297   :  { %v10815_v51 = vpop.eup %6984  ;;  %v3980_v22 = vadd.f32 %v3979_v8, %v3978_v47  ;;  %v3992_v49 = vrot.slane %v3991_v27, 2  ;;  %v4004_v38 = vadd.f32 %v4003_v41, %v4002_v4  ;;  %v4016_v44 = vrot.slane %v4015_v32, 4 }
 0x298   :  { %v10817_v3 = vpop.eup %6986  ;;  %v4028_v37 = vadd.f32 %v4027_v45, %v4026_v13  ;;  %v4039_v30 = vadd.f32 %v4038_v42, %v4037_v50  ;;  %v4049_v14 = vsel %vm93_vm0, %v10799_v25, 0.0  ;;  %v4051_v31 = vsel %vm93_vm0, %v10801_v35, 0.0 }
 0x299   :  { %v10823_v5 = vpop.eup %6988  ;;  %v3981_v6 = vrot.slane %v3980_v22, 1  ;;  %v3993_v16 = vadd.f32 %v3992_v49, %v3991_v27  ;;  %v4005_v9 = vrot.slane %v4004_v38, 2  ;;  %v4017_v2 = vadd.f32 %v4016_v44, %v4015_v32 }
 0x29a   :  { %v10825_v47 = vpop.eup %6990  ;;  %v4029_v4 = vrot.slane %v4028_v37, 4  ;;  %v4041_v8 = vadd.f32 %v4040_v59, %v4039_v30  ;;  %v4050_v41 = vadd.f32 %v4049_v14, %v4048_v0  ;;  %v4053_v45 = vsel %vm93_vm0, %v10809_v20, 0.0 }
 0x29b   :  { %v10829_v42 = vadd.f32 %v3981_v6, %v3980_v22  ;;  %v3994_v13 = vrot.slane %v3993_v16, 1  ;;  %v4006_v50 = vadd.f32 %v4005_v9, %v4004_v38  ;;  %v4018_v26 = vrot.slane %v4017_v2, 2 }
 0x29c   :  { %v4030_v1 = vadd.f32 %v4029_v4, %v4028_v37  ;;  %v4042_v58 = vrot.slane %v4041_v8, 4  ;;  %v4052_v11 = vadd.f32 %v4051_v31, %v4050_v41  ;;  %v4061_v27 = vsel %vm93_vm0, %v10815_v51, 0.0  ;;  %v13151_v41 = vld [vmem:[#allocation41_spill] sm:$0xff] }
 0x29d   :  { %v10833_v32 = vadd.f32 %v3994_v13, %v3993_v16  ;;  %v4007_v49 = vrot.slane %v4006_v50, 1  ;;  %v4019_v44 = vadd.f32 %v4018_v26, %v4017_v2  ;;  %v4062_v59 = vsel %vm93_vm0, %v10817_v3, 0.0 }
 0x29e   :  { %v4031_v0 = vrot.slane %v4030_v1, 2  ;;  %v4043_v30 = vadd.f32 %v4042_v58, %v4041_v8  ;;  %v4054_v22 = vadd.f32 %v4053_v45, %v4052_v11  ;;  %v4063_v14 = vadd.f32 %v4062_v59, %v4061_v27  ;;  %v13152_v11 = vld [vmem:[#allocation44_spill] sm:$0xff]  ;;  %v13153_v45 = vld [vmem:[#allocation46_spill] sm:$0xff] }
 0x29f   :  { %v10837_v6 = vadd.f32 %v4007_v49, %v4006_v50  ;;  %v4020_v38 = vrot.slane %v4019_v44, 1  ;;  %v4064_v37 = vsel %vm93_vm0, %v10823_v5, 0.0  ;;  %v4066_v31 = vsel %vm93_vm0, %v10825_v47, 0.0 }
 0x2a0   :  { %v4032_v16 = vadd.f32 %v4031_v0, %v4030_v1  ;;  %v4044_v9 = vrot.slane %v4043_v30, 2  ;;  %v4055_v4 = vrot.slane %v4054_v22, 4  ;;  %v4065_v26 = vadd.f32 %v4064_v37, %v4063_v14 }
 0x2a1   :  { %v10843_v2 = vadd.f32 %v4020_v38, %v4019_v44  ;;  %v4242_v58 = vmul.f32 %v13134_v48, %v13151_v41  ;;  %v4243_v8 = vmul.f32 %v13136_v39, %v13152_v11  ;;  %v4244_v13 = vmul.f32 %v13137_v18, %v13153_v45 }
 0x2a2   :  { %v4033_v50 = vrot.slane %v4032_v16, 1  ;;  %v4045_v27 = vadd.f32 %v4044_v9, %v4043_v30  ;;  %v4056_v49 = vadd.f32 %v4055_v4, %v4054_v22  ;;  %v4067_v59 = vadd.f32 %v4066_v31, %v4065_v26 }
 0x2a3   :  { %v4245_v1 = vmul.f32 %v13138_v33, %v13154_v28  ;;  %v4246_v44 = vmul.f32 %v13139_v56, %v13151_v41  ;;  %v4247_v0 = vmul.f32 %v13140_v7, %v13152_v11  ;;  %v4248_v48 = vmul.f32 %v13141_v52, %v13153_v45 }
 0x2a4   :  { %v10859_v39 = vadd.f32 %v4033_v50, %v4032_v16  ;;  %v4046_v14 = vrot.slane %v4045_v27, 1  ;;  %v4057_v18 = vrot.slane %v4056_v49, 2  ;;  %v4068_v38 = vrot.slane %v4067_v59, 4 }
 0x2a5   :  { %v4249_v30 = vmul.f32 %v13142_v57, %v13154_v28  ;;  %v4250_v33 = vmul.f32 %v13143_v60, %v13151_v41  ;;  %v4251_v56 = vmul.f32 %v13144_v10, %v13152_v11  ;;  %v4252_v7 = vmul.f32 %v13145_v15, %v13153_v45 }
 0x2a6   :  { %v10869_v22 = vadd.f32 %v4046_v14, %v4045_v27  ;;  %v4058_v52 = vadd.f32 %v4057_v18, %v4056_v49  ;;  %v4069_v37 = vadd.f32 %v4068_v38, %v4067_v59  ;;  %v4253_v31 = vmul.f32 %v13146_v62, %v13154_v28 }
 0x2a7   :  { %v4254_v16 = vmul.f32 %v13147_v12, %v13151_v41  ;;  %v4255_v57 = vmul.f32 %v13148_v61, %v13152_v11  ;;  %v4256_v60 = vmul.f32 %v10724_v29, %v13153_v45  ;;  %v4257_v10 = vmul.f32 %v10747_v46, %v13154_v28 }
 0x2a8   :  { %v4059_v15 = vrot.slane %v4058_v52, 1  ;;  %v4070_v9 = vrot.slane %v4069_v37, 2  ;;  %v4258_v4 = vmul.f32 %v13149_v19, %v13151_v41  ;;  %v4259_v62 = vmul.f32 %v13150_v21, %v13152_v11 }
 0x2a9   :  { %v4260_v12 = vmul.f32 %v10731_v23, %v13153_v45  ;;  %v4261_v61 = vmul.f32 %v10753_v36, %v13154_v28  ;;  %v4262_v29 = vmul.f32 %v10761_v34, %v13151_v41  ;;  %v4263_v46 = vmul.f32 %v10765_v63, %v13152_v11 }
 0x2aa   :  { %v10893_v26 = vadd.f32 %v4059_v15, %v4058_v52  ;;  %v4071_v50 = vadd.f32 %v4070_v9, %v4069_v37  ;;  %v4264_v19 = vmul.f32 %v10775_v55, %v13153_v45  ;;  %v4265_v21 = vmul.f32 %v10779_v54, %v13154_v28 }
 0x2ab   :  { %v4266_v23 = vmul.f32 %v10789_v53, %v13151_v41  ;;  %v4267_v36 = vmul.f32 %v10799_v25, %v13152_v11  ;;  %v10905_v34 = vmul.f32 %v10801_v35, %v13153_v45  ;;  %v10909_v63 = vmul.f32 %v10809_v20, %v13154_v28 }
 0x2ac   :  { %v4072_v27 = vrot.slane %v4071_v50, 1  ;;  %v10913_v55 = vmul.f32 %v10815_v51, %v13151_v41  ;;  %v10917_v54 = vmul.f32 %v10817_v3, %v13152_v11  ;;  %v10921_v53 = vmul.f32 %v10823_v5, %v13153_v45 }
 0x2ad   :  { %v10925_v25 = vmul.f32 %v10825_v47, %v13154_v28  ;;  %v4514_v35 = vsel %vm93_vm0, %v4242_v58, 0.0  ;;  %v4515_v20 = vsel %vm93_vm0, %v4243_v8, 0.0  ;;  %v4517_v49 = vsel %vm93_vm0, %v4244_v13, 0.0 }
 0x2ae   :  { %v10930_v51 = vadd.f32 %v4072_v27, %v4071_v50  ;;  %v4516_v59 = vadd.f32 %v4515_v20, %v4514_v35  ;;  %v4519_v3 = vsel %vm93_vm0, %v4245_v1, 0.0  ;;  %v4527_v14 = vsel %vm93_vm0, %v4246_v44, 0.0 }
 0x2af   :  { %v4528_v5 = vsel %vm93_vm0, %v4247_v0, 0.0  ;;  %v4530_v18 = vsel %vm93_vm0, %v4248_v48, 0.0  ;;  %v4532_v47 = vsel %vm93_vm0, %v4249_v30, 0.0  ;;  %v4540_v38 = vsel %vm93_vm0, %v4250_v33, 0.0 }
 0x2b0   :  { %v4518_v58 = vadd.f32 %v4517_v49, %v4516_v59  ;;  %v4529_v52 = vadd.f32 %v4528_v5, %v4527_v14  ;;  %v4541_v8 = vsel %vm93_vm0, %v4251_v56, 0.0  ;;  %v4543_v13 = vsel %vm93_vm0, %v4252_v7, 0.0 }
 0x2b1   :  { %v4542_v37 = vadd.f32 %v4541_v8, %v4540_v38  ;;  %v4545_v15 = vsel %vm93_vm0, %v4253_v31, 0.0  ;;  %v4553_v1 = vsel %vm93_vm0, %v4254_v16, 0.0  ;;  %v4554_v44 = vsel %vm93_vm0, %v4255_v57, 0.0 }
 0x2b2   :  { %v4520_v0 = vadd.f32 %v4519_v3, %v4518_v58  ;;  %v4531_v9 = vadd.f32 %v4530_v18, %v4529_v52  ;;  %v4555_v48 = vadd.f32 %v4554_v44, %v4553_v1  ;;  %v4556_v30 = vsel %vm93_vm0, %v4256_v60, 0.0 }
 0x2b3   :  { %v4544_v50 = vadd.f32 %v4543_v13, %v4542_v37  ;;  %v4558_v33 = vsel %vm93_vm0, %v4257_v10, 0.0  ;;  %v4566_v27 = vsel %vm93_vm0, %v4258_v4, 0.0  ;;  %v4567_v56 = vsel %vm93_vm0, %v4259_v62, 0.0 }
 0x2b4   :  { %v4521_v7 = vrot.slane %v4520_v0, 4  ;;  %v4533_v35 = vadd.f32 %v4532_v47, %v4531_v9  ;;  %v4557_v20 = vadd.f32 %v4556_v30, %v4555_v48  ;;  %v4568_v31 = vadd.f32 %v4567_v56, %v4566_v27 }
 0x2b5   :  { %v4546_v49 = vadd.f32 %v4545_v15, %v4544_v50  ;;  %v4569_v16 = vsel %vm93_vm0, %v4260_v12, 0.0  ;;  %v4571_v57 = vsel %vm93_vm0, %v4261_v61, 0.0  ;;  %v4579_v59 = vsel %vm93_vm0, %v4262_v29, 0.0 }
 0x2b6   :  { %v4522_v3 = vadd.f32 %v4521_v7, %v4520_v0  ;;  %v4534_v60 = vrot.slane %v4533_v35, 4  ;;  %v4559_v14 = vadd.f32 %v4558_v33, %v4557_v20  ;;  %v4570_v5 = vadd.f32 %v4569_v16, %v4568_v31 }
 0x2b7   :  { %v4547_v10 = vrot.slane %v4546_v49, 4  ;;  %v4580_v4 = vsel %vm93_vm0, %v4263_v46, 0.0  ;;  %v4582_v62 = vsel %vm93_vm0, %v4264_v19, 0.0  ;;  %v4584_v18 = vsel %vm93_vm0, %v4265_v21, 0.0 }
 0x2b8   :  { %v4523_v47 = vrot.slane %v4522_v3, 2  ;;  %v4535_v38 = vadd.f32 %v4534_v60, %v4533_v35  ;;  %v4560_v58 = vrot.slane %v4559_v14, 4  ;;  %v4572_v52 = vadd.f32 %v4571_v57, %v4570_v5 }
 0x2b9   :  { %v4548_v12 = vadd.f32 %v4547_v10, %v4546_v49  ;;  %v4581_v8 = vadd.f32 %v4580_v4, %v4579_v59  ;;  %v4592_v61 = vsel %vm93_vm0, %v4266_v23, 0.0  ;;  %v4593_v29 = vsel %vm93_vm0, %v4267_v36, 0.0 }
 0x2ba   :  { %v4524_v13 = vadd.f32 %v4523_v47, %v4522_v3  ;;  %v4536_v37 = vrot.slane %v4535_v38, 2  ;;  %v4561_v15 = vadd.f32 %v4560_v58, %v4559_v14  ;;  %v4573_v1 = vrot.slane %v4572_v52, 4  ;;  %v13155_v58 = vld [vmem:[#allocation11_spill] sm:$0xff] }
 0x2bb   :  { %v4549_v44 = vrot.slane %v4548_v12, 2  ;;  %v4583_v46 = vadd.f32 %v4582_v62, %v4581_v8  ;;  %v4594_v0 = vadd.f32 %v4593_v29, %v4592_v61  ;;  %v4595_v19 = vsel %vm93_vm0, %v10905_v34, 0.0  ;;  %v13157_v8 = vld [vmem:[#allocation10_spill] sm:$0xff]  ;;  %v13158_v61 = vld [vmem:[#allocation196_spill] sm:$0xff] }
 0x2bc   :  { %v4525_v21 = vrot.slane %v4524_v13, 1  ;;  %v4537_v9 = vadd.f32 %v4536_v37, %v4535_v38  ;;  %v4562_v48 = vrot.slane %v4561_v15, 2  ;;  %v4574_v30 = vadd.f32 %v4573_v1, %v4572_v52  ;;  %v13156_v52 = vld [vmem:[#allocation195_spill] sm:$0xff] }
 0x2bd   :  { %v4550_v50 = vadd.f32 %v4549_v44, %v4548_v12  ;;  %v4585_v33 = vadd.f32 %v4584_v18, %v4583_v46  ;;  %v4596_v27 = vadd.f32 %v4595_v19, %v4594_v0  ;;  %v4597_v23 = vsel %vm93_vm0, %v10909_v63, 0.0 }
 0x2be   :  { %v10959_v36 = vadd.f32 %v4525_v21, %v4524_v13  ;;  %v4538_v56 = vrot.slane %v4537_v9, 1  ;;  %v4563_v7 = vadd.f32 %v4562_v48, %v4561_v15  ;;  %v4575_v35 = vrot.slane %v4574_v30, 2  ;;  %v13160_v15 = vld [vmem:[#allocation197_spill] sm:$0xff]  ;;  %v13162_v21 = vld [vmem:[#allocation219_spill] sm:$0xff] }
 0x2bf   :  { %v4551_v20 = vrot.slane %v4550_v50, 1  ;;  %v4586_v31 = vrot.slane %v4585_v33, 4  ;;  %v4598_v49 = vadd.f32 %v4597_v23, %v4596_v27  ;;  %v4605_v34 = vsel %vm93_vm0, %v10913_v55, 0.0  ;;  %v13166_v23 = vld [vmem:[#allocation220_spill] sm:$0xff] }
 0x2c0   :  { %v10963_v16 = vadd.f32 %v4538_v56, %v4537_v9  ;;  %v4564_v57 = vrot.slane %v4563_v7, 1  ;;  %v4576_v59 = vadd.f32 %v4575_v35, %v4574_v30  ;;  %v4606_v3 = vsel %vm93_vm0, %v10917_v54, 0.0  ;;  %v13163_v9 = vld [vmem:[#allocation200_spill] sm:$0xff]  ;;  %v13168_v35 = vld [vmem:[#allocation206_spill] sm:$0xff] }
 0x2c1   :  { %v10967_v60 = vadd.f32 %v4551_v20, %v4550_v50  ;;  %v4587_v63 = vadd.f32 %v4586_v31, %v4585_v33  ;;  %v4599_v14 = vrot.slane %v4598_v49, 4  ;;  %v4607_v5 = vadd.f32 %v4606_v3, %v4605_v34  ;;  %v13167_v56 = vld [vmem:[#allocation204_spill] sm:$0xff]  ;;  %v13169_v34 = vld [vmem:[#allocation210_spill] sm:$0xff]  ;;  %v13170_v3 = vld [vmem:[#allocation221_spill] sm:$0xff] }
 0x2c2   :  { %v10969_v10 = vadd.f32 %v4564_v57, %v4563_v7  ;;  %v4577_v4 = vrot.slane %v4576_v59, 1  ;;  %v4608_v62 = vsel %vm93_vm0, %v10921_v53, 0.0  ;;  %v4610_v55 = vsel %vm93_vm0, %v10925_v25, 0.0  ;;  %v13159_v25 = vld [vmem:[#allocation8_spill] sm:$0xff] }
 0x2c3   :  { %v4588_v18 = vrot.slane %v4587_v63, 2  ;;  %v4600_v47 = vadd.f32 %v4599_v14, %v4598_v49  ;;  %v4609_v38 = vadd.f32 %v4608_v62, %v4607_v5  ;;  %6992 = vrcp.f32 %v10829_v42 }
 0x2c4   :  { %v10976_v54 = vadd.f32 %v4577_v4, %v4576_v59  ;;  %6994 = vrcp.f32 %v10833_v32  ;;  %v515_v12 = vmul.f32 %v13156_v52, %v13155_v58  ;;  %v518_v29 = vmul.f32 %v13158_v61, %v13157_v8  ;;  %v13161_v32 = vld [vmem:[#allocation9_spill] sm:$0xff]  ;;  %v13174_v52 = vld [vmem:[#allocation226_spill] sm:$0xff] }
 0x2c5   :  { %v4589_v13 = vadd.f32 %v4588_v18, %v4587_v63  ;;  %v4601_v53 = vrot.slane %v4600_v47, 2  ;;  %v4611_v37 = vadd.f32 %v4610_v55, %v4609_v38  ;;  %6996 = vrcp.f32 %v10837_v6  ;;  %v13173_v55 = vld [vmem:[#allocation223_spill] sm:$0xff] }
 0x2c6   :  { %6998 = vrcp.f32 %v10843_v2  ;;  %v519_v42 = vmul.f32 %v13158_v61, %v13155_v58  ;;  %v520_v1 = vmul.f32 %v13160_v15, %v13159_v25  ;;  %v521_v44 = vmul.f32 %v13160_v15, %v13161_v32 }
 0x2c7   :  { %v4590_v46 = vrot.slane %v4589_v13, 1  ;;  %v4602_v0 = vadd.f32 %v4601_v53, %v4600_v47  ;;  %v4612_v19 = vrot.slane %v4611_v37, 4  ;;  %7000 = vrcp.f32 %v10859_v39  ;;  %v13164_v39 = vld [vmem:[#allocation217_spill] sm:$0xff] }
 0x2c8   :  { %7002 = vrcp.f32 %v10869_v22  ;;  %v10995_v6 = vmul.f32 %v13160_v15, %v13157_v8  ;;  %v10999_v2 = vmul.f32 %v13160_v15, %v13155_v58  ;;  %v995_v48 = vsub.f32 %v13163_v9, %v13162_v21  ;;  %v13165_v22 = vld [vmem:[#allocation202_spill] sm:$0xff] }
 0x2c9   :  { %v4591_v30 = vadd.f32 %v4590_v46, %v4589_v13  ;;  %v4603_v50 = vrot.slane %v4602_v0, 1  ;;  %v4613_v33 = vadd.f32 %v4612_v19, %v4611_v37  ;;  %7004 = vrcp.f32 %v10893_v26  ;;  %v13171_v26 = vld [vmem:[#allocation211_spill] sm:$0xff] }
 0x2ca   :  { %7006 = vrcp.f32 %v10930_v51  ;;  %v999_v27 = vsub.f32 %v13165_v22, %v13164_v39  ;;  %v1000_v7 = vsub.f32 %v13167_v56, %v13166_v23  ;;  %v1001_v20 = vsub.f32 %v13168_v35, %v13166_v23  ;;  %v13172_v51 = vld [vmem:[#allocation213_spill] sm:$0xff]  ;;  %v13175_v13 = vld [vmem:[#allocation227_spill] sm:$0xff] }
 0x2cb   :  { %v4604_v31 = vadd.f32 %v4603_v50, %v4602_v0  ;;  %v4614_v49 = vrot.slane %v4613_v33, 2  ;;  %v1002_v57 = vsub.f32 %v13169_v34, %v13166_v23  ;;  %v1003_v59 = vsub.f32 %v515_v12, %v13166_v23 }
 0x2cc   :  { %v1004_v63 = vsub.f32 %v13171_v26, %v13170_v3  ;;  %v1005_v14 = vsub.f32 %v13172_v51, %v13170_v3  ;;  %v1006_v5 = vsub.f32 %v518_v29, %v13170_v3  ;;  %v1007_v4 = vsub.f32 %v519_v42, %v13170_v3 }
 0x2cd   :  { %v4615_v62 = vadd.f32 %v4614_v49, %v4613_v33  ;;  %v1008_v18 = vsub.f32 %v520_v1, %v13173_v55  ;;  %v1009_v47 = vsub.f32 %v521_v44, %v13173_v55  ;;  %v1010_v38 = vsub.f32 %v10995_v6, %v13173_v55  ;;  %v13176_v33 = vld [vmem:[#allocation30_spill] sm:$0xff] }
 0x2ce   :  { %v1011_v58 = vsub.f32 %v10999_v2, %v13173_v55  ;;  %7008 = vpow2.f32 %v13174_v52  ;;  %v1138_v12 = vmul.f32 1.442695, %v995_v48  ;;  %v1146_v8 = vmul.f32 1.442695, %v999_v27 }
 0x2cf   :  { %v4616_v61 = vrot.slane %v4615_v62, 1  ;;  %7010 = vpow2.f32 %v13175_v13  ;;  %v1148_v29 = vmul.f32 1.442695, %v1000_v7  ;;  %v1150_v53 = vmul.f32 1.442695, %v1001_v20  ;;  %v13177_v20 = vld [vmem:[#allocation49_spill] sm:$0xff] }
 0x2d0   :  { %v6993_v37 = vpop.eup %6992  ;;  %7012 = vpow2.f32 %v1138_v12  ;;  %v1152_v42 = vmul.f32 1.442695, %v1002_v57  ;;  %v1154_v25 = vmul.f32 1.442695, %v1003_v59  ;;  %v1156_v15 = vmul.f32 1.442695, %v1004_v63 }
 0x2d1   :  { %v6995_v1 = vpop.eup %6994  ;;  %v4617_v32 = vadd.f32 %v4616_v61, %v4615_v62  ;;  %v4770_v44 = vmul.f32 %v6993_v37, %v10959_v36  ;;  %7014 = vpow2.f32 %v1146_v8  ;;  %v1158_v46 = vmul.f32 1.442695, %v1005_v14 }
 0x2d2   :  { %v6997_v0 = vpop.eup %6996  ;;  %v4771_v19 = vmul.f32 %v6995_v1, %v10963_v16  ;;  %7016 = vpow2.f32 %v1148_v29  ;;  %v1160_v21 = vmul.f32 1.442695, %v1006_v5  ;;  %v1162_v9 = vmul.f32 1.442695, %v1007_v4 }
 0x2d3   :  { %v6999_v48 = vpop.eup %6998  ;;  %v4772_v50 = vmul.f32 %v6997_v0, %v10967_v60  ;;  %v4803_v39 = vmul.f32 %v13176_v33, %v4770_v44  ;;  %7018 = vpow2.f32 %v1150_v53  ;;  %v1164_v22 = vmul.f32 1.442695, %v1008_v18  ;;  %v13180_v0 = vld [vmem:[#allocation234_spill] sm:$0xff] }
 0x2d4   :  { %v7001_v27 = vpop.eup %7000  ;;  %v4773_v23 = vmul.f32 %v6999_v48, %v10969_v10  ;;  %v4804_v36 = vmul.f32 %v13176_v33, %v4771_v19  ;;  %7020 = vpow2.f32 %v1152_v42  ;;  %v1166_v56 = vmul.f32 1.442695, %v1009_v47  ;;  %v13183_v48 = vld [vmem:[#allocation239_spill] sm:$0xff] }
 0x2d5   :  { %v7003_v7 = vpop.eup %7002  ;;  %v4774_v16 = vmul.f32 %v7001_v27, %v10976_v54  ;;  %v4805_v35 = vmul.f32 %v13176_v33, %v4772_v50  ;;  %v4836_v49 = vadd.f32 %v13177_v20, %v4803_v39  ;;  %7022 = vpow2.f32 %v1154_v25  ;;  %v13184_v39 = vld [vmem:[#allocation243_spill] sm:$0xff] }
 0x2d6   :  { %v7005_v60 = vpop.eup %7004  ;;  %v4775_v34 = vmul.f32 %v7003_v7, %v4591_v30  ;;  %v4806_v57 = vmul.f32 %v13176_v33, %v4773_v23  ;;  %v4837_v59 = vadd.f32 %v13177_v20, %v4804_v36  ;;  %7024 = vpow2.f32 %v1156_v15  ;;  %v13178_v15 = vld [vmem:[#allocation231_spill] sm:$0xff] }
 0x2d7   :  { %v7007_v10 = vpop.eup %7006  ;;  %v4776_v3 = vmul.f32 %v7005_v60, %v4604_v31  ;;  %v4807_v26 = vmul.f32 %v13176_v33, %v4774_v16  ;;  %v4838_v63 = vadd.f32 %v13177_v20, %v4805_v35  ;;  %7026 = vpow2.f32 %v1158_v46  ;;  %v13186_v16 = vld [vmem:[#allocation246_spill] sm:$0xff]  ;;  %v13187_v60 = vld [vmem:[#allocation248_spill] sm:$0xff] }
 0x2d8   :  { %v4777_v54 = vmul.f32 %v7007_v10, %v4617_v32  ;;  %v4808_v51 = vmul.f32 %v13176_v33, %v4775_v34  ;;  %v4839_v14 = vadd.f32 %v13177_v20, %v4806_v57  ;;  %v5556_v5 = vsel %vm5190_vm2, %v4837_v59, %v4836_v49  ;;  %v13188_v57 = vld [vmem:[#allocation12_spill] sm:$0xff]  ;;  %v13189_v10 = vld [vmem:[#allocation13_spill] sm:$0xff] }
 0x2d9   :  { %v4809_v30 = vmul.f32 %v13176_v33, %v4776_v3  ;;  %v4840_v4 = vadd.f32 %v13177_v20, %v4807_v26  ;;  %v5557_v62 = vsel %vm5192_vm3, %v4838_v63, %v5556_v5  ;;  %7028 = vpow2.f32 %v1160_v21  ;;  %v13182_v21 = vld [vmem:[#allocation238_spill] sm:$0xff] }
 0x2da   :  { %v4810_v31 = vmul.f32 %v13176_v33, %v4777_v54  ;;  %v4841_v18 = vadd.f32 %v13177_v20, %v4808_v51  ;;  %v5558_v47 = vsel %vm5194_vm4, %v4839_v14, %v5557_v62  ;;  %7030 = vpow2.f32 %v1162_v9  ;;  %v13190_v26 = vld [vmem:[#allocation250_spill] sm:$0xff] }
 0x2db   :  { %v11050_v52 = vpop.eup %7008  ;;  %v4842_v12 = vadd.f32 %v13177_v20, %v4809_v30  ;;  %v5559_v8 = vsel %vm5196_vm5, %v4840_v4, %v5558_v47  ;;  %7032 = vpow2.f32 %v1164_v22  ;;  %v1168_v61 = vmul.f32 1.442695, %v1010_v38  ;;  %v13179_v38 = vld [vmem:[#allocation232_spill] sm:$0xff]  ;;  %v13191_v30 = vld [vmem:[#allocation254_spill] sm:$0xff] }
 0x2dc   :  { %v11057_v13 = vpop.eup %7010  ;;  %v4843_v29 = vadd.f32 %v13177_v20, %v4810_v31  ;;  %v5560_v53 = vsel %vm5198_vm6, %v4841_v18, %v5559_v8  ;;  %7034 = vpow2.f32 %v1166_v56  ;;  %v1170_v37 = vmul.f32 1.442695, %v1011_v58  ;;  %v13181_v58 = vld [vmem:[#allocation236_spill] sm:$0xff] }
 0x2dd   :  { %v11064_v42 = vpop.eup %7012  ;;  %v5561_v25 = vsel %vm5200_vm7, %v4842_v12, %v5560_v53  ;;  %7036 = vpow2.f32 %v1168_v61  ;;  %v1364_v6 = vsel %vm93_vm0, %v13178_v15, 0.0  ;;  %v1365_v1 = vsel %vm93_vm0, %v13179_v38, 0.0  ;;  %v13185_v56 = vld [vmem:[#allocation244_spill] sm:$0xff]  ;;  %v13192_v12 = vld [vmem:[#allocation257_spill] sm:$0xff] }
 0x2de   :  { %v11071_v32 = vpop.eup %7014  ;;  %v5562_v44 = vsel %vm5202_vm8, %v4843_v29, %v5561_v25  ;;  %7038 = vpow2.f32 %v1170_v37  ;;  %v1366_v46 = vadd.f32 %v1365_v1, %v1364_v6  ;;  %v1367_v2 = vsel %vm93_vm0, %v13180_v0, 0.0  ;;  %v13193_v25 = vld [vmem:[#allocation258_spill] sm:$0xff] }
 0x2df   :  { %v11076_v55 = vpop.eup %7016  ;;  %6455 = vmatprep.subr.mxu0 %v5562_v44  ;;  %v1369_v19 = vsel %vm93_vm0, %v13181_v58, 0.0  ;;  %v1377_v9 = vsel %vm93_vm0, %v13182_v21, 0.0  ;;  %v1378_v50 = vsel %vm93_vm0, %v13183_v48, 0.0  ;;  %v1380_v22 = vsel %vm93_vm0, %v13184_v39, 0.0 }
 0x2e0   :  { %v11086_v27 = vpop.eup %7018  ;;  %6456 = vmatpush3.msra.mxu0 %v5562_v44  ;;  %v1368_v23 = vadd.f32 %v1367_v2, %v1366_v46  ;;  %v1379_v36 = vadd.f32 %v1378_v50, %v1377_v9  ;;  %v1382_v7 = vsel %vm93_vm0, %v13185_v56, 0.0  ;;  %v1390_v35 = vsel %vm93_vm0, %v13186_v16, 0.0 }
 0x2e1   :  { %v11092_v49 = vpop.eup %7020  ;;  %v1391_v34 = vsel %vm93_vm0, %v13187_v60, 0.0  ;;  %v1393_v59 = vsel %vm93_vm0, %v13188_v57, 0.0  ;;  %v1395_v3 = vsel %vm93_vm0, %v13189_v10, 0.0  ;;  %v1403_v63 = vsel %vm93_vm0, %v13190_v26, 0.0 }
 0x2e2   :  { %v11102_v54 = vpop.eup %7022  ;;  %v1370_v51 = vadd.f32 %v1369_v19, %v1368_v23  ;;  %v1381_v14 = vadd.f32 %v1380_v22, %v1379_v36  ;;  %v1392_v5 = vadd.f32 %v1391_v34, %v1390_v35  ;;  %v1404_v4 = vsel %vm93_vm0, %v13191_v30, 0.0 }
 0x2e3   :  { %v11106_v62 = vpop.eup %7024  ;;  %v1405_v31 = vadd.f32 %v1404_v4, %v1403_v63  ;;  %v1406_v18 = vsel %vm93_vm0, %v11050_v52, 0.0  ;;  %v1408_v47 = vsel %vm93_vm0, %v11064_v42, 0.0  ;;  %v1416_v8 = vsel %vm93_vm0, %v13192_v12, 0.0 }
 0x2e4   :  { %v11114_v61 = vpop.eup %7026  ;;  %v1371_v29 = vrot.slane %v1370_v51, 4  ;;  %v1383_v53 = vadd.f32 %v1382_v7, %v1381_v14  ;;  %v1394_v37 = vadd.f32 %v1393_v59, %v1392_v5  ;;  %v1417_v6 = vsel %vm93_vm0, %v13193_v25, 0.0 }
 0x2e5   :  { %v1407_v1 = vadd.f32 %v1406_v18, %v1405_v31  ;;  %v1418_v44 = vadd.f32 %v1417_v6, %v1416_v8  ;;  %v1419_v46 = vsel %vm93_vm0, %v11057_v13, 0.0  ;;  %v1421_v2 = vsel %vm93_vm0, %v11071_v32, 0.0 }
 0x2e6   :  { %v11122_v19 = vpop.eup %7028  ;;  %v1372_v9 = vadd.f32 %v1371_v29, %v1370_v51  ;;  %v1384_v50 = vrot.slane %v1383_v53, 4  ;;  %v1396_v22 = vadd.f32 %v1395_v3, %v1394_v37  ;;  %v1429_v23 = vsel %vm93_vm0, %v11076_v55, 0.0 }
 0x2e7   :  { %v11126_v36 = vpop.eup %7030  ;;  %v1409_v7 = vadd.f32 %v1408_v47, %v1407_v1  ;;  %v1420_v35 = vadd.f32 %v1419_v46, %v1418_v44  ;;  %v1430_v34 = vsel %vm93_vm0, %v11086_v27, 0.0  ;;  %v1432_v59 = vsel %vm93_vm0, %v11092_v49, 0.0 }
 0x2e8   :  { %v11132_v63 = vpop.eup %7032  ;;  %v1373_v14 = vrot.slane %v1372_v9, 2  ;;  %v1385_v5 = vadd.f32 %v1384_v50, %v1383_v53  ;;  %v1397_v51 = vrot.slane %v1396_v22, 4  ;;  %v1431_v4 = vadd.f32 %v1430_v34, %v1429_v23 }
 0x2e9   :  { %v11134_v3 = vpop.eup %7034  ;;  %v1410_v31 = vrot.slane %v1409_v7, 4  ;;  %v1422_v18 = vadd.f32 %v1421_v2, %v1420_v35  ;;  %v1434_v47 = vsel %vm93_vm0, %v11102_v54, 0.0  ;;  %v1442_v8 = vsel %vm93_vm0, %v11106_v62, 0.0 }
 0x2ea   :  { %v11140_v29 = vpop.eup %7036  ;;  %v1374_v37 = vadd.f32 %v1373_v14, %v1372_v9  ;;  %v1386_v6 = vrot.slane %v1385_v5, 2  ;;  %v1398_v1 = vadd.f32 %v1397_v51, %v1396_v22  ;;  %v1433_v44 = vadd.f32 %v1432_v59, %v1431_v4 }
 0x2eb   :  { %v11142_v46 = vpop.eup %7038  ;;  %v1411_v53 = vadd.f32 %v1410_v31, %v1409_v7  ;;  %v1423_v50 = vrot.slane %v1422_v18, 4  ;;  %v1443_v23 = vsel %vm93_vm0, %v11114_v61, 0.0  ;;  %v1445_v2 = vsel %vm93_vm0, %v11122_v19, 0.0 }
 0x2ec   :  { %v1375_v35 = vrot.slane %v1374_v37, 1  ;;  %v1387_v34 = vadd.f32 %v1386_v6, %v1385_v5  ;;  %v1399_v20 = vrot.slane %v1398_v1, 2  ;;  %v1435_v33 = vadd.f32 %v1434_v47, %v1433_v44 }
 0x2ed   :  { %v1412_v28 = vrot.slane %v1411_v53, 2  ;;  %v1424_v45 = vadd.f32 %v1423_v50, %v1422_v18  ;;  %v1444_v9 = vadd.f32 %v1443_v23, %v1442_v8  ;;  %v1447_v22 = vsel %vm93_vm0, %v11126_v36, 0.0 }
 0x2ee   :  { %v11150_v59 = vadd.f32 %v1375_v35, %v1374_v37  ;;  %v1388_v7 = vrot.slane %v1387_v34, 1  ;;  %v1400_v14 = vadd.f32 %v1399_v20, %v1398_v1  ;;  %v1436_v51 = vrot.slane %v1435_v33, 4 }
 0x2ef   :  { %v1413_v4 = vadd.f32 %v1412_v28, %v1411_v53  ;;  %v1425_v31 = vrot.slane %v1424_v45, 2  ;;  %v1446_v11 = vadd.f32 %v1445_v2, %v1444_v9  ;;  %v1455_v41 = vsel %vm93_vm0, %v11132_v63, 0.0 }
 0x2f0   :  { %v11154_v5 = vadd.f32 %v1388_v7, %v1387_v34  ;;  %v1401_v47 = vrot.slane %v1400_v14, 1  ;;  %v1437_v6 = vadd.f32 %v1436_v51, %v1435_v33  ;;  %v1456_v18 = vsel %vm93_vm0, %v11134_v3, 0.0 }
 0x2f1   :  { %v1414_v8 = vrot.slane %v1413_v4, 1  ;;  %v1426_v44 = vadd.f32 %v1425_v31, %v1424_v45  ;;  %v1448_v37 = vadd.f32 %v1447_v22, %v1446_v11  ;;  %v1457_v50 = vadd.f32 %v1456_v18, %v1455_v41 }
 0x2f2   :  { %v11158_v23 = vadd.f32 %v1401_v47, %v1400_v14  ;;  %v1438_v20 = vrot.slane %v1437_v6, 2  ;;  %v1458_v28 = vsel %vm93_vm0, %v11140_v29, 0.0  ;;  %v1460_v1 = vsel %vm93_vm0, %v11142_v46, 0.0 }
 0x2f3   :  { %v11164_v53 = vadd.f32 %v1414_v8, %v1413_v4  ;;  %v1427_v2 = vrot.slane %v1426_v44, 1  ;;  %v1449_v33 = vrot.slane %v1448_v37, 4  ;;  %v1459_v35 = vadd.f32 %v1458_v28, %v1457_v50 }
 0x2f4   :  { %v1439_v34 = vadd.f32 %v1438_v20, %v1437_v6  ;;  %v1780_v45 = vmul.f32 %v13178_v15, %v9132_v17  ;;  %v1781_v41 = vmul.f32 %v13179_v38, %v9141_v43  ;;  %v1782_v11 = vmul.f32 %v13180_v0, %v13075_v40 }
 0x2f5   :  { %v11172_v9 = vadd.f32 %v1427_v2, %v1426_v44  ;;  %v1450_v22 = vadd.f32 %v1449_v33, %v1448_v37  ;;  %v1461_v7 = vadd.f32 %v1460_v1, %v1459_v35  ;;  %v1783_v14 = vmul.f32 %v13181_v58, %v13076_v24 }
 0x2f6   :  { %v1440_v51 = vrot.slane %v1439_v34, 1  ;;  %v1784_v4 = vmul.f32 %v13182_v21, %v9132_v17  ;;  %v1785_v15 = vmul.f32 %v13183_v48, %v9141_v43  ;;  %v1786_v38 = vmul.f32 %v13184_v39, %v13075_v40 }
 0x2f7   :  { %v1451_v31 = vrot.slane %v1450_v22, 2  ;;  %v1462_v47 = vrot.slane %v1461_v7, 4  ;;  %v1787_v0 = vmul.f32 %v13185_v56, %v13076_v24  ;;  %v1788_v6 = vmul.f32 %v13186_v16, %v9132_v17 }
 0x2f8   :  { %v11186_v18 = vadd.f32 %v1440_v51, %v1439_v34  ;;  %v1789_v58 = vmul.f32 %v13187_v60, %v9141_v43  ;;  %v1790_v21 = vmul.f32 %v13188_v57, %v13075_v40  ;;  %v1791_v48 = vmul.f32 %v13189_v10, %v13076_v24 }
 0x2f9   :  { %v1452_v39 = vadd.f32 %v1451_v31, %v1450_v22  ;;  %v1463_v8 = vadd.f32 %v1462_v47, %v1461_v7  ;;  %v1792_v44 = vmul.f32 %v13190_v26, %v9132_v17  ;;  %v1793_v56 = vmul.f32 %v13191_v30, %v9141_v43 }
 0x2fa   :  { %v1794_v16 = vmul.f32 %v11050_v52, %v13075_v40  ;;  %v1795_v60 = vmul.f32 %v11064_v42, %v13076_v24  ;;  %v1796_v57 = vmul.f32 %v13192_v12, %v9132_v17  ;;  %v1797_v10 = vmul.f32 %v13193_v25, %v9141_v43 }
 0x2fb   :  { %v1453_v37 = vrot.slane %v1452_v39, 1  ;;  %v1464_v50 = vrot.slane %v1463_v8, 2  ;;  %v1798_v26 = vmul.f32 %v11057_v13, %v13075_v40  ;;  %v1799_v30 = vmul.f32 %v11071_v32, %v13076_v24 }
 0x2fc   :  { %v1800_v52 = vmul.f32 %v11076_v55, %v9132_v17  ;;  %v1801_v42 = vmul.f32 %v11086_v27, %v9141_v43  ;;  %v1802_v12 = vmul.f32 %v11092_v49, %v13075_v40  ;;  %v1803_v25 = vmul.f32 %v11102_v54, %v13076_v24 }
 0x2fd   :  { %v11218_v20 = vadd.f32 %v1453_v37, %v1452_v39  ;;  %v1465_v28 = vadd.f32 %v1464_v50, %v1463_v8  ;;  %v1804_v13 = vmul.f32 %v11106_v62, %v9132_v17  ;;  %v1805_v32 = vmul.f32 %v11114_v61, %v9141_v43 }
 0x2fe   :  { %v11226_v55 = vmul.f32 %v11122_v19, %v13075_v40  ;;  %v11230_v27 = vmul.f32 %v11126_v36, %v13076_v24  ;;  %v11234_v49 = vmul.f32 %v11132_v63, %v9132_v17  ;;  %v11238_v54 = vmul.f32 %v11134_v3, %v9141_v43 }
 0x2ff   :  { %v1466_v62 = vrot.slane %v1465_v28, 1  ;;  %v11242_v61 = vmul.f32 %v11140_v29, %v13075_v40  ;;  %v11246_v19 = vmul.f32 %v11142_v46, %v13076_v24  ;;  %v1908_v36 = vsel %vm93_vm0, %v1780_v45, 0.0 }
 0x300   :  { %v1909_v1 = vsel %vm93_vm0, %v1781_v41, 0.0  ;;  %v1911_v17 = vsel %vm93_vm0, %v1782_v11, 0.0  ;;  %v1913_v63 = vsel %vm93_vm0, %v1783_v14, 0.0  ;;  %v1921_v43 = vsel %vm93_vm0, %v1784_v4, 0.0  ;;  %v4852_v4 = vld [vmem:[%s12435_s2] sm:$0xff] }
 0x301   :  { %v11253_v3 = vadd.f32 %v1466_v62, %v1465_v28  ;;  %v1910_v2 = vadd.f32 %v1909_v1, %v1908_v36  ;;  %v1922_v40 = vsel %vm93_vm0, %v1785_v15, 0.0  ;;  %v1924_v29 = vsel %vm93_vm0, %v1786_v38, 0.0  ;;  %6417 = vmatprep.mubr.msk.f32.mxu1 %vm4900_vm1, %v4852_v4 }
 0x302   :  { %v1923_v33 = vadd.f32 %v1922_v40, %v1921_v43  ;;  %v1926_v24 = vsel %vm93_vm0, %v1787_v0, 0.0  ;;  %v1934_v46 = vsel %vm93_vm0, %v1788_v6, 0.0  ;;  %v1935_v35 = vsel %vm93_vm0, %v1789_v58, 0.0 }
 0x303   :  { %v1912_v34 = vadd.f32 %v1911_v17, %v1910_v2  ;;  %v1936_v45 = vadd.f32 %v1935_v35, %v1934_v46  ;;  %v1937_v41 = vsel %vm93_vm0, %v1790_v21, 0.0  ;;  %v1939_v11 = vsel %vm93_vm0, %v1791_v48, 0.0 }
 0x304   :  { %v1925_v22 = vadd.f32 %v1924_v29, %v1923_v33  ;;  %v1947_v7 = vsel %vm93_vm0, %v1792_v44, 0.0  ;;  %v1948_v14 = vsel %vm93_vm0, %v1793_v56, 0.0  ;;  %v1950_v51 = vsel %vm93_vm0, %v1794_v16, 0.0 }
 0x305   :  { %v1914_v15 = vadd.f32 %v1913_v63, %v1912_v34  ;;  %v1938_v38 = vadd.f32 %v1937_v41, %v1936_v45  ;;  %v1949_v31 = vadd.f32 %v1948_v14, %v1947_v7  ;;  %v1952_v47 = vsel %vm93_vm0, %v1795_v60, 0.0 }
 0x306   :  { %v1927_v0 = vadd.f32 %v1926_v24, %v1925_v22  ;;  %v1960_v6 = vsel %vm93_vm0, %v1796_v57, 0.0  ;;  %v1961_v58 = vsel %vm93_vm0, %v1797_v10, 0.0  ;;  %v1963_v21 = vsel %vm93_vm0, %v1798_v26, 0.0 }
 0x307   :  { %v1915_v48 = vrot.slane %v1914_v15, 4  ;;  %v1940_v39 = vadd.f32 %v1939_v11, %v1938_v38  ;;  %v1951_v8 = vadd.f32 %v1950_v51, %v1949_v31  ;;  %v1962_v44 = vadd.f32 %v1961_v58, %v1960_v6 }
 0x308   :  { %v1928_v56 = vrot.slane %v1927_v0, 4  ;;  %v1965_v16 = vsel %vm93_vm0, %v1799_v30, 0.0  ;;  %v1973_v37 = vsel %vm93_vm0, %v1800_v52, 0.0  ;;  %v1974_v60 = vsel %vm93_vm0, %v1801_v42, 0.0 }
 0x309   :  { %v1916_v50 = vadd.f32 %v1915_v48, %v1914_v15  ;;  %v1941_v28 = vrot.slane %v1940_v39, 4  ;;  %v1953_v62 = vadd.f32 %v1952_v47, %v1951_v8  ;;  %v1964_v36 = vadd.f32 %v1963_v21, %v1962_v44 }
 0x30a   :  { %v1929_v57 = vadd.f32 %v1928_v56, %v1927_v0  ;;  %v1975_v1 = vadd.f32 %v1974_v60, %v1973_v37  ;;  %v1976_v10 = vsel %vm93_vm0, %v1802_v12, 0.0  ;;  %v1978_v26 = vsel %vm93_vm0, %v1803_v25, 0.0 }
 0x30b   :  { %v1917_v17 = vrot.slane %v1916_v50, 2  ;;  %v1942_v63 = vadd.f32 %v1941_v28, %v1940_v39  ;;  %v1954_v43 = vrot.slane %v1953_v62, 4  ;;  %v1966_v2 = vadd.f32 %v1965_v16, %v1964_v36  ;;  %v13194_v28 = vld [vmem:[#allocation20_spill] sm:$0xff]  ;;  %v13196_v36 = vld [vmem:[#allocation18_spill] sm:$0xff] }
 0x30c   :  { %v1930_v40 = vrot.slane %v1929_v57, 2  ;;  %v1977_v30 = vadd.f32 %v1976_v10, %v1975_v1  ;;  %v1986_v52 = vsel %vm93_vm0, %v1804_v13, 0.0  ;;  %v1987_v42 = vsel %vm93_vm0, %v1805_v32, 0.0 }
 0x30d   :  { %v1918_v29 = vadd.f32 %v1917_v17, %v1916_v50  ;;  %v1943_v33 = vrot.slane %v1942_v63, 2  ;;  %v1955_v24 = vadd.f32 %v1954_v43, %v1953_v62  ;;  %v1967_v46 = vrot.slane %v1966_v2, 4  ;;  %v13195_v62 = vld [vmem:[#allocation162_spill] sm:$0xff]  ;;  %v13199_v17 = vld [vmem:[#allocation164_spill] sm:$0xff] }
 0x30e   :  { %v1931_v35 = vadd.f32 %v1930_v40, %v1929_v57  ;;  %v1979_v34 = vadd.f32 %v1978_v26, %v1977_v30  ;;  %v1988_v45 = vadd.f32 %v1987_v42, %v1986_v52  ;;  %v1989_v12 = vsel %vm93_vm0, %v11226_v55, 0.0  ;;  %v13197_v57 = vld [vmem:[#allocation163_spill] sm:$0xff]  ;;  %v13201_v52 = vld [vmem:[#allocation186_spill] sm:$0xff] }
 0x30f   :  { %v1919_v25 = vrot.slane %v1918_v29, 1  ;;  %v1944_v41 = vadd.f32 %v1943_v33, %v1942_v63  ;;  %v1956_v11 = vrot.slane %v1955_v24, 2  ;;  %v1968_v22 = vadd.f32 %v1967_v46, %v1966_v2  ;;  %v13202_v42 = vld [vmem:[#allocation167_spill] sm:$0xff]  ;;  %v13203_v46 = vld [vmem:[#allocation184_spill] sm:$0xff] }
 0x310   :  { %v1932_v7 = vrot.slane %v1931_v35, 1  ;;  %v1980_v14 = vrot.slane %v1979_v34, 4  ;;  %v1990_v51 = vadd.f32 %v1989_v12, %v1988_v45  ;;  %v1991_v13 = vsel %vm93_vm0, %v11230_v27, 0.0  ;;  %v13207_v12 = vld [vmem:[#allocation174_spill] sm:$0xff] }
 0x311   :  { %v11284_v32 = vadd.f32 %v1919_v25, %v1918_v29  ;;  %v1945_v4 = vrot.slane %v1944_v41, 1  ;;  %v1957_v15 = vadd.f32 %v1956_v11, %v1955_v24  ;;  %v1969_v38 = vrot.slane %v1968_v22, 2 }
 0x312   :  { %v11286_v31 = vadd.f32 %v1932_v7, %v1931_v35  ;;  %v1981_v47 = vadd.f32 %v1980_v14, %v1979_v34  ;;  %v1992_v0 = vadd.f32 %v1991_v13, %v1990_v51  ;;  %v1999_v55 = vsel %vm93_vm0, %v11234_v49, 0.0  ;;  %v13204_v35 = vld [vmem:[#allocation169_spill] sm:$0xff]  ;;  %v13205_v34 = vld [vmem:[#allocation187_spill] sm:$0xff]  ;;  %v13209_v51 = vld [vmem:[#allocation188_spill] sm:$0xff] }
 0x313   :  { %v11290_v6 = vadd.f32 %v1945_v4, %v1944_v41  ;;  %v1958_v58 = vrot.slane %v1957_v15, 1  ;;  %v1970_v21 = vadd.f32 %v1969_v38, %v1968_v22  ;;  %v2000_v48 = vsel %vm93_vm0, %v11238_v54, 0.0  ;;  %v13208_v41 = vld [vmem:[#allocation177_spill] sm:$0xff]  ;;  %v13210_v13 = vld [vmem:[#allocation178_spill] sm:$0xff] }
 0x314   :  { %v1982_v27 = vrot.slane %v1981_v47, 2  ;;  %v1993_v39 = vrot.slane %v1992_v0, 4  ;;  %v2001_v8 = vadd.f32 %v2000_v48, %v1999_v55  ;;  %v2002_v44 = vsel %vm93_vm0, %v11242_v61, 0.0 }
 0x315   :  { %v11296_v56 = vadd.f32 %v1958_v58, %v1957_v15  ;;  %v1971_v16 = vrot.slane %v1970_v21, 1  ;;  %v2004_v37 = vsel %vm93_vm0, %v11246_v19, 0.0  ;;  %7040 = vrcp.f32 %v11150_v59 }
 0x316   :  { %v1983_v49 = vadd.f32 %v1982_v27, %v1981_v47  ;;  %v1994_v60 = vadd.f32 %v1993_v39, %v1992_v0  ;;  %v2003_v50 = vadd.f32 %v2002_v44, %v2001_v8  ;;  %7042 = vrcp.f32 %v11154_v5  ;;  %v13198_v5 = vld [vmem:[#allocation16_spill] sm:$0xff]  ;;  %v13212_v0 = vld [vmem:[#allocation190_spill] sm:$0xff]  ;;  %v13213_v39 = vld [vmem:[#allocation193_spill] sm:$0xff] }
 0x317   :  { %v11302_v54 = vadd.f32 %v1971_v16, %v1970_v21  ;;  %7044 = vrcp.f32 %v11158_v23  ;;  %v2945_v61 = vmul.f32 %v13195_v62, %v13194_v28  ;;  %v2948_v1 = vmul.f32 %v13197_v57, %v13196_v36  ;;  %v13200_v23 = vld [vmem:[#allocation17_spill] sm:$0xff]  ;;  %v13214_v44 = vld [vmem:[#allocation194_spill] sm:$0xff] }
 0x318   :  { %v1984_v10 = vrot.slane %v1983_v49, 1  ;;  %v1995_v26 = vrot.slane %v1994_v60, 2  ;;  %v2005_v19 = vadd.f32 %v2004_v37, %v2003_v50  ;;  %7046 = vrcp.f32 %v11164_v53 }
 0x319   :  { %7048 = vrcp.f32 %v11172_v9  ;;  %v2949_v59 = vmul.f32 %v13197_v57, %v13194_v28  ;;  %v11315_v63 = vmul.f32 %v13199_v17, %v13198_v5  ;;  %v11319_v43 = vmul.f32 %v13199_v17, %v13200_v23 }
 0x31a   :  { %v11321_v2 = vadd.f32 %v1984_v10, %v1983_v49  ;;  %v1996_v40 = vadd.f32 %v1995_v26, %v1994_v60  ;;  %v2006_v30 = vrot.slane %v2005_v19, 4  ;;  %7050 = vrcp.f32 %v11186_v18 }
 0x31b   :  { %7052 = vrcp.f32 %v11218_v20  ;;  %v11327_v53 = vmul.f32 %v13199_v17, %v13196_v36  ;;  %v11331_v9 = vmul.f32 %v13199_v17, %v13194_v28  ;;  %v3425_v29 = vsub.f32 %v13202_v42, %v13201_v52  ;;  %v13206_v20 = vld [vmem:[#allocation171_spill] sm:$0xff] }
 0x31c   :  { %v1997_v33 = vrot.slane %v1996_v40, 1  ;;  %v2007_v24 = vadd.f32 %v2006_v30, %v2005_v19  ;;  %7054 = vrcp.f32 %v11253_v3  ;;  %v3429_v18 = vsub.f32 %v13204_v35, %v13203_v46  ;;  %v13211_v3 = vld [vmem:[#allocation180_spill] sm:$0xff] }
 0x31d   :  { %v3430_v45 = vsub.f32 %v13206_v20, %v13205_v34  ;;  %v3431_v25 = vsub.f32 %v13207_v12, %v13205_v34  ;;  %v3432_v11 = vsub.f32 %v13208_v41, %v13205_v34  ;;  %v3433_v22 = vsub.f32 %v2945_v61, %v13205_v34  ;;  %v13215_v61 = vld [vmem:[#allocation198_spill] sm:$0xff] }
 0x31e   :  { %v1998_v7 = vadd.f32 %v1997_v33, %v1996_v40  ;;  %v2008_v14 = vrot.slane %v2007_v24, 2  ;;  %v3434_v4 = vsub.f32 %v13210_v13, %v13209_v51  ;;  %v3435_v15 = vsub.f32 %v13211_v3, %v13209_v51 }
 0x31f   :  { %v3436_v38 = vsub.f32 %v2948_v1, %v13209_v51  ;;  %v3437_v47 = vsub.f32 %v2949_v59, %v13209_v51  ;;  %v3438_v55 = vsub.f32 %v11315_v63, %v13212_v0  ;;  %v3439_v58 = vsub.f32 %v11319_v43, %v13212_v0 }
 0x320   :  { %v2009_v21 = vadd.f32 %v2008_v14, %v2007_v24  ;;  %v3440_v48 = vsub.f32 %v11327_v53, %v13212_v0  ;;  %v3441_v27 = vsub.f32 %v11331_v9, %v13212_v0  ;;  %7056 = vpow2.f32 %v13213_v39  ;;  %v13220_v9 = vld [vmem:[#allocation203_spill] sm:$0xff] }
 0x321   :  { %v3600_v8 = vmul.f32 1.442695, %v3425_v29  ;;  %7058 = vpow2.f32 %v13214_v44  ;;  %v3608_v16 = vmul.f32 1.442695, %v3429_v18  ;;  %v3610_v37 = vmul.f32 1.442695, %v3430_v45 }
 0x322   :  { %v7041_v49 = vpop.eup %7040  ;;  %v2010_v60 = vrot.slane %v2009_v21, 1  ;;  %v3612_v50 = vmul.f32 1.442695, %v3431_v25  ;;  %v3614_v62 = vmul.f32 1.442695, %v3432_v11  ;;  %v11363_v57 = vsel %vm93_vm0, %v13215_v61, 0.0 }
 0x323   :  { %v7043_v1 = vpop.eup %7042  ;;  %v2356_v10 = vmul.f32 %v7041_v49, %v11284_v32  ;;  %7060 = vpow2.f32 %v3600_v8  ;;  %v3616_v26 = vmul.f32 1.442695, %v3433_v22  ;;  %v3618_v19 = vmul.f32 1.442695, %v3434_v4  ;;  %v13216_v29 = vld [vmem:[#allocation40_spill] sm:$0xff]  ;;  %v13217_v45 = vld [vmem:[#allocation29_spill] sm:$0xff] }
 0x324   :  { %v7045_v59 = vpop.eup %7044  ;;  %v2011_v17 = vadd.f32 %v2010_v60, %v2009_v21  ;;  %v2357_v40 = vmul.f32 %v7043_v1, %v11286_v31  ;;  %7062 = vpow2.f32 %v3608_v16  ;;  %v3620_v30 = vmul.f32 1.442695, %v3435_v15 }
 0x325   :  { %v7047_v52 = vpop.eup %7046  ;;  %v2358_v42 = vmul.f32 %v7045_v59, %v11290_v6  ;;  %v2389_v33 = vmul.f32 %v13216_v29, %v2356_v10  ;;  %7064 = vpow2.f32 %v3610_v37  ;;  %v3622_v24 = vmul.f32 1.442695, %v3436_v38 }
 0x326   :  { %v7049_v46 = vpop.eup %7048  ;;  %v2359_v35 = vmul.f32 %v7047_v52, %v11296_v56  ;;  %v2390_v32 = vmul.f32 %v13216_v29, %v2357_v40  ;;  %7066 = vpow2.f32 %v3612_v50  ;;  %v3624_v18 = vmul.f32 1.442695, %v3437_v47  ;;  %v13222_v40 = vld [vmem:[#allocation207_spill] sm:$0xff] }
 0x327   :  { %v7051_v34 = vpop.eup %7050  ;;  %v2360_v20 = vmul.f32 %v7049_v46, %v11302_v54  ;;  %v2391_v31 = vmul.f32 %v13216_v29, %v2358_v42  ;;  %v2422_v12 = vadd.f32 %v13217_v45, %v2389_v33  ;;  %7068 = vpow2.f32 %v3614_v62  ;;  %v13224_v46 = vld [vmem:[#allocation209_spill] sm:$0xff] }
 0x328   :  { %v7053_v6 = vpop.eup %7052  ;;  %v2361_v25 = vmul.f32 %v7051_v34, %v11321_v2  ;;  %v2392_v41 = vmul.f32 %v13216_v29, %v2359_v35  ;;  %v2423_v11 = vadd.f32 %v13217_v45, %v2390_v32  ;;  %7070 = vpow2.f32 %v3616_v26  ;;  %v13225_v32 = vld [vmem:[#allocation212_spill] sm:$0xff]  ;;  %v13226_v34 = vld [vmem:[#allocation214_spill] sm:$0xff] }
 0x329   :  { %v7055_v56 = vpop.eup %7054  ;;  %v2362_v22 = vmul.f32 %v7053_v6, %v1998_v7  ;;  %v2393_v14 = vmul.f32 %v13216_v29, %v2360_v20  ;;  %v2424_v51 = vadd.f32 %v13217_v45, %v2391_v31  ;;  %7072 = vpow2.f32 %v3618_v19  ;;  %v13227_v31 = vld [vmem:[#allocation215_spill] sm:$0xff] }
 0x32a   :  { %v2363_v54 = vmul.f32 %v7055_v56, %v2011_v17  ;;  %v2394_v13 = vmul.f32 %v13216_v29, %v2361_v25  ;;  %v2425_v4 = vadd.f32 %v13217_v45, %v2392_v41  ;;  %v5191_v3 = vsel %vm5190_vm2, %v2423_v11, %v2422_v12  ;;  %v13228_v11 = vld [vmem:[#allocation216_spill] sm:$0xff] }
 0x32b   :  { %v2395_v2 = vmul.f32 %v13216_v29, %v2362_v22  ;;  %v2426_v15 = vadd.f32 %v13217_v45, %v2393_v14  ;;  %v5193_v38 = vsel %vm5192_vm3, %v2424_v51, %v5191_v3  ;;  %7074 = vpow2.f32 %v3620_v30  ;;  %v13229_v14 = vld [vmem:[#allocation218_spill] sm:$0xff] }
 0x32c   :  { %v2396_v7 = vmul.f32 %v13216_v29, %v2363_v54  ;;  %v2427_v47 = vadd.f32 %v13217_v45, %v2394_v13  ;;  %v5195_v21 = vsel %vm5194_vm4, %v2425_v4, %v5193_v38  ;;  %7076 = vpow2.f32 %v3622_v24  ;;  %v13223_v29 = vld [vmem:[#allocation208_spill] sm:$0xff]  ;;  %v13230_v54 = vld [vmem:[#allocation222_spill] sm:$0xff] }
 0x32d   :  { %v11388_v39 = vpop.eup %7056  ;;  %v2428_v8 = vadd.f32 %v13217_v45, %v2395_v2  ;;  %v5197_v44 = vsel %vm5196_vm5, %v2426_v15, %v5195_v21  ;;  %7078 = vpow2.f32 %v3624_v18  ;;  %v3626_v16 = vmul.f32 1.442695, %v3438_v55  ;;  %v13218_v55 = vld [vmem:[#allocation199_spill] sm:$0xff]  ;;  %v13231_v21 = vld [vmem:[#allocation224_spill] sm:$0xff] }
 0x32e   :  { %v11395_v37 = vpop.eup %7058  ;;  %v2429_v49 = vadd.f32 %v13217_v45, %v2396_v7  ;;  %v5199_v60 = vsel %vm5198_vm6, %v2427_v47, %v5197_v44  ;;  %v3628_v50 = vmul.f32 1.442695, %v3439_v58  ;;  %v3630_v62 = vmul.f32 1.442695, %v3440_v48  ;;  %v13219_v58 = vld [vmem:[#allocation201_spill] sm:$0xff]  ;;  %v4853_v48 = vld [vmem:[%s12435_s2 + $0x8] sm:$0xff] }
 0x32f   :  { %v5201_v1 = vsel %vm5200_vm7, %v2428_v8, %v5199_v60  ;;  %7080 = vpow2.f32 %v3626_v16  ;;  %v3632_v63 = vmul.f32 1.442695, %v3441_v27  ;;  %v3867_v10 = vsel %vm93_vm0, %v13218_v55, 0.0  ;;  %v13221_v27 = vld [vmem:[#allocation205_spill] sm:$0xff] }
 0x330   :  { %v11411_v26 = vpop.eup %7060  ;;  %v5203_v19 = vsel %vm5202_vm8, %v2429_v49, %v5201_v1  ;;  %7082 = vpow2.f32 %v3628_v50  ;;  %v3868_v43 = vadd.f32 %v3867_v10, %v11363_v57  ;;  %v3869_v53 = vsel %vm93_vm0, %v13219_v58, 0.0  ;;  %v13232_v44 = vld [vmem:[#allocation225_spill] sm:$0xff] }
 0x331   :  { %v11420_v59 = vpop.eup %7062  ;;  %6415 = vmatprep.subr.mxu1 %v5203_v19  ;;  %7084 = vpow2.f32 %v3630_v62  ;;  %v3871_v0 = vsel %vm93_vm0, %v13220_v9, 0.0  ;;  %v3879_v17 = vsel %vm93_vm0, %v13221_v27, 0.0  ;;  %v3880_v57 = vsel %vm93_vm0, %v13222_v40, 0.0 }
 0x332   :  { %v11428_v30 = vpop.eup %7064  ;;  %7086 = vpow2.f32 %v3632_v63  ;;  %v3870_v52 = vadd.f32 %v3869_v53, %v3868_v43  ;;  %v3881_v42 = vadd.f32 %v3880_v57, %v3879_v17  ;;  %v3882_v33 = vsel %vm93_vm0, %v13223_v29, 0.0  ;;  %6416 = vmatpush3.msra.mxu1 %v5203_v19 }
 0x333   :  { %v11432_v24 = vpop.eup %7066  ;;  %v3884_v35 = vsel %vm93_vm0, %v13224_v46, 0.0  ;;  %v3892_v18 = vsel %vm93_vm0, %v13225_v32, 0.0  ;;  %v3893_v20 = vsel %vm93_vm0, %v13226_v34, 0.0  ;;  %v3895_v45 = vsel %vm93_vm0, %v13227_v31, 0.0  ;;  %6418 = vmatmul.mubr.msk.f32.vlgmr.msra.gmra.mxu1 %vm4900_vm1, %v4853_v48 }
 0x334   :  { %v11443_v12 = vpop.eup %7068  ;;  %v3872_v6 = vadd.f32 %v3871_v0, %v3870_v52  ;;  %v3883_v25 = vadd.f32 %v3882_v33, %v3881_v42  ;;  %v3894_v41 = vadd.f32 %v3893_v20, %v3892_v18  ;;  %v3897_v56 = vsel %vm93_vm0, %v13228_v11, 0.0 }
 0x335   :  { %v11447_v22 = vpop.eup %7070  ;;  %v3905_v51 = vsel %vm93_vm0, %v13229_v14, 0.0  ;;  %v3906_v13 = vsel %vm93_vm0, %v13230_v54, 0.0  ;;  %v3908_v4 = vsel %vm93_vm0, %v11388_v39, 0.0  ;;  %v3910_v3 = vsel %vm93_vm0, %v11411_v26, 0.0 }
 0x336   :  { %v11457_v2 = vpop.eup %7072  ;;  %v3873_v15 = vrot.slane %v3872_v6, 4  ;;  %v3885_v38 = vadd.f32 %v3884_v35, %v3883_v25  ;;  %v3896_v7 = vadd.f32 %v3895_v45, %v3894_v41  ;;  %v3907_v47 = vadd.f32 %v3906_v13, %v3905_v51 }
 0x337   :  { %v3918_v8 = vsel %vm93_vm0, %v13231_v21, 0.0  ;;  %v3919_v16 = vsel %vm93_vm0, %v13232_v44, 0.0  ;;  %v3921_v49 = vsel %vm93_vm0, %v11395_v37, 0.0  ;;  %v3923_v60 = vsel %vm93_vm0, %v11420_v59, 0.0 }
 0x338   :  { %v11467_v50 = vpop.eup %7074  ;;  %v3874_v62 = vadd.f32 %v3873_v15, %v3872_v6  ;;  %v3886_v1 = vrot.slane %v3885_v38, 4  ;;  %v3898_v63 = vadd.f32 %v3897_v56, %v3896_v7  ;;  %v3909_v10 = vadd.f32 %v3908_v4, %v3907_v47 }
 0x339   :  { %v11469_v19 = vpop.eup %7076  ;;  %v3920_v43 = vadd.f32 %v3919_v16, %v3918_v8  ;;  %v3931_v53 = vsel %vm93_vm0, %v11428_v30, 0.0  ;;  %v3932_v48 = vsel %vm93_vm0, %v11432_v24, 0.0  ;;  %v3934_v0 = vsel %vm93_vm0, %v11443_v12, 0.0 }
 0x33a   :  { %v11477_v17 = vpop.eup %7078  ;;  %v3875_v57 = vrot.slane %v3874_v62, 2  ;;  %v3887_v52 = vadd.f32 %v3886_v1, %v3885_v38  ;;  %v3899_v42 = vrot.slane %v3898_v63, 4  ;;  %v3911_v33 = vadd.f32 %v3910_v3, %v3909_v10 }
 0x33b   :  { %v3922_v35 = vadd.f32 %v3921_v49, %v3920_v43  ;;  %v3933_v18 = vadd.f32 %v3932_v48, %v3931_v53  ;;  %v3936_v20 = vsel %vm93_vm0, %v11447_v22, 0.0  ;;  %v3944_v45 = vsel %vm93_vm0, %v11457_v2, 0.0 }
 0x33c   :  { %v11483_v6 = vpop.eup %7080  ;;  %v3876_v25 = vadd.f32 %v3875_v57, %v3874_v62  ;;  %v3888_v41 = vrot.slane %v3887_v52, 2  ;;  %v3900_v56 = vadd.f32 %v3899_v42, %v3898_v63  ;;  %v3912_v51 = vrot.slane %v3911_v33, 4 }
 0x33d   :  { %v11485_v13 = vpop.eup %7082  ;;  %v3924_v4 = vadd.f32 %v3923_v60, %v3922_v35  ;;  %v3935_v15 = vadd.f32 %v3934_v0, %v3933_v18  ;;  %v3945_v3 = vsel %vm93_vm0, %v11467_v50, 0.0  ;;  %v3947_v38 = vsel %vm93_vm0, %v11469_v19, 0.0 }
 0x33e   :  { %v11491_v7 = vpop.eup %7084  ;;  %v3877_v47 = vrot.slane %v3876_v25, 1  ;;  %v3889_v8 = vadd.f32 %v3888_v41, %v3887_v52  ;;  %v3901_v16 = vrot.slane %v3900_v56, 2  ;;  %v3913_v49 = vadd.f32 %v3912_v51, %v3911_v33 }
 0x33f   :  { %v11493_v62 = vpop.eup %7086  ;;  %v3925_v1 = vrot.slane %v3924_v4, 4  ;;  %v3937_v63 = vadd.f32 %v3936_v20, %v3935_v15  ;;  %v3946_v10 = vadd.f32 %v3945_v3, %v3944_v45  ;;  %v3949_v60 = vsel %vm93_vm0, %v11477_v17, 0.0 }
 0x340   :  { %v11497_v43 = vadd.f32 %v3877_v47, %v3876_v25  ;;  %v3890_v53 = vrot.slane %v3889_v8, 1  ;;  %v3902_v48 = vadd.f32 %v3901_v16, %v3900_v56  ;;  %v3914_v0 = vrot.slane %v3913_v49, 2 }
 0x341   :  { %v3926_v57 = vadd.f32 %v3925_v1, %v3924_v4  ;;  %v3938_v42 = vrot.slane %v3937_v63, 4  ;;  %v3948_v35 = vadd.f32 %v3947_v38, %v3946_v10  ;;  %v3957_v52 = vsel %vm93_vm0, %v11483_v6, 0.0  ;;  %v13233_v10 = vld [vmem:[#allocation41_spill] sm:$0xff] }
 0x342   :  { %v11501_v33 = vadd.f32 %v3890_v53, %v3889_v8  ;;  %v3903_v18 = vrot.slane %v3902_v48, 1  ;;  %v3915_v41 = vadd.f32 %v3914_v0, %v3913_v49  ;;  %v3958_v20 = vsel %vm93_vm0, %v11485_v13, 0.0 }
 0x343   :  { %v3927_v45 = vrot.slane %v3926_v57, 2  ;;  %v3939_v51 = vadd.f32 %v3938_v42, %v3937_v63  ;;  %v3950_v25 = vadd.f32 %v3949_v60, %v3948_v35  ;;  %v3959_v15 = vadd.f32 %v3958_v20, %v3957_v52  ;;  %v13234_v60 = vld [vmem:[#allocation44_spill] sm:$0xff] }
 0x344   :  { %v11505_v3 = vadd.f32 %v3903_v18, %v3902_v48  ;;  %v3916_v56 = vrot.slane %v3915_v41, 1  ;;  %v3960_v4 = vsel %vm93_vm0, %v11491_v7, 0.0  ;;  %v3962_v38 = vsel %vm93_vm0, %v11493_v62, 0.0  ;;  %v13235_v48 = vld [vmem:[#allocation46_spill] sm:$0xff]  ;;  %v13236_v20 = vld [vmem:[#allocation48_spill] sm:$0xff] }
 0x345   :  { %v3928_v47 = vadd.f32 %v3927_v45, %v3926_v57  ;;  %v3940_v8 = vrot.slane %v3939_v51, 2  ;;  %v3951_v16 = vrot.slane %v3950_v25, 4  ;;  %v3961_v49 = vadd.f32 %v3960_v4, %v3959_v15 }
 0x346   :  { %v11511_v1 = vadd.f32 %v3916_v56, %v3915_v41  ;;  %v4210_v63 = vmul.f32 %v13215_v61, %v13233_v10  ;;  %v4211_v53 = vmul.f32 %v13218_v55, %v13234_v60  ;;  %v4212_v0 = vmul.f32 %v13219_v58, %v13235_v48 }
 0x347   :  { %v3929_v42 = vrot.slane %v3928_v47, 1  ;;  %v3941_v35 = vadd.f32 %v3940_v8, %v3939_v51  ;;  %v3952_v52 = vadd.f32 %v3951_v16, %v3950_v25  ;;  %v3963_v18 = vadd.f32 %v3962_v38, %v3961_v49 }
 0x348   :  { %v4213_v57 = vmul.f32 %v13220_v9, %v13236_v20  ;;  %v4214_v41 = vmul.f32 %v13221_v27, %v13233_v10  ;;  %v4215_v45 = vmul.f32 %v13222_v40, %v13234_v60  ;;  %v4216_v61 = vmul.f32 %v13223_v29, %v13235_v48 }
 0x349   :  { %v11527_v55 = vadd.f32 %v3929_v42, %v3928_v47  ;;  %v3942_v15 = vrot.slane %v3941_v35, 1  ;;  %v3953_v58 = vrot.slane %v3952_v52, 2  ;;  %v3964_v56 = vrot.slane %v3963_v18, 4 }
 0x34a   :  { %v4217_v51 = vmul.f32 %v13224_v46, %v13236_v20  ;;  %v4218_v9 = vmul.f32 %v13225_v32, %v13233_v10  ;;  %v4219_v27 = vmul.f32 %v13226_v34, %v13234_v60  ;;  %v4220_v40 = vmul.f32 %v13227_v31, %v13235_v48 }
 0x34b   :  { %v11537_v25 = vadd.f32 %v3942_v15, %v3941_v35  ;;  %v3954_v29 = vadd.f32 %v3953_v58, %v3952_v52  ;;  %v3965_v4 = vadd.f32 %v3964_v56, %v3963_v18  ;;  %v4221_v38 = vmul.f32 %v13228_v11, %v13236_v20 }
 0x34c   :  { %v4222_v47 = vmul.f32 %v13229_v14, %v13233_v10  ;;  %v4223_v46 = vmul.f32 %v13230_v54, %v13234_v60  ;;  %v4224_v32 = vmul.f32 %v11388_v39, %v13235_v48  ;;  %v4225_v34 = vmul.f32 %v11411_v26, %v13236_v20 }
 0x34d   :  { %v3955_v31 = vrot.slane %v3954_v29, 1  ;;  %v3966_v8 = vrot.slane %v3965_v4, 2  ;;  %v4226_v16 = vmul.f32 %v13231_v21, %v13233_v10  ;;  %v4227_v11 = vmul.f32 %v13232_v44, %v13234_v60 }
 0x34e   :  { %v4228_v14 = vmul.f32 %v11395_v37, %v13235_v48  ;;  %v4229_v54 = vmul.f32 %v11420_v59, %v13236_v20  ;;  %v4230_v39 = vmul.f32 %v11428_v30, %v13233_v10  ;;  %v4231_v26 = vmul.f32 %v11432_v24, %v13234_v60 }
 0x34f   :  { %v11561_v49 = vadd.f32 %v3955_v31, %v3954_v29  ;;  %v3967_v42 = vadd.f32 %v3966_v8, %v3965_v4  ;;  %v4232_v21 = vmul.f32 %v11443_v12, %v13235_v48  ;;  %v4233_v44 = vmul.f32 %v11447_v22, %v13236_v20 }
 0x350   :  { %v11569_v37 = vmul.f32 %v11457_v2, %v13233_v10  ;;  %v11573_v59 = vmul.f32 %v11467_v50, %v13234_v60  ;;  %v11577_v30 = vmul.f32 %v11469_v19, %v13235_v48  ;;  %v11581_v24 = vmul.f32 %v11477_v17, %v13236_v20 }
 0x351   :  { %v3968_v12 = vrot.slane %v3967_v42, 1  ;;  %v11585_v22 = vmul.f32 %v11483_v6, %v13233_v10  ;;  %v11589_v2 = vmul.f32 %v11485_v13, %v13234_v60  ;;  %v11593_v50 = vmul.f32 %v11491_v7, %v13235_v48 }
 0x352   :  { %v11597_v19 = vmul.f32 %v11493_v62, %v13236_v20  ;;  %v4410_v17 = vsel %vm93_vm0, %v4210_v63, 0.0  ;;  %v4411_v35 = vsel %vm93_vm0, %v4211_v53, 0.0  ;;  %v4413_v52 = vsel %vm93_vm0, %v4212_v0, 0.0 }
 0x353   :  { %v11602_v6 = vadd.f32 %v3968_v12, %v3967_v42  ;;  %v4412_v18 = vadd.f32 %v4411_v35, %v4410_v17  ;;  %v4415_v13 = vsel %vm93_vm0, %v4213_v57, 0.0  ;;  %v4423_v15 = vsel %vm93_vm0, %v4214_v41, 0.0  ;;  %v4855_v42 = vld [vmem:[%s12435_s2 + $0x18] sm:$0xff] }
 0x354   :  { %v4424_v7 = vsel %vm93_vm0, %v4215_v45, 0.0  ;;  %v4426_v58 = vsel %vm93_vm0, %v4216_v61, 0.0  ;;  %v4428_v62 = vsel %vm93_vm0, %v4217_v51, 0.0  ;;  %v4436_v56 = vsel %vm93_vm0, %v4218_v9, 0.0  ;;  %v5486_v45 = vld [vmem:[%s12437_s4] sm:$0xff] }
 0x355   :  { %v4414_v63 = vadd.f32 %v4413_v52, %v4412_v18  ;;  %v4425_v29 = vadd.f32 %v4424_v7, %v4423_v15  ;;  %v4437_v53 = vsel %vm93_vm0, %v4219_v27, 0.0  ;;  %v4439_v0 = vsel %vm93_vm0, %v4220_v40, 0.0  ;;  %6461 = vmatprep.mubr.msk.f32.mxu0 %vm4900_vm1, %v5486_v45 }
 0x356   :  { %v4438_v4 = vadd.f32 %v4437_v53, %v4436_v56  ;;  %v4441_v31 = vsel %vm93_vm0, %v4221_v38, 0.0  ;;  %v4449_v57 = vsel %vm93_vm0, %v4222_v47, 0.0  ;;  %v4450_v41 = vsel %vm93_vm0, %v4223_v46, 0.0  ;;  %v4854_v46 = vld [vmem:[%s12435_s2 + $0x10] sm:$0xff] }
 0x357   :  { %v4416_v61 = vadd.f32 %v4415_v13, %v4414_v63  ;;  %v4427_v51 = vadd.f32 %v4426_v58, %v4425_v29  ;;  %v4451_v9 = vadd.f32 %v4450_v41, %v4449_v57  ;;  %v4452_v8 = vsel %vm93_vm0, %v4224_v32, 0.0  ;;  %6420 = vmatprep.mubr.msk.f32.mxu1 %vm4900_vm1, %v4854_v46 }
 0x358   :  { %v4440_v27 = vadd.f32 %v4439_v0, %v4438_v4  ;;  %v4454_v40 = vsel %vm93_vm0, %v4225_v34, 0.0  ;;  %v4462_v38 = vsel %vm93_vm0, %v4226_v16, 0.0  ;;  %v4463_v47 = vsel %vm93_vm0, %v4227_v11, 0.0  ;;  %6421 = vmatmul.mubr.msk.f32.gmra.mxu1 %vm4900_vm1, %v4855_v42 }
 0x359   :  { %v4417_v12 = vrot.slane %v4416_v61, 4  ;;  %v4429_v17 = vadd.f32 %v4428_v62, %v4427_v51  ;;  %v4453_v32 = vadd.f32 %v4452_v8, %v4451_v9  ;;  %v4464_v35 = vadd.f32 %v4463_v47, %v4462_v38 }
 0x35a   :  { %v4442_v52 = vadd.f32 %v4441_v31, %v4440_v27  ;;  %v4465_v34 = vsel %vm93_vm0, %v4228_v14, 0.0  ;;  %v4467_v16 = vsel %vm93_vm0, %v4229_v54, 0.0  ;;  %v4475_v11 = vsel %vm93_vm0, %v4230_v39, 0.0  ;;  %v4856_v14 = vld [vmem:[%s12435_s2 + $0x20] sm:$0xff]  ;;  %v4857_v54 = vld [vmem:[%s12435_s2 + $0x28] sm:$0xff]  ;;  %v4858_v27 = vld [vmem:[%s12435_s2 + $0x30] sm:$0xff] }
 0x35b   :  { %v4418_v18 = vadd.f32 %v4417_v12, %v4416_v61  ;;  %v4430_v13 = vrot.slane %v4429_v17, 4  ;;  %v4455_v15 = vadd.f32 %v4454_v40, %v4453_v32  ;;  %v4466_v7 = vadd.f32 %v4465_v34, %v4464_v35  ;;  %6423 = vmatprep.mubr.msk.f32.mxu1 %vm4900_vm1, %v4856_v14 }
 0x35c   :  { %v4443_v58 = vrot.slane %v4442_v52, 4  ;;  %v4476_v62 = vsel %vm93_vm0, %v4231_v26, 0.0  ;;  %v4478_v56 = vsel %vm93_vm0, %v4232_v21, 0.0  ;;  %v4480_v63 = vsel %vm93_vm0, %v4233_v44, 0.0  ;;  %6424 = vmatmul.mubr.msk.f32.gmra.mxu1 %vm4900_vm1, %v4857_v54 }
 0x35d   :  { %v4419_v39 = vrot.slane %v4418_v18, 2  ;;  %v4431_v29 = vadd.f32 %v4430_v13, %v4429_v17  ;;  %v4456_v53 = vrot.slane %v4455_v15, 4  ;;  %v4468_v0 = vadd.f32 %v4467_v16, %v4466_v7  ;;  %6426 = vmatprep.mubr.msk.f32.mxu1 %vm4900_vm1, %v4858_v27  ;;  %v4860_v13 = vld [vmem:[%s12435_s2 + $0x40] sm:$0xff] }
 0x35e   :  { %v4444_v4 = vadd.f32 %v4443_v58, %v4442_v52  ;;  %v4477_v26 = vadd.f32 %v4476_v62, %v4475_v11  ;;  %v4488_v21 = vsel %vm93_vm0, %v11569_v37, 0.0  ;;  %v4489_v44 = vsel %vm93_vm0, %v11573_v59, 0.0  ;;  %v4859_v37 = vld [vmem:[%s12435_s2 + $0x38] sm:$0xff] }
 0x35f   :  { %v4420_v31 = vadd.f32 %v4419_v39, %v4418_v18  ;;  %v4432_v57 = vrot.slane %v4431_v29, 2  ;;  %v4457_v41 = vadd.f32 %v4456_v53, %v4455_v15  ;;  %v4469_v45 = vrot.slane %v4468_v0, 4 }
 0x360   :  { %v4445_v61 = vrot.slane %v4444_v4, 2  ;;  %v4479_v51 = vadd.f32 %v4478_v56, %v4477_v26  ;;  %v4490_v9 = vadd.f32 %v4489_v44, %v4488_v21  ;;  %v4491_v8 = vsel %vm93_vm0, %v11577_v30, 0.0  ;;  %6427 = vmatmul.mubr.msk.f32.gmra.mxu1 %vm4900_vm1, %v4859_v37  ;;  %v4862_v26 = vld [vmem:[%s12435_s2 + $0x50] sm:$0xff]  ;;  %v4863_v21 = vld [vmem:[%s12435_s2 + $0x58] sm:$0xff] }
 0x361   :  { %v4421_v59 = vrot.slane %v4420_v31, 1  ;;  %v4433_v40 = vadd.f32 %v4432_v57, %v4431_v29  ;;  %v4458_v38 = vrot.slane %v4457_v41, 2  ;;  %v4470_v47 = vadd.f32 %v4469_v45, %v4468_v0  ;;  %6429 = vmatprep.mubr.msk.f32.mxu1 %vm4900_vm1, %v4860_v13  ;;  %v13248_v13 = vld [vmem:[#allocation255_spill] sm:$0xff] }
 0x362   :  { %v4446_v46 = vadd.f32 %v4445_v61, %v4444_v4  ;;  %v4481_v42 = vadd.f32 %v4480_v63, %v4479_v51  ;;  %v4492_v12 = vadd.f32 %v4491_v8, %v4490_v9  ;;  %v4493_v30 = vsel %vm93_vm0, %v11581_v24, 0.0  ;;  %v4861_v24 = vld [vmem:[%s12435_s2 + $0x48] sm:$0xff]  ;;  %v13239_v61 = vld [vmem:[#allocation230_spill] sm:$0xff] }
 0x363   :  { %v11661_v17 = vadd.f32 %v4421_v59, %v4420_v31  ;;  %v4434_v32 = vrot.slane %v4433_v40, 1  ;;  %v4459_v35 = vadd.f32 %v4458_v38, %v4457_v41  ;;  %v4471_v52 = vrot.slane %v4470_v47, 2  ;;  %v13238_v31 = vld [vmem:[#allocation229_spill] sm:$0xff]  ;;  %v13240_v59 = vld [vmem:[#allocation251_spill] sm:$0xff] }
 0x364   :  { %v4447_v34 = vrot.slane %v4446_v46, 1  ;;  %v4482_v16 = vrot.slane %v4481_v42, 4  ;;  %v4494_v11 = vadd.f32 %v4493_v30, %v4492_v12  ;;  %v4501_v18 = vsel %vm93_vm0, %v11585_v22, 0.0  ;;  %6430 = vmatmul.mubr.msk.f32.gmra.mxu1 %vm4900_vm1, %v4861_v24  ;;  %v13245_v12 = vld [vmem:[#allocation237_spill] sm:$0xff]  ;;  %v13249_v24 = vld [vmem:[#allocation242_spill] sm:$0xff] }
 0x365   :  { %v11671_v15 = vadd.f32 %v4434_v32, %v4433_v40  ;;  %v4460_v7 = vrot.slane %v4459_v35, 1  ;;  %v4472_v58 = vadd.f32 %v4471_v52, %v4470_v47  ;;  %v4502_v62 = vsel %vm93_vm0, %v11589_v2, 0.0  ;;  %6432 = vmatprep.mubr.msk.f32.mxu1 %vm4900_vm1, %v4862_v26  ;;  %v13246_v32 = vld [vmem:[#allocation240_spill] sm:$0xff] }
 0x366   :  { %v11676_v56 = vadd.f32 %v4447_v34, %v4446_v46  ;;  %v4483_v22 = vadd.f32 %v4482_v16, %v4481_v42  ;;  %v4495_v63 = vrot.slane %v4494_v11, 4  ;;  %v4503_v14 = vadd.f32 %v4502_v62, %v4501_v18  ;;  %v13247_v16 = vld [vmem:[#allocation241_spill] sm:$0xff]  ;;  %v4867_v18 = vld [vmem:[%s12435_s2 + $0x78] sm:$0xff] }
 0x367   :  { %v11679_v54 = vadd.f32 %v4460_v7, %v4459_v35  ;;  %v4473_v39 = vrot.slane %v4472_v58, 1  ;;  %v4504_v29 = vsel %vm93_vm0, %v11593_v50, 0.0  ;;  %v4506_v53 = vsel %vm93_vm0, %v11597_v19, 0.0  ;;  %v13237_v50 = vld [vmem:[#allocation228_spill] sm:$0xff] }
 0x368   :  { %v4484_v0 = vrot.slane %v4483_v22, 2  ;;  %v4496_v2 = vadd.f32 %v4495_v63, %v4494_v11  ;;  %v4505_v4 = vadd.f32 %v4504_v29, %v4503_v14  ;;  %7088 = vrcp.f32 %v11497_v43  ;;  %6433 = vmatmul.mubr.msk.f32.gmra.mxu1 %vm4900_vm1, %v4863_v21 }
 0x369   :  { %v11692_v44 = vadd.f32 %v4473_v39, %v4472_v58  ;;  %7090 = vrcp.f32 %v11501_v33  ;;  %v2913_v19 = vmul.f32 %v13237_v50, %v13194_v28  ;;  %v11699_v57 = vmul.f32 %v13238_v31, %v13196_v36  ;;  %v13250_v58 = vld [vmem:[#allocation245_spill] sm:$0xff]  ;;  %v13251_v39 = vld [vmem:[#allocation256_spill] sm:$0xff] }
 0x36a   :  { %v4485_v43 = vadd.f32 %v4484_v0, %v4483_v22  ;;  %v4497_v41 = vrot.slane %v4496_v2, 2  ;;  %v4507_v45 = vadd.f32 %v4506_v53, %v4505_v4  ;;  %7092 = vrcp.f32 %v11505_v3  ;;  %v4864_v3 = vld [vmem:[%s12435_s2 + $0x60] sm:$0xff] }
 0x36b   :  { %7094 = vrcp.f32 %v11511_v1  ;;  %v11707_v33 = vmul.f32 %v13238_v31, %v13194_v28  ;;  %v11711_v51 = vmul.f32 %v13239_v61, %v13198_v5  ;;  %v11715_v9 = vmul.f32 %v13239_v61, %v13200_v23  ;;  %v4865_v1 = vld [vmem:[%s12435_s2 + $0x68] sm:$0xff]  ;;  %6435 = vmatprep.mubr.msk.f32.mxu1 %vm4900_vm1, %v4864_v3  ;;  %v13252_v4 = vld [vmem:[#allocation259_spill] sm:$0xff] }
 0x36c   :  { %v4486_v8 = vrot.slane %v4485_v43, 1  ;;  %v4498_v27 = vadd.f32 %v4497_v41, %v4496_v2  ;;  %v4508_v37 = vrot.slane %v4507_v45, 4  ;;  %7096 = vrcp.f32 %v11527_v55  ;;  %v13241_v55 = vld [vmem:[#allocation233_spill] sm:$0xff]  ;;  %6436 = vmatmul.mubr.msk.f32.gmra.mxu1 %vm4900_vm1, %v4865_v1 }
 0x36d   :  { %7098 = vrcp.f32 %v11537_v25  ;;  %v11727_v5 = vmul.f32 %v13239_v61, %v13196_v36  ;;  %v11731_v23 = vmul.f32 %v13239_v61, %v13194_v28  ;;  %v3393_v40 = vsub.f32 %v13241_v55, %v13240_v59  ;;  %v13242_v36 = vld [vmem:[#allocation252_spill] sm:$0xff]  ;;  %v13243_v25 = vld [vmem:[#allocation235_spill] sm:$0xff]  ;;  %v13244_v28 = vld [vmem:[#allocation253_spill] sm:$0xff] }
 0x36e   :  { %v11736_v38 = vadd.f32 %v4486_v8, %v4485_v43  ;;  %v4499_v47 = vrot.slane %v4498_v27, 1  ;;  %v4509_v46 = vadd.f32 %v4508_v37, %v4507_v45  ;;  %7100 = vrcp.f32 %v11561_v49  ;;  %v4868_v43 = vld [vmem:[%s12435_s2 + $0x80] sm:$0xff]  ;;  %v4869_v37 = vld [vmem:[%s12435_s2 + $0x88] sm:$0xff] }
 0x36f   :  { %7102 = vrcp.f32 %v11602_v6  ;;  %v3397_v42 = vsub.f32 %v13243_v25, %v13242_v36  ;;  %v3398_v30 = vsub.f32 %v13245_v12, %v13244_v28  ;;  %v3399_v35 = vsub.f32 %v13246_v32, %v13244_v28  ;;  %v4866_v6 = vld [vmem:[%s12435_s2 + $0x70] sm:$0xff] }
 0x370   :  { %v11747_v52 = vadd.f32 %v4499_v47, %v4498_v27  ;;  %v4510_v34 = vrot.slane %v4509_v46, 2  ;;  %v3400_v11 = vsub.f32 %v13247_v16, %v13244_v28  ;;  %v3401_v49 = vsub.f32 %v2913_v19, %v13244_v28  ;;  %6438 = vmatprep.mubr.msk.f32.mxu1 %vm4900_vm1, %v4866_v6  ;;  %v13253_v19 = vld [vmem:[#allocation260_spill] sm:$0xff]  ;;  %v4870_v25 = vld [vmem:[%s12435_s2 + $0x90] sm:$0xff] }
 0x371   :  { %v3402_v7 = vsub.f32 %v13249_v24, %v13248_v13  ;;  %v3403_v62 = vsub.f32 %v13250_v58, %v13248_v13  ;;  %v3404_v22 = vsub.f32 %v11699_v57, %v13248_v13  ;;  %v3405_v63 = vsub.f32 %v11707_v33, %v13248_v13  ;;  %6439 = vmatmul.mubr.msk.f32.gmra.mxu1 %vm4900_vm1, %v4867_v18 }
 0x372   :  { %v4511_v14 = vadd.f32 %v4510_v34, %v4509_v46  ;;  %v3406_v29 = vsub.f32 %v11711_v51, %v13251_v39  ;;  %v3407_v53 = vsub.f32 %v11715_v9, %v13251_v39  ;;  %v3408_v0 = vsub.f32 %v11727_v5, %v13251_v39  ;;  %6441 = vmatprep.mubr.msk.f32.mxu1 %vm4900_vm1, %v4868_v43  ;;  %v13254_v46 = vld [vmem:[#allocation30_spill] sm:$0xff]  ;;  %v13255_v34 = vld [vmem:[#allocation49_spill] sm:$0xff] }
 0x373   :  { %v3409_v2 = vsub.f32 %v11731_v23, %v13251_v39  ;;  %7104 = vpow2.f32 %v13252_v4  ;;  %v3536_v26 = vmul.f32 1.442695, %v3393_v40  ;;  %v3544_v21 = vmul.f32 1.442695, %v3397_v42  ;;  %v4875_v43 = vld [vmem:[%s12435_s2 + $0xb8] sm:$0xff]  ;;  %v13258_v39 = vld [vmem:[#allocation15_spill] sm:$0xff] }
 0x374   :  { %v4512_v50 = vrot.slane %v4511_v14, 1  ;;  %7106 = vpow2.f32 %v13253_v19  ;;  %v3546_v31 = vmul.f32 1.442695, %v3398_v30  ;;  %v3548_v57 = vmul.f32 1.442695, %v3399_v35 }
 0x375   :  { %v7089_v41 = vpop.eup %7088  ;;  %7108 = vpow2.f32 %v3536_v26  ;;  %v3550_v45 = vmul.f32 1.442695, %v3400_v11  ;;  %v3552_v33 = vmul.f32 1.442695, %v3401_v49  ;;  %v3554_v61 = vmul.f32 1.442695, %v3402_v7  ;;  %6442 = vmatmul.mubr.msk.f32.gmra.mxu1 %vm4900_vm1, %v4869_v37 }
 0x376   :  { %v7091_v51 = vpop.eup %7090  ;;  %v4513_v9 = vadd.f32 %v4512_v50, %v4511_v14  ;;  %v4762_v8 = vmul.f32 %v7089_v41, %v11661_v17  ;;  %7110 = vpow2.f32 %v3544_v21  ;;  %v3556_v27 = vmul.f32 1.442695, %v3403_v62  ;;  %6444 = vmatprep.mubr.msk.f32.mxu1 %vm4900_vm1, %v4870_v25  ;;  %v4872_v7 = vld [vmem:[%s12435_s2 + $0xa0] sm:$0xff]  ;;  %v13262_v25 = vld [vmem:[#allocation22_spill] sm:$0xff] }
 0x377   :  { %v7093_v3 = vpop.eup %7092  ;;  %v4763_v1 = vmul.f32 %v7091_v51, %v11671_v15  ;;  %7112 = vpow2.f32 %v3546_v31  ;;  %v3558_v59 = vmul.f32 1.442695, %v3404_v22  ;;  %v3560_v55 = vmul.f32 1.442695, %v3405_v63  ;;  %v4871_v15 = vld [vmem:[%s12435_s2 + $0x98] sm:$0xff] }
 0x378   :  { %v7095_v40 = vpop.eup %7094  ;;  %v4764_v47 = vmul.f32 %v7093_v3, %v11676_v56  ;;  %v4795_v36 = vmul.f32 %v13254_v46, %v4762_v8  ;;  %7114 = vpow2.f32 %v3548_v57  ;;  %v3562_v17 = vmul.f32 1.442695, %v3406_v29  ;;  %v4874_v57 = vld [vmem:[%s12435_s2 + $0xb0] sm:$0xff]  ;;  %v13256_v51 = vld [vmem:[#allocation14_spill] sm:$0xff] }
 0x379   :  { %v7097_v42 = vpop.eup %7096  ;;  %v4765_v28 = vmul.f32 %v7095_v40, %v11679_v54  ;;  %v4796_v12 = vmul.f32 %v13254_v46, %v4763_v1  ;;  %7116 = vpow2.f32 %v3550_v45  ;;  %v3564_v30 = vmul.f32 1.442695, %v3407_v53  ;;  %6445 = vmatmul.mubr.msk.f32.gmra.mxu1 %vm4900_vm1, %v4871_v15  ;;  %v13257_v8 = vld [vmem:[#allocation25_spill] sm:$0xff]  ;;  %v13260_v40 = vld [vmem:[#allocation19_spill] sm:$0xff] }
 0x37a   :  { %v7099_v56 = vpop.eup %7098  ;;  %v4766_v32 = vmul.f32 %v7097_v42, %v11692_v44  ;;  %v4797_v35 = vmul.f32 %v13254_v46, %v4764_v47  ;;  %v4828_v16 = vadd.f32 %v13255_v34, %v4795_v36  ;;  %7118 = vpow2.f32 %v3552_v33  ;;  %6447 = vmatprep.mubr.msk.f32.mxu1 %vm4900_vm1, %v4872_v7  ;;  %v13261_v36 = vld [vmem:[#allocation21_spill] sm:$0xff] }
 0x37b   :  { %v7101_v11 = vpop.eup %7100  ;;  %v4767_v49 = vmul.f32 %v7099_v56, %v11736_v38  ;;  %v4798_v6 = vmul.f32 %v13254_v46, %v4765_v28  ;;  %v4829_v54 = vadd.f32 %v13255_v34, %v4796_v12  ;;  %7120 = vpow2.f32 %v3554_v61  ;;  %v4873_v38 = vld [vmem:[%s12435_s2 + $0xa8] sm:$0xff] }
 0x37c   :  { %v7103_v18 = vpop.eup %7102  ;;  %v4768_v13 = vmul.f32 %v7101_v11, %v11747_v52  ;;  %v4799_v44 = vmul.f32 %v13254_v46, %v4766_v32  ;;  %v4830_v24 = vadd.f32 %v13255_v34, %v4797_v35  ;;  %7122 = vpow2.f32 %v3556_v27  ;;  %v13264_v32 = vld [vmem:[#allocation23_spill] sm:$0xff]  ;;  %v13265_v11 = vld [vmem:[#allocation24_spill] sm:$0xff] }
 0x37d   :  { %v4769_v58 = vmul.f32 %v7103_v18, %v4513_v9  ;;  %v4800_v62 = vmul.f32 %v13254_v46, %v4767_v49  ;;  %v4831_v22 = vadd.f32 %v13255_v34, %v4798_v6  ;;  %v5549_v52 = vsel %vm5190_vm2, %v4829_v54, %v4828_v16  ;;  %6448 = vmatmul.mubr.msk.f32.gmra.mxu1 %vm4900_vm1, %v4873_v38  ;;  %v13266_v6 = vld [vmem:[#allocation28_spill] sm:$0xff]  ;;  %v13267_v18 = vld [vmem:[#allocation34_spill] sm:$0xff] }
 0x37e   :  { %v4801_v63 = vmul.f32 %v13254_v46, %v4768_v13  ;;  %v4832_v14 = vadd.f32 %v13255_v34, %v4799_v44  ;;  %v5550_v29 = vsel %vm5192_vm3, %v4830_v24, %v5549_v52  ;;  %7124 = vpow2.f32 %v3558_v59  ;;  %6450 = vmatprep.mubr.msk.f32.mxu1 %vm4900_vm1, %v4874_v57  ;;  %v13259_v59 = vld [vmem:[#allocation26_spill] sm:$0xff]  ;;  %v13268_v44 = vld [vmem:[#allocation35_spill] sm:$0xff] }
 0x37f   :  { %v4802_v53 = vmul.f32 %v13254_v46, %v4769_v58  ;;  %v4833_v4 = vadd.f32 %v13255_v34, %v4800_v62  ;;  %v5551_v26 = vsel %vm5194_vm4, %v4831_v22, %v5550_v29  ;;  %7126 = vpow2.f32 %v3560_v55  ;;  %v13269_v22 = vld [vmem:[#allocation36_spill] sm:$0xff] }
 0x380   :  { %v11826_v21 = vpop.eup %7104  ;;  %v4834_v50 = vadd.f32 %v13255_v34, %v4801_v63  ;;  %v5552_v19 = vsel %vm5196_vm5, %v4832_v14, %v5551_v26  ;;  %7128 = vpow2.f32 %v3562_v17  ;;  %v3566_v31 = vmul.f32 1.442695, %v3408_v0 }
 0x381   :  { %v11839_v41 = vpop.eup %7106  ;;  %v4835_v45 = vadd.f32 %v13255_v34, %v4802_v53  ;;  %v5553_v33 = vsel %vm5198_vm6, %v4833_v4, %v5552_v19  ;;  %7130 = vpow2.f32 %v3564_v30  ;;  %v3568_v5 = vmul.f32 1.442695, %v3409_v2  ;;  %6451 = vmatmul.mubr.msk.f32.gmra.mxu1 %vm4900_vm1, %v4875_v43  ;;  %v13263_v30 = vld [vmem:[#allocation27_spill] sm:$0xff]  ;;  %v13270_v4 = vld [vmem:[#allocation37_spill] sm:$0xff]  ;;  %v13271_v43 = vld [vmem:[#allocation38_spill] sm:$0xff] }
 0x382   :  { %v11847_v0 = vpop.eup %7108  ;;  %v5554_v61 = vsel %vm5200_vm7, %v4834_v50, %v5553_v33  ;;  %7132 = vpow2.f32 %v3566_v31  ;;  %v3762_v9 = vsel %vm93_vm0, %v13256_v51, 0.0  ;;  %v3763_v27 = vsel %vm93_vm0, %v13257_v8, 0.0 }
 0x383   :  { %v11854_v37 = vpop.eup %7110  ;;  %v5555_v3 = vsel %vm5202_vm8, %v4835_v45, %v5554_v61  ;;  %7134 = vpow2.f32 %v3568_v5  ;;  %v3764_v23 = vadd.f32 %v3763_v27, %v3762_v9  ;;  %v3765_v2 = vsel %vm93_vm0, %v13258_v39, 0.0 }
 0x384   :  { %v11860_v1 = vpop.eup %7112  ;;  %6457 = vmatprep.subr.mxu0 %v5555_v3  ;;  %v3767_v55 = vsel %vm93_vm0, %v13259_v59, 0.0  ;;  %v3775_v47 = vsel %vm93_vm0, %v13260_v40, 0.0  ;;  %v3776_v17 = vsel %vm93_vm0, %v13261_v36, 0.0  ;;  %v3778_v15 = vsel %vm93_vm0, %v13262_v25, 0.0 }
 0x385   :  { %v11870_v42 = vpop.eup %7114  ;;  %6458 = vmatpush3.msra.mxu0 %v5555_v3  ;;  %v3766_v28 = vadd.f32 %v3765_v2, %v3764_v23  ;;  %v3777_v12 = vadd.f32 %v3776_v17, %v3775_v47  ;;  %v3780_v56 = vsel %vm93_vm0, %v13263_v30, 0.0  ;;  %v3788_v35 = vsel %vm93_vm0, %v13264_v32, 0.0 }
 0x386   :  { %v11876_v16 = vpop.eup %7116  ;;  %v3789_v49 = vsel %vm93_vm0, %v13265_v11, 0.0  ;;  %v3791_v54 = vsel %vm93_vm0, %v13266_v6, 0.0  ;;  %v3793_v13 = vsel %vm93_vm0, %v13267_v18, 0.0  ;;  %v3801_v24 = vsel %vm93_vm0, %v13268_v44, 0.0 }
 0x387   :  { %v11886_v7 = vpop.eup %7118  ;;  %v3768_v38 = vadd.f32 %v3767_v55, %v3766_v28  ;;  %v3779_v58 = vadd.f32 %v3778_v15, %v3777_v12  ;;  %v3790_v62 = vadd.f32 %v3789_v49, %v3788_v35  ;;  %v3802_v52 = vsel %vm93_vm0, %v13269_v22, 0.0 }
 0x388   :  { %v11890_v63 = vpop.eup %7120  ;;  %v3803_v14 = vadd.f32 %v3802_v52, %v3801_v24  ;;  %v3804_v29 = vsel %vm93_vm0, %v11826_v21, 0.0  ;;  %v3806_v53 = vsel %vm93_vm0, %v11847_v0, 0.0  ;;  %v3814_v26 = vsel %vm93_vm0, %v13270_v4, 0.0 }
 0x389   :  { %v11898_v50 = vpop.eup %7122  ;;  %v3769_v19 = vrot.slane %v3768_v38, 4  ;;  %v3781_v31 = vadd.f32 %v3780_v56, %v3779_v58  ;;  %v3792_v57 = vadd.f32 %v3791_v54, %v3790_v62  ;;  %v3815_v45 = vsel %vm93_vm0, %v13271_v43, 0.0 }
 0x38a   :  { %v3805_v33 = vadd.f32 %v3804_v29, %v3803_v14  ;;  %v3816_v5 = vadd.f32 %v3815_v45, %v3814_v26  ;;  %v3817_v61 = vsel %vm93_vm0, %v11839_v41, 0.0  ;;  %v3819_v9 = vsel %vm93_vm0, %v11854_v37, 0.0 }
 0x38b   :  { %v11906_v27 = vpop.eup %7124  ;;  %v3770_v3 = vadd.f32 %v3769_v19, %v3768_v38  ;;  %v3782_v23 = vrot.slane %v3781_v31, 4  ;;  %v3794_v2 = vadd.f32 %v3793_v13, %v3792_v57  ;;  %v3827_v55 = vsel %vm93_vm0, %v11860_v1, 0.0 }
 0x38c   :  { %v11910_v47 = vpop.eup %7126  ;;  %v3807_v17 = vadd.f32 %v3806_v53, %v3805_v33  ;;  %v3818_v15 = vadd.f32 %v3817_v61, %v3816_v5  ;;  %v3828_v28 = vsel %vm93_vm0, %v11870_v42, 0.0  ;;  %v3830_v12 = vsel %vm93_vm0, %v11876_v16, 0.0 }
 0x38d   :  { %v11916_v56 = vpop.eup %7128  ;;  %v3783_v35 = vadd.f32 %v3782_v23, %v3781_v31  ;;  %v3795_v49 = vrot.slane %v3794_v2, 4  ;;  %v3829_v54 = vadd.f32 %v3828_v28, %v3827_v55  ;;  %v3832_v58 = vsel %vm93_vm0, %v11886_v7, 0.0 }
 0x38e   :  { %v11918_v24 = vpop.eup %7130  ;;  %v3808_v13 = vrot.slane %v3807_v17, 4  ;;  %v3820_v38 = vadd.f32 %v3819_v9, %v3818_v15  ;;  %v3771_v52 = vrot.slane %v3770_v3, 2  ;;  %v3840_v53 = vsel %vm93_vm0, %v11890_v63, 0.0 }
 0x38f   :  { %v11922_v62 = vpop.eup %7132  ;;  %v3796_v14 = vadd.f32 %v3795_v49, %v3794_v2  ;;  %v3831_v29 = vadd.f32 %v3830_v12, %v3829_v54  ;;  %v3784_v19 = vrot.slane %v3783_v35, 2  ;;  %v3841_v45 = vsel %vm93_vm0, %v11898_v50, 0.0 }
 0x390   :  { %v11926_v26 = vpop.eup %7134  ;;  %v3809_v31 = vadd.f32 %v3808_v13, %v3807_v17  ;;  %v3821_v57 = vrot.slane %v3820_v38, 4  ;;  %v3843_v61 = vsel %vm93_vm0, %v11906_v27, 0.0  ;;  %v3842_v2 = vadd.f32 %v3841_v45, %v3840_v53 }
 0x391   :  { %v3797_v33 = vrot.slane %v3796_v14, 2  ;;  %v3833_v5 = vadd.f32 %v3832_v58, %v3831_v29  ;;  %v3772_v55 = vadd.f32 %v3771_v52, %v3770_v3  ;;  %v3845_v28 = vsel %vm93_vm0, %v11910_v47, 0.0 }
 0x392   :  { %v3810_v9 = vrot.slane %v3809_v31, 2  ;;  %v3822_v23 = vadd.f32 %v3821_v57, %v3820_v38  ;;  %v3785_v12 = vadd.f32 %v3784_v19, %v3783_v35  ;;  %v3844_v17 = vadd.f32 %v3843_v61, %v3842_v2 }
 0x393   :  { %v3834_v15 = vrot.slane %v3833_v5, 4  ;;  %v3853_v54 = vsel %vm93_vm0, %v11916_v56, 0.0  ;;  %v3798_v13 = vadd.f32 %v3797_v33, %v3796_v14  ;;  %v3854_v29 = vsel %vm93_vm0, %v11918_v24, 0.0 }
 0x394   :  { %v3823_v49 = vrot.slane %v3822_v23, 2  ;;  %v3811_v34 = vadd.f32 %v3810_v9, %v3809_v31  ;;  %v3846_v46 = vadd.f32 %v3845_v28, %v3844_v17  ;;  %v3855_v38 = vadd.f32 %v3854_v29, %v3853_v54 }
 0x395   :  { %v3835_v58 = vadd.f32 %v3834_v15, %v3833_v5  ;;  %v3856_v52 = vsel %vm93_vm0, %v11922_v62, 0.0  ;;  %v3858_v35 = vsel %vm93_vm0, %v11926_v26, 0.0  ;;  %v3773_v45 = vrot.slane %v3772_v55, 1 }
 0x396   :  { %v3824_v53 = vadd.f32 %v3823_v49, %v3822_v23  ;;  %v3847_v19 = vrot.slane %v3846_v46, 4  ;;  %v3857_v57 = vadd.f32 %v3856_v52, %v3855_v38  ;;  %v3786_v61 = vrot.slane %v3785_v12, 1 }
 0x397   :  { %v3836_v3 = vrot.slane %v3835_v58, 2  ;;  %v3799_v14 = vrot.slane %v3798_v13, 1  ;;  %v3812_v31 = vrot.slane %v3811_v34, 1  ;;  %v11946_v23 = vadd.f32 %v3773_v45, %v3772_v55 }
 0x398   :  { %v3859_v33 = vadd.f32 %v3858_v35, %v3857_v57  ;;  %v3825_v5 = vrot.slane %v3824_v53, 1  ;;  %v11944_v2 = vadd.f32 %v3847_v19, %v3846_v46  ;;  %v11948_v15 = vadd.f32 %v3786_v61, %v3785_v12 }
 0x399   :  { %v11942_v9 = vadd.f32 %v3836_v3, %v3835_v58  ;;  %v11950_v28 = vadd.f32 %v3799_v14, %v3798_v13  ;;  %v11952_v49 = vadd.f32 %v3812_v31, %v3811_v34  ;;  %v4178_v54 = vmul.f32 %v13256_v51, %v13233_v10 }
 0x39a   :  { %v3860_v17 = vrot.slane %v3859_v33, 4  ;;  %v4179_v29 = vmul.f32 %v13257_v8, %v13234_v60  ;;  %v4180_v58 = vmul.f32 %v13258_v39, %v13235_v48  ;;  %v11960_v46 = vadd.f32 %v3825_v5, %v3824_v53 }
 0x39b   :  { %v3838_v55 = vrot.slane %v11942_v9, 1  ;;  %v4181_v12 = vmul.f32 %v13259_v59, %v13236_v20  ;;  %v4182_v34 = vmul.f32 %v13260_v40, %v13233_v10  ;;  %v3849_v13 = vrot.slane %v11944_v2, 2 }
 0x39c   :  { %v4183_v51 = vmul.f32 %v13261_v36, %v13234_v60  ;;  %v4184_v8 = vmul.f32 %v13262_v25, %v13235_v48  ;;  %v4185_v39 = vmul.f32 %v13263_v30, %v13236_v20  ;;  %v4186_v38 = vmul.f32 %v13264_v32, %v13233_v10 }
 0x39d   :  { %v4187_v59 = vmul.f32 %v13265_v11, %v13234_v60  ;;  %v4188_v40 = vmul.f32 %v13266_v6, %v13235_v48  ;;  %v4189_v53 = vmul.f32 %v13267_v18, %v13236_v20  ;;  %v11982_v3 = vadd.f32 %v3860_v17, %v3859_v33 }
 0x39e   :  { %v4190_v36 = vmul.f32 %v13268_v44, %v13233_v10  ;;  %v4191_v25 = vmul.f32 %v13269_v22, %v13234_v60  ;;  %v4192_v30 = vmul.f32 %v11826_v21, %v13235_v48  ;;  %v4193_v32 = vmul.f32 %v11847_v0, %v13236_v20 }
 0x39f   :  { %v4194_v11 = vmul.f32 %v13270_v4, %v13233_v10  ;;  %v4195_v6 = vmul.f32 %v13271_v43, %v13234_v60  ;;  %v4196_v18 = vmul.f32 %v11839_v41, %v13235_v48  ;;  %v4197_v44 = vmul.f32 %v11854_v37, %v13236_v20 }
 0x3a0   :  { %v4198_v22 = vmul.f32 %v11860_v1, %v13233_v10  ;;  %v4199_v21 = vmul.f32 %v11870_v42, %v13234_v60  ;;  %v4306_v0 = vsel %vm93_vm0, %v4178_v54, 0.0  ;;  %v4200_v4 = vmul.f32 %v11876_v16, %v13235_v48 }
 0x3a1   :  { %v4307_v52 = vsel %vm93_vm0, %v4179_v29, 0.0  ;;  %v4309_v43 = vsel %vm93_vm0, %v4180_v58, 0.0  ;;  %v4319_v41 = vsel %vm93_vm0, %v4182_v34, 0.0  ;;  %v4201_v37 = vmul.f32 %v11886_v7, %v13236_v20 }
 0x3a2   :  { %v4308_v35 = vadd.f32 %v4307_v52, %v4306_v0  ;;  %v4320_v1 = vsel %vm93_vm0, %v4183_v51, 0.0  ;;  %v4322_v19 = vsel %vm93_vm0, %v4184_v8, 0.0  ;;  %v4311_v42 = vsel %vm93_vm0, %v4181_v12, 0.0 }
 0x3a3   :  { %v4321_v57 = vadd.f32 %v4320_v1, %v4319_v41  ;;  %v4332_v45 = vsel %vm93_vm0, %v4186_v38, 0.0  ;;  %v4333_v16 = vsel %vm93_vm0, %v4187_v59, 0.0  ;;  %v4324_v14 = vsel %vm93_vm0, %v4185_v39, 0.0 }
 0x3a4   :  { %v4310_v61 = vadd.f32 %v4309_v43, %v4308_v35  ;;  %v4334_v31 = vadd.f32 %v4333_v16, %v4332_v45  ;;  %v4335_v33 = vsel %vm93_vm0, %v4188_v40, 0.0  ;;  %v4345_v7 = vsel %vm93_vm0, %v4190_v36, 0.0 }
 0x3a5   :  { %v4323_v5 = vadd.f32 %v4322_v19, %v4321_v57  ;;  %v4346_v17 = vsel %vm93_vm0, %v4191_v25, 0.0  ;;  %v4348_v54 = vsel %vm93_vm0, %v4192_v30, 0.0  ;;  %v4202_v29 = vmul.f32 %v11890_v63, %v13233_v10 }
 0x3a6   :  { %v4336_v58 = vadd.f32 %v4335_v33, %v4334_v31  ;;  %v4337_v12 = vsel %vm93_vm0, %v4189_v53, 0.0  ;;  %v4347_v34 = vadd.f32 %v4346_v17, %v4345_v7  ;;  %v4312_v51 = vadd.f32 %v4311_v42, %v4310_v61 }
 0x3a7   :  { %v4358_v8 = vsel %vm93_vm0, %v4194_v11, 0.0  ;;  %v4359_v39 = vsel %vm93_vm0, %v4195_v6, 0.0  ;;  %v4361_v38 = vsel %vm93_vm0, %v4196_v18, 0.0  ;;  %v4325_v59 = vadd.f32 %v4324_v14, %v4323_v5 }
 0x3a8   :  { %v4349_v40 = vadd.f32 %v4348_v54, %v4347_v34  ;;  %v4350_v36 = vsel %vm93_vm0, %v4193_v32, 0.0  ;;  %v4360_v25 = vadd.f32 %v4359_v39, %v4358_v8  ;;  %v4203_v30 = vmul.f32 %v11898_v50, %v13234_v60 }
 0x3a9   :  { %v4363_v63 = vsel %vm93_vm0, %v4197_v44, 0.0  ;;  %v4371_v53 = vsel %vm93_vm0, %v4198_v22, 0.0  ;;  %v4372_v0 = vsel %vm93_vm0, %v4199_v21, 0.0  ;;  %v3850_v11 = vadd.f32 %v3849_v13, %v11944_v2 }
 0x3aa   :  { %v3862_v6 = vrot.slane %v11982_v3, 2  ;;  %v4338_v52 = vadd.f32 %v4337_v12, %v4336_v58  ;;  %v4362_v18 = vadd.f32 %v4361_v38, %v4360_v25  ;;  %v4204_v43 = vmul.f32 %v11906_v27, %v13235_v48  ;;  %v5870_v25 = vld [vmem:[%s12438_s5 + $0x78] sm:$0xff] }
 0x3ab   :  { %v4351_v32 = vadd.f32 %v4350_v36, %v4349_v40  ;;  %v4373_v41 = vadd.f32 %v4372_v0, %v4371_v53  ;;  %v4374_v35 = vsel %vm93_vm0, %v4200_v4, 0.0  ;;  %v4313_v50 = vrot.slane %v4312_v51, 4 }
 0x3ac   :  { %v4326_v1 = vrot.slane %v4325_v59, 4  ;;  %v4364_v44 = vadd.f32 %v4363_v63, %v4362_v18  ;;  %v4376_v22 = vsel %vm93_vm0, %v4201_v37, 0.0  ;;  %v4205_v21 = vmul.f32 %v11910_v47, %v13236_v20 }
 0x3ad   :  { %v4375_v2 = vadd.f32 %v4374_v35, %v4373_v41  ;;  %v4384_v13 = vsel %vm93_vm0, %v4202_v29, 0.0  ;;  %v4385_v19 = vsel %vm93_vm0, %v4203_v30, 0.0  ;;  %v3851_v42 = vrot.slane %v3850_v11, 1  ;;  %v5868_v30 = vld [vmem:[%s12438_s5 + $0x68] sm:$0xff] }
 0x3ae   :  { %v3863_v27 = vadd.f32 %v3862_v6, %v11982_v3  ;;  %v4206_v57 = vmul.f32 %v11916_v56, %v13233_v10  ;;  %v4339_v4 = vrot.slane %v4338_v52, 4  ;;  %v4352_v45 = vrot.slane %v4351_v32, 4 }
 0x3af   :  { %v4377_v16 = vadd.f32 %v4376_v22, %v4375_v2  ;;  %v4386_v61 = vadd.f32 %v4385_v19, %v4384_v13  ;;  %v4387_v37 = vsel %vm93_vm0, %v4204_v43, 0.0  ;;  %v4207_v47 = vmul.f32 %v11918_v24, %v13234_v60  ;;  %v5866_v2 = vld [vmem:[%s12438_s5 + $0x58] sm:$0xff]  ;;  %v5865_v13 = vld [vmem:[%s12438_s5 + $0x50] sm:$0xff] }
 0x3b0   :  { %v4314_v14 = vadd.f32 %v4313_v50, %v4312_v51  ;;  %v4327_v31 = vadd.f32 %v4326_v1, %v4325_v59  ;;  %v4365_v33 = vrot.slane %v4364_v44, 4  ;;  %v4208_v5 = vmul.f32 %v11922_v62, %v13235_v48 }
 0x3b1   :  { %v4378_v7 = vrot.slane %v4377_v16, 4  ;;  %v4388_v3 = vadd.f32 %v4387_v37, %v4386_v61  ;;  %v4389_v17 = vsel %vm93_vm0, %v4205_v21, 0.0  ;;  %v3839_v10 = vadd.f32 %v3838_v55, %v11942_v9 }
 0x3b2   :  { %v3864_v56 = vrot.slane %v3863_v27, 1  ;;  %v4209_v54 = vmul.f32 %v11926_v26, %v13236_v20  ;;  %v4340_v29 = vadd.f32 %v4339_v4, %v4338_v52  ;;  %v3852_v60 = vadd.f32 %v3851_v42, %v3850_v11 }
 0x3b3   :  { %v4353_v24 = vadd.f32 %v4352_v45, %v4351_v32  ;;  %v4390_v58 = vadd.f32 %v4389_v17, %v4388_v3  ;;  %v4397_v12 = vsel %vm93_vm0, %v4206_v57, 0.0  ;;  %v4315_v34 = vrot.slane %v4314_v14, 2 }
 0x3b4   :  { %v4328_v48 = vrot.slane %v4327_v31, 2  ;;  %v4366_v62 = vadd.f32 %v4365_v33, %v4364_v44  ;;  %v4398_v51 = vsel %vm93_vm0, %v4207_v47, 0.0  ;;  %v4379_v8 = vadd.f32 %v4378_v7, %v4377_v16 }
 0x3b5   :  { %v4391_v39 = vrot.slane %v4390_v58, 4  ;;  %v4399_v38 = vadd.f32 %v4398_v51, %v4397_v12  ;;  %v4400_v9 = vsel %vm93_vm0, %v4208_v5, 0.0  ;;  %v3865_v55 = vadd.f32 %v3864_v56, %v3863_v27  ;;  %v5861_v51 = vld [vmem:[%s12438_s5 + $0x30] sm:$0xff] }
 0x3b6   :  { %v4341_v59 = vrot.slane %v4340_v29, 2  ;;  %v4402_v20 = vsel %vm93_vm0, %v4209_v54, 0.0  ;;  %7136 = vrcp.f32 %v11946_v23  ;;  %v4354_v26 = vrot.slane %v4353_v24, 2 }
 0x3b7   :  { %v4392_v40 = vadd.f32 %v4391_v39, %v4390_v58  ;;  %v4401_v36 = vadd.f32 %v4400_v9, %v4399_v38  ;;  %7138 = vrcp.f32 %v11948_v15  ;;  %v4316_v63 = vadd.f32 %v4315_v34, %v4314_v14  ;;  %v5864_v14 = vld [vmem:[%s12438_s5 + $0x48] sm:$0xff]  ;;  %v13273_v9 = vld [vmem:[#allocation49_spill] sm:$0xff] }
 0x3b8   :  { %v4367_v53 = vrot.slane %v4366_v62, 2  ;;  %7140 = vrcp.f32 %v11950_v28  ;;  %v4329_v0 = vadd.f32 %v4328_v48, %v4327_v31  ;;  %v4380_v11 = vrot.slane %v4379_v8, 2  ;;  %v5869_v28 = vld [vmem:[%s12438_s5 + $0x70] sm:$0xff]  ;;  %v5863_v31 = vld [vmem:[%s12438_s5 + $0x40] sm:$0xff] }
 0x3b9   :  { %v4403_v23 = vadd.f32 %v4402_v20, %v4401_v36  ;;  %7142 = vrcp.f32 %v11952_v49  ;;  %v7198_v6 = vmov 0   ;;  %v4342_v15 = vadd.f32 %v4341_v59, %v4340_v29  ;;  %v5867_v49 = vld [vmem:[%s12438_s5 + $0x60] sm:$0xff] }
 0x3ba   :  { %6510 = vset.pattern.permute.xlu0 %v7198_v6  ;;  %6511 = vset.pattern.permute.xlu1 %v7198_v6  ;;  %v4393_v52 = vrot.slane %v4392_v40, 2  ;;  %7144 = vrcp.f32 %v11960_v46  ;;  %v4355_v18 = vadd.f32 %v4354_v26, %v4353_v24  ;;  %v4317_v32 = vrot.slane %v4316_v63, 1  ;;  %v5860_v6 = vld [vmem:[%s12438_s5 + $0x28] sm:$0xff] }
 0x3bb   :  { %5956 = vperm.xlu0 %6510, %v5870_v25   ;;  %5946 = vperm.xlu1 %6511, %v5868_v30   ;;  %v4404_v43 = vrot.slane %v4403_v23, 4  ;;  %7146 = vrcp.f32 %v3839_v10  ;;  %v4368_v41 = vadd.f32 %v4367_v53, %v4366_v62  ;;  %v4330_v35 = vrot.slane %v4329_v0, 1  ;;  %v5862_v62 = vld [vmem:[%s12438_s5 + $0x38] sm:$0xff] }
 0x3bc   :  { %7148 = vrcp.f32 %v3852_v60  ;;  %v4381_v50 = vadd.f32 %v4380_v11, %v4379_v8  ;;  %v4343_v46 = vrot.slane %v4342_v15, 1  ;;  %v4394_v44 = vadd.f32 %v4393_v52, %v4392_v40  ;;  %v13272_v60 = vld [vmem:[#allocation30_spill] sm:$0xff] }
 0x3bd   :  { %v4405_v1 = vadd.f32 %v4404_v43, %v4403_v23  ;;  %7150 = vrcp.f32 %v3865_v55  ;;  %v4356_v22 = vrot.slane %v4355_v18, 1  ;;  %v4318_v19 = vadd.f32 %v4317_v32, %v4316_v63 }
 0x3be   :  { %v4369_v42 = vrot.slane %v4368_v41, 1  ;;  %v4331_v27 = vadd.f32 %v4330_v35, %v4329_v0  ;;  %v4382_v57 = vrot.slane %v4381_v50, 1  ;;  %v4344_v45 = vadd.f32 %v4343_v46, %v4342_v15  ;;  %v5859_v15 = vld [vmem:[%s12438_s5 + $0x20] sm:$0xff]  ;;  %v5858_v46 = vld [vmem:[%s12438_s5 + $0x18] sm:$0xff] }
 0x3bf   :  { %5951 = vperm.xlu0 %6510, %v5869_v28   ;;  %5941 = vperm.xlu1 %6511, %v5867_v49   ;;  %v4406_v21 = vrot.slane %v4405_v1, 2  ;;  %v4395_v16 = vrot.slane %v4394_v44, 1  ;;  %v4357_v37 = vadd.f32 %v4356_v22, %v4355_v18  ;;  %v5857_v22 = vld [vmem:[%s12438_s5 + $0x10] sm:$0xff] }
 0x3c0   :  { %v4370_v5 = vadd.f32 %v4369_v42, %v4368_v41  ;;  %v4383_v17 = vadd.f32 %v4382_v57, %v4381_v50  ;;  %v5855_v42 = vld [vmem:[%s12438_s5] sm:$0xff] }
 0x3c1   :  { %v4407_v4 = vadd.f32 %v4406_v21, %v4405_v1  ;;  %v4396_v54 = vadd.f32 %v4395_v16, %v4394_v44  ;;  %v5490_v57 = vld [vmem:[%s12437_s4 + $0x20] sm:$0xff]  ;;  %v5491_v16 = vld [vmem:[%s12437_s4 + $0x28] sm:$0xff] }
 0x3c3   :  { %5936 = vperm.xlu0 %6510, %v5866_v2   ;;  %5931 = vperm.xlu1 %6511, %v5865_v13   ;;  %v7137_v61 = vpop.eup %7136  ;;  %v4408_v47 = vrot.slane %v4407_v4, 1  ;;  %v5487_v2 = vld [vmem:[%s12437_s4 + $0x8] sm:$0xff]  ;;  %v5488_v13 = vld [vmem:[%s12437_s4 + $0x10] sm:$0xff] }
 0x3c4   :  { %v7139_v33 = vpop.eup %7138  ;;  %v4754_v7 = vmul.f32 %v7137_v61, %v4318_v19  ;;  %v5856_v19 = vld [vmem:[%s12438_s5 + $0x8] sm:$0xff]  ;;  %v5492_v61 = vld [vmem:[%s12437_s4 + $0x30] sm:$0xff] }
 0x3c5   :  { %v7141_v3 = vpop.eup %7140  ;;  %v4755_v10 = vmul.f32 %v7139_v33, %v4331_v27  ;;  %v4409_v12 = vadd.f32 %v4408_v47, %v4407_v4  ;;  %v5489_v27 = vld [vmem:[%s12437_s4 + $0x18] sm:$0xff]  ;;  %v5875_v47 = vld [vmem:[%s12438_s5 + $0xa0] sm:$0xff] }
 0x3c6   :  { %v7143_v56 = vpop.eup %7142  ;;  %v4756_v29 = vmul.f32 %v7141_v3, %v4344_v45  ;;  %v4787_v24 = vmul.f32 %v13272_v60, %v4754_v7  ;;  %v5878_v4 = vld [vmem:[%s12438_s5 + $0xb8] sm:$0xff]  ;;  %v5877_v45 = vld [vmem:[%s12438_s5 + $0xb0] sm:$0xff]  ;;  %v5495_v7 = vld [vmem:[%s12437_s4 + $0x48] sm:$0xff] }
 0x3c7   :  { %5926 = vperm.xlu0 %6510, %v5864_v14   ;;  %5921 = vperm.xlu1 %6511, %v5863_v31   ;;  %v7145_v58 = vpop.eup %7144  ;;  %v4757_v34 = vmul.f32 %v7143_v56, %v4357_v37  ;;  %v4788_v48 = vmul.f32 %v13272_v60, %v4755_v10  ;;  %v5876_v37 = vld [vmem:[%s12438_s5 + $0xa8] sm:$0xff]  ;;  %v5493_v14 = vld [vmem:[%s12437_s4 + $0x38] sm:$0xff]  ;;  %v5494_v31 = vld [vmem:[%s12437_s4 + $0x40] sm:$0xff] }
 0x3c8   :  { %v7147_v8 = vpop.eup %7146  ;;  %v4758_v39 = vmul.f32 %v7145_v58, %v4370_v5  ;;  %v4789_v38 = vmul.f32 %v13272_v60, %v4756_v29  ;;  %v4820_v55 = vadd.f32 %v13273_v9, %v4787_v24  ;;  %v5874_v33 = vld [vmem:[%s12438_s5 + $0x98] sm:$0xff]  ;;  %v5873_v5 = vld [vmem:[%s12438_s5 + $0x90] sm:$0xff]  ;;  %v5871_v10 = vld [vmem:[%s12438_s5 + $0x80] sm:$0xff] }
 0x3c9   :  { %v7149_v59 = vpop.eup %7148  ;;  %v4759_v20 = vmul.f32 %v7147_v8, %v4383_v17  ;;  %v4790_v26 = vmul.f32 %v13272_v60, %v4757_v34  ;;  %v4821_v40 = vadd.f32 %v13273_v9, %v4788_v48  ;;  %v5496_v3 = vld [vmem:[%s12437_s4 + $0x50] sm:$0xff]  ;;  %v5872_v17 = vld [vmem:[%s12438_s5 + $0x88] sm:$0xff]  ;;  %v5497_v56 = vld [vmem:[%s12437_s4 + $0x58] sm:$0xff] }
 0x3ca   :  { %v7151_v36 = vpop.eup %7150  ;;  %v4760_v25 = vmul.f32 %v7149_v59, %v4396_v54  ;;  %v4791_v30 = vmul.f32 %v13272_v60, %v4758_v39  ;;  %v4822_v63 = vadd.f32 %v13273_v9, %v4789_v38  ;;  %v5498_v54 = vld [vmem:[%s12437_s4 + $0x60] sm:$0xff]  ;;  %v5500_v24 = vld [vmem:[%s12437_s4 + $0x70] sm:$0xff]  ;;  %v5501_v58 = vld [vmem:[%s12437_s4 + $0x78] sm:$0xff] }
 0x3cb   :  { %5916 = vperm.xlu0 %6510, %v5862_v62   ;;  %5911 = vperm.xlu1 %6511, %v5861_v51   ;;  %v4761_v53 = vmul.f32 %v7151_v36, %v4409_v12  ;;  %v4792_v0 = vmul.f32 %v13272_v60, %v4759_v20  ;;  %v4823_v11 = vadd.f32 %v13273_v9, %v4790_v26  ;;  %v6097_v29 = vld [vmem:[%s12440_s7] sm:$0xff]  ;;  %v5503_v34 = vld [vmem:[%s12437_s4 + $0x88] sm:$0xff]  ;;  %v5504_v48 = vld [vmem:[%s12437_s4 + $0x90] sm:$0xff] }
 0x3cc   :  { %v5542_v23 = vsel %vm5190_vm2, %v4821_v40, %v4820_v55  ;;  %v4793_v52 = vmul.f32 %v13272_v60, %v4760_v25  ;;  %v4824_v18 = vadd.f32 %v13273_v9, %v4791_v30  ;;  %v5502_v12 = vld [vmem:[%s12437_s4 + $0x80] sm:$0xff]  ;;  %v5505_v62 = vld [vmem:[%s12437_s4 + $0x98] sm:$0xff]  ;;  %v5507_v8 = vld [vmem:[%s12437_s4 + $0xa8] sm:$0xff]  ;;  %v12258_v55 = vpop.f32.mrf.mxu1  ;;  %v12270_v25 = vpop.f32.mrf.mxu0 }
 0x3cd   :  { %v5543_v43 = vsel %vm5192_vm3, %v4822_v63, %v5542_v23  ;;  %v4794_v28 = vmul.f32 %v13272_v60, %v4761_v53  ;;  %v4825_v49 = vadd.f32 %v13273_v9, %v4792_v0  ;;  %v5499_v60 = vld [vmem:[%s12437_s4 + $0x68] sm:$0xff]  ;;  %v5506_v51 = vld [vmem:[%s12437_s4 + $0xa0] sm:$0xff]  ;;  %v5508_v39 = vld [vmem:[%s12437_s4 + $0xb0] sm:$0xff] }
 0x3ce   :  { %v5544_v32 = vsel %vm5194_vm4, %v4823_v11, %v5543_v43  ;;  %v4826_v41 = vadd.f32 %v13273_v9, %v4793_v52  ;;  %v5509_v38 = vld [vmem:[%s12437_s4 + $0xb8] sm:$0xff]  ;;  %v12260_v59 = vpop.f32.mrf.mxu1  ;;  %v12274_v63 = vpop.f32.mrf.mxu0  ;;  %v6096_v23 = vld [vmem:[%s12439_s6 + $0x8] sm:$0xff] }
 0x3cf   :  { %v5545_v35 = vsel %vm5196_vm5, %v4824_v18, %v5544_v32  ;;  %5906 = vperm.xlu0 %6510, %v5860_v6   ;;  %5901 = vperm.xlu1 %6511, %v5859_v15   ;;  %v4827_v50 = vadd.f32 %v13273_v9, %v4794_v28  ;;  %v12691_v9 = vmov 0.0   ;;  %13279 = vst [vmem:[#allocation31_spill] sm:$0xff] %v12274_v63 }
 0x3d0   :  { %v5546_v1 = vsel %vm5198_vm6, %v4825_v49, %v5545_v35  ;;  %6107 = vmatprep.subr.mxu1 %v12691_v9  ;;  %v12262_v20 = vpop.f32.mrf.mxu1  ;;  %v12278_v0 = vpop.f32.mrf.mxu0  ;;  %6280 = vmatprep.mubr.msk.f32.mxu1 %vm6103_vm9, %v6096_v23 }
 0x3d1   :  { %v5547_v44 = vsel %vm5200_vm7, %v4826_v41, %v5546_v1  ;;  %13274 = vst [vmem:[#allocation52_spill] sm:$0xff] %v12262_v20 }
 0x3d2   :  { %v5548_v21 = vsel %vm5202_vm8, %v4827_v50, %v5547_v44  ;;  %v12264_v26 = vpop.f32.mrf.mxu1  ;;  %v12285_v6 = vpop.f32.mrf.mxu0 }
 0x3d3   :  { %6459 = vmatprep.subr.mxu0 %v5548_v21  ;;  %5896 = vperm.xlu0 %6510, %v5858_v46   ;;  %13275 = vst [vmem:[#allocation53_spill] sm:$0xff] %v12264_v26 }
 0x3d4   :  { %6460 = vmatpush3.msra.mxu0 %v5548_v21  ;;  %5891 = vperm.xlu1 %6511, %v5857_v22   ;;  %v12266_v40 = vpop.f32.mrf.mxu1  ;;  %v12291_v18 = vpop.f32.mrf.mxu0 }
 0x3d5   :  { %6462 = vmatmul.mubr.msk.f32.vlgmr.msra.gmra.mxu0 %vm4900_vm1, %v5487_v2  ;;  %13276 = vst [vmem:[#allocation54_spill] sm:$0xff] %v12266_v40 }
 0x3d6   :  { %6464 = vmatprep.mubr.msk.f32.mxu0 %vm4900_vm1, %v5488_v13  ;;  %v12268_v36 = vpop.f32.mrf.mxu1  ;;  %v12295_v28 = vpop.f32.mrf.mxu0 }
 0x3d7   :  { %5886 = vperm.xlu0 %6510, %v5856_v19   ;;  %13277 = vst [vmem:[#allocation55_spill] sm:$0xff] %v12268_v36 }
 0x3d8   :  { %5881 = vperm.xlu1 %6511, %v5855_v42   ;;  %v12272_v30 = vpop.f32.mrf.mxu1  ;;  %v12299_v32 = vpop.f32.mrf.mxu0 }
 0x3d9   :  { %6465 = vmatmul.mubr.msk.f32.gmra.mxu0 %vm4900_vm1, %v5489_v27  ;;  %13278 = vst [vmem:[#allocation57_spill] sm:$0xff] %v12272_v30 }
 0x3da   :  { %6467 = vmatprep.mubr.msk.f32.mxu0 %vm4900_vm1, %v5490_v57  ;;  %v12276_v53 = vpop.f32.mrf.mxu1  ;;  %v12303_v35 = vpop.f32.mrf.mxu0 }
 0x3db   :  { %5996 = vperm.xlu0 %6510, %v5878_v4   ;;  %13280 = vst [vmem:[#allocation32_spill] sm:$0xff] %v12276_v53 }
 0x3dc   :  { %5991 = vperm.xlu1 %6511, %v5877_v45   ;;  %v12280_v11 = vpop.f32.mrf.mxu1  ;;  %v6387_v1 = vpop.f32.mrf.mxu0 }
 0x3dd   :  { %6468 = vmatmul.mubr.msk.f32.gmra.mxu0 %vm4900_vm1, %v5491_v16  ;;  %13281 = vst [vmem:[#allocation33_spill] sm:$0xff] %v12280_v11 }
 0x3de   :  { %6470 = vmatprep.mubr.msk.f32.mxu0 %vm4900_vm1, %v5492_v61  ;;  %v12287_v15 = vpop.f32.mrf.mxu1  ;;  %v5079_v44 = vpop.f32.mrf.mxu0 }
 0x3df   :  { %5986 = vperm.xlu0 %6510, %v5876_v37   ;;  %13282 = vst [vmem:[#allocation39_spill] sm:$0xff] %v12287_v15 }
 0x3e0   :  { %5981 = vperm.xlu1 %6511, %v5875_v47   ;;  %v6390_v21 = vpop.f32.mrf.mxu0 }
 0x3e1   :  { %6471 = vmatmul.mubr.msk.f32.gmra.mxu0 %vm4900_vm1, %v5493_v14 }
 0x3e2   :  { %6473 = vmatprep.mubr.msk.f32.mxu0 %vm4900_vm1, %v5494_v31  ;;  %v5089_v13 = vpop.f32.mrf.mxu0 }
 0x3e3   :  { %5976 = vperm.xlu0 %6510, %v5874_v33  }
 0x3e4   :  { %5971 = vperm.xlu1 %6511, %v5873_v5   ;;  %v6393_v42 = vpop.f32.mrf.mxu0 }
 0x3e5   :  { %6474 = vmatmul.mubr.msk.f32.gmra.mxu0 %vm4900_vm1, %v5495_v7 }
 0x3e6   :  { %6476 = vmatprep.mubr.msk.f32.mxu0 %vm4900_vm1, %v5496_v3  ;;  %v5099_v57 = vpop.f32.mrf.mxu0 }
 0x3e7   :  { %5966 = vperm.xlu0 %6510, %v5872_v17  }
 0x3e8   :  { %5961 = vperm.xlu1 %6511, %v5871_v10  }
 0x3e9   :  { %6477 = vmatmul.mubr.msk.f32.gmra.mxu0 %vm4900_vm1, %v5497_v56 }
 0x3ea   :  { %6479 = vmatprep.mubr.msk.f32.mxu0 %vm4900_vm1, %v5498_v54 }
 0x3eb   :  { %6100 = vperm.xlu0 %6510, %v6097_v29  }
 0x3ed   :  { %6480 = vmatmul.mubr.msk.f32.gmra.mxu0 %vm4900_vm1, %v5499_v60 }
 0x3ee   :  { %6482 = vmatprep.mubr.msk.f32.mxu0 %vm4900_vm1, %v5500_v24 }
 0x3f1   :  { %6483 = vmatmul.mubr.msk.f32.gmra.mxu0 %vm4900_vm1, %v5501_v58 }
 0x3f2   :  { %6485 = vmatprep.mubr.msk.f32.mxu0 %vm4900_vm1, %v5502_v12 }
 0x3f3   :  { %v12289_v52 = vpop.f32.mrf.mxu1 }
 0x3f5   :  { %6486 = vmatmul.mubr.msk.f32.gmra.mxu0 %vm4900_vm1, %v5503_v34  ;;  %v12293_v43 = vpop.f32.mrf.mxu1 }
 0x3f6   :  { %6488 = vmatprep.mubr.msk.f32.mxu0 %vm4900_vm1, %v5504_v48  ;;  %13283 = vst [vmem:[#allocation56_spill] sm:$0xff] %v12293_v43 }
 0x3f9   :  { %6489 = vmatmul.mubr.msk.f32.gmra.mxu0 %vm4900_vm1, %v5505_v62 }
 0x3fa   :  { %6491 = vmatprep.mubr.msk.f32.mxu0 %vm4900_vm1, %v5506_v51 }
 0x3fd   :  { %6492 = vmatmul.mubr.msk.f32.gmra.mxu0 %vm4900_vm1, %v5507_v8 }
 0x3fe   :  { %6494 = vmatprep.mubr.msk.f32.mxu0 %vm4900_vm1, %v5508_v39 }
 0x401   :  { %6495 = vmatmul.mubr.msk.f32.gmra.mxu0 %vm4900_vm1, %v5509_v38 }
 0x418   :  { %v12297_v49 = vpop.f32.mrf.mxu1 }
 0x41a   :  { %v12301_v41 = vpop.f32.mrf.mxu1 }
 0x41c   :  { %v12305_v50 = vpop.f32.mrf.mxu1 }
 0x41e   :  { %v12307_v46 = vpop.f32.mrf.mxu1 }
 0x420   :  { %v12309_v22 = vpop.f32.mrf.mxu1 }
 0x422   :  { %v12311_v2 = vpop.f32.mrf.mxu1 }
 0x424   :  { %v6431_v19 = vpop.f32.mrf.mxu1 }
 0x426   :  { %v5407_v27 = vpop.f32.mrf.mxu1 }
 0x428   :  { %v6434_v4 = vpop.f32.mrf.mxu1 }
 0x429   :  { %v5423_v53 = vadd.f32 %v6434_v4, %v6390_v21  ;;  %v5408_v21 = vadd.f32 %v5407_v27, %v5079_v44  ;;  %v13289_v44 = vmov 0.0  }
 0x42a   :  { %v5417_v61 = vpop.f32.mrf.mxu1 }
 0x42c   :  { %v6437_v14 = vpop.f32.mrf.mxu1 }
 0x42d   :  { %v5433_v8 = vadd.f32 %v6437_v14, %v6393_v42 }
 0x42e   :  { %v5427_v3 = vpop.f32.mrf.mxu1 }
 0x42f   :  { %v5428_v9 = vadd.f32 %v5427_v3, %v5099_v57 }
 0x431   :  { %v6440_v54 = vpop.f32.mrf.mxu1 }
 0x432   :  { %v5443_v23 = vadd.f32 %v6440_v54, %v12258_v55  ;;  %v5413_v55 = vadd.f32 %v6431_v19, %v6387_v1 }
 0x433   :  { %v5437_v58 = vpop.f32.mrf.mxu1 }
 0x434   :  { %v5438_v40 = vadd.f32 %v5437_v58, %v12260_v59 }
 0x435   :  { %v12329_v51 = vpop.f32.mrf.mxu1 }
 0x436   :  { %v5957_v31 = vpop.permute.xlu0 %5956  ;;  %v5947_v5 = vpop.permute.xlu1 %5946  ;;  %13287 = vst [vmem:[#allocation45_spill] sm:$0xff] %v12329_v51 }
 0x437   :  { %v12332_v20 = vpop.f32.mrf.mxu1 }
 0x438   :  { %13288 = vst [vmem:[#allocation47_spill] sm:$0xff] %v12332_v20 }
 0x439   :  { %v12335_v51 = vpop.f32.mrf.mxu1 }
 0x43a   :  { %v5952_v10 = vpop.permute.xlu0 %5951  ;;  %v5942_v29 = vpop.permute.xlu1 %5941 }
 0x43e   :  { %v5937_v12 = vpop.permute.xlu0 %5936  ;;  %v5932_v48 = vpop.permute.xlu1 %5931 }
 0x442   :  { %v5927_v38 = vpop.permute.xlu0 %5926  ;;  %v5922_v36 = vpop.permute.xlu1 %5921 }
 0x446   :  { %v5917_v42 = vpop.permute.xlu0 %5916  ;;  %v5912_v20 = vpop.permute.xlu1 %5911 }
 0x495   :  { %v12313_v45 = vpop.f32.mrf.mxu0 }
 0x496   :  { %13284 = vst [vmem:[#allocation42_spill] sm:$0xff] %v12313_v45  ;;  %v5418_v45 = vadd.f32 %v5417_v61, %v5089_v13 }
 0x497   :  { %v12315_v16 = vpop.f32.mrf.mxu0 }
 0x498   :  { %13285 = vst [vmem:[#allocation58_spill] sm:$0xff] %v12315_v16 }
 0x499   :  { %v12317_v37 = vpop.f32.mrf.mxu0 }
 0x49b   :  { %v12319_v47 = vpop.f32.mrf.mxu0 }
 0x49c   :  { %13286 = vst [vmem:[#allocation43_spill] sm:$0xff] %v12319_v47 }
 0x49d   :  { %v12321_v33 = vpop.f32.mrf.mxu0 }
 0x49f   :  { %v12323_v7 = vpop.f32.mrf.mxu0 }
 0x4a1   :  { %v12325_v17 = vpop.f32.mrf.mxu0 }
 0x4a3   :  { %v12327_v56 = vpop.f32.mrf.mxu0 }
 0x4a5   :  { %v6475_v60 = vpop.f32.mrf.mxu0 }
 0x4a7   :  { %v5752_v24 = vpop.f32.mrf.mxu0 }
 0x4a8   :  { %v5839_v27 = vadd.f32 %v5752_v24, %v5408_v21 }
 0x4a9   :  { %v6478_v34 = vpop.f32.mrf.mxu0 }
 0x4aa   :  { %v5842_v57 = vadd.f32 %v6478_v34, %v5423_v53  ;;  %v5840_v53 = vadd.f32 %v6475_v60, %v5413_v55  ;;  %v6007_v24 = vadd.f32 %v5922_v36, %v5839_v27  ;;  %v13295_v27 = vld [vmem:[#allocation39_spill] sm:$0xff] }
 0x4ab   :  { %v5762_v62 = vpop.f32.mrf.mxu0 }
 0x4ac   :  { %v5841_v4 = vadd.f32 %v5762_v62, %v5418_v45  ;;  %v5378_v62 = vadd.f32 %v12301_v41, %v12285_v6  ;;  %vm6031_vm2 = vcmp.gt.f32.partialorder %v6007_v24, 0.0 }
 0x4ad   :  { %v6481_v39 = vpop.f32.mrf.mxu0 }
 0x4ae   :  { %v5844_v30 = vadd.f32 %v6481_v39, %v5433_v8  ;;  %v6009_v45 = vadd.f32 %v5932_v48, %v5841_v4  ;;  %v6055_v8 = vmul.f32 0.01, %v6007_v24 }
 0x4af   :  { %v5772_v26 = vpop.f32.mrf.mxu0 }
 0x4b0   :  { %v5843_v11 = vadd.f32 %v5772_v26, %v5428_v9  ;;  %v6012_v3 = vadd.f32 %v5947_v5, %v5844_v30  ;;  %v12341_v9 = vpop.f32.mrf.mxu1  ;;  %v5403_v26 = vadd.f32 %v12309_v22, %v12299_v32  ;;  %v6010_v30 = vadd.f32 %v5937_v12, %v5842_v57  ;;  %v5902_v22 = vpop.permute.xlu1 %5901 }
 0x4b1   :  { %v6484_v16 = vpop.f32.mrf.mxu0  ;;  %v5383_v12 = vadd.f32 %v12297_v49, %v12278_v0  ;;  %vm6033_vm15 = vcmp.gt.f32.partialorder %v6009_v45, 0.0  ;;  %v6079_v4 = vsel %vm6031_vm2, %v6007_v24, %v6055_v8 }
 0x4b2   :  { %v5846_v15 = vadd.f32 %v6484_v16, %v5443_v23  ;;  %v6011_v16 = vadd.f32 %v5942_v29, %v5843_v11  ;;  %v6060_v1 = vmul.f32 0.01, %v6012_v3  ;;  %v5398_v11 = vadd.f32 %v12311_v2, %v12303_v35  ;;  %v12350_v32 = vpop.f32.mrf.mxu1 }
 0x4b3   :  { %v5782_v47 = vpop.f32.mrf.mxu0  ;;  %vm6036_vm12 = vcmp.gt.f32.partialorder %v6012_v3, 0.0  ;;  %v5838_v5 = vadd.f32 %v12325_v17, %v5403_v26  ;;  %v6008_v35 = vadd.f32 %v5927_v38, %v5840_v53  ;;  %v6058_v2 = vmul.f32 0.01, %v6010_v30 }
 0x4b4   :  { %v6014_v14 = vadd.f32 %v5957_v31, %v5846_v15  ;;  %v5845_v43 = vadd.f32 %v5782_v47, %v5438_v40  ;;  %v6059_v61 = vmul.f32 0.01, %v6011_v16  ;;  %v5393_v47 = vadd.f32 %v12305_v50, %v12291_v18  ;;  %v12361_v50 = vpop.f32.mrf.mxu1 }
 0x4b5   :  { %v12337_v54 = vpop.f32.mrf.mxu0  ;;  %vm6035_vm13 = vcmp.gt.f32.partialorder %v6011_v16, 0.0  ;;  %v5388_v29 = vadd.f32 %v12307_v46, %v12295_v28  ;;  %vm6034_vm14 = vcmp.gt.f32.partialorder %v6010_v30, 0.0  ;;  %v5837_v60 = vadd.f32 %v12327_v56, %v5398_v11  ;;  %v5892_v56 = vpop.permute.xlu1 %5891 }
 0x4b6   :  { %v6062_v63 = vmul.f32 0.01, %v6014_v14  ;;  %v6013_v59 = vadd.f32 %v5952_v10, %v5845_v43  ;;  %vm6038_vm10 = vcmp.gt.f32.partialorder %v6014_v14, 0.0  ;;  %v5907_v43 = vpop.permute.xlu0 %5906  ;;  %v6084_v10 = vsel %vm6036_vm12, %v6012_v3, %v6060_v1  ;;  %v6452_v39 = vpop.f32.mrf.mxu1  ;;  %v13292_v3 = vld [vmem:[#allocation43_spill] sm:$0xff] }
 0x4b7   :  { %v12339_v13 = vpop.f32.mrf.mxu0  ;;  %v6057_v18 = vmul.f32 0.01, %v6009_v45  ;;  %v6083_v58 = vsel %vm6035_vm13, %v6011_v16, %v6059_v61  ;;  %v5836_v28 = vadd.f32 %v12321_v33, %v5393_v47  ;;  %v6006_v46 = vadd.f32 %v5917_v42, %v5838_v5  ;;  %v13293_v16 = vld [vmem:[#allocation33_spill] sm:$0xff]  ;;  %v13296_v61 = vld [vmem:[#allocation58_spill] sm:$0xff] }
 0x4b8   :  { %v6061_v40 = vmul.f32 0.01, %v6013_v59  ;;  %v6086_v15 = vsel %vm6038_vm10, %v6014_v14, %v6062_v63  ;;  %vm6037_vm11 = vcmp.gt.f32.partialorder %v6013_v59, 0.0  ;;  %v6056_v48 = vmul.f32 0.01, %v6008_v35  ;;  %v13291_v14 = vld [vmem:[#allocation56_spill] sm:$0xff]  ;;  %v5477_v21 = vpop.f32.mrf.mxu1 }
 0x4b9   :  { %v12345_v19 = vpop.f32.mrf.mxu0  ;;  %6108 = vmatpush1.msra.mxu1 %v6086_v15  ;;  %v6082_v36 = vsel %vm6034_vm14, %v6010_v30, %v6058_v2  ;;  %vm6032_vm1 = vcmp.gt.f32.partialorder %v6008_v35, 0.0  ;;  %v5835_v0 = vadd.f32 %v12323_v7, %v5388_v29  ;;  %v6005_v49 = vadd.f32 %v5912_v20, %v5837_v60  ;;  %v13290_v20 = vld [vmem:[#allocation31_spill] sm:$0xff]  ;;  %v13294_v15 = vld [vmem:[#allocation42_spill] sm:$0xff]  ;;  %v13297_v2 = vld [vmem:[#allocation57_spill] sm:$0xff] }
 0x4ba   :  { %6109 = vmatprep.subr.mxu1 %v13289_v44  ;;  %v6085_v63 = vsel %vm6037_vm11, %v6013_v59, %v6061_v40  ;;  %v5897_v17 = vpop.permute.xlu0 %5896  ;;  %v6081_v33 = vsel %vm6033_vm15, %v6009_v45, %v6057_v18  ;;  %v5373_v38 = vadd.f32 %v12289_v52, %v12270_v25  ;;  %v5834_v42 = vadd.f32 %v12317_v37, %v5383_v12  ;;  %v5882_v37 = vpop.permute.xlu1 %5881 }
 0x4bb   :  { %v12354_v31 = vpop.f32.mrf.mxu0  ;;  %6110 = vmatpush1.msra.mxu1 %v6085_v63  ;;  %v6004_v6 = vadd.f32 %v5907_v43, %v5836_v28  ;;  %v6054_v41 = vmul.f32 0.01, %v6006_v46  ;;  %v6080_v7 = vsel %vm6032_vm1, %v6008_v35, %v6056_v48  ;;  %v5368_v55 = vadd.f32 %v13291_v14, %v13290_v20 }
 0x4bc   :  { %6111 = vmatprep.subr.mxu1 %v13289_v44  ;;  %vm6030_vm3 = vcmp.gt.f32.partialorder %v6006_v46, 0.0  ;;  %v5833_v59 = vadd.f32 %v13292_v3, %v5378_v62  ;;  %v6003_v25 = vadd.f32 %v5902_v22, %v5835_v0  ;;  %v6053_v52 = vmul.f32 0.01, %v6005_v49 }
 0x4bd   :  { %6112 = vmatpush1.msra.mxu1 %v6084_v10  ;;  %v12366_v34 = vpop.f32.mrf.mxu0  ;;  %v5483_v26 = vadd.f32 %v6452_v39, %v13293_v16  ;;  %vm6029_vm4 = vcmp.gt.f32.partialorder %v6005_v49, 0.0  ;;  %v5832_v53 = vadd.f32 %v13294_v15, %v5373_v38  ;;  %v6002_v30 = vadd.f32 %v5897_v17, %v5834_v42  ;;  %v13298_v17 = vld [vmem:[#allocation32_spill] sm:$0xff] }
 0x4be   :  { %6113 = vmatprep.subr.mxu1 %v13289_v44  ;;  %v5887_v57 = vpop.permute.xlu0 %5886  ;;  %v6052_v1 = vmul.f32 0.01, %v6004_v6  ;;  %v6078_v43 = vsel %vm6030_vm3, %v6006_v46, %v6054_v41  ;;  %v5478_v45 = vadd.f32 %v5477_v21, %v13295_v27  ;;  %vm6028_vm5 = vcmp.gt.f32.partialorder %v6004_v6, 0.0  ;;  %v5992_v35 = vpop.permute.xlu1 %5991 }
 0x4bf   :  { %6114 = vmatpush1.msra.mxu1 %v6083_v58  ;;  %v12377_v23 = vpop.f32.mrf.mxu0  ;;  %v5831_v63 = vadd.f32 %v13296_v61, %v5368_v55  ;;  %v6001_v22 = vadd.f32 %v5892_v56, %v5833_v59  ;;  %v6051_v47 = vmul.f32 0.01, %v6003_v25  ;;  %v6077_v5 = vsel %vm6029_vm4, %v6005_v49, %v6053_v52  ;;  %v13299_v56 = vld [vmem:[#allocation54_spill] sm:$0xff]  ;;  %v13303_v59 = vld [vmem:[#allocation53_spill] sm:$0xff] }
 0x4c0   :  { %6115 = vmatprep.subr.mxu1 %v13289_v44  ;;  %v5473_v10 = vadd.f32 %v12350_v32, %v13297_v2  ;;  %vm6027_vm6 = vcmp.gt.f32.partialorder %v6003_v25, 0.0  ;;  %v6000_v60 = vadd.f32 %v5887_v57, %v5832_v53  ;;  %v6050_v24 = vmul.f32 0.01, %v6002_v30 }
 0x4c1   :  { %6116 = vmatpush1.msra.mxu1 %v6082_v36  ;;  %v6496_v40 = vpop.f32.mrf.mxu0  ;;  %v6076_v58 = vsel %vm6028_vm5, %v6004_v6, %v6052_v1  ;;  %v5468_v12 = vadd.f32 %v12361_v50, %v13298_v17  ;;  %vm6026_vm7 = vcmp.gt.f32.partialorder %v6002_v30, 0.0  ;;  %v5999_v28 = vadd.f32 %v5882_v37, %v5831_v63 }
 0x4c2   :  { %6117 = vmatprep.subr.mxu1 %v13289_v44  ;;  %v5997_v11 = vpop.permute.xlu0 %5996  ;;  %v5854_v18 = vadd.f32 %v6496_v40, %v5483_v26  ;;  %v6049_v46 = vmul.f32 0.01, %v6001_v22  ;;  %v6075_v32 = vsel %vm6027_vm6, %v6003_v25, %v6051_v47  ;;  %v5463_v62 = vadd.f32 %v12335_v51, %v13299_v56  ;;  %v5982_v39 = vpop.permute.xlu1 %5981 }
 0x4c3   :  { %6118 = vmatpush1.msra.mxu1 %v6081_v33  ;;  %v5822_v29 = vpop.f32.mrf.mxu0  ;;  %vm6025_vm8 = vcmp.gt.f32.partialorder %v6001_v22, 0.0  ;;  %v6048_v0 = vmul.f32 0.01, %v6000_v60  ;;  %v5852_v49 = vadd.f32 %v12366_v34, %v5473_v10  ;;  %v6074_v50 = vsel %vm6026_vm7, %v6002_v30, %v6050_v24  ;;  %v13300_v33 = vld [vmem:[#allocation55_spill] sm:$0xff]  ;;  %v13302_v34 = vld [vmem:[#allocation45_spill] sm:$0xff] }
 0x4c4   :  { %6119 = vmatprep.subr.mxu1 %v13289_v44  ;;  %v5853_v48 = vadd.f32 %v5822_v29, %v5478_v45  ;;  %v6022_v8 = vadd.f32 %v5997_v11, %v5854_v18  ;;  %vm6024_vm9 = vcmp.gt.f32.partialorder %v6000_v60, 0.0  ;;  %v5458_v38 = vadd.f32 %v12341_v9, %v13300_v33  ;;  %v6095_v10 = vld [vmem:[%s12439_s6] sm:$0xff] }
 0x4c5   :  { %6120 = vmatpush1.msra.mxu1 %v6080_v7  ;;  %v6047_v42 = vmul.f32 0.01, %v5999_v28  ;;  %v5851_v6 = vadd.f32 %v12377_v23, %v5468_v12  ;;  %v6073_v51 = vsel %vm6025_vm8, %v6001_v22, %v6049_v46  ;;  %vm6023_vm10 = vcmp.gt.f32.partialorder %v5999_v28, 0.0  ;;  %v13301_v7 = vld [vmem:[#allocation52_spill] sm:$0xff]  ;;  %v13304_v23 = vld [vmem:[#allocation47_spill] sm:$0xff] }
 0x4c6   :  { %6121 = vmatprep.subr.mxu1 %v13289_v44  ;;  %v5987_v36 = vpop.permute.xlu0 %5986  ;;  %v6021_v41 = vadd.f32 %v5992_v35, %v5853_v48  ;;  %v5453_v20 = vadd.f32 %v13302_v34, %v13301_v7  ;;  %v5850_v14 = vadd.f32 %v12345_v19, %v5463_v62  ;;  %v6070_v57 = vmul.f32 0.01, %v6022_v8  ;;  %v5972_v37 = vpop.permute.xlu1 %5971 }
 0x4c7   :  { %6122 = vmatpush1.msra.mxu1 %v6079_v4  ;;  %v6020_v55 = vadd.f32 %v5987_v36, %v5852_v49  ;;  %v6072_v9 = vsel %vm6024_vm9, %v6000_v60, %v6048_v0  ;;  %v5448_v25 = vadd.f32 %v13304_v23, %v13303_v59  ;;  %vm6046_vm11 = vcmp.gt.f32.partialorder %v6022_v8, 0.0 }
 0x4c8   :  { %6123 = vmatprep.subr.mxu1 %v13289_v44  ;;  %v5849_v52 = vadd.f32 %v12354_v31, %v5458_v38  ;;  %v6019_v21 = vadd.f32 %v5982_v39, %v5851_v6  ;;  %v6069_v4 = vmul.f32 0.01, %v6021_v41  ;;  %v6071_v19 = vsel %vm6023_vm10, %v5999_v28, %v6047_v42 }
 0x4c9   :  { %6124 = vmatpush1.msra.mxu1 %v6078_v43  ;;  %vm6045_vm12 = vcmp.gt.f32.partialorder %v6021_v41, 0.0  ;;  %v5848_v16 = vadd.f32 %v12337_v54, %v5453_v20  ;;  %v6068_v40 = vmul.f32 0.01, %v6020_v55  ;;  %v6094_v15 = vsel %vm6046_vm11, %v6022_v8, %v6070_v57 }
 0x4ca   :  { %6125 = vmatprep.subr.mxu1 %v13289_v44  ;;  %v5977_v3 = vpop.permute.xlu0 %5976  ;;  %vm6044_vm13 = vcmp.gt.f32.partialorder %v6020_v55, 0.0  ;;  %v5847_v31 = vadd.f32 %v12339_v13, %v5448_v25  ;;  %v6017_v53 = vadd.f32 %v5972_v37, %v5849_v52  ;;  %v6067_v30 = vmul.f32 0.01, %v6019_v21  ;;  %v5962_v45 = vpop.permute.xlu1 %5961 }
 0x4cb   :  { %6126 = vmatpush1.msra.mxu1 %v6077_v5  ;;  %v6018_v26 = vadd.f32 %v5977_v3, %v5850_v14  ;;  %v6093_v1 = vsel %vm6045_vm12, %v6021_v41, %v6069_v4  ;;  %vm6043_vm14 = vcmp.gt.f32.partialorder %v6019_v21, 0.0  ;;  %v6092_v54 = vsel %vm6044_vm13, %v6020_v55, %v6068_v40 }
 0x4cc   :  { %6127 = vmatprep.subr.mxu1 %v13289_v44  ;;  %v6015_v61 = vadd.f32 %v5962_v45, %v5847_v31  ;;  %v6065_v63 = vmul.f32 0.01, %v6017_v53  ;;  %v6091_v13 = vsel %vm6043_vm14, %v6019_v21, %v6067_v30  ;;  %vm6041_vm1 = vcmp.gt.f32.partialorder %v6017_v53, 0.0 }
 0x4cd   :  { %6128 = vmatpush1.msra.mxu1 %v6076_v58  ;;  %v6066_v27 = vmul.f32 0.01, %v6018_v26  ;;  %vm6042_vm15 = vcmp.gt.f32.partialorder %v6018_v26, 0.0 }
 0x4ce   :  { %6129 = vmatprep.subr.mxu1 %v13289_v44  ;;  %v5967_v43 = vpop.permute.xlu0 %5966  ;;  %v6063_v5 = vmul.f32 0.01, %v6015_v61  ;;  %v6089_v35 = vsel %vm6041_vm1, %v6017_v53, %v6065_v63  ;;  %vm6039_vm3 = vcmp.gt.f32.partialorder %v6015_v61, 0.0 }
 0x4cf   :  { %6130 = vmatpush1.msra.mxu1 %v6075_v32  ;;  %v6016_v11 = vadd.f32 %v5967_v43, %v5848_v16  ;;  %v6090_v47 = vsel %vm6042_vm15, %v6018_v26, %v6066_v27 }
 0x4d0   :  { %6131 = vmatprep.subr.mxu1 %v13289_v44  ;;  %v6087_v29 = vsel %vm6039_vm3, %v6015_v61, %v6063_v5 }
 0x4d1   :  { %6132 = vmatpush1.msra.mxu1 %v6074_v50  ;;  %v6064_v22 = vmul.f32 0.01, %v6016_v11  ;;  %vm6040_vm2 = vcmp.gt.f32.partialorder %v6016_v11, 0.0 }
 0x4d2   :  { %6133 = vmatprep.subr.mxu1 %v13289_v44  ;;  %v6101_v60 = vpop.permute.xlu0 %6100 }
 0x4d3   :  { %6134 = vmatpush1.msra.mxu1 %v6073_v51  ;;  %v6088_v2 = vsel %vm6040_vm2, %v6016_v11, %v6064_v22 }
 0x4d4   :  { %6135 = vmatprep.subr.mxu1 %v13289_v44 }
 0x4d5   :  { %6136 = vmatpush1.msra.mxu1 %v6072_v9 }
 0x4d6   :  { %6137 = vmatprep.subr.mxu1 %v13289_v44 }
 0x4d7   :  { %6138 = vmatpush1.msra.mxu1 %v6071_v19 }
 0x4d8   :  { %6155 = vmatprep.subr.mxu1 %v13289_v44 }
 0x4d9   :  { %6156 = vmatpush2.msra.mxu1 %v6094_v15 }
 0x4da   :  { %6157 = vmatprep.subr.mxu1 %v13289_v44 }
 0x4db   :  { %6158 = vmatpush2.msra.mxu1 %v6093_v1 }
 0x4dc   :  { %6159 = vmatprep.subr.mxu1 %v13289_v44 }
 0x4dd   :  { %6160 = vmatpush2.msra.mxu1 %v6092_v54 }
 0x4de   :  { %6161 = vmatprep.subr.mxu1 %v13289_v44 }
 0x4df   :  { %6162 = vmatpush2.msra.mxu1 %v6091_v13 }
 0x4e0   :  { %6163 = vmatprep.subr.mxu1 %v13289_v44 }
 0x4e1   :  { %6164 = vmatpush2.msra.mxu1 %v6090_v47 }
 0x4e2   :  { %6165 = vmatprep.subr.mxu1 %v13289_v44 }
 0x4e3   :  { %6166 = vmatpush2.msra.mxu1 %v6089_v35 }
 0x4e4   :  { %6167 = vmatprep.subr.mxu1 %v13289_v44 }
 0x4e5   :  { %6168 = vmatpush2.msra.mxu1 %v6088_v2 }
 0x4e6   :  { %6169 = vmatprep.subr.mxu1 %v13289_v44 }
 0x4e7   :  { %6170 = vmatpush2.msra.mxu1 %v6087_v29 }
 0x4e8   :  { %6172 = vmatmul.mubr.f32.vlgmr.msra.gmra.mxu1 %v6095_v10 }
 0x5a8   :  { %v6173_v24 = vpop.f32.mrf.mxu1 }
 0x5a9   :  { %v6174_v18 = vadd.f32 %v6173_v24, %v6101_v60 }
 0x5aa   :  { %v6175_v58 = vpop.f32.mrf.mxu1 }
 0x5ab   :  { %6177 = vst.msk [vmem:[#allocation5] sm:$0xff] %vm93_vm0, %v6174_v18 }
 0x5ac   :  { %7183 = shalt.err (!%p7180_p9)
}
 0x5ad   :  { %6187 = dma.vmem_to_hbm [thread:$0]  %s6185_s14, 128, %s12441_s8, [#allocation3]  }
 0x5ae   :  { %7194 = dma.done.wait [#allocation3], 128  }
 0x5af   :  { %7195 = vsyncadd [#allocation3], 4294967168 }
 0x5b0   :  { %6191 = vsyncpa [#allocation3], 1 }
 0x5b1   :  { %6192 = vsyncpa [#allocation4], 1 }

</bundles_post_ra>
